<compile_context>
chip_gen: v5e
topology: v5e:2x2
jax: 0.10.0
libtpu: 0.0.40
codegen_flags: <defaults>
</compile_context>

<pallas_src>
import numpy as np
import jax
import jax.numpy as jnp
from jax.experimental import pallas as pl
from jax.experimental.pallas import tpu as pltpu

N_JOINTS = 24
N_BETAS = 10
N_POSE = (N_JOINTS - 1) * 9          # 207
PAD_BETAS = 32                        # 3*N_BETAS = 30  -> 32  (sublane aligned)
PAD_POSE = 640                        # 3*N_POSE = 621 -> 640  (sublane aligned)

# Standard SMPL kinematic tree (kintree_table[0] = parent id, [1] = joint id).
SMPL_PARENTS = np.array(
    [-1, 0, 0, 0, 1, 2, 3, 4, 5, 6, 7, 8, 9, 9, 9, 12, 13, 14, 16, 17, 18, 19,
     20, 21], dtype=np.int64)
_PARENTS_PY = tuple(int(p) for p in SMPL_PARENTS)


# -----------------------------------------------------------------------------
# Fused kernel.
#   Inputs (VMEM, full arrays):
#     rhs_b   [3, 32]   block-diagonal betas   (rhs_b[c, c*10+k] = betas[k])
#     rhs_p   [3, 640]  block-diagonal lrotmin (rhs_p[c, c*207+k] = lrotmin[k])
#     r9      [9, 24]   r9[3c+k, j] = R_j[k, c]   (joint rotations, col-major)
#     trans   [3, 1]
#     sdT     [32, V]   shapedirs^T  (rows >= 30 are zero)
#     pdT     [640, V]  posedirs^T   (rows >= 621 are zero)
#     vtT     [3, V]    v_template^T
#     jregT   [V, 24]   J_regressor^T
#     wT      [24, V]   weights^T
#   Output:
#     outT    [3, V]    skinned vertices (transposed, lane-dense)
#   Scratch:
#     jT      [3, 24]   regressed joints
#     g       [12, 24]  per-joint global transforms, column j:
#                       rows 3c..3c+2 = column c of Rg_j, rows 9..11 = t_j
# -----------------------------------------------------------------------------
def _smpl_fused_kernel(rhs_b_ref, rhs_p_ref, r9_ref, trans_ref,
                       sdT_ref, pdT_ref, vtT_ref, jregT_ref, wT_ref,
                       outT_ref, jT_ref, g_ref):
    f32 = jnp.float32

    # ---- blend shapes / pose blend shapes / joint regression (MXU) ---------
    v_shaped_T = jnp.dot(rhs_b_ref[...], sdT_ref[...],
                         preferred_element_type=f32) + vtT_ref[...]      # [3,V]
    v_posed_T = v_shaped_T + jnp.dot(rhs_p_ref[...], pdT_ref[...],
                                     preferred_element_type=f32)         # [3,V]
    jT_ref[...] = jnp.dot(v_shaped_T, jregT_ref[...],
                          preferred_element_type=f32)                    # [3,24]

    # ---- kinematic chain, statically unrolled over the parent tree ---------
    # Joint 0: global rotation = R_0, global translation = J_0.
    for c in range(3):
        g_ref[3 * c:3 * c + 3, 0:1] = r9_ref[3 * c:3 * c + 3, 0:1]
    g_ref[9:12, 0:1] = jT_ref[:, 0:1]

    for i in range(1, N_JOINTS):
        p = _PARENTS_PY[i]
        pc0 = g_ref[0:3, p:p + 1]          # parent rotation column 0  [3,1]
        pc1 = g_ref[3:6, p:p + 1]
        pc2 = g_ref[6:9, p:p + 1]
        # New rotation column c = sum_k (parent column k) * R_i[k, c].
        for c in range(3):
            g_ref[3 * c:3 * c + 3, i:i + 1] = (
                pc0 * r9_ref[3 * c + 0:3 * c + 1, i:i + 1]
                + pc1 * r9_ref[3 * c + 1:3 * c + 2, i:i + 1]
                + pc2 * r9_ref[3 * c + 2:3 * c + 3, i:i + 1])
        # New translation = Rg_parent @ (J_i - J_p) + t_parent.
        d0 = jT_ref[0:1, i:i + 1] - jT_ref[0:1, p:p + 1]
        d1 = jT_ref[1:2, i:i + 1] - jT_ref[1:2, p:p + 1]
        d2 = jT_ref[2:3, i:i + 1] - jT_ref[2:3, p:p + 1]
        g_ref[9:12, i:i + 1] = (pc0 * d0 + pc1 * d1 + pc2 * d2
                                + g_ref[9:12, p:p + 1])

    # Relative-to-rest translation (the torch "pack" subtraction):
    #   t_j <- t_j - Rg_j @ J_j
    g_ref[9:12, :] = g_ref[9:12, :] - (g_ref[0:3, :] * jT_ref[0:1, :]
                                       + g_ref[3:6, :] * jT_ref[1:2, :]
                                       + g_ref[6:9, :] * jT_ref[2:3, :])

    # ---- linear blend skinning (MXU + lane-dense epilogue) ------------------
    #   M[3c+r, v] = sum_j Rg_j[r,c] * w[v,j];  M[9+r, v] = sum_j t_j[r] * w[v,j]
    M = jnp.dot(g_ref[...], wT_ref[...], preferred_element_type=f32)     # [12,V]
    outT_ref[...] = (M[0:3, :] * v_posed_T[0:1, :]
                     + M[3:6, :] * v_posed_T[1:2, :]
                     + M[6:9, :] * v_posed_T[2:3, :]
                     + M[9:12, :]
                     + trans_ref[...])                                   # [3,V]


class SMPLModelPallas:
    """SMPL forward pass; parameters are synthetic & deterministic."""

    def __init__(self, num_verts=256, seed=0):
        assert num_verts % 128 == 0, "keep V lane-aligned (multiple of 128)"
        self.V = num_verts

        key = jax.random.PRNGKey(seed)
        k1, k2, k3, k4, k5 = jax.random.split(key, 5)

        jreg = jax.random.uniform(k1, (N_JOINTS, num_verts), jnp.float32)
        self.J_regressor = jreg / jnp.sum(jreg, axis=1, keepdims=True)

        w = jax.random.uniform(k2, (num_verts, N_JOINTS), jnp.float32)
        self.weights = w / jnp.sum(w, axis=1, keepdims=True)

        self.posedirs = jax.random.normal(k3, (num_verts, 3, N_POSE), jnp.float32) * 1e-2
        self.v_template = jax.random.normal(k4, (num_verts, 3), jnp.float32)
        self.shapedirs = jax.random.normal(k5, (num_verts, 3, N_BETAS), jnp.float32) * 1e-2

        # Transposed, lane-dense (vertex = lane axis) slabs; contraction dims
        # zero-padded to sublane-friendly sizes (30->32, 621->640).
        sdT = self.shapedirs.reshape(num_verts, 3 * N_BETAS).T            # [30, V]
        pdT = self.posedirs.reshape(num_verts, 3 * N_POSE).T              # [621, V]
        self.shapedirs_T = jnp.pad(sdT, ((0, PAD_BETAS - 3 * N_BETAS), (0, 0)))
        self.posedirs_T = jnp.pad(pdT, ((0, PAD_POSE - 3 * N_POSE), (0, 0)))
        self.v_template_T = self.v_template.T                             # [3, V]
        self.weights_T = self.weights.T                                   # [24, V]
        self.J_regressor_T = self.J_regressor.T                           # [V, 24]

        # Kinematic tree bookkeeping (same logic as the torch module).
        self.kintree_table = np.stack([SMPL_PARENTS, np.arange(N_JOINTS)], axis=0)
        id_to_col = {self.kintree_table[1, i]: i
                     for i in range(self.kintree_table.shape[1])}
        self.parent = {i: id_to_col[self.kintree_table[0, i]]
                       for i in range(1, self.kintree_table.shape[1])}
        # TODO(synk): faces / write_obj are file-I/O only; placeholder faces.
        self.faces = np.zeros((1, 3), dtype=np.int64)

        # One executable: Rodrigues + rhs construction glue + the fused kernel.
        self._forward_jit = jax.jit(self._forward_impl, static_argnames=("simplify",))

    # ----------------------- small glue (plain JAX) -----------------------
    @staticmethod
    def rodrigues(r):
        # r: [B, 1, 3] axis-angle -> [B, 3, 3] rotation matrices.
        eps = 1e-8  # deterministic stand-in for torch's normal_(std=1e-8)
        theta = jnp.linalg.norm(r + eps, axis=(1, 2), keepdims=True)  # [B,1,1]
        r_hat = r / theta
        cos = jnp.cos(theta)
        rh = r_hat[:, 0, :]
        z = jnp.zeros((r.shape[0],), dtype=r.dtype)
        m = jnp.stack([z, -rh[:, 2], rh[:, 1],
                       rh[:, 2], z, -rh[:, 0],
                       -rh[:, 1], rh[:, 0], z], axis=1).reshape(-1, 3, 3)
        i_cube = jnp.broadcast_to(jnp.eye(3, dtype=r.dtype), (r.shape[0], 3, 3))
        dot = jnp.matmul(jnp.transpose(r_hat, (0, 2, 1)), r_hat)
        return cos * i_cube + (1.0 - cos) * dot + jnp.sin(theta) * m

    @staticmethod
    def with_zeros(x):
        ones = jnp.array([[0.0, 0.0, 0.0, 1.0]], dtype=x.dtype)
        return jnp.concatenate([x, ones], axis=0)

    @staticmethod
    def pack(x):
        zeros43 = jnp.zeros((x.shape[0], 4, 3), dtype=x.dtype)
        return jnp.concatenate([zeros43, x], axis=2)

    # ------------------------------ kernel -------------------------------
    def _fused(self, rhs_b, rhs_p, r9, trans_col):
        V = self.V
        flops = int(2 * V * (3 * PAD_BETAS + 3 * PAD_POSE + 3 * N_JOINTS
                             + 12 * N_JOINTS) + 24 * V)
        bytes_accessed = int(4 * ((PAD_BETAS + PAD_POSE + 3) * V
                                  + 2 * N_JOINTS * V + 3 * V
                                  + 3 * (PAD_BETAS + PAD_POSE)
                                  + 9 * N_JOINTS + 3))
        vmem = pl.BlockSpec(memory_space=pltpu.MemorySpace.VMEM)
        return pl.pallas_call(
            _smpl_fused_kernel,
            out_shape=jax.ShapeDtypeStruct((3, V), jnp.float32),
            in_specs=[vmem] * 9,
            out_specs=vmem,
            scratch_shapes=[pltpu.VMEM((3, N_JOINTS), jnp.float32),
                            pltpu.VMEM((12, N_JOINTS), jnp.float32)],
            cost_estimate=pl.CostEstimate(
                flops=flops, transcendentals=0, bytes_accessed=bytes_accessed),
        )(rhs_b, rhs_p, r9, trans_col,
          self.shapedirs_T, self.posedirs_T, self.v_template_T,
          self.J_regressor_T, self.weights_T)

    # ------------------------------ forward ------------------------------
    def _forward_impl(self, betas, pose, trans, simplify=False):
        betas = betas.astype(jnp.float32).reshape(-1)
        pose = pose.astype(jnp.float32)
        trans_col = trans.astype(jnp.float32).reshape(3, 1)

        R_cube_big = self.rodrigues(pose.reshape(-1, 1, 3))      # [24, 3, 3]
        if simplify:
            lrotmin = jnp.zeros((N_POSE,), jnp.float32)
        else:
            lrotmin = (R_cube_big[1:] - jnp.eye(3, dtype=jnp.float32)).reshape(-1)

        # Block-diagonal RHS matrices so the blend/pose contractions are pure
        # MXU matmuls; zero-padded to the padded slab heights.
        eye3 = jnp.eye(3, dtype=jnp.float32)
        rhs_b = (eye3[:, :, None] * betas[None, None, :]).reshape(3, 3 * N_BETAS)
        rhs_b = jnp.pad(rhs_b, ((0, 0), (0, PAD_BETAS - 3 * N_BETAS)))
        rhs_p = (eye3[:, :, None] * lrotmin[None, None, :]).reshape(3, 3 * N_POSE)
        rhs_p = jnp.pad(rhs_p, ((0, 0), (0, PAD_POSE - 3 * N_POSE)))

        # r9[3c+k, j] = R_j[k, c]  (column-major per joint, joint = lane axis).
        r9 = jnp.transpose(R_cube_big, (2, 1, 0)).reshape(9, N_JOINTS)

        verts_T = self._fused(rhs_b, rhs_p, r9, trans_col)        # [3, V]
        return verts_T.T                                          # [V, 3]

    def forward(self, betas, pose, trans, simplify=False):
        return self._forward_jit(betas, pose, trans, simplify=simplify)

    # Pure-JAX reference (mirrors the torch forward) for verification.
    def reference_forward(self, betas, pose, trans):
        hp = jax.lax.Precision.HIGHEST
        v_shaped = jnp.tensordot(self.shapedirs, betas, axes=([2], [0]),
                                 precision=hp) + self.v_template
        J = jnp.matmul(self.J_regressor, v_shaped, precision=hp)
        R = self.rodrigues(pose.reshape(-1, 1, 3))
        lrotmin = (R[1:] - jnp.eye(3, dtype=jnp.float32)).reshape(-1)
        v_posed = v_shaped + jnp.tensordot(self.posedirs, lrotmin,
                                           axes=([2], [0]), precision=hp)
        results = [self.with_zeros(
            jnp.concatenate([R[0], J[0].reshape(3, 1)], axis=1))]
        for i in range(1, N_JOINTS):
            p = self.parent[i]
            A = self.with_zeros(jnp.concatenate(
                [R[i], (J[i] - J[p]).reshape(3, 1)], axis=1))
            results.append(results[p] @ A)
        stacked = jnp.stack(results, axis=0)
        J_h = jnp.concatenate(
            [J, jnp.zeros((N_JOINTS, 1), jnp.float32)], axis=1).reshape(N_JOINTS, 4, 1)
        rel = stacked - self.pack(jnp.matmul(stacked, J_h, precision=hp))
        T = jnp.tensordot(self.weights, rel, axes=([1], [0]), precision=hp)  # [V,4,4]
        rest = jnp.concatenate(
            [v_posed, jnp.ones((self.V, 1), jnp.float32)], axis=1)
        v = jnp.matmul(T, rest.reshape(-1, 4, 1), precision=hp).reshape(-1, 4)[:, :3]
        return v + trans.reshape(1, 3)


if __name__ == "__main__":
    V = 256
    model = SMPLModelPallas(num_verts=V, seed=0)

    key = jax.random.PRNGKey(0)
    kb, kp, kt = jax.random.split(key, 3)
    betas = jax.random.normal(kb, (N_BETAS,), jnp.float32) * 0.03
    pose = jax.random.normal(kp, (N_JOINTS, 3), jnp.float32) * 0.2
    trans = jax.random.normal(kt, (3,), jnp.float32) * 0.1

    verts = jax.block_until_ready(model.forward(betas, pose, trans))
    assert verts.shape == (V, 3)

    ref = jax.block_until_ready(model.reference_forward(betas, pose, trans))
    np.testing.assert_allclose(np.asarray(verts), np.asarray(ref),
                               rtol=1e-2, atol=1e-2)

    print("KERNEL_OK")
</pallas_src>

<mosaic_0001>
module attributes {stable_mosaic.version = 11 : i64} {
  func.func @_smpl_fused_kernel(%arg0: memref<3x32xf32, #tpu.memory_space<vmem>>, %arg1: memref<3x640xf32, #tpu.memory_space<vmem>>, %arg2: memref<9x24xf32, #tpu.memory_space<vmem>>, %arg3: memref<3x1xf32, #tpu.memory_space<vmem>>, %arg4: memref<32x256xf32, #tpu.memory_space<vmem>>, %arg5: memref<640x256xf32, #tpu.memory_space<vmem>>, %arg6: memref<3x256xf32, #tpu.memory_space<vmem>>, %arg7: memref<256x24xf32, #tpu.memory_space<vmem>>, %arg8: memref<24x256xf32, #tpu.memory_space<vmem>>, %arg9: memref<3x256xf32, #tpu.memory_space<vmem>>, %arg10: memref<3x24xf32, #tpu.memory_space<vmem>>, %arg11: memref<12x24xf32, #tpu.memory_space<vmem>>) attributes {dimension_semantics = [], scalar_prefetch = 0 : i64, scratch_operands = 2 : i64, tpu.core_type = #tpu.core_type<tc>} {
    %c0 = arith.constant 0 : index
    %c0_0 = arith.constant 0 : index
    %0 = vector.load %arg0[%c0, %c0_0] : memref<3x32xf32, #tpu.memory_space<vmem>>, vector<3x32xf32>
    %c0_1 = arith.constant 0 : index
    %c0_2 = arith.constant 0 : index
    %1 = vector.load %arg4[%c0_1, %c0_2] : memref<32x256xf32, #tpu.memory_space<vmem>>, vector<32x256xf32>
    %cst = arith.constant dense<0.000000e+00> : vector<3x256xf32>
    %2 = tpu.matmul %0, %1, %cst {dimension_numbers = #tpu.dot_dimension_numbers<[1], [0], [0], [1], [0, 0, 1, 1], [], []>} : vector<3x32xf32>, vector<32x256xf32>, vector<3x256xf32> -> vector<3x256xf32>
    %c0_3 = arith.constant 0 : index
    %c0_4 = arith.constant 0 : index
    %3 = vector.load %arg6[%c0_3, %c0_4] : memref<3x256xf32, #tpu.memory_space<vmem>>, vector<3x256xf32>
    %4 = arith.addf %2, %3 : vector<3x256xf32>
    %c0_5 = arith.constant 0 : index
    %c0_6 = arith.constant 0 : index
    %5 = vector.load %arg1[%c0_5, %c0_6] : memref<3x640xf32, #tpu.memory_space<vmem>>, vector<3x640xf32>
    %c0_7 = arith.constant 0 : index
    %c0_8 = arith.constant 0 : index
    %6 = vector.load %arg5[%c0_7, %c0_8] : memref<640x256xf32, #tpu.memory_space<vmem>>, vector<640x256xf32>
    %cst_9 = arith.constant dense<0.000000e+00> : vector<3x256xf32>
    %7 = tpu.matmul %5, %6, %cst_9 {dimension_numbers = #tpu.dot_dimension_numbers<[1], [0], [0], [1], [0, 0, 1, 1], [], []>} : vector<3x640xf32>, vector<640x256xf32>, vector<3x256xf32> -> vector<3x256xf32>
    %8 = arith.addf %4, %7 : vector<3x256xf32>
    %c0_10 = arith.constant 0 : index
    %c0_11 = arith.constant 0 : index
    %9 = vector.load %arg7[%c0_10, %c0_11] : memref<256x24xf32, #tpu.memory_space<vmem>>, vector<256x24xf32>
    %cst_12 = arith.constant dense<0.000000e+00> : vector<3x24xf32>
    %10 = tpu.matmul %4, %9, %cst_12 {dimension_numbers = #tpu.dot_dimension_numbers<[1], [0], [0], [1], [0, 0, 1, 1], [], []>} : vector<3x256xf32>, vector<256x24xf32>, vector<3x24xf32> -> vector<3x24xf32>
    %c0_13 = arith.constant 0 : index
    %c0_14 = arith.constant 0 : index
    %11 = vector.load %arg10[%c0_13, %c0_14] : memref<3x24xf32, #tpu.memory_space<vmem>>, vector<3x24xf32>
    tpu.vector_store %arg10[%c0_13, %c0_14], %10 {strides = array<i32>} : memref<3x24xf32, #tpu.memory_space<vmem>>, vector<3x24xf32>,
    %c0_15 = arith.constant 0 : index
    %c0_16 = arith.constant 0 : index
    %12 = vector.load %arg2[%c0_15, %c0_16] : memref<9x24xf32, #tpu.memory_space<vmem>>, vector<3x1xf32>
    %c0_17 = arith.constant 0 : index
    %c0_18 = arith.constant 0 : index
    %13 = vector.load %arg11[%c0_17, %c0_18] : memref<12x24xf32, #tpu.memory_space<vmem>>, vector<3x1xf32>
    tpu.vector_store %arg11[%c0_17, %c0_18], %12 {strides = array<i32>} : memref<12x24xf32, #tpu.memory_space<vmem>>, vector<3x1xf32>,
    %c3 = arith.constant 3 : index
    %c0_19 = arith.constant 0 : index
    %14 = vector.load %arg2[%c3, %c0_19] : memref<9x24xf32, #tpu.memory_space<vmem>>, vector<3x1xf32>
    %c3_20 = arith.constant 3 : index
    %c0_21 = arith.constant 0 : index
    %15 = vector.load %arg11[%c3_20, %c0_21] : memref<12x24xf32, #tpu.memory_space<vmem>>, vector<3x1xf32>
    tpu.vector_store %arg11[%c3_20, %c0_21], %14 {strides = array<i32>} : memref<12x24xf32, #tpu.memory_space<vmem>>, vector<3x1xf32>,
    %c6 = arith.constant 6 : index
    %c0_22 = arith.constant 0 : index
    %16 = vector.load %arg2[%c6, %c0_22] : memref<9x24xf32, #tpu.memory_space<vmem>>, vector<3x1xf32>
    %c6_23 = arith.constant 6 : index
    %c0_24 = arith.constant 0 : index
    %17 = vector.load %arg11[%c6_23, %c0_24] : memref<12x24xf32, #tpu.memory_space<vmem>>, vector<3x1xf32>
    tpu.vector_store %arg11[%c6_23, %c0_24], %16 {strides = array<i32>} : memref<12x24xf32, #tpu.memory_space<vmem>>, vector<3x1xf32>,
    %c0_25 = arith.constant 0 : index
    %c0_26 = arith.constant 0 : index
    %18 = vector.load %arg10[%c0_25, %c0_26] : memref<3x24xf32, #tpu.memory_space<vmem>>, vector<3x1xf32>
    %c9 = arith.constant 9 : index
    %c0_27 = arith.constant 0 : index
    %19 = vector.load %arg11[%c9, %c0_27] : memref<12x24xf32, #tpu.memory_space<vmem>>, vector<3x1xf32>
    tpu.vector_store %arg11[%c9, %c0_27], %18 {strides = array<i32>} : memref<12x24xf32, #tpu.memory_space<vmem>>, vector<3x1xf32>,
    %c0_28 = arith.constant 0 : index
    %c0_29 = arith.constant 0 : index
    %20 = vector.load %arg11[%c0_28, %c0_29] : memref<12x24xf32, #tpu.memory_space<vmem>>, vector<3x1xf32>
    %c3_30 = arith.constant 3 : index
    %c0_31 = arith.constant 0 : index
    %21 = vector.load %arg11[%c3_30, %c0_31] : memref<12x24xf32, #tpu.memory_space<vmem>>, vector<3x1xf32>
    %c6_32 = arith.constant 6 : index
    %c0_33 = arith.constant 0 : index
    %22 = vector.load %arg11[%c6_32, %c0_33] : memref<12x24xf32, #tpu.memory_space<vmem>>, vector<3x1xf32>
    %c0_34 = arith.constant 0 : index
    %c1 = arith.constant 1 : index
    %23 = vector.load %arg2[%c0_34, %c1] : memref<9x24xf32, #tpu.memory_space<vmem>>, vector<1x1xf32>
    %24 = vector.broadcast %23 : vector<1x1xf32> to vector<3x1xf32>
    %25 = arith.mulf %20, %24 : vector<3x1xf32>
    %c1_35 = arith.constant 1 : index
    %c1_36 = arith.constant 1 : index
    %26 = vector.load %arg2[%c1_35, %c1_36] : memref<9x24xf32, #tpu.memory_space<vmem>>, vector<1x1xf32>
    %27 = vector.broadcast %26 : vector<1x1xf32> to vector<3x1xf32>
    %28 = arith.mulf %21, %27 : vector<3x1xf32>
    %29 = arith.addf %25, %28 : vector<3x1xf32>
    %c2 = arith.constant 2 : index
    %c1_37 = arith.constant 1 : index
    %30 = vector.load %arg2[%c2, %c1_37] : memref<9x24xf32, #tpu.memory_space<vmem>>, vector<1x1xf32>
    %31 = vector.broadcast %30 : vector<1x1xf32> to vector<3x1xf32>
    %32 = arith.mulf %22, %31 : vector<3x1xf32>
    %33 = arith.addf %29, %32 : vector<3x1xf32>
    %c0_38 = arith.constant 0 : index
    %c1_39 = arith.constant 1 : index
    %34 = vector.load %arg11[%c0_38, %c1_39] : memref<12x24xf32, #tpu.memory_space<vmem>>, vector<3x1xf32>
    tpu.vector_store %arg11[%c0_38, %c1_39], %33 {strides = array<i32>} : memref<12x24xf32, #tpu.memory_space<vmem>>, vector<3x1xf32>,
    %c3_40 = arith.constant 3 : index
    %c1_41 = arith.constant 1 : index
    %35 = vector.load %arg2[%c3_40, %c1_41] : memref<9x24xf32, #tpu.memory_space<vmem>>, vector<1x1xf32>
    %36 = vector.broadcast %35 : vector<1x1xf32> to vector<3x1xf32>
    %37 = arith.mulf %20, %36 : vector<3x1xf32>
    %c4 = arith.constant 4 : index
    %c1_42 = arith.constant 1 : index
    %38 = vector.load %arg2[%c4, %c1_42] : memref<9x24xf32, #tpu.memory_space<vmem>>, vector<1x1xf32>
    %39 = vector.broadcast %38 : vector<1x1xf32> to vector<3x1xf32>
    %40 = arith.mulf %21, %39 : vector<3x1xf32>
    %41 = arith.addf %37, %40 : vector<3x1xf32>
    %c5 = arith.constant 5 : index
    %c1_43 = arith.constant 1 : index
    %42 = vector.load %arg2[%c5, %c1_43] : memref<9x24xf32, #tpu.memory_space<vmem>>, vector<1x1xf32>
    %43 = vector.broadcast %42 : vector<1x1xf32> to vector<3x1xf32>
    %44 = arith.mulf %22, %43 : vector<3x1xf32>
    %45 = arith.addf %41, %44 : vector<3x1xf32>
    %c3_44 = arith.constant 3 : index
    %c1_45 = arith.constant 1 : index
    %46 = vector.load %arg11[%c3_44, %c1_45] : memref<12x24xf32, #tpu.memory_space<vmem>>, vector<3x1xf32>
    tpu.vector_store %arg11[%c3_44, %c1_45], %45 {strides = array<i32>} : memref<12x24xf32, #tpu.memory_space<vmem>>, vector<3x1xf32>,
    %c6_46 = arith.constant 6 : index
    %c1_47 = arith.constant 1 : index
    %47 = vector.load %arg2[%c6_46, %c1_47] : memref<9x24xf32, #tpu.memory_space<vmem>>, vector<1x1xf32>
    %48 = vector.broadcast %47 : vector<1x1xf32> to vector<3x1xf32>
    %49 = arith.mulf %20, %48 : vector<3x1xf32>
    %c7 = arith.constant 7 : index
    %c1_48 = arith.constant 1 : index
    %50 = vector.load %arg2[%c7, %c1_48] : memref<9x24xf32, #tpu.memory_space<vmem>>, vector<1x1xf32>
    %51 = vector.broadcast %50 : vector<1x1xf32> to vector<3x1xf32>
    %52 = arith.mulf %21, %51 : vector<3x1xf32>
    %53 = arith.addf %49, %52 : vector<3x1xf32>
    %c8 = arith.constant 8 : index
    %c1_49 = arith.constant 1 : index
    %54 = vector.load %arg2[%c8, %c1_49] : memref<9x24xf32, #tpu.memory_space<vmem>>, vector<1x1xf32>
    %55 = vector.broadcast %54 : vector<1x1xf32> to vector<3x1xf32>
    %56 = arith.mulf %22, %55 : vector<3x1xf32>
    %57 = arith.addf %53, %56 : vector<3x1xf32>
    %c6_50 = arith.constant 6 : index
    %c1_51 = arith.constant 1 : index
    %58 = vector.load %arg11[%c6_50, %c1_51] : memref<12x24xf32, #tpu.memory_space<vmem>>, vector<3x1xf32>
    tpu.vector_store %arg11[%c6_50, %c1_51], %57 {strides = array<i32>} : memref<12x24xf32, #tpu.memory_space<vmem>>, vector<3x1xf32>,
    %c0_52 = arith.constant 0 : index
    %c1_53 = arith.constant 1 : index
    %59 = vector.load %arg10[%c0_52, %c1_53] : memref<3x24xf32, #tpu.memory_space<vmem>>, vector<1x1xf32>
    %c0_54 = arith.constant 0 : index
    %c0_55 = arith.constant 0 : index
    %60 = vector.load %arg10[%c0_54, %c0_55] : memref<3x24xf32, #tpu.memory_space<vmem>>, vector<1x1xf32>
    %61 = arith.subf %59, %60 : vector<1x1xf32>
    %c1_56 = arith.constant 1 : index
    %c1_57 = arith.constant 1 : index
    %62 = vector.load %arg10[%c1_56, %c1_57] : memref<3x24xf32, #tpu.memory_space<vmem>>, vector<1x1xf32>
    %c1_58 = arith.constant 1 : index
    %c0_59 = arith.constant 0 : index
    %63 = vector.load %arg10[%c1_58, %c0_59] : memref<3x24xf32, #tpu.memory_space<vmem>>, vector<1x1xf32>
    %64 = arith.subf %62, %63 : vector<1x1xf32>
    %c2_60 = arith.constant 2 : index
    %c1_61 = arith.constant 1 : index
    %65 = vector.load %arg10[%c2_60, %c1_61] : memref<3x24xf32, #tpu.memory_space<vmem>>, vector<1x1xf32>
    %c2_62 = arith.constant 2 : index
    %c0_63 = arith.constant 0 : index
    %66 = vector.load %arg10[%c2_62, %c0_63] : memref<3x24xf32, #tpu.memory_space<vmem>>, vector<1x1xf32>
    %67 = arith.subf %65, %66 : vector<1x1xf32>
    %68 = vector.broadcast %61 : vector<1x1xf32> to vector<3x1xf32>
    %69 = arith.mulf %20, %68 : vector<3x1xf32>
    %70 = vector.broadcast %64 : vector<1x1xf32> to vector<3x1xf32>
    %71 = arith.mulf %21, %70 : vector<3x1xf32>
    %72 = arith.addf %69, %71 : vector<3x1xf32>
    %73 = vector.broadcast %67 : vector<1x1xf32> to vector<3x1xf32>
    %74 = arith.mulf %22, %73 : vector<3x1xf32>
    %75 = arith.addf %72, %74 : vector<3x1xf32>
    %c9_64 = arith.constant 9 : index
    %c0_65 = arith.constant 0 : index
    %76 = vector.load %arg11[%c9_64, %c0_65] : memref<12x24xf32, #tpu.memory_space<vmem>>, vector<3x1xf32>
    %77 = arith.addf %75, %76 : vector<3x1xf32>
    %c9_66 = arith.constant 9 : index
    %c1_67 = arith.constant 1 : index
    %78 = vector.load %arg11[%c9_66, %c1_67] : memref<12x24xf32, #tpu.memory_space<vmem>>, vector<3x1xf32>
    tpu.vector_store %arg11[%c9_66, %c1_67], %77 {strides = array<i32>} : memref<12x24xf32, #tpu.memory_space<vmem>>, vector<3x1xf32>,
    %c0_68 = arith.constant 0 : index
    %c0_69 = arith.constant 0 : index
    %79 = vector.load %arg11[%c0_68, %c0_69] : memref<12x24xf32, #tpu.memory_space<vmem>>, vector<3x1xf32>
    %c3_70 = arith.constant 3 : index
    %c0_71 = arith.constant 0 : index
    %80 = vector.load %arg11[%c3_70, %c0_71] : memref<12x24xf32, #tpu.memory_space<vmem>>, vector<3x1xf32>
    %c6_72 = arith.constant 6 : index
    %c0_73 = arith.constant 0 : index
    %81 = vector.load %arg11[%c6_72, %c0_73] : memref<12x24xf32, #tpu.memory_space<vmem>>, vector<3x1xf32>
    %c0_74 = arith.constant 0 : index
    %c2_75 = arith.constant 2 : index
    %82 = vector.load %arg2[%c0_74, %c2_75] : memref<9x24xf32, #tpu.memory_space<vmem>>, vector<1x1xf32>
    %83 = vector.broadcast %82 : vector<1x1xf32> to vector<3x1xf32>
    %84 = arith.mulf %79, %83 : vector<3x1xf32>
    %c1_76 = arith.constant 1 : index
    %c2_77 = arith.constant 2 : index
    %85 = vector.load %arg2[%c1_76, %c2_77] : memref<9x24xf32, #tpu.memory_space<vmem>>, vector<1x1xf32>
    %86 = vector.broadcast %85 : vector<1x1xf32> to vector<3x1xf32>
    %87 = arith.mulf %80, %86 : vector<3x1xf32>
    %88 = arith.addf %84, %87 : vector<3x1xf32>
    %c2_78 = arith.constant 2 : index
    %c2_79 = arith.constant 2 : index
    %89 = vector.load %arg2[%c2_78, %c2_79] : memref<9x24xf32, #tpu.memory_space<vmem>>, vector<1x1xf32>
    %90 = vector.broadcast %89 : vector<1x1xf32> to vector<3x1xf32>
    %91 = arith.mulf %81, %90 : vector<3x1xf32>
    %92 = arith.addf %88, %91 : vector<3x1xf32>
    %c0_80 = arith.constant 0 : index
    %c2_81 = arith.constant 2 : index
    %93 = vector.load %arg11[%c0_80, %c2_81] : memref<12x24xf32, #tpu.memory_space<vmem>>, vector<3x1xf32>
    tpu.vector_store %arg11[%c0_80, %c2_81], %92 {strides = array<i32>} : memref<12x24xf32, #tpu.memory_space<vmem>>, vector<3x1xf32>,
    %c3_82 = arith.constant 3 : index
    %c2_83 = arith.constant 2 : index
    %94 = vector.load %arg2[%c3_82, %c2_83] : memref<9x24xf32, #tpu.memory_space<vmem>>, vector<1x1xf32>
    %95 = vector.broadcast %94 : vector<1x1xf32> to vector<3x1xf32>
    %96 = arith.mulf %79, %95 : vector<3x1xf32>
    %c4_84 = arith.constant 4 : index
    %c2_85 = arith.constant 2 : index
    %97 = vector.load %arg2[%c4_84, %c2_85] : memref<9x24xf32, #tpu.memory_space<vmem>>, vector<1x1xf32>
    %98 = vector.broadcast %97 : vector<1x1xf32> to vector<3x1xf32>
    %99 = arith.mulf %80, %98 : vector<3x1xf32>
    %100 = arith.addf %96, %99 : vector<3x1xf32>
    %c5_86 = arith.constant 5 : index
    %c2_87 = arith.constant 2 : index
    %101 = vector.load %arg2[%c5_86, %c2_87] : memref<9x24xf32, #tpu.memory_space<vmem>>, vector<1x1xf32>
    %102 = vector.broadcast %101 : vector<1x1xf32> to vector<3x1xf32>
    %103 = arith.mulf %81, %102 : vector<3x1xf32>
    %104 = arith.addf %100, %103 : vector<3x1xf32>
    %c3_88 = arith.constant 3 : index
    %c2_89 = arith.constant 2 : index
    %105 = vector.load %arg11[%c3_88, %c2_89] : memref<12x24xf32, #tpu.memory_space<vmem>>, vector<3x1xf32>
    tpu.vector_store %arg11[%c3_88, %c2_89], %104 {strides = array<i32>} : memref<12x24xf32, #tpu.memory_space<vmem>>, vector<3x1xf32>,
    %c6_90 = arith.constant 6 : index
    %c2_91 = arith.constant 2 : index
    %106 = vector.load %arg2[%c6_90, %c2_91] : memref<9x24xf32, #tpu.memory_space<vmem>>, vector<1x1xf32>
    %107 = vector.broadcast %106 : vector<1x1xf32> to vector<3x1xf32>
    %108 = arith.mulf %79, %107 : vector<3x1xf32>
    %c7_92 = arith.constant 7 : index
    %c2_93 = arith.constant 2 : index
    %109 = vector.load %arg2[%c7_92, %c2_93] : memref<9x24xf32, #tpu.memory_space<vmem>>, vector<1x1xf32>
    %110 = vector.broadcast %109 : vector<1x1xf32> to vector<3x1xf32>
    %111 = arith.mulf %80, %110 : vector<3x1xf32>
    %112 = arith.addf %108, %111 : vector<3x1xf32>
    %c8_94 = arith.constant 8 : index
    %c2_95 = arith.constant 2 : index
    %113 = vector.load %arg2[%c8_94, %c2_95] : memref<9x24xf32, #tpu.memory_space<vmem>>, vector<1x1xf32>
    %114 = vector.broadcast %113 : vector<1x1xf32> to vector<3x1xf32>
    %115 = arith.mulf %81, %114 : vector<3x1xf32>
    %116 = arith.addf %112, %115 : vector<3x1xf32>
    %c6_96 = arith.constant 6 : index
    %c2_97 = arith.constant 2 : index
    %117 = vector.load %arg11[%c6_96, %c2_97] : memref<12x24xf32, #tpu.memory_space<vmem>>, vector<3x1xf32>
    tpu.vector_store %arg11[%c6_96, %c2_97], %116 {strides = array<i32>} : memref<12x24xf32, #tpu.memory_space<vmem>>, vector<3x1xf32>,
    %c0_98 = arith.constant 0 : index
    %c2_99 = arith.constant 2 : index
    %118 = vector.load %arg10[%c0_98, %c2_99] : memref<3x24xf32, #tpu.memory_space<vmem>>, vector<1x1xf32>
    %c0_100 = arith.constant 0 : index
    %c0_101 = arith.constant 0 : index
    %119 = vector.load %arg10[%c0_100, %c0_101] : memref<3x24xf32, #tpu.memory_space<vmem>>, vector<1x1xf32>
    %120 = arith.subf %118, %119 : vector<1x1xf32>
    %c1_102 = arith.constant 1 : index
    %c2_103 = arith.constant 2 : index
    %121 = vector.load %arg10[%c1_102, %c2_103] : memref<3x24xf32, #tpu.memory_space<vmem>>, vector<1x1xf32>
    %c1_104 = arith.constant 1 : index
    %c0_105 = arith.constant 0 : index
    %122 = vector.load %arg10[%c1_104, %c0_105] : memref<3x24xf32, #tpu.memory_space<vmem>>, vector<1x1xf32>
    %123 = arith.subf %121, %122 : vector<1x1xf32>
    %c2_106 = arith.constant 2 : index
    %c2_107 = arith.constant 2 : index
    %124 = vector.load %arg10[%c2_106, %c2_107] : memref<3x24xf32, #tpu.memory_space<vmem>>, vector<1x1xf32>
    %c2_108 = arith.constant 2 : index
    %c0_109 = arith.constant 0 : index
    %125 = vector.load %arg10[%c2_108, %c0_109] : memref<3x24xf32, #tpu.memory_space<vmem>>, vector<1x1xf32>
    %126 = arith.subf %124, %125 : vector<1x1xf32>
    %127 = vector.broadcast %120 : vector<1x1xf32> to vector<3x1xf32>
    %128 = arith.mulf %79, %127 : vector<3x1xf32>
    %129 = vector.broadcast %123 : vector<1x1xf32> to vector<3x1xf32>
    %130 = arith.mulf %80, %129 : vector<3x1xf32>
    %131 = arith.addf %128, %130 : vector<3x1xf32>
    %132 = vector.broadcast %126 : vector<1x1xf32> to vector<3x1xf32>
    %133 = arith.mulf %81, %132 : vector<3x1xf32>
    %134 = arith.addf %131, %133 : vector<3x1xf32>
    %c9_110 = arith.constant 9 : index
    %c0_111 = arith.constant 0 : index
    %135 = vector.load %arg11[%c9_110, %c0_111] : memref<12x24xf32, #tpu.memory_space<vmem>>, vector<3x1xf32>
    %136 = arith.addf %134, %135 : vector<3x1xf32>
    %c9_112 = arith.constant 9 : index
    %c2_113 = arith.constant 2 : index
    %137 = vector.load %arg11[%c9_112, %c2_113] : memref<12x24xf32, #tpu.memory_space<vmem>>, vector<3x1xf32>
    tpu.vector_store %arg11[%c9_112, %c2_113], %136 {strides = array<i32>} : memref<12x24xf32, #tpu.memory_space<vmem>>, vector<3x1xf32>,
    %c0_114 = arith.constant 0 : index
    %c0_115 = arith.constant 0 : index
    %138 = vector.load %arg11[%c0_114, %c0_115] : memref<12x24xf32, #tpu.memory_space<vmem>>, vector<3x1xf32>
    %c3_116 = arith.constant 3 : index
    %c0_117 = arith.constant 0 : index
    %139 = vector.load %arg11[%c3_116, %c0_117] : memref<12x24xf32, #tpu.memory_space<vmem>>, vector<3x1xf32>
    %c6_118 = arith.constant 6 : index
    %c0_119 = arith.constant 0 : index
    %140 = vector.load %arg11[%c6_118, %c0_119] : memref<12x24xf32, #tpu.memory_space<vmem>>, vector<3x1xf32>
    %c0_120 = arith.constant 0 : index
    %c3_121 = arith.constant 3 : index
    %141 = vector.load %arg2[%c0_120, %c3_121] : memref<9x24xf32, #tpu.memory_space<vmem>>, vector<1x1xf32>
    %142 = vector.broadcast %141 : vector<1x1xf32> to vector<3x1xf32>
    %143 = arith.mulf %138, %142 : vector<3x1xf32>
    %c1_122 = arith.constant 1 : index
    %c3_123 = arith.constant 3 : index
    %144 = vector.load %arg2[%c1_122, %c3_123] : memref<9x24xf32, #tpu.memory_space<vmem>>, vector<1x1xf32>
    %145 = vector.broadcast %144 : vector<1x1xf32> to vector<3x1xf32>
    %146 = arith.mulf %139, %145 : vector<3x1xf32>
    %147 = arith.addf %143, %146 : vector<3x1xf32>
    %c2_124 = arith.constant 2 : index
    %c3_125 = arith.constant 3 : index
    %148 = vector.load %arg2[%c2_124, %c3_125] : memref<9x24xf32, #tpu.memory_space<vmem>>, vector<1x1xf32>
    %149 = vector.broadcast %148 : vector<1x1xf32> to vector<3x1xf32>
    %150 = arith.mulf %140, %149 : vector<3x1xf32>
    %151 = arith.addf %147, %150 : vector<3x1xf32>
    %c0_126 = arith.constant 0 : index
    %c3_127 = arith.constant 3 : index
    %152 = vector.load %arg11[%c0_126, %c3_127] : memref<12x24xf32, #tpu.memory_space<vmem>>, vector<3x1xf32>
    tpu.vector_store %arg11[%c0_126, %c3_127], %151 {strides = array<i32>} : memref<12x24xf32, #tpu.memory_space<vmem>>, vector<3x1xf32>,
    %c3_128 = arith.constant 3 : index
    %c3_129 = arith.constant 3 : index
    %153 = vector.load %arg2[%c3_128, %c3_129] : memref<9x24xf32, #tpu.memory_space<vmem>>, vector<1x1xf32>
    %154 = vector.broadcast %153 : vector<1x1xf32> to vector<3x1xf32>
    %155 = arith.mulf %138, %154 : vector<3x1xf32>
    %c4_130 = arith.constant 4 : index
    %c3_131 = arith.constant 3 : index
    %156 = vector.load %arg2[%c4_130, %c3_131] : memref<9x24xf32, #tpu.memory_space<vmem>>, vector<1x1xf32>
    %157 = vector.broadcast %156 : vector<1x1xf32> to vector<3x1xf32>
    %158 = arith.mulf %139, %157 : vector<3x1xf32>
    %159 = arith.addf %155, %158 : vector<3x1xf32>
    %c5_132 = arith.constant 5 : index
    %c3_133 = arith.constant 3 : index
    %160 = vector.load %arg2[%c5_132, %c3_133] : memref<9x24xf32, #tpu.memory_space<vmem>>, vector<1x1xf32>
    %161 = vector.broadcast %160 : vector<1x1xf32> to vector<3x1xf32>
    %162 = arith.mulf %140, %161 : vector<3x1xf32>
    %163 = arith.addf %159, %162 : vector<3x1xf32>
    %c3_134 = arith.constant 3 : index
    %c3_135 = arith.constant 3 : index
    %164 = vector.load %arg11[%c3_134, %c3_135] : memref<12x24xf32, #tpu.memory_space<vmem>>, vector<3x1xf32>
    tpu.vector_store %arg11[%c3_134, %c3_135], %163 {strides = array<i32>} : memref<12x24xf32, #tpu.memory_space<vmem>>, vector<3x1xf32>,
    %c6_136 = arith.constant 6 : index
    %c3_137 = arith.constant 3 : index
    %165 = vector.load %arg2[%c6_136, %c3_137] : memref<9x24xf32, #tpu.memory_space<vmem>>, vector<1x1xf32>
    %166 = vector.broadcast %165 : vector<1x1xf32> to vector<3x1xf32>
    %167 = arith.mulf %138, %166 : vector<3x1xf32>
    %c7_138 = arith.constant 7 : index
    %c3_139 = arith.constant 3 : index
    %168 = vector.load %arg2[%c7_138, %c3_139] : memref<9x24xf32, #tpu.memory_space<vmem>>, vector<1x1xf32>
    %169 = vector.broadcast %168 : vector<1x1xf32> to vector<3x1xf32>
    %170 = arith.mulf %139, %169 : vector<3x1xf32>
    %171 = arith.addf %167, %170 : vector<3x1xf32>
    %c8_140 = arith.constant 8 : index
    %c3_141 = arith.constant 3 : index
    %172 = vector.load %arg2[%c8_140, %c3_141] : memref<9x24xf32, #tpu.memory_space<vmem>>, vector<1x1xf32>
    %173 = vector.broadcast %172 : vector<1x1xf32> to vector<3x1xf32>
    %174 = arith.mulf %140, %173 : vector<3x1xf32>
    %175 = arith.addf %171, %174 : vector<3x1xf32>
    %c6_142 = arith.constant 6 : index
    %c3_143 = arith.constant 3 : index
    %176 = vector.load %arg11[%c6_142, %c3_143] : memref<12x24xf32, #tpu.memory_space<vmem>>, vector<3x1xf32>
    tpu.vector_store %arg11[%c6_142, %c3_143], %175 {strides = array<i32>} : memref<12x24xf32, #tpu.memory_space<vmem>>, vector<3x1xf32>,
    %c0_144 = arith.constant 0 : index
    %c3_145 = arith.constant 3 : index
    %177 = vector.load %arg10[%c0_144, %c3_145] : memref<3x24xf32, #tpu.memory_space<vmem>>, vector<1x1xf32>
    %c0_146 = arith.constant 0 : index
    %c0_147 = arith.constant 0 : index
    %178 = vector.load %arg10[%c0_146, %c0_147] : memref<3x24xf32, #tpu.memory_space<vmem>>, vector<1x1xf32>
    %179 = arith.subf %177, %178 : vector<1x1xf32>
    %c1_148 = arith.constant 1 : index
    %c3_149 = arith.constant 3 : index
    %180 = vector.load %arg10[%c1_148, %c3_149] : memref<3x24xf32, #tpu.memory_space<vmem>>, vector<1x1xf32>
    %c1_150 = arith.constant 1 : index
    %c0_151 = arith.constant 0 : index
    %181 = vector.load %arg10[%c1_150, %c0_151] : memref<3x24xf32, #tpu.memory_space<vmem>>, vector<1x1xf32>
    %182 = arith.subf %180, %181 : vector<1x1xf32>
    %c2_152 = arith.constant 2 : index
    %c3_153 = arith.constant 3 : index
    %183 = vector.load %arg10[%c2_152, %c3_153] : memref<3x24xf32, #tpu.memory_space<vmem>>, vector<1x1xf32>
    %c2_154 = arith.constant 2 : index
    %c0_155 = arith.constant 0 : index
    %184 = vector.load %arg10[%c2_154, %c0_155] : memref<3x24xf32, #tpu.memory_space<vmem>>, vector<1x1xf32>
    %185 = arith.subf %183, %184 : vector<1x1xf32>
    %186 = vector.broadcast %179 : vector<1x1xf32> to vector<3x1xf32>
    %187 = arith.mulf %138, %186 : vector<3x1xf32>
    %188 = vector.broadcast %182 : vector<1x1xf32> to vector<3x1xf32>
    %189 = arith.mulf %139, %188 : vector<3x1xf32>
    %190 = arith.addf %187, %189 : vector<3x1xf32>
    %191 = vector.broadcast %185 : vector<1x1xf32> to vector<3x1xf32>
    %192 = arith.mulf %140, %191 : vector<3x1xf32>
    %193 = arith.addf %190, %192 : vector<3x1xf32>
    %c9_156 = arith.constant 9 : index
    %c0_157 = arith.constant 0 : index
    %194 = vector.load %arg11[%c9_156, %c0_157] : memref<12x24xf32, #tpu.memory_space<vmem>>, vector<3x1xf32>
    %195 = arith.addf %193, %194 : vector<3x1xf32>
    %c9_158 = arith.constant 9 : index
    %c3_159 = arith.constant 3 : index
    %196 = vector.load %arg11[%c9_158, %c3_159] : memref<12x24xf32, #tpu.memory_space<vmem>>, vector<3x1xf32>
    tpu.vector_store %arg11[%c9_158, %c3_159], %195 {strides = array<i32>} : memref<12x24xf32, #tpu.memory_space<vmem>>, vector<3x1xf32>,
    %c0_160 = arith.constant 0 : index
    %c1_161 = arith.constant 1 : index
    %197 = vector.load %arg11[%c0_160, %c1_161] : memref<12x24xf32, #tpu.memory_space<vmem>>, vector<3x1xf32>
    %c3_162 = arith.constant 3 : index
    %c1_163 = arith.constant 1 : index
    %198 = vector.load %arg11[%c3_162, %c1_163] : memref<12x24xf32, #tpu.memory_space<vmem>>, vector<3x1xf32>
    %c6_164 = arith.constant 6 : index
    %c1_165 = arith.constant 1 : index
    %199 = vector.load %arg11[%c6_164, %c1_165] : memref<12x24xf32, #tpu.memory_space<vmem>>, vector<3x1xf32>
    %c0_166 = arith.constant 0 : index
    %c4_167 = arith.constant 4 : index
    %200 = vector.load %arg2[%c0_166, %c4_167] : memref<9x24xf32, #tpu.memory_space<vmem>>, vector<1x1xf32>
    %201 = vector.broadcast %200 : vector<1x1xf32> to vector<3x1xf32>
    %202 = arith.mulf %197, %201 : vector<3x1xf32>
    %c1_168 = arith.constant 1 : index
    %c4_169 = arith.constant 4 : index
    %203 = vector.load %arg2[%c1_168, %c4_169] : memref<9x24xf32, #tpu.memory_space<vmem>>, vector<1x1xf32>
    %204 = vector.broadcast %203 : vector<1x1xf32> to vector<3x1xf32>
    %205 = arith.mulf %198, %204 : vector<3x1xf32>
    %206 = arith.addf %202, %205 : vector<3x1xf32>
    %c2_170 = arith.constant 2 : index
    %c4_171 = arith.constant 4 : index
    %207 = vector.load %arg2[%c2_170, %c4_171] : memref<9x24xf32, #tpu.memory_space<vmem>>, vector<1x1xf32>
    %208 = vector.broadcast %207 : vector<1x1xf32> to vector<3x1xf32>
    %209 = arith.mulf %199, %208 : vector<3x1xf32>
    %210 = arith.addf %206, %209 : vector<3x1xf32>
    %c0_172 = arith.constant 0 : index
    %c4_173 = arith.constant 4 : index
    %211 = vector.load %arg11[%c0_172, %c4_173] : memref<12x24xf32, #tpu.memory_space<vmem>>, vector<3x1xf32>
    tpu.vector_store %arg11[%c0_172, %c4_173], %210 {strides = array<i32>} : memref<12x24xf32, #tpu.memory_space<vmem>>, vector<3x1xf32>,
    %c3_174 = arith.constant 3 : index
    %c4_175 = arith.constant 4 : index
    %212 = vector.load %arg2[%c3_174, %c4_175] : memref<9x24xf32, #tpu.memory_space<vmem>>, vector<1x1xf32>
    %213 = vector.broadcast %212 : vector<1x1xf32> to vector<3x1xf32>
    %214 = arith.mulf %197, %213 : vector<3x1xf32>
    %c4_176 = arith.constant 4 : index
    %c4_177 = arith.constant 4 : index
    %215 = vector.load %arg2[%c4_176, %c4_177] : memref<9x24xf32, #tpu.memory_space<vmem>>, vector<1x1xf32>
    %216 = vector.broadcast %215 : vector<1x1xf32> to vector<3x1xf32>
    %217 = arith.mulf %198, %216 : vector<3x1xf32>
    %218 = arith.addf %214, %217 : vector<3x1xf32>
    %c5_178 = arith.constant 5 : index
    %c4_179 = arith.constant 4 : index
    %219 = vector.load %arg2[%c5_178, %c4_179] : memref<9x24xf32, #tpu.memory_space<vmem>>, vector<1x1xf32>
    %220 = vector.broadcast %219 : vector<1x1xf32> to vector<3x1xf32>
    %221 = arith.mulf %199, %220 : vector<3x1xf32>
    %222 = arith.addf %218, %221 : vector<3x1xf32>
    %c3_180 = arith.constant 3 : index
    %c4_181 = arith.constant 4 : index
    %223 = vector.load %arg11[%c3_180, %c4_181] : memref<12x24xf32, #tpu.memory_space<vmem>>, vector<3x1xf32>
    tpu.vector_store %arg11[%c3_180, %c4_181], %222 {strides = array<i32>} : memref<12x24xf32, #tpu.memory_space<vmem>>, vector<3x1xf32>,
    %c6_182 = arith.constant 6 : index
    %c4_183 = arith.constant 4 : index
    %224 = vector.load %arg2[%c6_182, %c4_183] : memref<9x24xf32, #tpu.memory_space<vmem>>, vector<1x1xf32>
    %225 = vector.broadcast %224 : vector<1x1xf32> to vector<3x1xf32>
    %226 = arith.mulf %197, %225 : vector<3x1xf32>
    %c7_184 = arith.constant 7 : index
    %c4_185 = arith.constant 4 : index
    %227 = vector.load %arg2[%c7_184, %c4_185] : memref<9x24xf32, #tpu.memory_space<vmem>>, vector<1x1xf32>
    %228 = vector.broadcast %227 : vector<1x1xf32> to vector<3x1xf32>
    %229 = arith.mulf %198, %228 : vector<3x1xf32>
    %230 = arith.addf %226, %229 : vector<3x1xf32>
    %c8_186 = arith.constant 8 : index
    %c4_187 = arith.constant 4 : index
    %231 = vector.load %arg2[%c8_186, %c4_187] : memref<9x24xf32, #tpu.memory_space<vmem>>, vector<1x1xf32>
    %232 = vector.broadcast %231 : vector<1x1xf32> to vector<3x1xf32>
    %233 = arith.mulf %199, %232 : vector<3x1xf32>
    %234 = arith.addf %230, %233 : vector<3x1xf32>
    %c6_188 = arith.constant 6 : index
    %c4_189 = arith.constant 4 : index
    %235 = vector.load %arg11[%c6_188, %c4_189] : memref<12x24xf32, #tpu.memory_space<vmem>>, vector<3x1xf32>
    tpu.vector_store %arg11[%c6_188, %c4_189], %234 {strides = array<i32>} : memref<12x24xf32, #tpu.memory_space<vmem>>, vector<3x1xf32>,
    %c0_190 = arith.constant 0 : index
    %c4_191 = arith.constant 4 : index
    %236 = vector.load %arg10[%c0_190, %c4_191] : memref<3x24xf32, #tpu.memory_space<vmem>>, vector<1x1xf32>
    %c0_192 = arith.constant 0 : index
    %c1_193 = arith.constant 1 : index
    %237 = vector.load %arg10[%c0_192, %c1_193] : memref<3x24xf32, #tpu.memory_space<vmem>>, vector<1x1xf32>
    %238 = arith.subf %236, %237 : vector<1x1xf32>
    %c1_194 = arith.constant 1 : index
    %c4_195 = arith.constant 4 : index
    %239 = vector.load %arg10[%c1_194, %c4_195] : memref<3x24xf32, #tpu.memory_space<vmem>>, vector<1x1xf32>
    %c1_196 = arith.constant 1 : index
    %c1_197 = arith.constant 1 : index
    %240 = vector.load %arg10[%c1_196, %c1_197] : memref<3x24xf32, #tpu.memory_space<vmem>>, vector<1x1xf32>
    %241 = arith.subf %239, %240 : vector<1x1xf32>
    %c2_198 = arith.constant 2 : index
    %c4_199 = arith.constant 4 : index
    %242 = vector.load %arg10[%c2_198, %c4_199] : memref<3x24xf32, #tpu.memory_space<vmem>>, vector<1x1xf32>
    %c2_200 = arith.constant 2 : index
    %c1_201 = arith.constant 1 : index
    %243 = vector.load %arg10[%c2_200, %c1_201] : memref<3x24xf32, #tpu.memory_space<vmem>>, vector<1x1xf32>
    %244 = arith.subf %242, %243 : vector<1x1xf32>
    %245 = vector.broadcast %238 : vector<1x1xf32> to vector<3x1xf32>
    %246 = arith.mulf %197, %245 : vector<3x1xf32>
    %247 = vector.broadcast %241 : vector<1x1xf32> to vector<3x1xf32>
    %248 = arith.mulf %198, %247 : vector<3x1xf32>
    %249 = arith.addf %246, %248 : vector<3x1xf32>
    %250 = vector.broadcast %244 : vector<1x1xf32> to vector<3x1xf32>
    %251 = arith.mulf %199, %250 : vector<3x1xf32>
    %252 = arith.addf %249, %251 : vector<3x1xf32>
    %c9_202 = arith.constant 9 : index
    %c1_203 = arith.constant 1 : index
    %253 = vector.load %arg11[%c9_202, %c1_203] : memref<12x24xf32, #tpu.memory_space<vmem>>, vector<3x1xf32>
    %254 = arith.addf %252, %253 : vector<3x1xf32>
    %c9_204 = arith.constant 9 : index
    %c4_205 = arith.constant 4 : index
    %255 = vector.load %arg11[%c9_204, %c4_205] : memref<12x24xf32, #tpu.memory_space<vmem>>, vector<3x1xf32>
    tpu.vector_store %arg11[%c9_204, %c4_205], %254 {strides = array<i32>} : memref<12x24xf32, #tpu.memory_space<vmem>>, vector<3x1xf32>,
    %c0_206 = arith.constant 0 : index
    %c2_207 = arith.constant 2 : index
    %256 = vector.load %arg11[%c0_206, %c2_207] : memref<12x24xf32, #tpu.memory_space<vmem>>, vector<3x1xf32>
    %c3_208 = arith.constant 3 : index
    %c2_209 = arith.constant 2 : index
    %257 = vector.load %arg11[%c3_208, %c2_209] : memref<12x24xf32, #tpu.memory_space<vmem>>, vector<3x1xf32>
    %c6_210 = arith.constant 6 : index
    %c2_211 = arith.constant 2 : index
    %258 = vector.load %arg11[%c6_210, %c2_211] : memref<12x24xf32, #tpu.memory_space<vmem>>, vector<3x1xf32>
    %c0_212 = arith.constant 0 : index
    %c5_213 = arith.constant 5 : index
    %259 = vector.load %arg2[%c0_212, %c5_213] : memref<9x24xf32, #tpu.memory_space<vmem>>, vector<1x1xf32>
    %260 = vector.broadcast %259 : vector<1x1xf32> to vector<3x1xf32>
    %261 = arith.mulf %256, %260 : vector<3x1xf32>
    %c1_214 = arith.constant 1 : index
    %c5_215 = arith.constant 5 : index
    %262 = vector.load %arg2[%c1_214, %c5_215] : memref<9x24xf32, #tpu.memory_space<vmem>>, vector<1x1xf32>
    %263 = vector.broadcast %262 : vector<1x1xf32> to vector<3x1xf32>
    %264 = arith.mulf %257, %263 : vector<3x1xf32>
    %265 = arith.addf %261, %264 : vector<3x1xf32>
    %c2_216 = arith.constant 2 : index
    %c5_217 = arith.constant 5 : index
    %266 = vector.load %arg2[%c2_216, %c5_217] : memref<9x24xf32, #tpu.memory_space<vmem>>, vector<1x1xf32>
    %267 = vector.broadcast %266 : vector<1x1xf32> to vector<3x1xf32>
    %268 = arith.mulf %258, %267 : vector<3x1xf32>
    %269 = arith.addf %265, %268 : vector<3x1xf32>
    %c0_218 = arith.constant 0 : index
    %c5_219 = arith.constant 5 : index
    %270 = vector.load %arg11[%c0_218, %c5_219] : memref<12x24xf32, #tpu.memory_space<vmem>>, vector<3x1xf32>
    tpu.vector_store %arg11[%c0_218, %c5_219], %269 {strides = array<i32>} : memref<12x24xf32, #tpu.memory_space<vmem>>, vector<3x1xf32>,
    %c3_220 = arith.constant 3 : index
    %c5_221 = arith.constant 5 : index
    %271 = vector.load %arg2[%c3_220, %c5_221] : memref<9x24xf32, #tpu.memory_space<vmem>>, vector<1x1xf32>
    %272 = vector.broadcast %271 : vector<1x1xf32> to vector<3x1xf32>
    %273 = arith.mulf %256, %272 : vector<3x1xf32>
    %c4_222 = arith.constant 4 : index
    %c5_223 = arith.constant 5 : index
    %274 = vector.load %arg2[%c4_222, %c5_223] : memref<9x24xf32, #tpu.memory_space<vmem>>, vector<1x1xf32>
    %275 = vector.broadcast %274 : vector<1x1xf32> to vector<3x1xf32>
    %276 = arith.mulf %257, %275 : vector<3x1xf32>
    %277 = arith.addf %273, %276 : vector<3x1xf32>
    %c5_224 = arith.constant 5 : index
    %c5_225 = arith.constant 5 : index
    %278 = vector.load %arg2[%c5_224, %c5_225] : memref<9x24xf32, #tpu.memory_space<vmem>>, vector<1x1xf32>
    %279 = vector.broadcast %278 : vector<1x1xf32> to vector<3x1xf32>
    %280 = arith.mulf %258, %279 : vector<3x1xf32>
    %281 = arith.addf %277, %280 : vector<3x1xf32>
    %c3_226 = arith.constant 3 : index
    %c5_227 = arith.constant 5 : index
    %282 = vector.load %arg11[%c3_226, %c5_227] : memref<12x24xf32, #tpu.memory_space<vmem>>, vector<3x1xf32>
    tpu.vector_store %arg11[%c3_226, %c5_227], %281 {strides = array<i32>} : memref<12x24xf32, #tpu.memory_space<vmem>>, vector<3x1xf32>,
    %c6_228 = arith.constant 6 : index
    %c5_229 = arith.constant 5 : index
    %283 = vector.load %arg2[%c6_228, %c5_229] : memref<9x24xf32, #tpu.memory_space<vmem>>, vector<1x1xf32>
    %284 = vector.broadcast %283 : vector<1x1xf32> to vector<3x1xf32>
    %285 = arith.mulf %256, %284 : vector<3x1xf32>
    %c7_230 = arith.constant 7 : index
    %c5_231 = arith.constant 5 : index
    %286 = vector.load %arg2[%c7_230, %c5_231] : memref<9x24xf32, #tpu.memory_space<vmem>>, vector<1x1xf32>
    %287 = vector.broadcast %286 : vector<1x1xf32> to vector<3x1xf32>
    %288 = arith.mulf %257, %287 : vector<3x1xf32>
    %289 = arith.addf %285, %288 : vector<3x1xf32>
    %c8_232 = arith.constant 8 : index
    %c5_233 = arith.constant 5 : index
    %290 = vector.load %arg2[%c8_232, %c5_233] : memref<9x24xf32, #tpu.memory_space<vmem>>, vector<1x1xf32>
    %291 = vector.broadcast %290 : vector<1x1xf32> to vector<3x1xf32>
    %292 = arith.mulf %258, %291 : vector<3x1xf32>
    %293 = arith.addf %289, %292 : vector<3x1xf32>
    %c6_234 = arith.constant 6 : index
    %c5_235 = arith.constant 5 : index
    %294 = vector.load %arg11[%c6_234, %c5_235] : memref<12x24xf32, #tpu.memory_space<vmem>>, vector<3x1xf32>
    tpu.vector_store %arg11[%c6_234, %c5_235], %293 {strides = array<i32>} : memref<12x24xf32, #tpu.memory_space<vmem>>, vector<3x1xf32>,
    %c0_236 = arith.constant 0 : index
    %c5_237 = arith.constant 5 : index
    %295 = vector.load %arg10[%c0_236, %c5_237] : memref<3x24xf32, #tpu.memory_space<vmem>>, vector<1x1xf32>
    %c0_238 = arith.constant 0 : index
    %c2_239 = arith.constant 2 : index
    %296 = vector.load %arg10[%c0_238, %c2_239] : memref<3x24xf32, #tpu.memory_space<vmem>>, vector<1x1xf32>
    %297 = arith.subf %295, %296 : vector<1x1xf32>
    %c1_240 = arith.constant 1 : index
    %c5_241 = arith.constant 5 : index
    %298 = vector.load %arg10[%c1_240, %c5_241] : memref<3x24xf32, #tpu.memory_space<vmem>>, vector<1x1xf32>
    %c1_242 = arith.constant 1 : index
    %c2_243 = arith.constant 2 : index
    %299 = vector.load %arg10[%c1_242, %c2_243] : memref<3x24xf32, #tpu.memory_space<vmem>>, vector<1x1xf32>
    %300 = arith.subf %298, %299 : vector<1x1xf32>
    %c2_244 = arith.constant 2 : index
    %c5_245 = arith.constant 5 : index
    %301 = vector.load %arg10[%c2_244, %c5_245] : memref<3x24xf32, #tpu.memory_space<vmem>>, vector<1x1xf32>
    %c2_246 = arith.constant 2 : index
    %c2_247 = arith.constant 2 : index
    %302 = vector.load %arg10[%c2_246, %c2_247] : memref<3x24xf32, #tpu.memory_space<vmem>>, vector<1x1xf32>
    %303 = arith.subf %301, %302 : vector<1x1xf32>
    %304 = vector.broadcast %297 : vector<1x1xf32> to vector<3x1xf32>
    %305 = arith.mulf %256, %304 : vector<3x1xf32>
    %306 = vector.broadcast %300 : vector<1x1xf32> to vector<3x1xf32>
    %307 = arith.mulf %257, %306 : vector<3x1xf32>
    %308 = arith.addf %305, %307 : vector<3x1xf32>
    %309 = vector.broadcast %303 : vector<1x1xf32> to vector<3x1xf32>
    %310 = arith.mulf %258, %309 : vector<3x1xf32>
    %311 = arith.addf %308, %310 : vector<3x1xf32>
    %c9_248 = arith.constant 9 : index
    %c2_249 = arith.constant 2 : index
    %312 = vector.load %arg11[%c9_248, %c2_249] : memref<12x24xf32, #tpu.memory_space<vmem>>, vector<3x1xf32>
    %313 = arith.addf %311, %312 : vector<3x1xf32>
    %c9_250 = arith.constant 9 : index
    %c5_251 = arith.constant 5 : index
    %314 = vector.load %arg11[%c9_250, %c5_251] : memref<12x24xf32, #tpu.memory_space<vmem>>, vector<3x1xf32>
    tpu.vector_store %arg11[%c9_250, %c5_251], %313 {strides = array<i32>} : memref<12x24xf32, #tpu.memory_space<vmem>>, vector<3x1xf32>,
    %c0_252 = arith.constant 0 : index
    %c3_253 = arith.constant 3 : index
    %315 = vector.load %arg11[%c0_252, %c3_253] : memref<12x24xf32, #tpu.memory_space<vmem>>, vector<3x1xf32>
    %c3_254 = arith.constant 3 : index
    %c3_255 = arith.constant 3 : index
    %316 = vector.load %arg11[%c3_254, %c3_255] : memref<12x24xf32, #tpu.memory_space<vmem>>, vector<3x1xf32>
    %c6_256 = arith.constant 6 : index
    %c3_257 = arith.constant 3 : index
    %317 = vector.load %arg11[%c6_256, %c3_257] : memref<12x24xf32, #tpu.memory_space<vmem>>, vector<3x1xf32>
    %c0_258 = arith.constant 0 : index
    %c6_259 = arith.constant 6 : index
    %318 = vector.load %arg2[%c0_258, %c6_259] : memref<9x24xf32, #tpu.memory_space<vmem>>, vector<1x1xf32>
    %319 = vector.broadcast %318 : vector<1x1xf32> to vector<3x1xf32>
    %320 = arith.mulf %315, %319 : vector<3x1xf32>
    %c1_260 = arith.constant 1 : index
    %c6_261 = arith.constant 6 : index
    %321 = vector.load %arg2[%c1_260, %c6_261] : memref<9x24xf32, #tpu.memory_space<vmem>>, vector<1x1xf32>
    %322 = vector.broadcast %321 : vector<1x1xf32> to vector<3x1xf32>
    %323 = arith.mulf %316, %322 : vector<3x1xf32>
    %324 = arith.addf %320, %323 : vector<3x1xf32>
    %c2_262 = arith.constant 2 : index
    %c6_263 = arith.constant 6 : index
    %325 = vector.load %arg2[%c2_262, %c6_263] : memref<9x24xf32, #tpu.memory_space<vmem>>, vector<1x1xf32>
    %326 = vector.broadcast %325 : vector<1x1xf32> to vector<3x1xf32>
    %327 = arith.mulf %317, %326 : vector<3x1xf32>
    %328 = arith.addf %324, %327 : vector<3x1xf32>
    %c0_264 = arith.constant 0 : index
    %c6_265 = arith.constant 6 : index
    %329 = vector.load %arg11[%c0_264, %c6_265] : memref<12x24xf32, #tpu.memory_space<vmem>>, vector<3x1xf32>
    tpu.vector_store %arg11[%c0_264, %c6_265], %328 {strides = array<i32>} : memref<12x24xf32, #tpu.memory_space<vmem>>, vector<3x1xf32>,
    %c3_266 = arith.constant 3 : index
    %c6_267 = arith.constant 6 : index
    %330 = vector.load %arg2[%c3_266, %c6_267] : memref<9x24xf32, #tpu.memory_space<vmem>>, vector<1x1xf32>
    %331 = vector.broadcast %330 : vector<1x1xf32> to vector<3x1xf32>
    %332 = arith.mulf %315, %331 : vector<3x1xf32>
    %c4_268 = arith.constant 4 : index
    %c6_269 = arith.constant 6 : index
    %333 = vector.load %arg2[%c4_268, %c6_269] : memref<9x24xf32, #tpu.memory_space<vmem>>, vector<1x1xf32>
    %334 = vector.broadcast %333 : vector<1x1xf32> to vector<3x1xf32>
    %335 = arith.mulf %316, %334 : vector<3x1xf32>
    %336 = arith.addf %332, %335 : vector<3x1xf32>
    %c5_270 = arith.constant 5 : index
    %c6_271 = arith.constant 6 : index
    %337 = vector.load %arg2[%c5_270, %c6_271] : memref<9x24xf32, #tpu.memory_space<vmem>>, vector<1x1xf32>
    %338 = vector.broadcast %337 : vector<1x1xf32> to vector<3x1xf32>
    %339 = arith.mulf %317, %338 : vector<3x1xf32>
    %340 = arith.addf %336, %339 : vector<3x1xf32>
    %c3_272 = arith.constant 3 : index
    %c6_273 = arith.constant 6 : index
    %341 = vector.load %arg11[%c3_272, %c6_273] : memref<12x24xf32, #tpu.memory_space<vmem>>, vector<3x1xf32>
    tpu.vector_store %arg11[%c3_272, %c6_273], %340 {strides = array<i32>} : memref<12x24xf32, #tpu.memory_space<vmem>>, vector<3x1xf32>,
    %c6_274 = arith.constant 6 : index
    %c6_275 = arith.constant 6 : index
    %342 = vector.load %arg2[%c6_274, %c6_275] : memref<9x24xf32, #tpu.memory_space<vmem>>, vector<1x1xf32>
    %343 = vector.broadcast %342 : vector<1x1xf32> to vector<3x1xf32>
    %344 = arith.mulf %315, %343 : vector<3x1xf32>
    %c7_276 = arith.constant 7 : index
    %c6_277 = arith.constant 6 : index
    %345 = vector.load %arg2[%c7_276, %c6_277] : memref<9x24xf32, #tpu.memory_space<vmem>>, vector<1x1xf32>
    %346 = vector.broadcast %345 : vector<1x1xf32> to vector<3x1xf32>
    %347 = arith.mulf %316, %346 : vector<3x1xf32>
    %348 = arith.addf %344, %347 : vector<3x1xf32>
    %c8_278 = arith.constant 8 : index
    %c6_279 = arith.constant 6 : index
    %349 = vector.load %arg2[%c8_278, %c6_279] : memref<9x24xf32, #tpu.memory_space<vmem>>, vector<1x1xf32>
    %350 = vector.broadcast %349 : vector<1x1xf32> to vector<3x1xf32>
    %351 = arith.mulf %317, %350 : vector<3x1xf32>
    %352 = arith.addf %348, %351 : vector<3x1xf32>
    %c6_280 = arith.constant 6 : index
    %c6_281 = arith.constant 6 : index
    %353 = vector.load %arg11[%c6_280, %c6_281] : memref<12x24xf32, #tpu.memory_space<vmem>>, vector<3x1xf32>
    tpu.vector_store %arg11[%c6_280, %c6_281], %352 {strides = array<i32>} : memref<12x24xf32, #tpu.memory_space<vmem>>, vector<3x1xf32>,
    %c0_282 = arith.constant 0 : index
    %c6_283 = arith.constant 6 : index
    %354 = vector.load %arg10[%c0_282, %c6_283] : memref<3x24xf32, #tpu.memory_space<vmem>>, vector<1x1xf32>
    %c0_284 = arith.constant 0 : index
    %c3_285 = arith.constant 3 : index
    %355 = vector.load %arg10[%c0_284, %c3_285] : memref<3x24xf32, #tpu.memory_space<vmem>>, vector<1x1xf32>
    %356 = arith.subf %354, %355 : vector<1x1xf32>
    %c1_286 = arith.constant 1 : index
    %c6_287 = arith.constant 6 : index
    %357 = vector.load %arg10[%c1_286, %c6_287] : memref<3x24xf32, #tpu.memory_space<vmem>>, vector<1x1xf32>
    %c1_288 = arith.constant 1 : index
    %c3_289 = arith.constant 3 : index
    %358 = vector.load %arg10[%c1_288, %c3_289] : memref<3x24xf32, #tpu.memory_space<vmem>>, vector<1x1xf32>
    %359 = arith.subf %357, %358 : vector<1x1xf32>
    %c2_290 = arith.constant 2 : index
    %c6_291 = arith.constant 6 : index
    %360 = vector.load %arg10[%c2_290, %c6_291] : memref<3x24xf32, #tpu.memory_space<vmem>>, vector<1x1xf32>
    %c2_292 = arith.constant 2 : index
    %c3_293 = arith.constant 3 : index
    %361 = vector.load %arg10[%c2_292, %c3_293] : memref<3x24xf32, #tpu.memory_space<vmem>>, vector<1x1xf32>
    %362 = arith.subf %360, %361 : vector<1x1xf32>
    %363 = vector.broadcast %356 : vector<1x1xf32> to vector<3x1xf32>
    %364 = arith.mulf %315, %363 : vector<3x1xf32>
    %365 = vector.broadcast %359 : vector<1x1xf32> to vector<3x1xf32>
    %366 = arith.mulf %316, %365 : vector<3x1xf32>
    %367 = arith.addf %364, %366 : vector<3x1xf32>
    %368 = vector.broadcast %362 : vector<1x1xf32> to vector<3x1xf32>
    %369 = arith.mulf %317, %368 : vector<3x1xf32>
    %370 = arith.addf %367, %369 : vector<3x1xf32>
    %c9_294 = arith.constant 9 : index
    %c3_295 = arith.constant 3 : index
    %371 = vector.load %arg11[%c9_294, %c3_295] : memref<12x24xf32, #tpu.memory_space<vmem>>, vector<3x1xf32>
    %372 = arith.addf %370, %371 : vector<3x1xf32>
    %c9_296 = arith.constant 9 : index
    %c6_297 = arith.constant 6 : index
    %373 = vector.load %arg11[%c9_296, %c6_297] : memref<12x24xf32, #tpu.memory_space<vmem>>, vector<3x1xf32>
    tpu.vector_store %arg11[%c9_296, %c6_297], %372 {strides = array<i32>} : memref<12x24xf32, #tpu.memory_space<vmem>>, vector<3x1xf32>,
    %c0_298 = arith.constant 0 : index
    %c4_299 = arith.constant 4 : index
    %374 = vector.load %arg11[%c0_298, %c4_299] : memref<12x24xf32, #tpu.memory_space<vmem>>, vector<3x1xf32>
    %c3_300 = arith.constant 3 : index
    %c4_301 = arith.constant 4 : index
    %375 = vector.load %arg11[%c3_300, %c4_301] : memref<12x24xf32, #tpu.memory_space<vmem>>, vector<3x1xf32>
    %c6_302 = arith.constant 6 : index
    %c4_303 = arith.constant 4 : index
    %376 = vector.load %arg11[%c6_302, %c4_303] : memref<12x24xf32, #tpu.memory_space<vmem>>, vector<3x1xf32>
    %c0_304 = arith.constant 0 : index
    %c7_305 = arith.constant 7 : index
    %377 = vector.load %arg2[%c0_304, %c7_305] : memref<9x24xf32, #tpu.memory_space<vmem>>, vector<1x1xf32>
    %378 = vector.broadcast %377 : vector<1x1xf32> to vector<3x1xf32>
    %379 = arith.mulf %374, %378 : vector<3x1xf32>
    %c1_306 = arith.constant 1 : index
    %c7_307 = arith.constant 7 : index
    %380 = vector.load %arg2[%c1_306, %c7_307] : memref<9x24xf32, #tpu.memory_space<vmem>>, vector<1x1xf32>
    %381 = vector.broadcast %380 : vector<1x1xf32> to vector<3x1xf32>
    %382 = arith.mulf %375, %381 : vector<3x1xf32>
    %383 = arith.addf %379, %382 : vector<3x1xf32>
    %c2_308 = arith.constant 2 : index
    %c7_309 = arith.constant 7 : index
    %384 = vector.load %arg2[%c2_308, %c7_309] : memref<9x24xf32, #tpu.memory_space<vmem>>, vector<1x1xf32>
    %385 = vector.broadcast %384 : vector<1x1xf32> to vector<3x1xf32>
    %386 = arith.mulf %376, %385 : vector<3x1xf32>
    %387 = arith.addf %383, %386 : vector<3x1xf32>
    %c0_310 = arith.constant 0 : index
    %c7_311 = arith.constant 7 : index
    %388 = vector.load %arg11[%c0_310, %c7_311] : memref<12x24xf32, #tpu.memory_space<vmem>>, vector<3x1xf32>
    tpu.vector_store %arg11[%c0_310, %c7_311], %387 {strides = array<i32>} : memref<12x24xf32, #tpu.memory_space<vmem>>, vector<3x1xf32>,
    %c3_312 = arith.constant 3 : index
    %c7_313 = arith.constant 7 : index
    %389 = vector.load %arg2[%c3_312, %c7_313] : memref<9x24xf32, #tpu.memory_space<vmem>>, vector<1x1xf32>
    %390 = vector.broadcast %389 : vector<1x1xf32> to vector<3x1xf32>
    %391 = arith.mulf %374, %390 : vector<3x1xf32>
    %c4_314 = arith.constant 4 : index
    %c7_315 = arith.constant 7 : index
    %392 = vector.load %arg2[%c4_314, %c7_315] : memref<9x24xf32, #tpu.memory_space<vmem>>, vector<1x1xf32>
    %393 = vector.broadcast %392 : vector<1x1xf32> to vector<3x1xf32>
    %394 = arith.mulf %375, %393 : vector<3x1xf32>
    %395 = arith.addf %391, %394 : vector<3x1xf32>
    %c5_316 = arith.constant 5 : index
    %c7_317 = arith.constant 7 : index
    %396 = vector.load %arg2[%c5_316, %c7_317] : memref<9x24xf32, #tpu.memory_space<vmem>>, vector<1x1xf32>
    %397 = vector.broadcast %396 : vector<1x1xf32> to vector<3x1xf32>
    %398 = arith.mulf %376, %397 : vector<3x1xf32>
    %399 = arith.addf %395, %398 : vector<3x1xf32>
    %c3_318 = arith.constant 3 : index
    %c7_319 = arith.constant 7 : index
    %400 = vector.load %arg11[%c3_318, %c7_319] : memref<12x24xf32, #tpu.memory_space<vmem>>, vector<3x1xf32>
    tpu.vector_store %arg11[%c3_318, %c7_319], %399 {strides = array<i32>} : memref<12x24xf32, #tpu.memory_space<vmem>>, vector<3x1xf32>,
    %c6_320 = arith.constant 6 : index
    %c7_321 = arith.constant 7 : index
    %401 = vector.load %arg2[%c6_320, %c7_321] : memref<9x24xf32, #tpu.memory_space<vmem>>, vector<1x1xf32>
    %402 = vector.broadcast %401 : vector<1x1xf32> to vector<3x1xf32>
    %403 = arith.mulf %374, %402 : vector<3x1xf32>
    %c7_322 = arith.constant 7 : index
    %c7_323 = arith.constant 7 : index
    %404 = vector.load %arg2[%c7_322, %c7_323] : memref<9x24xf32, #tpu.memory_space<vmem>>, vector<1x1xf32>
    %405 = vector.broadcast %404 : vector<1x1xf32> to vector<3x1xf32>
    %406 = arith.mulf %375, %405 : vector<3x1xf32>
    %407 = arith.addf %403, %406 : vector<3x1xf32>
    %c8_324 = arith.constant 8 : index
    %c7_325 = arith.constant 7 : index
    %408 = vector.load %arg2[%c8_324, %c7_325] : memref<9x24xf32, #tpu.memory_space<vmem>>, vector<1x1xf32>
    %409 = vector.broadcast %408 : vector<1x1xf32> to vector<3x1xf32>
    %410 = arith.mulf %376, %409 : vector<3x1xf32>
    %411 = arith.addf %407, %410 : vector<3x1xf32>
    %c6_326 = arith.constant 6 : index
    %c7_327 = arith.constant 7 : index
    %412 = vector.load %arg11[%c6_326, %c7_327] : memref<12x24xf32, #tpu.memory_space<vmem>>, vector<3x1xf32>
    tpu.vector_store %arg11[%c6_326, %c7_327], %411 {strides = array<i32>} : memref<12x24xf32, #tpu.memory_space<vmem>>, vector<3x1xf32>,
    %c0_328 = arith.constant 0 : index
    %c7_329 = arith.constant 7 : index
    %413 = vector.load %arg10[%c0_328, %c7_329] : memref<3x24xf32, #tpu.memory_space<vmem>>, vector<1x1xf32>
    %c0_330 = arith.constant 0 : index
    %c4_331 = arith.constant 4 : index
    %414 = vector.load %arg10[%c0_330, %c4_331] : memref<3x24xf32, #tpu.memory_space<vmem>>, vector<1x1xf32>
    %415 = arith.subf %413, %414 : vector<1x1xf32>
    %c1_332 = arith.constant 1 : index
    %c7_333 = arith.constant 7 : index
    %416 = vector.load %arg10[%c1_332, %c7_333] : memref<3x24xf32, #tpu.memory_space<vmem>>, vector<1x1xf32>
    %c1_334 = arith.constant 1 : index
    %c4_335 = arith.constant 4 : index
    %417 = vector.load %arg10[%c1_334, %c4_335] : memref<3x24xf32, #tpu.memory_space<vmem>>, vector<1x1xf32>
    %418 = arith.subf %416, %417 : vector<1x1xf32>
    %c2_336 = arith.constant 2 : index
    %c7_337 = arith.constant 7 : index
    %419 = vector.load %arg10[%c2_336, %c7_337] : memref<3x24xf32, #tpu.memory_space<vmem>>, vector<1x1xf32>
    %c2_338 = arith.constant 2 : index
    %c4_339 = arith.constant 4 : index
    %420 = vector.load %arg10[%c2_338, %c4_339] : memref<3x24xf32, #tpu.memory_space<vmem>>, vector<1x1xf32>
    %421 = arith.subf %419, %420 : vector<1x1xf32>
    %422 = vector.broadcast %415 : vector<1x1xf32> to vector<3x1xf32>
    %423 = arith.mulf %374, %422 : vector<3x1xf32>
    %424 = vector.broadcast %418 : vector<1x1xf32> to vector<3x1xf32>
    %425 = arith.mulf %375, %424 : vector<3x1xf32>
    %426 = arith.addf %423, %425 : vector<3x1xf32>
    %427 = vector.broadcast %421 : vector<1x1xf32> to vector<3x1xf32>
    %428 = arith.mulf %376, %427 : vector<3x1xf32>
    %429 = arith.addf %426, %428 : vector<3x1xf32>
    %c9_340 = arith.constant 9 : index
    %c4_341 = arith.constant 4 : index
    %430 = vector.load %arg11[%c9_340, %c4_341] : memref<12x24xf32, #tpu.memory_space<vmem>>, vector<3x1xf32>
    %431 = arith.addf %429, %430 : vector<3x1xf32>
    %c9_342 = arith.constant 9 : index
    %c7_343 = arith.constant 7 : index
    %432 = vector.load %arg11[%c9_342, %c7_343] : memref<12x24xf32, #tpu.memory_space<vmem>>, vector<3x1xf32>
    tpu.vector_store %arg11[%c9_342, %c7_343], %431 {strides = array<i32>} : memref<12x24xf32, #tpu.memory_space<vmem>>, vector<3x1xf32>,
    %c0_344 = arith.constant 0 : index
    %c5_345 = arith.constant 5 : index
    %433 = vector.load %arg11[%c0_344, %c5_345] : memref<12x24xf32, #tpu.memory_space<vmem>>, vector<3x1xf32>
    %c3_346 = arith.constant 3 : index
    %c5_347 = arith.constant 5 : index
    %434 = vector.load %arg11[%c3_346, %c5_347] : memref<12x24xf32, #tpu.memory_space<vmem>>, vector<3x1xf32>
    %c6_348 = arith.constant 6 : index
    %c5_349 = arith.constant 5 : index
    %435 = vector.load %arg11[%c6_348, %c5_349] : memref<12x24xf32, #tpu.memory_space<vmem>>, vector<3x1xf32>
    %c0_350 = arith.constant 0 : index
    %c8_351 = arith.constant 8 : index
    %436 = vector.load %arg2[%c0_350, %c8_351] : memref<9x24xf32, #tpu.memory_space<vmem>>, vector<1x1xf32>
    %437 = vector.broadcast %436 : vector<1x1xf32> to vector<3x1xf32>
    %438 = arith.mulf %433, %437 : vector<3x1xf32>
    %c1_352 = arith.constant 1 : index
    %c8_353 = arith.constant 8 : index
    %439 = vector.load %arg2[%c1_352, %c8_353] : memref<9x24xf32, #tpu.memory_space<vmem>>, vector<1x1xf32>
    %440 = vector.broadcast %439 : vector<1x1xf32> to vector<3x1xf32>
    %441 = arith.mulf %434, %440 : vector<3x1xf32>
    %442 = arith.addf %438, %441 : vector<3x1xf32>
    %c2_354 = arith.constant 2 : index
    %c8_355 = arith.constant 8 : index
    %443 = vector.load %arg2[%c2_354, %c8_355] : memref<9x24xf32, #tpu.memory_space<vmem>>, vector<1x1xf32>
    %444 = vector.broadcast %443 : vector<1x1xf32> to vector<3x1xf32>
    %445 = arith.mulf %435, %444 : vector<3x1xf32>
    %446 = arith.addf %442, %445 : vector<3x1xf32>
    %c0_356 = arith.constant 0 : index
    %c8_357 = arith.constant 8 : index
    %447 = vector.load %arg11[%c0_356, %c8_357] : memref<12x24xf32, #tpu.memory_space<vmem>>, vector<3x1xf32>
    tpu.vector_store %arg11[%c0_356, %c8_357], %446 {strides = array<i32>} : memref<12x24xf32, #tpu.memory_space<vmem>>, vector<3x1xf32>,
    %c3_358 = arith.constant 3 : index
    %c8_359 = arith.constant 8 : index
    %448 = vector.load %arg2[%c3_358, %c8_359] : memref<9x24xf32, #tpu.memory_space<vmem>>, vector<1x1xf32>
    %449 = vector.broadcast %448 : vector<1x1xf32> to vector<3x1xf32>
    %450 = arith.mulf %433, %449 : vector<3x1xf32>
    %c4_360 = arith.constant 4 : index
    %c8_361 = arith.constant 8 : index
    %451 = vector.load %arg2[%c4_360, %c8_361] : memref<9x24xf32, #tpu.memory_space<vmem>>, vector<1x1xf32>
    %452 = vector.broadcast %451 : vector<1x1xf32> to vector<3x1xf32>
    %453 = arith.mulf %434, %452 : vector<3x1xf32>
    %454 = arith.addf %450, %453 : vector<3x1xf32>
    %c5_362 = arith.constant 5 : index
    %c8_363 = arith.constant 8 : index
    %455 = vector.load %arg2[%c5_362, %c8_363] : memref<9x24xf32, #tpu.memory_space<vmem>>, vector<1x1xf32>
    %456 = vector.broadcast %455 : vector<1x1xf32> to vector<3x1xf32>
    %457 = arith.mulf %435, %456 : vector<3x1xf32>
    %458 = arith.addf %454, %457 : vector<3x1xf32>
    %c3_364 = arith.constant 3 : index
    %c8_365 = arith.constant 8 : index
    %459 = vector.load %arg11[%c3_364, %c8_365] : memref<12x24xf32, #tpu.memory_space<vmem>>, vector<3x1xf32>
    tpu.vector_store %arg11[%c3_364, %c8_365], %458 {strides = array<i32>} : memref<12x24xf32, #tpu.memory_space<vmem>>, vector<3x1xf32>,
    %c6_366 = arith.constant 6 : index
    %c8_367 = arith.constant 8 : index
    %460 = vector.load %arg2[%c6_366, %c8_367] : memref<9x24xf32, #tpu.memory_space<vmem>>, vector<1x1xf32>
    %461 = vector.broadcast %460 : vector<1x1xf32> to vector<3x1xf32>
    %462 = arith.mulf %433, %461 : vector<3x1xf32>
    %c7_368 = arith.constant 7 : index
    %c8_369 = arith.constant 8 : index
    %463 = vector.load %arg2[%c7_368, %c8_369] : memref<9x24xf32, #tpu.memory_space<vmem>>, vector<1x1xf32>
    %464 = vector.broadcast %463 : vector<1x1xf32> to vector<3x1xf32>
    %465 = arith.mulf %434, %464 : vector<3x1xf32>
    %466 = arith.addf %462, %465 : vector<3x1xf32>
    %c8_370 = arith.constant 8 : index
    %c8_371 = arith.constant 8 : index
    %467 = vector.load %arg2[%c8_370, %c8_371] : memref<9x24xf32, #tpu.memory_space<vmem>>, vector<1x1xf32>
    %468 = vector.broadcast %467 : vector<1x1xf32> to vector<3x1xf32>
    %469 = arith.mulf %435, %468 : vector<3x1xf32>
    %470 = arith.addf %466, %469 : vector<3x1xf32>
    %c6_372 = arith.constant 6 : index
    %c8_373 = arith.constant 8 : index
    %471 = vector.load %arg11[%c6_372, %c8_373] : memref<12x24xf32, #tpu.memory_space<vmem>>, vector<3x1xf32>
    tpu.vector_store %arg11[%c6_372, %c8_373], %470 {strides = array<i32>} : memref<12x24xf32, #tpu.memory_space<vmem>>, vector<3x1xf32>,
    %c0_374 = arith.constant 0 : index
    %c8_375 = arith.constant 8 : index
    %472 = vector.load %arg10[%c0_374, %c8_375] : memref<3x24xf32, #tpu.memory_space<vmem>>, vector<1x1xf32>
    %c0_376 = arith.constant 0 : index
    %c5_377 = arith.constant 5 : index
    %473 = vector.load %arg10[%c0_376, %c5_377] : memref<3x24xf32, #tpu.memory_space<vmem>>, vector<1x1xf32>
    %474 = arith.subf %472, %473 : vector<1x1xf32>
    %c1_378 = arith.constant 1 : index
    %c8_379 = arith.constant 8 : index
    %475 = vector.load %arg10[%c1_378, %c8_379] : memref<3x24xf32, #tpu.memory_space<vmem>>, vector<1x1xf32>
    %c1_380 = arith.constant 1 : index
    %c5_381 = arith.constant 5 : index
    %476 = vector.load %arg10[%c1_380, %c5_381] : memref<3x24xf32, #tpu.memory_space<vmem>>, vector<1x1xf32>
    %477 = arith.subf %475, %476 : vector<1x1xf32>
    %c2_382 = arith.constant 2 : index
    %c8_383 = arith.constant 8 : index
    %478 = vector.load %arg10[%c2_382, %c8_383] : memref<3x24xf32, #tpu.memory_space<vmem>>, vector<1x1xf32>
    %c2_384 = arith.constant 2 : index
    %c5_385 = arith.constant 5 : index
    %479 = vector.load %arg10[%c2_384, %c5_385] : memref<3x24xf32, #tpu.memory_space<vmem>>, vector<1x1xf32>
    %480 = arith.subf %478, %479 : vector<1x1xf32>
    %481 = vector.broadcast %474 : vector<1x1xf32> to vector<3x1xf32>
    %482 = arith.mulf %433, %481 : vector<3x1xf32>
    %483 = vector.broadcast %477 : vector<1x1xf32> to vector<3x1xf32>
    %484 = arith.mulf %434, %483 : vector<3x1xf32>
    %485 = arith.addf %482, %484 : vector<3x1xf32>
    %486 = vector.broadcast %480 : vector<1x1xf32> to vector<3x1xf32>
    %487 = arith.mulf %435, %486 : vector<3x1xf32>
    %488 = arith.addf %485, %487 : vector<3x1xf32>
    %c9_386 = arith.constant 9 : index
    %c5_387 = arith.constant 5 : index
    %489 = vector.load %arg11[%c9_386, %c5_387] : memref<12x24xf32, #tpu.memory_space<vmem>>, vector<3x1xf32>
    %490 = arith.addf %488, %489 : vector<3x1xf32>
    %c9_388 = arith.constant 9 : index
    %c8_389 = arith.constant 8 : index
    %491 = vector.load %arg11[%c9_388, %c8_389] : memref<12x24xf32, #tpu.memory_space<vmem>>, vector<3x1xf32>
    tpu.vector_store %arg11[%c9_388, %c8_389], %490 {strides = array<i32>} : memref<12x24xf32, #tpu.memory_space<vmem>>, vector<3x1xf32>,
    %c0_390 = arith.constant 0 : index
    %c6_391 = arith.constant 6 : index
    %492 = vector.load %arg11[%c0_390, %c6_391] : memref<12x24xf32, #tpu.memory_space<vmem>>, vector<3x1xf32>
    %c3_392 = arith.constant 3 : index
    %c6_393 = arith.constant 6 : index
    %493 = vector.load %arg11[%c3_392, %c6_393] : memref<12x24xf32, #tpu.memory_space<vmem>>, vector<3x1xf32>
    %c6_394 = arith.constant 6 : index
    %c6_395 = arith.constant 6 : index
    %494 = vector.load %arg11[%c6_394, %c6_395] : memref<12x24xf32, #tpu.memory_space<vmem>>, vector<3x1xf32>
    %c0_396 = arith.constant 0 : index
    %c9_397 = arith.constant 9 : index
    %495 = vector.load %arg2[%c0_396, %c9_397] : memref<9x24xf32, #tpu.memory_space<vmem>>, vector<1x1xf32>
    %496 = vector.broadcast %495 : vector<1x1xf32> to vector<3x1xf32>
    %497 = arith.mulf %492, %496 : vector<3x1xf32>
    %c1_398 = arith.constant 1 : index
    %c9_399 = arith.constant 9 : index
    %498 = vector.load %arg2[%c1_398, %c9_399] : memref<9x24xf32, #tpu.memory_space<vmem>>, vector<1x1xf32>
    %499 = vector.broadcast %498 : vector<1x1xf32> to vector<3x1xf32>
    %500 = arith.mulf %493, %499 : vector<3x1xf32>
    %501 = arith.addf %497, %500 : vector<3x1xf32>
    %c2_400 = arith.constant 2 : index
    %c9_401 = arith.constant 9 : index
    %502 = vector.load %arg2[%c2_400, %c9_401] : memref<9x24xf32, #tpu.memory_space<vmem>>, vector<1x1xf32>
    %503 = vector.broadcast %502 : vector<1x1xf32> to vector<3x1xf32>
    %504 = arith.mulf %494, %503 : vector<3x1xf32>
    %505 = arith.addf %501, %504 : vector<3x1xf32>
    %c0_402 = arith.constant 0 : index
    %c9_403 = arith.constant 9 : index
    %506 = vector.load %arg11[%c0_402, %c9_403] : memref<12x24xf32, #tpu.memory_space<vmem>>, vector<3x1xf32>
    tpu.vector_store %arg11[%c0_402, %c9_403], %505 {strides = array<i32>} : memref<12x24xf32, #tpu.memory_space<vmem>>, vector<3x1xf32>,
    %c3_404 = arith.constant 3 : index
    %c9_405 = arith.constant 9 : index
    %507 = vector.load %arg2[%c3_404, %c9_405] : memref<9x24xf32, #tpu.memory_space<vmem>>, vector<1x1xf32>
    %508 = vector.broadcast %507 : vector<1x1xf32> to vector<3x1xf32>
    %509 = arith.mulf %492, %508 : vector<3x1xf32>
    %c4_406 = arith.constant 4 : index
    %c9_407 = arith.constant 9 : index
    %510 = vector.load %arg2[%c4_406, %c9_407] : memref<9x24xf32, #tpu.memory_space<vmem>>, vector<1x1xf32>
    %511 = vector.broadcast %510 : vector<1x1xf32> to vector<3x1xf32>
    %512 = arith.mulf %493, %511 : vector<3x1xf32>
    %513 = arith.addf %509, %512 : vector<3x1xf32>
    %c5_408 = arith.constant 5 : index
    %c9_409 = arith.constant 9 : index
    %514 = vector.load %arg2[%c5_408, %c9_409] : memref<9x24xf32, #tpu.memory_space<vmem>>, vector<1x1xf32>
    %515 = vector.broadcast %514 : vector<1x1xf32> to vector<3x1xf32>
    %516 = arith.mulf %494, %515 : vector<3x1xf32>
    %517 = arith.addf %513, %516 : vector<3x1xf32>
    %c3_410 = arith.constant 3 : index
    %c9_411 = arith.constant 9 : index
    %518 = vector.load %arg11[%c3_410, %c9_411] : memref<12x24xf32, #tpu.memory_space<vmem>>, vector<3x1xf32>
    tpu.vector_store %arg11[%c3_410, %c9_411], %517 {strides = array<i32>} : memref<12x24xf32, #tpu.memory_space<vmem>>, vector<3x1xf32>,
    %c6_412 = arith.constant 6 : index
    %c9_413 = arith.constant 9 : index
    %519 = vector.load %arg2[%c6_412, %c9_413] : memref<9x24xf32, #tpu.memory_space<vmem>>, vector<1x1xf32>
    %520 = vector.broadcast %519 : vector<1x1xf32> to vector<3x1xf32>
    %521 = arith.mulf %492, %520 : vector<3x1xf32>
    %c7_414 = arith.constant 7 : index
    %c9_415 = arith.constant 9 : index
    %522 = vector.load %arg2[%c7_414, %c9_415] : memref<9x24xf32, #tpu.memory_space<vmem>>, vector<1x1xf32>
    %523 = vector.broadcast %522 : vector<1x1xf32> to vector<3x1xf32>
    %524 = arith.mulf %493, %523 : vector<3x1xf32>
    %525 = arith.addf %521, %524 : vector<3x1xf32>
    %c8_416 = arith.constant 8 : index
    %c9_417 = arith.constant 9 : index
    %526 = vector.load %arg2[%c8_416, %c9_417] : memref<9x24xf32, #tpu.memory_space<vmem>>, vector<1x1xf32>
    %527 = vector.broadcast %526 : vector<1x1xf32> to vector<3x1xf32>
    %528 = arith.mulf %494, %527 : vector<3x1xf32>
    %529 = arith.addf %525, %528 : vector<3x1xf32>
    %c6_418 = arith.constant 6 : index
    %c9_419 = arith.constant 9 : index
    %530 = vector.load %arg11[%c6_418, %c9_419] : memref<12x24xf32, #tpu.memory_space<vmem>>, vector<3x1xf32>
    tpu.vector_store %arg11[%c6_418, %c9_419], %529 {strides = array<i32>} : memref<12x24xf32, #tpu.memory_space<vmem>>, vector<3x1xf32>,
    %c0_420 = arith.constant 0 : index
    %c9_421 = arith.constant 9 : index
    %531 = vector.load %arg10[%c0_420, %c9_421] : memref<3x24xf32, #tpu.memory_space<vmem>>, vector<1x1xf32>
    %c0_422 = arith.constant 0 : index
    %c6_423 = arith.constant 6 : index
    %532 = vector.load %arg10[%c0_422, %c6_423] : memref<3x24xf32, #tpu.memory_space<vmem>>, vector<1x1xf32>
    %533 = arith.subf %531, %532 : vector<1x1xf32>
    %c1_424 = arith.constant 1 : index
    %c9_425 = arith.constant 9 : index
    %534 = vector.load %arg10[%c1_424, %c9_425] : memref<3x24xf32, #tpu.memory_space<vmem>>, vector<1x1xf32>
    %c1_426 = arith.constant 1 : index
    %c6_427 = arith.constant 6 : index
    %535 = vector.load %arg10[%c1_426, %c6_427] : memref<3x24xf32, #tpu.memory_space<vmem>>, vector<1x1xf32>
    %536 = arith.subf %534, %535 : vector<1x1xf32>
    %c2_428 = arith.constant 2 : index
    %c9_429 = arith.constant 9 : index
    %537 = vector.load %arg10[%c2_428, %c9_429] : memref<3x24xf32, #tpu.memory_space<vmem>>, vector<1x1xf32>
    %c2_430 = arith.constant 2 : index
    %c6_431 = arith.constant 6 : index
    %538 = vector.load %arg10[%c2_430, %c6_431] : memref<3x24xf32, #tpu.memory_space<vmem>>, vector<1x1xf32>
    %539 = arith.subf %537, %538 : vector<1x1xf32>
    %540 = vector.broadcast %533 : vector<1x1xf32> to vector<3x1xf32>
    %541 = arith.mulf %492, %540 : vector<3x1xf32>
    %542 = vector.broadcast %536 : vector<1x1xf32> to vector<3x1xf32>
    %543 = arith.mulf %493, %542 : vector<3x1xf32>
    %544 = arith.addf %541, %543 : vector<3x1xf32>
    %545 = vector.broadcast %539 : vector<1x1xf32> to vector<3x1xf32>
    %546 = arith.mulf %494, %545 : vector<3x1xf32>
    %547 = arith.addf %544, %546 : vector<3x1xf32>
    %c9_432 = arith.constant 9 : index
    %c6_433 = arith.constant 6 : index
    %548 = vector.load %arg11[%c9_432, %c6_433] : memref<12x24xf32, #tpu.memory_space<vmem>>, vector<3x1xf32>
    %549 = arith.addf %547, %548 : vector<3x1xf32>
    %c9_434 = arith.constant 9 : index
    %c9_435 = arith.constant 9 : index
    %550 = vector.load %arg11[%c9_434, %c9_435] : memref<12x24xf32, #tpu.memory_space<vmem>>, vector<3x1xf32>
    tpu.vector_store %arg11[%c9_434, %c9_435], %549 {strides = array<i32>} : memref<12x24xf32, #tpu.memory_space<vmem>>, vector<3x1xf32>,
    %c0_436 = arith.constant 0 : index
    %c7_437 = arith.constant 7 : index
    %551 = vector.load %arg11[%c0_436, %c7_437] : memref<12x24xf32, #tpu.memory_space<vmem>>, vector<3x1xf32>
    %c3_438 = arith.constant 3 : index
    %c7_439 = arith.constant 7 : index
    %552 = vector.load %arg11[%c3_438, %c7_439] : memref<12x24xf32, #tpu.memory_space<vmem>>, vector<3x1xf32>
    %c6_440 = arith.constant 6 : index
    %c7_441 = arith.constant 7 : index
    %553 = vector.load %arg11[%c6_440, %c7_441] : memref<12x24xf32, #tpu.memory_space<vmem>>, vector<3x1xf32>
    %c0_442 = arith.constant 0 : index
    %c10 = arith.constant 10 : index
    %554 = vector.load %arg2[%c0_442, %c10] : memref<9x24xf32, #tpu.memory_space<vmem>>, vector<1x1xf32>
    %555 = vector.broadcast %554 : vector<1x1xf32> to vector<3x1xf32>
    %556 = arith.mulf %551, %555 : vector<3x1xf32>
    %c1_443 = arith.constant 1 : index
    %c10_444 = arith.constant 10 : index
    %557 = vector.load %arg2[%c1_443, %c10_444] : memref<9x24xf32, #tpu.memory_space<vmem>>, vector<1x1xf32>
    %558 = vector.broadcast %557 : vector<1x1xf32> to vector<3x1xf32>
    %559 = arith.mulf %552, %558 : vector<3x1xf32>
    %560 = arith.addf %556, %559 : vector<3x1xf32>
    %c2_445 = arith.constant 2 : index
    %c10_446 = arith.constant 10 : index
    %561 = vector.load %arg2[%c2_445, %c10_446] : memref<9x24xf32, #tpu.memory_space<vmem>>, vector<1x1xf32>
    %562 = vector.broadcast %561 : vector<1x1xf32> to vector<3x1xf32>
    %563 = arith.mulf %553, %562 : vector<3x1xf32>
    %564 = arith.addf %560, %563 : vector<3x1xf32>
    %c0_447 = arith.constant 0 : index
    %c10_448 = arith.constant 10 : index
    %565 = vector.load %arg11[%c0_447, %c10_448] : memref<12x24xf32, #tpu.memory_space<vmem>>, vector<3x1xf32>
    tpu.vector_store %arg11[%c0_447, %c10_448], %564 {strides = array<i32>} : memref<12x24xf32, #tpu.memory_space<vmem>>, vector<3x1xf32>,
    %c3_449 = arith.constant 3 : index
    %c10_450 = arith.constant 10 : index
    %566 = vector.load %arg2[%c3_449, %c10_450] : memref<9x24xf32, #tpu.memory_space<vmem>>, vector<1x1xf32>
    %567 = vector.broadcast %566 : vector<1x1xf32> to vector<3x1xf32>
    %568 = arith.mulf %551, %567 : vector<3x1xf32>
    %c4_451 = arith.constant 4 : index
    %c10_452 = arith.constant 10 : index
    %569 = vector.load %arg2[%c4_451, %c10_452] : memref<9x24xf32, #tpu.memory_space<vmem>>, vector<1x1xf32>
    %570 = vector.broadcast %569 : vector<1x1xf32> to vector<3x1xf32>
    %571 = arith.mulf %552, %570 : vector<3x1xf32>
    %572 = arith.addf %568, %571 : vector<3x1xf32>
    %c5_453 = arith.constant 5 : index
    %c10_454 = arith.constant 10 : index
    %573 = vector.load %arg2[%c5_453, %c10_454] : memref<9x24xf32, #tpu.memory_space<vmem>>, vector<1x1xf32>
    %574 = vector.broadcast %573 : vector<1x1xf32> to vector<3x1xf32>
    %575 = arith.mulf %553, %574 : vector<3x1xf32>
    %576 = arith.addf %572, %575 : vector<3x1xf32>
    %c3_455 = arith.constant 3 : index
    %c10_456 = arith.constant 10 : index
    %577 = vector.load %arg11[%c3_455, %c10_456] : memref<12x24xf32, #tpu.memory_space<vmem>>, vector<3x1xf32>
    tpu.vector_store %arg11[%c3_455, %c10_456], %576 {strides = array<i32>} : memref<12x24xf32, #tpu.memory_space<vmem>>, vector<3x1xf32>,
    %c6_457 = arith.constant 6 : index
    %c10_458 = arith.constant 10 : index
    %578 = vector.load %arg2[%c6_457, %c10_458] : memref<9x24xf32, #tpu.memory_space<vmem>>, vector<1x1xf32>
    %579 = vector.broadcast %578 : vector<1x1xf32> to vector<3x1xf32>
    %580 = arith.mulf %551, %579 : vector<3x1xf32>
    %c7_459 = arith.constant 7 : index
    %c10_460 = arith.constant 10 : index
    %581 = vector.load %arg2[%c7_459, %c10_460] : memref<9x24xf32, #tpu.memory_space<vmem>>, vector<1x1xf32>
    %582 = vector.broadcast %581 : vector<1x1xf32> to vector<3x1xf32>
    %583 = arith.mulf %552, %582 : vector<3x1xf32>
    %584 = arith.addf %580, %583 : vector<3x1xf32>
    %c8_461 = arith.constant 8 : index
    %c10_462 = arith.constant 10 : index
    %585 = vector.load %arg2[%c8_461, %c10_462] : memref<9x24xf32, #tpu.memory_space<vmem>>, vector<1x1xf32>
    %586 = vector.broadcast %585 : vector<1x1xf32> to vector<3x1xf32>
    %587 = arith.mulf %553, %586 : vector<3x1xf32>
    %588 = arith.addf %584, %587 : vector<3x1xf32>
    %c6_463 = arith.constant 6 : index
    %c10_464 = arith.constant 10 : index
    %589 = vector.load %arg11[%c6_463, %c10_464] : memref<12x24xf32, #tpu.memory_space<vmem>>, vector<3x1xf32>
    tpu.vector_store %arg11[%c6_463, %c10_464], %588 {strides = array<i32>} : memref<12x24xf32, #tpu.memory_space<vmem>>, vector<3x1xf32>,
    %c0_465 = arith.constant 0 : index
    %c10_466 = arith.constant 10 : index
    %590 = vector.load %arg10[%c0_465, %c10_466] : memref<3x24xf32, #tpu.memory_space<vmem>>, vector<1x1xf32>
    %c0_467 = arith.constant 0 : index
    %c7_468 = arith.constant 7 : index
    %591 = vector.load %arg10[%c0_467, %c7_468] : memref<3x24xf32, #tpu.memory_space<vmem>>, vector<1x1xf32>
    %592 = arith.subf %590, %591 : vector<1x1xf32>
    %c1_469 = arith.constant 1 : index
    %c10_470 = arith.constant 10 : index
    %593 = vector.load %arg10[%c1_469, %c10_470] : memref<3x24xf32, #tpu.memory_space<vmem>>, vector<1x1xf32>
    %c1_471 = arith.constant 1 : index
    %c7_472 = arith.constant 7 : index
    %594 = vector.load %arg10[%c1_471, %c7_472] : memref<3x24xf32, #tpu.memory_space<vmem>>, vector<1x1xf32>
    %595 = arith.subf %593, %594 : vector<1x1xf32>
    %c2_473 = arith.constant 2 : index
    %c10_474 = arith.constant 10 : index
    %596 = vector.load %arg10[%c2_473, %c10_474] : memref<3x24xf32, #tpu.memory_space<vmem>>, vector<1x1xf32>
    %c2_475 = arith.constant 2 : index
    %c7_476 = arith.constant 7 : index
    %597 = vector.load %arg10[%c2_475, %c7_476] : memref<3x24xf32, #tpu.memory_space<vmem>>, vector<1x1xf32>
    %598 = arith.subf %596, %597 : vector<1x1xf32>
    %599 = vector.broadcast %592 : vector<1x1xf32> to vector<3x1xf32>
    %600 = arith.mulf %551, %599 : vector<3x1xf32>
    %601 = vector.broadcast %595 : vector<1x1xf32> to vector<3x1xf32>
    %602 = arith.mulf %552, %601 : vector<3x1xf32>
    %603 = arith.addf %600, %602 : vector<3x1xf32>
    %604 = vector.broadcast %598 : vector<1x1xf32> to vector<3x1xf32>
    %605 = arith.mulf %553, %604 : vector<3x1xf32>
    %606 = arith.addf %603, %605 : vector<3x1xf32>
    %c9_477 = arith.constant 9 : index
    %c7_478 = arith.constant 7 : index
    %607 = vector.load %arg11[%c9_477, %c7_478] : memref<12x24xf32, #tpu.memory_space<vmem>>, vector<3x1xf32>
    %608 = arith.addf %606, %607 : vector<3x1xf32>
    %c9_479 = arith.constant 9 : index
    %c10_480 = arith.constant 10 : index
    %609 = vector.load %arg11[%c9_479, %c10_480] : memref<12x24xf32, #tpu.memory_space<vmem>>, vector<3x1xf32>
    tpu.vector_store %arg11[%c9_479, %c10_480], %608 {strides = array<i32>} : memref<12x24xf32, #tpu.memory_space<vmem>>, vector<3x1xf32>,
    %c0_481 = arith.constant 0 : index
    %c8_482 = arith.constant 8 : index
    %610 = vector.load %arg11[%c0_481, %c8_482] : memref<12x24xf32, #tpu.memory_space<vmem>>, vector<3x1xf32>
    %c3_483 = arith.constant 3 : index
    %c8_484 = arith.constant 8 : index
    %611 = vector.load %arg11[%c3_483, %c8_484] : memref<12x24xf32, #tpu.memory_space<vmem>>, vector<3x1xf32>
    %c6_485 = arith.constant 6 : index
    %c8_486 = arith.constant 8 : index
    %612 = vector.load %arg11[%c6_485, %c8_486] : memref<12x24xf32, #tpu.memory_space<vmem>>, vector<3x1xf32>
    %c0_487 = arith.constant 0 : index
    %c11 = arith.constant 11 : index
    %613 = vector.load %arg2[%c0_487, %c11] : memref<9x24xf32, #tpu.memory_space<vmem>>, vector<1x1xf32>
    %614 = vector.broadcast %613 : vector<1x1xf32> to vector<3x1xf32>
    %615 = arith.mulf %610, %614 : vector<3x1xf32>
    %c1_488 = arith.constant 1 : index
    %c11_489 = arith.constant 11 : index
    %616 = vector.load %arg2[%c1_488, %c11_489] : memref<9x24xf32, #tpu.memory_space<vmem>>, vector<1x1xf32>
    %617 = vector.broadcast %616 : vector<1x1xf32> to vector<3x1xf32>
    %618 = arith.mulf %611, %617 : vector<3x1xf32>
    %619 = arith.addf %615, %618 : vector<3x1xf32>
    %c2_490 = arith.constant 2 : index
    %c11_491 = arith.constant 11 : index
    %620 = vector.load %arg2[%c2_490, %c11_491] : memref<9x24xf32, #tpu.memory_space<vmem>>, vector<1x1xf32>
    %621 = vector.broadcast %620 : vector<1x1xf32> to vector<3x1xf32>
    %622 = arith.mulf %612, %621 : vector<3x1xf32>
    %623 = arith.addf %619, %622 : vector<3x1xf32>
    %c0_492 = arith.constant 0 : index
    %c11_493 = arith.constant 11 : index
    %624 = vector.load %arg11[%c0_492, %c11_493] : memref<12x24xf32, #tpu.memory_space<vmem>>, vector<3x1xf32>
    tpu.vector_store %arg11[%c0_492, %c11_493], %623 {strides = array<i32>} : memref<12x24xf32, #tpu.memory_space<vmem>>, vector<3x1xf32>,
    %c3_494 = arith.constant 3 : index
    %c11_495 = arith.constant 11 : index
    %625 = vector.load %arg2[%c3_494, %c11_495] : memref<9x24xf32, #tpu.memory_space<vmem>>, vector<1x1xf32>
    %626 = vector.broadcast %625 : vector<1x1xf32> to vector<3x1xf32>
    %627 = arith.mulf %610, %626 : vector<3x1xf32>
    %c4_496 = arith.constant 4 : index
    %c11_497 = arith.constant 11 : index
    %628 = vector.load %arg2[%c4_496, %c11_497] : memref<9x24xf32, #tpu.memory_space<vmem>>, vector<1x1xf32>
    %629 = vector.broadcast %628 : vector<1x1xf32> to vector<3x1xf32>
    %630 = arith.mulf %611, %629 : vector<3x1xf32>
    %631 = arith.addf %627, %630 : vector<3x1xf32>
    %c5_498 = arith.constant 5 : index
    %c11_499 = arith.constant 11 : index
    %632 = vector.load %arg2[%c5_498, %c11_499] : memref<9x24xf32, #tpu.memory_space<vmem>>, vector<1x1xf32>
    %633 = vector.broadcast %632 : vector<1x1xf32> to vector<3x1xf32>
    %634 = arith.mulf %612, %633 : vector<3x1xf32>
    %635 = arith.addf %631, %634 : vector<3x1xf32>
    %c3_500 = arith.constant 3 : index
    %c11_501 = arith.constant 11 : index
    %636 = vector.load %arg11[%c3_500, %c11_501] : memref<12x24xf32, #tpu.memory_space<vmem>>, vector<3x1xf32>
    tpu.vector_store %arg11[%c3_500, %c11_501], %635 {strides = array<i32>} : memref<12x24xf32, #tpu.memory_space<vmem>>, vector<3x1xf32>,
    %c6_502 = arith.constant 6 : index
    %c11_503 = arith.constant 11 : index
    %637 = vector.load %arg2[%c6_502, %c11_503] : memref<9x24xf32, #tpu.memory_space<vmem>>, vector<1x1xf32>
    %638 = vector.broadcast %637 : vector<1x1xf32> to vector<3x1xf32>
    %639 = arith.mulf %610, %638 : vector<3x1xf32>
    %c7_504 = arith.constant 7 : index
    %c11_505 = arith.constant 11 : index
    %640 = vector.load %arg2[%c7_504, %c11_505] : memref<9x24xf32, #tpu.memory_space<vmem>>, vector<1x1xf32>
    %641 = vector.broadcast %640 : vector<1x1xf32> to vector<3x1xf32>
    %642 = arith.mulf %611, %641 : vector<3x1xf32>
    %643 = arith.addf %639, %642 : vector<3x1xf32>
    %c8_506 = arith.constant 8 : index
    %c11_507 = arith.constant 11 : index
    %644 = vector.load %arg2[%c8_506, %c11_507] : memref<9x24xf32, #tpu.memory_space<vmem>>, vector<1x1xf32>
    %645 = vector.broadcast %644 : vector<1x1xf32> to vector<3x1xf32>
    %646 = arith.mulf %612, %645 : vector<3x1xf32>
    %647 = arith.addf %643, %646 : vector<3x1xf32>
    %c6_508 = arith.constant 6 : index
    %c11_509 = arith.constant 11 : index
    %648 = vector.load %arg11[%c6_508, %c11_509] : memref<12x24xf32, #tpu.memory_space<vmem>>, vector<3x1xf32>
    tpu.vector_store %arg11[%c6_508, %c11_509], %647 {strides = array<i32>} : memref<12x24xf32, #tpu.memory_space<vmem>>, vector<3x1xf32>,
    %c0_510 = arith.constant 0 : index
    %c11_511 = arith.constant 11 : index
    %649 = vector.load %arg10[%c0_510, %c11_511] : memref<3x24xf32, #tpu.memory_space<vmem>>, vector<1x1xf32>
    %c0_512 = arith.constant 0 : index
    %c8_513 = arith.constant 8 : index
    %650 = vector.load %arg10[%c0_512, %c8_513] : memref<3x24xf32, #tpu.memory_space<vmem>>, vector<1x1xf32>
    %651 = arith.subf %649, %650 : vector<1x1xf32>
    %c1_514 = arith.constant 1 : index
    %c11_515 = arith.constant 11 : index
    %652 = vector.load %arg10[%c1_514, %c11_515] : memref<3x24xf32, #tpu.memory_space<vmem>>, vector<1x1xf32>
    %c1_516 = arith.constant 1 : index
    %c8_517 = arith.constant 8 : index
    %653 = vector.load %arg10[%c1_516, %c8_517] : memref<3x24xf32, #tpu.memory_space<vmem>>, vector<1x1xf32>
    %654 = arith.subf %652, %653 : vector<1x1xf32>
    %c2_518 = arith.constant 2 : index
    %c11_519 = arith.constant 11 : index
    %655 = vector.load %arg10[%c2_518, %c11_519] : memref<3x24xf32, #tpu.memory_space<vmem>>, vector<1x1xf32>
    %c2_520 = arith.constant 2 : index
    %c8_521 = arith.constant 8 : index
    %656 = vector.load %arg10[%c2_520, %c8_521] : memref<3x24xf32, #tpu.memory_space<vmem>>, vector<1x1xf32>
    %657 = arith.subf %655, %656 : vector<1x1xf32>
    %658 = vector.broadcast %651 : vector<1x1xf32> to vector<3x1xf32>
    %659 = arith.mulf %610, %658 : vector<3x1xf32>
    %660 = vector.broadcast %654 : vector<1x1xf32> to vector<3x1xf32>
    %661 = arith.mulf %611, %660 : vector<3x1xf32>
    %662 = arith.addf %659, %661 : vector<3x1xf32>
    %663 = vector.broadcast %657 : vector<1x1xf32> to vector<3x1xf32>
    %664 = arith.mulf %612, %663 : vector<3x1xf32>
    %665 = arith.addf %662, %664 : vector<3x1xf32>
    %c9_522 = arith.constant 9 : index
    %c8_523 = arith.constant 8 : index
    %666 = vector.load %arg11[%c9_522, %c8_523] : memref<12x24xf32, #tpu.memory_space<vmem>>, vector<3x1xf32>
    %667 = arith.addf %665, %666 : vector<3x1xf32>
    %c9_524 = arith.constant 9 : index
    %c11_525 = arith.constant 11 : index
    %668 = vector.load %arg11[%c9_524, %c11_525] : memref<12x24xf32, #tpu.memory_space<vmem>>, vector<3x1xf32>
    tpu.vector_store %arg11[%c9_524, %c11_525], %667 {strides = array<i32>} : memref<12x24xf32, #tpu.memory_space<vmem>>, vector<3x1xf32>,
    %c0_526 = arith.constant 0 : index
    %c9_527 = arith.constant 9 : index
    %669 = vector.load %arg11[%c0_526, %c9_527] : memref<12x24xf32, #tpu.memory_space<vmem>>, vector<3x1xf32>
    %c3_528 = arith.constant 3 : index
    %c9_529 = arith.constant 9 : index
    %670 = vector.load %arg11[%c3_528, %c9_529] : memref<12x24xf32, #tpu.memory_space<vmem>>, vector<3x1xf32>
    %c6_530 = arith.constant 6 : index
    %c9_531 = arith.constant 9 : index
    %671 = vector.load %arg11[%c6_530, %c9_531] : memref<12x24xf32, #tpu.memory_space<vmem>>, vector<3x1xf32>
    %c0_532 = arith.constant 0 : index
    %c12 = arith.constant 12 : index
    %672 = vector.load %arg2[%c0_532, %c12] : memref<9x24xf32, #tpu.memory_space<vmem>>, vector<1x1xf32>
    %673 = vector.broadcast %672 : vector<1x1xf32> to vector<3x1xf32>
    %674 = arith.mulf %669, %673 : vector<3x1xf32>
    %c1_533 = arith.constant 1 : index
    %c12_534 = arith.constant 12 : index
    %675 = vector.load %arg2[%c1_533, %c12_534] : memref<9x24xf32, #tpu.memory_space<vmem>>, vector<1x1xf32>
    %676 = vector.broadcast %675 : vector<1x1xf32> to vector<3x1xf32>
    %677 = arith.mulf %670, %676 : vector<3x1xf32>
    %678 = arith.addf %674, %677 : vector<3x1xf32>
    %c2_535 = arith.constant 2 : index
    %c12_536 = arith.constant 12 : index
    %679 = vector.load %arg2[%c2_535, %c12_536] : memref<9x24xf32, #tpu.memory_space<vmem>>, vector<1x1xf32>
    %680 = vector.broadcast %679 : vector<1x1xf32> to vector<3x1xf32>
    %681 = arith.mulf %671, %680 : vector<3x1xf32>
    %682 = arith.addf %678, %681 : vector<3x1xf32>
    %c0_537 = arith.constant 0 : index
    %c12_538 = arith.constant 12 : index
    %683 = vector.load %arg11[%c0_537, %c12_538] : memref<12x24xf32, #tpu.memory_space<vmem>>, vector<3x1xf32>
    tpu.vector_store %arg11[%c0_537, %c12_538], %682 {strides = array<i32>} : memref<12x24xf32, #tpu.memory_space<vmem>>, vector<3x1xf32>,
    %c3_539 = arith.constant 3 : index
    %c12_540 = arith.constant 12 : index
    %684 = vector.load %arg2[%c3_539, %c12_540] : memref<9x24xf32, #tpu.memory_space<vmem>>, vector<1x1xf32>
    %685 = vector.broadcast %684 : vector<1x1xf32> to vector<3x1xf32>
    %686 = arith.mulf %669, %685 : vector<3x1xf32>
    %c4_541 = arith.constant 4 : index
    %c12_542 = arith.constant 12 : index
    %687 = vector.load %arg2[%c4_541, %c12_542] : memref<9x24xf32, #tpu.memory_space<vmem>>, vector<1x1xf32>
    %688 = vector.broadcast %687 : vector<1x1xf32> to vector<3x1xf32>
    %689 = arith.mulf %670, %688 : vector<3x1xf32>
    %690 = arith.addf %686, %689 : vector<3x1xf32>
    %c5_543 = arith.constant 5 : index
    %c12_544 = arith.constant 12 : index
    %691 = vector.load %arg2[%c5_543, %c12_544] : memref<9x24xf32, #tpu.memory_space<vmem>>, vector<1x1xf32>
    %692 = vector.broadcast %691 : vector<1x1xf32> to vector<3x1xf32>
    %693 = arith.mulf %671, %692 : vector<3x1xf32>
    %694 = arith.addf %690, %693 : vector<3x1xf32>
    %c3_545 = arith.constant 3 : index
    %c12_546 = arith.constant 12 : index
    %695 = vector.load %arg11[%c3_545, %c12_546] : memref<12x24xf32, #tpu.memory_space<vmem>>, vector<3x1xf32>
    tpu.vector_store %arg11[%c3_545, %c12_546], %694 {strides = array<i32>} : memref<12x24xf32, #tpu.memory_space<vmem>>, vector<3x1xf32>,
    %c6_547 = arith.constant 6 : index
    %c12_548 = arith.constant 12 : index
    %696 = vector.load %arg2[%c6_547, %c12_548] : memref<9x24xf32, #tpu.memory_space<vmem>>, vector<1x1xf32>
    %697 = vector.broadcast %696 : vector<1x1xf32> to vector<3x1xf32>
    %698 = arith.mulf %669, %697 : vector<3x1xf32>
    %c7_549 = arith.constant 7 : index
    %c12_550 = arith.constant 12 : index
    %699 = vector.load %arg2[%c7_549, %c12_550] : memref<9x24xf32, #tpu.memory_space<vmem>>, vector<1x1xf32>
    %700 = vector.broadcast %699 : vector<1x1xf32> to vector<3x1xf32>
    %701 = arith.mulf %670, %700 : vector<3x1xf32>
    %702 = arith.addf %698, %701 : vector<3x1xf32>
    %c8_551 = arith.constant 8 : index
    %c12_552 = arith.constant 12 : index
    %703 = vector.load %arg2[%c8_551, %c12_552] : memref<9x24xf32, #tpu.memory_space<vmem>>, vector<1x1xf32>
    %704 = vector.broadcast %703 : vector<1x1xf32> to vector<3x1xf32>
    %705 = arith.mulf %671, %704 : vector<3x1xf32>
    %706 = arith.addf %702, %705 : vector<3x1xf32>
    %c6_553 = arith.constant 6 : index
    %c12_554 = arith.constant 12 : index
    %707 = vector.load %arg11[%c6_553, %c12_554] : memref<12x24xf32, #tpu.memory_space<vmem>>, vector<3x1xf32>
    tpu.vector_store %arg11[%c6_553, %c12_554], %706 {strides = array<i32>} : memref<12x24xf32, #tpu.memory_space<vmem>>, vector<3x1xf32>,
    %c0_555 = arith.constant 0 : index
    %c12_556 = arith.constant 12 : index
    %708 = vector.load %arg10[%c0_555, %c12_556] : memref<3x24xf32, #tpu.memory_space<vmem>>, vector<1x1xf32>
    %c0_557 = arith.constant 0 : index
    %c9_558 = arith.constant 9 : index
    %709 = vector.load %arg10[%c0_557, %c9_558] : memref<3x24xf32, #tpu.memory_space<vmem>>, vector<1x1xf32>
    %710 = arith.subf %708, %709 : vector<1x1xf32>
    %c1_559 = arith.constant 1 : index
    %c12_560 = arith.constant 12 : index
    %711 = vector.load %arg10[%c1_559, %c12_560] : memref<3x24xf32, #tpu.memory_space<vmem>>, vector<1x1xf32>
    %c1_561 = arith.constant 1 : index
    %c9_562 = arith.constant 9 : index
    %712 = vector.load %arg10[%c1_561, %c9_562] : memref<3x24xf32, #tpu.memory_space<vmem>>, vector<1x1xf32>
    %713 = arith.subf %711, %712 : vector<1x1xf32>
    %c2_563 = arith.constant 2 : index
    %c12_564 = arith.constant 12 : index
    %714 = vector.load %arg10[%c2_563, %c12_564] : memref<3x24xf32, #tpu.memory_space<vmem>>, vector<1x1xf32>
    %c2_565 = arith.constant 2 : index
    %c9_566 = arith.constant 9 : index
    %715 = vector.load %arg10[%c2_565, %c9_566] : memref<3x24xf32, #tpu.memory_space<vmem>>, vector<1x1xf32>
    %716 = arith.subf %714, %715 : vector<1x1xf32>
    %717 = vector.broadcast %710 : vector<1x1xf32> to vector<3x1xf32>
    %718 = arith.mulf %669, %717 : vector<3x1xf32>
    %719 = vector.broadcast %713 : vector<1x1xf32> to vector<3x1xf32>
    %720 = arith.mulf %670, %719 : vector<3x1xf32>
    %721 = arith.addf %718, %720 : vector<3x1xf32>
    %722 = vector.broadcast %716 : vector<1x1xf32> to vector<3x1xf32>
    %723 = arith.mulf %671, %722 : vector<3x1xf32>
    %724 = arith.addf %721, %723 : vector<3x1xf32>
    %c9_567 = arith.constant 9 : index
    %c9_568 = arith.constant 9 : index
    %725 = vector.load %arg11[%c9_567, %c9_568] : memref<12x24xf32, #tpu.memory_space<vmem>>, vector<3x1xf32>
    %726 = arith.addf %724, %725 : vector<3x1xf32>
    %c9_569 = arith.constant 9 : index
    %c12_570 = arith.constant 12 : index
    %727 = vector.load %arg11[%c9_569, %c12_570] : memref<12x24xf32, #tpu.memory_space<vmem>>, vector<3x1xf32>
    tpu.vector_store %arg11[%c9_569, %c12_570], %726 {strides = array<i32>} : memref<12x24xf32, #tpu.memory_space<vmem>>, vector<3x1xf32>,
    %c0_571 = arith.constant 0 : index
    %c9_572 = arith.constant 9 : index
    %728 = vector.load %arg11[%c0_571, %c9_572] : memref<12x24xf32, #tpu.memory_space<vmem>>, vector<3x1xf32>
    %c3_573 = arith.constant 3 : index
    %c9_574 = arith.constant 9 : index
    %729 = vector.load %arg11[%c3_573, %c9_574] : memref<12x24xf32, #tpu.memory_space<vmem>>, vector<3x1xf32>
    %c6_575 = arith.constant 6 : index
    %c9_576 = arith.constant 9 : index
    %730 = vector.load %arg11[%c6_575, %c9_576] : memref<12x24xf32, #tpu.memory_space<vmem>>, vector<3x1xf32>
    %c0_577 = arith.constant 0 : index
    %c13 = arith.constant 13 : index
    %731 = vector.load %arg2[%c0_577, %c13] : memref<9x24xf32, #tpu.memory_space<vmem>>, vector<1x1xf32>
    %732 = vector.broadcast %731 : vector<1x1xf32> to vector<3x1xf32>
    %733 = arith.mulf %728, %732 : vector<3x1xf32>
    %c1_578 = arith.constant 1 : index
    %c13_579 = arith.constant 13 : index
    %734 = vector.load %arg2[%c1_578, %c13_579] : memref<9x24xf32, #tpu.memory_space<vmem>>, vector<1x1xf32>
    %735 = vector.broadcast %734 : vector<1x1xf32> to vector<3x1xf32>
    %736 = arith.mulf %729, %735 : vector<3x1xf32>
    %737 = arith.addf %733, %736 : vector<3x1xf32>
    %c2_580 = arith.constant 2 : index
    %c13_581 = arith.constant 13 : index
    %738 = vector.load %arg2[%c2_580, %c13_581] : memref<9x24xf32, #tpu.memory_space<vmem>>, vector<1x1xf32>
    %739 = vector.broadcast %738 : vector<1x1xf32> to vector<3x1xf32>
    %740 = arith.mulf %730, %739 : vector<3x1xf32>
    %741 = arith.addf %737, %740 : vector<3x1xf32>
    %c0_582 = arith.constant 0 : index
    %c13_583 = arith.constant 13 : index
    %742 = vector.load %arg11[%c0_582, %c13_583] : memref<12x24xf32, #tpu.memory_space<vmem>>, vector<3x1xf32>
    tpu.vector_store %arg11[%c0_582, %c13_583], %741 {strides = array<i32>} : memref<12x24xf32, #tpu.memory_space<vmem>>, vector<3x1xf32>,
    %c3_584 = arith.constant 3 : index
    %c13_585 = arith.constant 13 : index
    %743 = vector.load %arg2[%c3_584, %c13_585] : memref<9x24xf32, #tpu.memory_space<vmem>>, vector<1x1xf32>
    %744 = vector.broadcast %743 : vector<1x1xf32> to vector<3x1xf32>
    %745 = arith.mulf %728, %744 : vector<3x1xf32>
    %c4_586 = arith.constant 4 : index
    %c13_587 = arith.constant 13 : index
    %746 = vector.load %arg2[%c4_586, %c13_587] : memref<9x24xf32, #tpu.memory_space<vmem>>, vector<1x1xf32>
    %747 = vector.broadcast %746 : vector<1x1xf32> to vector<3x1xf32>
    %748 = arith.mulf %729, %747 : vector<3x1xf32>
    %749 = arith.addf %745, %748 : vector<3x1xf32>
    %c5_588 = arith.constant 5 : index
    %c13_589 = arith.constant 13 : index
    %750 = vector.load %arg2[%c5_588, %c13_589] : memref<9x24xf32, #tpu.memory_space<vmem>>, vector<1x1xf32>
    %751 = vector.broadcast %750 : vector<1x1xf32> to vector<3x1xf32>
    %752 = arith.mulf %730, %751 : vector<3x1xf32>
    %753 = arith.addf %749, %752 : vector<3x1xf32>
    %c3_590 = arith.constant 3 : index
    %c13_591 = arith.constant 13 : index
    %754 = vector.load %arg11[%c3_590, %c13_591] : memref<12x24xf32, #tpu.memory_space<vmem>>, vector<3x1xf32>
    tpu.vector_store %arg11[%c3_590, %c13_591], %753 {strides = array<i32>} : memref<12x24xf32, #tpu.memory_space<vmem>>, vector<3x1xf32>,
    %c6_592 = arith.constant 6 : index
    %c13_593 = arith.constant 13 : index
    %755 = vector.load %arg2[%c6_592, %c13_593] : memref<9x24xf32, #tpu.memory_space<vmem>>, vector<1x1xf32>
    %756 = vector.broadcast %755 : vector<1x1xf32> to vector<3x1xf32>
    %757 = arith.mulf %728, %756 : vector<3x1xf32>
    %c7_594 = arith.constant 7 : index
    %c13_595 = arith.constant 13 : index
    %758 = vector.load %arg2[%c7_594, %c13_595] : memref<9x24xf32, #tpu.memory_space<vmem>>, vector<1x1xf32>
    %759 = vector.broadcast %758 : vector<1x1xf32> to vector<3x1xf32>
    %760 = arith.mulf %729, %759 : vector<3x1xf32>
    %761 = arith.addf %757, %760 : vector<3x1xf32>
    %c8_596 = arith.constant 8 : index
    %c13_597 = arith.constant 13 : index
    %762 = vector.load %arg2[%c8_596, %c13_597] : memref<9x24xf32, #tpu.memory_space<vmem>>, vector<1x1xf32>
    %763 = vector.broadcast %762 : vector<1x1xf32> to vector<3x1xf32>
    %764 = arith.mulf %730, %763 : vector<3x1xf32>
    %765 = arith.addf %761, %764 : vector<3x1xf32>
    %c6_598 = arith.constant 6 : index
    %c13_599 = arith.constant 13 : index
    %766 = vector.load %arg11[%c6_598, %c13_599] : memref<12x24xf32, #tpu.memory_space<vmem>>, vector<3x1xf32>
    tpu.vector_store %arg11[%c6_598, %c13_599], %765 {strides = array<i32>} : memref<12x24xf32, #tpu.memory_space<vmem>>, vector<3x1xf32>,
    %c0_600 = arith.constant 0 : index
    %c13_601 = arith.constant 13 : index
    %767 = vector.load %arg10[%c0_600, %c13_601] : memref<3x24xf32, #tpu.memory_space<vmem>>, vector<1x1xf32>
    %c0_602 = arith.constant 0 : index
    %c9_603 = arith.constant 9 : index
    %768 = vector.load %arg10[%c0_602, %c9_603] : memref<3x24xf32, #tpu.memory_space<vmem>>, vector<1x1xf32>
    %769 = arith.subf %767, %768 : vector<1x1xf32>
    %c1_604 = arith.constant 1 : index
    %c13_605 = arith.constant 13 : index
    %770 = vector.load %arg10[%c1_604, %c13_605] : memref<3x24xf32, #tpu.memory_space<vmem>>, vector<1x1xf32>
    %c1_606 = arith.constant 1 : index
    %c9_607 = arith.constant 9 : index
    %771 = vector.load %arg10[%c1_606, %c9_607] : memref<3x24xf32, #tpu.memory_space<vmem>>, vector<1x1xf32>
    %772 = arith.subf %770, %771 : vector<1x1xf32>
    %c2_608 = arith.constant 2 : index
    %c13_609 = arith.constant 13 : index
    %773 = vector.load %arg10[%c2_608, %c13_609] : memref<3x24xf32, #tpu.memory_space<vmem>>, vector<1x1xf32>
    %c2_610 = arith.constant 2 : index
    %c9_611 = arith.constant 9 : index
    %774 = vector.load %arg10[%c2_610, %c9_611] : memref<3x24xf32, #tpu.memory_space<vmem>>, vector<1x1xf32>
    %775 = arith.subf %773, %774 : vector<1x1xf32>
    %776 = vector.broadcast %769 : vector<1x1xf32> to vector<3x1xf32>
    %777 = arith.mulf %728, %776 : vector<3x1xf32>
    %778 = vector.broadcast %772 : vector<1x1xf32> to vector<3x1xf32>
    %779 = arith.mulf %729, %778 : vector<3x1xf32>
    %780 = arith.addf %777, %779 : vector<3x1xf32>
    %781 = vector.broadcast %775 : vector<1x1xf32> to vector<3x1xf32>
    %782 = arith.mulf %730, %781 : vector<3x1xf32>
    %783 = arith.addf %780, %782 : vector<3x1xf32>
    %c9_612 = arith.constant 9 : index
    %c9_613 = arith.constant 9 : index
    %784 = vector.load %arg11[%c9_612, %c9_613] : memref<12x24xf32, #tpu.memory_space<vmem>>, vector<3x1xf32>
    %785 = arith.addf %783, %784 : vector<3x1xf32>
    %c9_614 = arith.constant 9 : index
    %c13_615 = arith.constant 13 : index
    %786 = vector.load %arg11[%c9_614, %c13_615] : memref<12x24xf32, #tpu.memory_space<vmem>>, vector<3x1xf32>
    tpu.vector_store %arg11[%c9_614, %c13_615], %785 {strides = array<i32>} : memref<12x24xf32, #tpu.memory_space<vmem>>, vector<3x1xf32>,
    %c0_616 = arith.constant 0 : index
    %c9_617 = arith.constant 9 : index
    %787 = vector.load %arg11[%c0_616, %c9_617] : memref<12x24xf32, #tpu.memory_space<vmem>>, vector<3x1xf32>
    %c3_618 = arith.constant 3 : index
    %c9_619 = arith.constant 9 : index
    %788 = vector.load %arg11[%c3_618, %c9_619] : memref<12x24xf32, #tpu.memory_space<vmem>>, vector<3x1xf32>
    %c6_620 = arith.constant 6 : index
    %c9_621 = arith.constant 9 : index
    %789 = vector.load %arg11[%c6_620, %c9_621] : memref<12x24xf32, #tpu.memory_space<vmem>>, vector<3x1xf32>
    %c0_622 = arith.constant 0 : index
    %c14 = arith.constant 14 : index
    %790 = vector.load %arg2[%c0_622, %c14] : memref<9x24xf32, #tpu.memory_space<vmem>>, vector<1x1xf32>
    %791 = vector.broadcast %790 : vector<1x1xf32> to vector<3x1xf32>
    %792 = arith.mulf %787, %791 : vector<3x1xf32>
    %c1_623 = arith.constant 1 : index
    %c14_624 = arith.constant 14 : index
    %793 = vector.load %arg2[%c1_623, %c14_624] : memref<9x24xf32, #tpu.memory_space<vmem>>, vector<1x1xf32>
    %794 = vector.broadcast %793 : vector<1x1xf32> to vector<3x1xf32>
    %795 = arith.mulf %788, %794 : vector<3x1xf32>
    %796 = arith.addf %792, %795 : vector<3x1xf32>
    %c2_625 = arith.constant 2 : index
    %c14_626 = arith.constant 14 : index
    %797 = vector.load %arg2[%c2_625, %c14_626] : memref<9x24xf32, #tpu.memory_space<vmem>>, vector<1x1xf32>
    %798 = vector.broadcast %797 : vector<1x1xf32> to vector<3x1xf32>
    %799 = arith.mulf %789, %798 : vector<3x1xf32>
    %800 = arith.addf %796, %799 : vector<3x1xf32>
    %c0_627 = arith.constant 0 : index
    %c14_628 = arith.constant 14 : index
    %801 = vector.load %arg11[%c0_627, %c14_628] : memref<12x24xf32, #tpu.memory_space<vmem>>, vector<3x1xf32>
    tpu.vector_store %arg11[%c0_627, %c14_628], %800 {strides = array<i32>} : memref<12x24xf32, #tpu.memory_space<vmem>>, vector<3x1xf32>,
    %c3_629 = arith.constant 3 : index
    %c14_630 = arith.constant 14 : index
    %802 = vector.load %arg2[%c3_629, %c14_630] : memref<9x24xf32, #tpu.memory_space<vmem>>, vector<1x1xf32>
    %803 = vector.broadcast %802 : vector<1x1xf32> to vector<3x1xf32>
    %804 = arith.mulf %787, %803 : vector<3x1xf32>
    %c4_631 = arith.constant 4 : index
    %c14_632 = arith.constant 14 : index
    %805 = vector.load %arg2[%c4_631, %c14_632] : memref<9x24xf32, #tpu.memory_space<vmem>>, vector<1x1xf32>
    %806 = vector.broadcast %805 : vector<1x1xf32> to vector<3x1xf32>
    %807 = arith.mulf %788, %806 : vector<3x1xf32>
    %808 = arith.addf %804, %807 : vector<3x1xf32>
    %c5_633 = arith.constant 5 : index
    %c14_634 = arith.constant 14 : index
    %809 = vector.load %arg2[%c5_633, %c14_634] : memref<9x24xf32, #tpu.memory_space<vmem>>, vector<1x1xf32>
    %810 = vector.broadcast %809 : vector<1x1xf32> to vector<3x1xf32>
    %811 = arith.mulf %789, %810 : vector<3x1xf32>
    %812 = arith.addf %808, %811 : vector<3x1xf32>
    %c3_635 = arith.constant 3 : index
    %c14_636 = arith.constant 14 : index
    %813 = vector.load %arg11[%c3_635, %c14_636] : memref<12x24xf32, #tpu.memory_space<vmem>>, vector<3x1xf32>
    tpu.vector_store %arg11[%c3_635, %c14_636], %812 {strides = array<i32>} : memref<12x24xf32, #tpu.memory_space<vmem>>, vector<3x1xf32>,
    %c6_637 = arith.constant 6 : index
    %c14_638 = arith.constant 14 : index
    %814 = vector.load %arg2[%c6_637, %c14_638] : memref<9x24xf32, #tpu.memory_space<vmem>>, vector<1x1xf32>
    %815 = vector.broadcast %814 : vector<1x1xf32> to vector<3x1xf32>
    %816 = arith.mulf %787, %815 : vector<3x1xf32>
    %c7_639 = arith.constant 7 : index
    %c14_640 = arith.constant 14 : index
    %817 = vector.load %arg2[%c7_639, %c14_640] : memref<9x24xf32, #tpu.memory_space<vmem>>, vector<1x1xf32>
    %818 = vector.broadcast %817 : vector<1x1xf32> to vector<3x1xf32>
    %819 = arith.mulf %788, %818 : vector<3x1xf32>
    %820 = arith.addf %816, %819 : vector<3x1xf32>
    %c8_641 = arith.constant 8 : index
    %c14_642 = arith.constant 14 : index
    %821 = vector.load %arg2[%c8_641, %c14_642] : memref<9x24xf32, #tpu.memory_space<vmem>>, vector<1x1xf32>
    %822 = vector.broadcast %821 : vector<1x1xf32> to vector<3x1xf32>
    %823 = arith.mulf %789, %822 : vector<3x1xf32>
    %824 = arith.addf %820, %823 : vector<3x1xf32>
    %c6_643 = arith.constant 6 : index
    %c14_644 = arith.constant 14 : index
    %825 = vector.load %arg11[%c6_643, %c14_644] : memref<12x24xf32, #tpu.memory_space<vmem>>, vector<3x1xf32>
    tpu.vector_store %arg11[%c6_643, %c14_644], %824 {strides = array<i32>} : memref<12x24xf32, #tpu.memory_space<vmem>>, vector<3x1xf32>,
    %c0_645 = arith.constant 0 : index
    %c14_646 = arith.constant 14 : index
    %826 = vector.load %arg10[%c0_645, %c14_646] : memref<3x24xf32, #tpu.memory_space<vmem>>, vector<1x1xf32>
    %c0_647 = arith.constant 0 : index
    %c9_648 = arith.constant 9 : index
    %827 = vector.load %arg10[%c0_647, %c9_648] : memref<3x24xf32, #tpu.memory_space<vmem>>, vector<1x1xf32>
    %828 = arith.subf %826, %827 : vector<1x1xf32>
    %c1_649 = arith.constant 1 : index
    %c14_650 = arith.constant 14 : index
    %829 = vector.load %arg10[%c1_649, %c14_650] : memref<3x24xf32, #tpu.memory_space<vmem>>, vector<1x1xf32>
    %c1_651 = arith.constant 1 : index
    %c9_652 = arith.constant 9 : index
    %830 = vector.load %arg10[%c1_651, %c9_652] : memref<3x24xf32, #tpu.memory_space<vmem>>, vector<1x1xf32>
    %831 = arith.subf %829, %830 : vector<1x1xf32>
    %c2_653 = arith.constant 2 : index
    %c14_654 = arith.constant 14 : index
    %832 = vector.load %arg10[%c2_653, %c14_654] : memref<3x24xf32, #tpu.memory_space<vmem>>, vector<1x1xf32>
    %c2_655 = arith.constant 2 : index
    %c9_656 = arith.constant 9 : index
    %833 = vector.load %arg10[%c2_655, %c9_656] : memref<3x24xf32, #tpu.memory_space<vmem>>, vector<1x1xf32>
    %834 = arith.subf %832, %833 : vector<1x1xf32>
    %835 = vector.broadcast %828 : vector<1x1xf32> to vector<3x1xf32>
    %836 = arith.mulf %787, %835 : vector<3x1xf32>
    %837 = vector.broadcast %831 : vector<1x1xf32> to vector<3x1xf32>
    %838 = arith.mulf %788, %837 : vector<3x1xf32>
    %839 = arith.addf %836, %838 : vector<3x1xf32>
    %840 = vector.broadcast %834 : vector<1x1xf32> to vector<3x1xf32>
    %841 = arith.mulf %789, %840 : vector<3x1xf32>
    %842 = arith.addf %839, %841 : vector<3x1xf32>
    %c9_657 = arith.constant 9 : index
    %c9_658 = arith.constant 9 : index
    %843 = vector.load %arg11[%c9_657, %c9_658] : memref<12x24xf32, #tpu.memory_space<vmem>>, vector<3x1xf32>
    %844 = arith.addf %842, %843 : vector<3x1xf32>
    %c9_659 = arith.constant 9 : index
    %c14_660 = arith.constant 14 : index
    %845 = vector.load %arg11[%c9_659, %c14_660] : memref<12x24xf32, #tpu.memory_space<vmem>>, vector<3x1xf32>
    tpu.vector_store %arg11[%c9_659, %c14_660], %844 {strides = array<i32>} : memref<12x24xf32, #tpu.memory_space<vmem>>, vector<3x1xf32>,
    %c0_661 = arith.constant 0 : index
    %c12_662 = arith.constant 12 : index
    %846 = vector.load %arg11[%c0_661, %c12_662] : memref<12x24xf32, #tpu.memory_space<vmem>>, vector<3x1xf32>
    %c3_663 = arith.constant 3 : index
    %c12_664 = arith.constant 12 : index
    %847 = vector.load %arg11[%c3_663, %c12_664] : memref<12x24xf32, #tpu.memory_space<vmem>>, vector<3x1xf32>
    %c6_665 = arith.constant 6 : index
    %c12_666 = arith.constant 12 : index
    %848 = vector.load %arg11[%c6_665, %c12_666] : memref<12x24xf32, #tpu.memory_space<vmem>>, vector<3x1xf32>
    %c0_667 = arith.constant 0 : index
    %c15 = arith.constant 15 : index
    %849 = vector.load %arg2[%c0_667, %c15] : memref<9x24xf32, #tpu.memory_space<vmem>>, vector<1x1xf32>
    %850 = vector.broadcast %849 : vector<1x1xf32> to vector<3x1xf32>
    %851 = arith.mulf %846, %850 : vector<3x1xf32>
    %c1_668 = arith.constant 1 : index
    %c15_669 = arith.constant 15 : index
    %852 = vector.load %arg2[%c1_668, %c15_669] : memref<9x24xf32, #tpu.memory_space<vmem>>, vector<1x1xf32>
    %853 = vector.broadcast %852 : vector<1x1xf32> to vector<3x1xf32>
    %854 = arith.mulf %847, %853 : vector<3x1xf32>
    %855 = arith.addf %851, %854 : vector<3x1xf32>
    %c2_670 = arith.constant 2 : index
    %c15_671 = arith.constant 15 : index
    %856 = vector.load %arg2[%c2_670, %c15_671] : memref<9x24xf32, #tpu.memory_space<vmem>>, vector<1x1xf32>
    %857 = vector.broadcast %856 : vector<1x1xf32> to vector<3x1xf32>
    %858 = arith.mulf %848, %857 : vector<3x1xf32>
    %859 = arith.addf %855, %858 : vector<3x1xf32>
    %c0_672 = arith.constant 0 : index
    %c15_673 = arith.constant 15 : index
    %860 = vector.load %arg11[%c0_672, %c15_673] : memref<12x24xf32, #tpu.memory_space<vmem>>, vector<3x1xf32>
    tpu.vector_store %arg11[%c0_672, %c15_673], %859 {strides = array<i32>} : memref<12x24xf32, #tpu.memory_space<vmem>>, vector<3x1xf32>,
    %c3_674 = arith.constant 3 : index
    %c15_675 = arith.constant 15 : index
    %861 = vector.load %arg2[%c3_674, %c15_675] : memref<9x24xf32, #tpu.memory_space<vmem>>, vector<1x1xf32>
    %862 = vector.broadcast %861 : vector<1x1xf32> to vector<3x1xf32>
    %863 = arith.mulf %846, %862 : vector<3x1xf32>
    %c4_676 = arith.constant 4 : index
    %c15_677 = arith.constant 15 : index
    %864 = vector.load %arg2[%c4_676, %c15_677] : memref<9x24xf32, #tpu.memory_space<vmem>>, vector<1x1xf32>
    %865 = vector.broadcast %864 : vector<1x1xf32> to vector<3x1xf32>
    %866 = arith.mulf %847, %865 : vector<3x1xf32>
    %867 = arith.addf %863, %866 : vector<3x1xf32>
    %c5_678 = arith.constant 5 : index
    %c15_679 = arith.constant 15 : index
    %868 = vector.load %arg2[%c5_678, %c15_679] : memref<9x24xf32, #tpu.memory_space<vmem>>, vector<1x1xf32>
    %869 = vector.broadcast %868 : vector<1x1xf32> to vector<3x1xf32>
    %870 = arith.mulf %848, %869 : vector<3x1xf32>
    %871 = arith.addf %867, %870 : vector<3x1xf32>
    %c3_680 = arith.constant 3 : index
    %c15_681 = arith.constant 15 : index
    %872 = vector.load %arg11[%c3_680, %c15_681] : memref<12x24xf32, #tpu.memory_space<vmem>>, vector<3x1xf32>
    tpu.vector_store %arg11[%c3_680, %c15_681], %871 {strides = array<i32>} : memref<12x24xf32, #tpu.memory_space<vmem>>, vector<3x1xf32>,
    %c6_682 = arith.constant 6 : index
    %c15_683 = arith.constant 15 : index
    %873 = vector.load %arg2[%c6_682, %c15_683] : memref<9x24xf32, #tpu.memory_space<vmem>>, vector<1x1xf32>
    %874 = vector.broadcast %873 : vector<1x1xf32> to vector<3x1xf32>
    %875 = arith.mulf %846, %874 : vector<3x1xf32>
    %c7_684 = arith.constant 7 : index
    %c15_685 = arith.constant 15 : index
    %876 = vector.load %arg2[%c7_684, %c15_685] : memref<9x24xf32, #tpu.memory_space<vmem>>, vector<1x1xf32>
    %877 = vector.broadcast %876 : vector<1x1xf32> to vector<3x1xf32>
    %878 = arith.mulf %847, %877 : vector<3x1xf32>
    %879 = arith.addf %875, %878 : vector<3x1xf32>
    %c8_686 = arith.constant 8 : index
    %c15_687 = arith.constant 15 : index
    %880 = vector.load %arg2[%c8_686, %c15_687] : memref<9x24xf32, #tpu.memory_space<vmem>>, vector<1x1xf32>
    %881 = vector.broadcast %880 : vector<1x1xf32> to vector<3x1xf32>
    %882 = arith.mulf %848, %881 : vector<3x1xf32>
    %883 = arith.addf %879, %882 : vector<3x1xf32>
    %c6_688 = arith.constant 6 : index
    %c15_689 = arith.constant 15 : index
    %884 = vector.load %arg11[%c6_688, %c15_689] : memref<12x24xf32, #tpu.memory_space<vmem>>, vector<3x1xf32>
    tpu.vector_store %arg11[%c6_688, %c15_689], %883 {strides = array<i32>} : memref<12x24xf32, #tpu.memory_space<vmem>>, vector<3x1xf32>,
    %c0_690 = arith.constant 0 : index
    %c15_691 = arith.constant 15 : index
    %885 = vector.load %arg10[%c0_690, %c15_691] : memref<3x24xf32, #tpu.memory_space<vmem>>, vector<1x1xf32>
    %c0_692 = arith.constant 0 : index
    %c12_693 = arith.constant 12 : index
    %886 = vector.load %arg10[%c0_692, %c12_693] : memref<3x24xf32, #tpu.memory_space<vmem>>, vector<1x1xf32>
    %887 = arith.subf %885, %886 : vector<1x1xf32>
    %c1_694 = arith.constant 1 : index
    %c15_695 = arith.constant 15 : index
    %888 = vector.load %arg10[%c1_694, %c15_695] : memref<3x24xf32, #tpu.memory_space<vmem>>, vector<1x1xf32>
    %c1_696 = arith.constant 1 : index
    %c12_697 = arith.constant 12 : index
    %889 = vector.load %arg10[%c1_696, %c12_697] : memref<3x24xf32, #tpu.memory_space<vmem>>, vector<1x1xf32>
    %890 = arith.subf %888, %889 : vector<1x1xf32>
    %c2_698 = arith.constant 2 : index
    %c15_699 = arith.constant 15 : index
    %891 = vector.load %arg10[%c2_698, %c15_699] : memref<3x24xf32, #tpu.memory_space<vmem>>, vector<1x1xf32>
    %c2_700 = arith.constant 2 : index
    %c12_701 = arith.constant 12 : index
    %892 = vector.load %arg10[%c2_700, %c12_701] : memref<3x24xf32, #tpu.memory_space<vmem>>, vector<1x1xf32>
    %893 = arith.subf %891, %892 : vector<1x1xf32>
    %894 = vector.broadcast %887 : vector<1x1xf32> to vector<3x1xf32>
    %895 = arith.mulf %846, %894 : vector<3x1xf32>
    %896 = vector.broadcast %890 : vector<1x1xf32> to vector<3x1xf32>
    %897 = arith.mulf %847, %896 : vector<3x1xf32>
    %898 = arith.addf %895, %897 : vector<3x1xf32>
    %899 = vector.broadcast %893 : vector<1x1xf32> to vector<3x1xf32>
    %900 = arith.mulf %848, %899 : vector<3x1xf32>
    %901 = arith.addf %898, %900 : vector<3x1xf32>
    %c9_702 = arith.constant 9 : index
    %c12_703 = arith.constant 12 : index
    %902 = vector.load %arg11[%c9_702, %c12_703] : memref<12x24xf32, #tpu.memory_space<vmem>>, vector<3x1xf32>
    %903 = arith.addf %901, %902 : vector<3x1xf32>
    %c9_704 = arith.constant 9 : index
    %c15_705 = arith.constant 15 : index
    %904 = vector.load %arg11[%c9_704, %c15_705] : memref<12x24xf32, #tpu.memory_space<vmem>>, vector<3x1xf32>
    tpu.vector_store %arg11[%c9_704, %c15_705], %903 {strides = array<i32>} : memref<12x24xf32, #tpu.memory_space<vmem>>, vector<3x1xf32>,
    %c0_706 = arith.constant 0 : index
    %c13_707 = arith.constant 13 : index
    %905 = vector.load %arg11[%c0_706, %c13_707] : memref<12x24xf32, #tpu.memory_space<vmem>>, vector<3x1xf32>
    %c3_708 = arith.constant 3 : index
    %c13_709 = arith.constant 13 : index
    %906 = vector.load %arg11[%c3_708, %c13_709] : memref<12x24xf32, #tpu.memory_space<vmem>>, vector<3x1xf32>
    %c6_710 = arith.constant 6 : index
    %c13_711 = arith.constant 13 : index
    %907 = vector.load %arg11[%c6_710, %c13_711] : memref<12x24xf32, #tpu.memory_space<vmem>>, vector<3x1xf32>
    %c0_712 = arith.constant 0 : index
    %c16 = arith.constant 16 : index
    %908 = vector.load %arg2[%c0_712, %c16] : memref<9x24xf32, #tpu.memory_space<vmem>>, vector<1x1xf32>
    %909 = vector.broadcast %908 : vector<1x1xf32> to vector<3x1xf32>
    %910 = arith.mulf %905, %909 : vector<3x1xf32>
    %c1_713 = arith.constant 1 : index
    %c16_714 = arith.constant 16 : index
    %911 = vector.load %arg2[%c1_713, %c16_714] : memref<9x24xf32, #tpu.memory_space<vmem>>, vector<1x1xf32>
    %912 = vector.broadcast %911 : vector<1x1xf32> to vector<3x1xf32>
    %913 = arith.mulf %906, %912 : vector<3x1xf32>
    %914 = arith.addf %910, %913 : vector<3x1xf32>
    %c2_715 = arith.constant 2 : index
    %c16_716 = arith.constant 16 : index
    %915 = vector.load %arg2[%c2_715, %c16_716] : memref<9x24xf32, #tpu.memory_space<vmem>>, vector<1x1xf32>
    %916 = vector.broadcast %915 : vector<1x1xf32> to vector<3x1xf32>
    %917 = arith.mulf %907, %916 : vector<3x1xf32>
    %918 = arith.addf %914, %917 : vector<3x1xf32>
    %c0_717 = arith.constant 0 : index
    %c16_718 = arith.constant 16 : index
    %919 = vector.load %arg11[%c0_717, %c16_718] : memref<12x24xf32, #tpu.memory_space<vmem>>, vector<3x1xf32>
    tpu.vector_store %arg11[%c0_717, %c16_718], %918 {strides = array<i32>} : memref<12x24xf32, #tpu.memory_space<vmem>>, vector<3x1xf32>,
    %c3_719 = arith.constant 3 : index
    %c16_720 = arith.constant 16 : index
    %920 = vector.load %arg2[%c3_719, %c16_720] : memref<9x24xf32, #tpu.memory_space<vmem>>, vector<1x1xf32>
    %921 = vector.broadcast %920 : vector<1x1xf32> to vector<3x1xf32>
    %922 = arith.mulf %905, %921 : vector<3x1xf32>
    %c4_721 = arith.constant 4 : index
    %c16_722 = arith.constant 16 : index
    %923 = vector.load %arg2[%c4_721, %c16_722] : memref<9x24xf32, #tpu.memory_space<vmem>>, vector<1x1xf32>
    %924 = vector.broadcast %923 : vector<1x1xf32> to vector<3x1xf32>
    %925 = arith.mulf %906, %924 : vector<3x1xf32>
    %926 = arith.addf %922, %925 : vector<3x1xf32>
    %c5_723 = arith.constant 5 : index
    %c16_724 = arith.constant 16 : index
    %927 = vector.load %arg2[%c5_723, %c16_724] : memref<9x24xf32, #tpu.memory_space<vmem>>, vector<1x1xf32>
    %928 = vector.broadcast %927 : vector<1x1xf32> to vector<3x1xf32>
    %929 = arith.mulf %907, %928 : vector<3x1xf32>
    %930 = arith.addf %926, %929 : vector<3x1xf32>
    %c3_725 = arith.constant 3 : index
    %c16_726 = arith.constant 16 : index
    %931 = vector.load %arg11[%c3_725, %c16_726] : memref<12x24xf32, #tpu.memory_space<vmem>>, vector<3x1xf32>
    tpu.vector_store %arg11[%c3_725, %c16_726], %930 {strides = array<i32>} : memref<12x24xf32, #tpu.memory_space<vmem>>, vector<3x1xf32>,
    %c6_727 = arith.constant 6 : index
    %c16_728 = arith.constant 16 : index
    %932 = vector.load %arg2[%c6_727, %c16_728] : memref<9x24xf32, #tpu.memory_space<vmem>>, vector<1x1xf32>
    %933 = vector.broadcast %932 : vector<1x1xf32> to vector<3x1xf32>
    %934 = arith.mulf %905, %933 : vector<3x1xf32>
    %c7_729 = arith.constant 7 : index
    %c16_730 = arith.constant 16 : index
    %935 = vector.load %arg2[%c7_729, %c16_730] : memref<9x24xf32, #tpu.memory_space<vmem>>, vector<1x1xf32>
    %936 = vector.broadcast %935 : vector<1x1xf32> to vector<3x1xf32>
    %937 = arith.mulf %906, %936 : vector<3x1xf32>
    %938 = arith.addf %934, %937 : vector<3x1xf32>
    %c8_731 = arith.constant 8 : index
    %c16_732 = arith.constant 16 : index
    %939 = vector.load %arg2[%c8_731, %c16_732] : memref<9x24xf32, #tpu.memory_space<vmem>>, vector<1x1xf32>
    %940 = vector.broadcast %939 : vector<1x1xf32> to vector<3x1xf32>
    %941 = arith.mulf %907, %940 : vector<3x1xf32>
    %942 = arith.addf %938, %941 : vector<3x1xf32>
    %c6_733 = arith.constant 6 : index
    %c16_734 = arith.constant 16 : index
    %943 = vector.load %arg11[%c6_733, %c16_734] : memref<12x24xf32, #tpu.memory_space<vmem>>, vector<3x1xf32>
    tpu.vector_store %arg11[%c6_733, %c16_734], %942 {strides = array<i32>} : memref<12x24xf32, #tpu.memory_space<vmem>>, vector<3x1xf32>,
    %c0_735 = arith.constant 0 : index
    %c16_736 = arith.constant 16 : index
    %944 = vector.load %arg10[%c0_735, %c16_736] : memref<3x24xf32, #tpu.memory_space<vmem>>, vector<1x1xf32>
    %c0_737 = arith.constant 0 : index
    %c13_738 = arith.constant 13 : index
    %945 = vector.load %arg10[%c0_737, %c13_738] : memref<3x24xf32, #tpu.memory_space<vmem>>, vector<1x1xf32>
    %946 = arith.subf %944, %945 : vector<1x1xf32>
    %c1_739 = arith.constant 1 : index
    %c16_740 = arith.constant 16 : index
    %947 = vector.load %arg10[%c1_739, %c16_740] : memref<3x24xf32, #tpu.memory_space<vmem>>, vector<1x1xf32>
    %c1_741 = arith.constant 1 : index
    %c13_742 = arith.constant 13 : index
    %948 = vector.load %arg10[%c1_741, %c13_742] : memref<3x24xf32, #tpu.memory_space<vmem>>, vector<1x1xf32>
    %949 = arith.subf %947, %948 : vector<1x1xf32>
    %c2_743 = arith.constant 2 : index
    %c16_744 = arith.constant 16 : index
    %950 = vector.load %arg10[%c2_743, %c16_744] : memref<3x24xf32, #tpu.memory_space<vmem>>, vector<1x1xf32>
    %c2_745 = arith.constant 2 : index
    %c13_746 = arith.constant 13 : index
    %951 = vector.load %arg10[%c2_745, %c13_746] : memref<3x24xf32, #tpu.memory_space<vmem>>, vector<1x1xf32>
    %952 = arith.subf %950, %951 : vector<1x1xf32>
    %953 = vector.broadcast %946 : vector<1x1xf32> to vector<3x1xf32>
    %954 = arith.mulf %905, %953 : vector<3x1xf32>
    %955 = vector.broadcast %949 : vector<1x1xf32> to vector<3x1xf32>
    %956 = arith.mulf %906, %955 : vector<3x1xf32>
    %957 = arith.addf %954, %956 : vector<3x1xf32>
    %958 = vector.broadcast %952 : vector<1x1xf32> to vector<3x1xf32>
    %959 = arith.mulf %907, %958 : vector<3x1xf32>
    %960 = arith.addf %957, %959 : vector<3x1xf32>
    %c9_747 = arith.constant 9 : index
    %c13_748 = arith.constant 13 : index
    %961 = vector.load %arg11[%c9_747, %c13_748] : memref<12x24xf32, #tpu.memory_space<vmem>>, vector<3x1xf32>
    %962 = arith.addf %960, %961 : vector<3x1xf32>
    %c9_749 = arith.constant 9 : index
    %c16_750 = arith.constant 16 : index
    %963 = vector.load %arg11[%c9_749, %c16_750] : memref<12x24xf32, #tpu.memory_space<vmem>>, vector<3x1xf32>
    tpu.vector_store %arg11[%c9_749, %c16_750], %962 {strides = array<i32>} : memref<12x24xf32, #tpu.memory_space<vmem>>, vector<3x1xf32>,
    %c0_751 = arith.constant 0 : index
    %c14_752 = arith.constant 14 : index
    %964 = vector.load %arg11[%c0_751, %c14_752] : memref<12x24xf32, #tpu.memory_space<vmem>>, vector<3x1xf32>
    %c3_753 = arith.constant 3 : index
    %c14_754 = arith.constant 14 : index
    %965 = vector.load %arg11[%c3_753, %c14_754] : memref<12x24xf32, #tpu.memory_space<vmem>>, vector<3x1xf32>
    %c6_755 = arith.constant 6 : index
    %c14_756 = arith.constant 14 : index
    %966 = vector.load %arg11[%c6_755, %c14_756] : memref<12x24xf32, #tpu.memory_space<vmem>>, vector<3x1xf32>
    %c0_757 = arith.constant 0 : index
    %c17 = arith.constant 17 : index
    %967 = vector.load %arg2[%c0_757, %c17] : memref<9x24xf32, #tpu.memory_space<vmem>>, vector<1x1xf32>
    %968 = vector.broadcast %967 : vector<1x1xf32> to vector<3x1xf32>
    %969 = arith.mulf %964, %968 : vector<3x1xf32>
    %c1_758 = arith.constant 1 : index
    %c17_759 = arith.constant 17 : index
    %970 = vector.load %arg2[%c1_758, %c17_759] : memref<9x24xf32, #tpu.memory_space<vmem>>, vector<1x1xf32>
    %971 = vector.broadcast %970 : vector<1x1xf32> to vector<3x1xf32>
    %972 = arith.mulf %965, %971 : vector<3x1xf32>
    %973 = arith.addf %969, %972 : vector<3x1xf32>
    %c2_760 = arith.constant 2 : index
    %c17_761 = arith.constant 17 : index
    %974 = vector.load %arg2[%c2_760, %c17_761] : memref<9x24xf32, #tpu.memory_space<vmem>>, vector<1x1xf32>
    %975 = vector.broadcast %974 : vector<1x1xf32> to vector<3x1xf32>
    %976 = arith.mulf %966, %975 : vector<3x1xf32>
    %977 = arith.addf %973, %976 : vector<3x1xf32>
    %c0_762 = arith.constant 0 : index
    %c17_763 = arith.constant 17 : index
    %978 = vector.load %arg11[%c0_762, %c17_763] : memref<12x24xf32, #tpu.memory_space<vmem>>, vector<3x1xf32>
    tpu.vector_store %arg11[%c0_762, %c17_763], %977 {strides = array<i32>} : memref<12x24xf32, #tpu.memory_space<vmem>>, vector<3x1xf32>,
    %c3_764 = arith.constant 3 : index
    %c17_765 = arith.constant 17 : index
    %979 = vector.load %arg2[%c3_764, %c17_765] : memref<9x24xf32, #tpu.memory_space<vmem>>, vector<1x1xf32>
    %980 = vector.broadcast %979 : vector<1x1xf32> to vector<3x1xf32>
    %981 = arith.mulf %964, %980 : vector<3x1xf32>
    %c4_766 = arith.constant 4 : index
    %c17_767 = arith.constant 17 : index
    %982 = vector.load %arg2[%c4_766, %c17_767] : memref<9x24xf32, #tpu.memory_space<vmem>>, vector<1x1xf32>
    %983 = vector.broadcast %982 : vector<1x1xf32> to vector<3x1xf32>
    %984 = arith.mulf %965, %983 : vector<3x1xf32>
    %985 = arith.addf %981, %984 : vector<3x1xf32>
    %c5_768 = arith.constant 5 : index
    %c17_769 = arith.constant 17 : index
    %986 = vector.load %arg2[%c5_768, %c17_769] : memref<9x24xf32, #tpu.memory_space<vmem>>, vector<1x1xf32>
    %987 = vector.broadcast %986 : vector<1x1xf32> to vector<3x1xf32>
    %988 = arith.mulf %966, %987 : vector<3x1xf32>
    %989 = arith.addf %985, %988 : vector<3x1xf32>
    %c3_770 = arith.constant 3 : index
    %c17_771 = arith.constant 17 : index
    %990 = vector.load %arg11[%c3_770, %c17_771] : memref<12x24xf32, #tpu.memory_space<vmem>>, vector<3x1xf32>
    tpu.vector_store %arg11[%c3_770, %c17_771], %989 {strides = array<i32>} : memref<12x24xf32, #tpu.memory_space<vmem>>, vector<3x1xf32>,
    %c6_772 = arith.constant 6 : index
    %c17_773 = arith.constant 17 : index
    %991 = vector.load %arg2[%c6_772, %c17_773] : memref<9x24xf32, #tpu.memory_space<vmem>>, vector<1x1xf32>
    %992 = vector.broadcast %991 : vector<1x1xf32> to vector<3x1xf32>
    %993 = arith.mulf %964, %992 : vector<3x1xf32>
    %c7_774 = arith.constant 7 : index
    %c17_775 = arith.constant 17 : index
    %994 = vector.load %arg2[%c7_774, %c17_775] : memref<9x24xf32, #tpu.memory_space<vmem>>, vector<1x1xf32>
    %995 = vector.broadcast %994 : vector<1x1xf32> to vector<3x1xf32>
    %996 = arith.mulf %965, %995 : vector<3x1xf32>
    %997 = arith.addf %993, %996 : vector<3x1xf32>
    %c8_776 = arith.constant 8 : index
    %c17_777 = arith.constant 17 : index
    %998 = vector.load %arg2[%c8_776, %c17_777] : memref<9x24xf32, #tpu.memory_space<vmem>>, vector<1x1xf32>
    %999 = vector.broadcast %998 : vector<1x1xf32> to vector<3x1xf32>
    %1000 = arith.mulf %966, %999 : vector<3x1xf32>
    %1001 = arith.addf %997, %1000 : vector<3x1xf32>
    %c6_778 = arith.constant 6 : index
    %c17_779 = arith.constant 17 : index
    %1002 = vector.load %arg11[%c6_778, %c17_779] : memref<12x24xf32, #tpu.memory_space<vmem>>, vector<3x1xf32>
    tpu.vector_store %arg11[%c6_778, %c17_779], %1001 {strides = array<i32>} : memref<12x24xf32, #tpu.memory_space<vmem>>, vector<3x1xf32>,
    %c0_780 = arith.constant 0 : index
    %c17_781 = arith.constant 17 : index
    %1003 = vector.load %arg10[%c0_780, %c17_781] : memref<3x24xf32, #tpu.memory_space<vmem>>, vector<1x1xf32>
    %c0_782 = arith.constant 0 : index
    %c14_783 = arith.constant 14 : index
    %1004 = vector.load %arg10[%c0_782, %c14_783] : memref<3x24xf32, #tpu.memory_space<vmem>>, vector<1x1xf32>
    %1005 = arith.subf %1003, %1004 : vector<1x1xf32>
    %c1_784 = arith.constant 1 : index
    %c17_785 = arith.constant 17 : index
    %1006 = vector.load %arg10[%c1_784, %c17_785] : memref<3x24xf32, #tpu.memory_space<vmem>>, vector<1x1xf32>
    %c1_786 = arith.constant 1 : index
    %c14_787 = arith.constant 14 : index
    %1007 = vector.load %arg10[%c1_786, %c14_787] : memref<3x24xf32, #tpu.memory_space<vmem>>, vector<1x1xf32>
    %1008 = arith.subf %1006, %1007 : vector<1x1xf32>
    %c2_788 = arith.constant 2 : index
    %c17_789 = arith.constant 17 : index
    %1009 = vector.load %arg10[%c2_788, %c17_789] : memref<3x24xf32, #tpu.memory_space<vmem>>, vector<1x1xf32>
    %c2_790 = arith.constant 2 : index
    %c14_791 = arith.constant 14 : index
    %1010 = vector.load %arg10[%c2_790, %c14_791] : memref<3x24xf32, #tpu.memory_space<vmem>>, vector<1x1xf32>
    %1011 = arith.subf %1009, %1010 : vector<1x1xf32>
    %1012 = vector.broadcast %1005 : vector<1x1xf32> to vector<3x1xf32>
    %1013 = arith.mulf %964, %1012 : vector<3x1xf32>
    %1014 = vector.broadcast %1008 : vector<1x1xf32> to vector<3x1xf32>
    %1015 = arith.mulf %965, %1014 : vector<3x1xf32>
    %1016 = arith.addf %1013, %1015 : vector<3x1xf32>
    %1017 = vector.broadcast %1011 : vector<1x1xf32> to vector<3x1xf32>
    %1018 = arith.mulf %966, %1017 : vector<3x1xf32>
    %1019 = arith.addf %1016, %1018 : vector<3x1xf32>
    %c9_792 = arith.constant 9 : index
    %c14_793 = arith.constant 14 : index
    %1020 = vector.load %arg11[%c9_792, %c14_793] : memref<12x24xf32, #tpu.memory_space<vmem>>, vector<3x1xf32>
    %1021 = arith.addf %1019, %1020 : vector<3x1xf32>
    %c9_794 = arith.constant 9 : index
    %c17_795 = arith.constant 17 : index
    %1022 = vector.load %arg11[%c9_794, %c17_795] : memref<12x24xf32, #tpu.memory_space<vmem>>, vector<3x1xf32>
    tpu.vector_store %arg11[%c9_794, %c17_795], %1021 {strides = array<i32>} : memref<12x24xf32, #tpu.memory_space<vmem>>, vector<3x1xf32>,
    %c0_796 = arith.constant 0 : index
    %c16_797 = arith.constant 16 : index
    %1023 = vector.load %arg11[%c0_796, %c16_797] : memref<12x24xf32, #tpu.memory_space<vmem>>, vector<3x1xf32>
    %c3_798 = arith.constant 3 : index
    %c16_799 = arith.constant 16 : index
    %1024 = vector.load %arg11[%c3_798, %c16_799] : memref<12x24xf32, #tpu.memory_space<vmem>>, vector<3x1xf32>
    %c6_800 = arith.constant 6 : index
    %c16_801 = arith.constant 16 : index
    %1025 = vector.load %arg11[%c6_800, %c16_801] : memref<12x24xf32, #tpu.memory_space<vmem>>, vector<3x1xf32>
    %c0_802 = arith.constant 0 : index
    %c18 = arith.constant 18 : index
    %1026 = vector.load %arg2[%c0_802, %c18] : memref<9x24xf32, #tpu.memory_space<vmem>>, vector<1x1xf32>
    %1027 = vector.broadcast %1026 : vector<1x1xf32> to vector<3x1xf32>
    %1028 = arith.mulf %1023, %1027 : vector<3x1xf32>
    %c1_803 = arith.constant 1 : index
    %c18_804 = arith.constant 18 : index
    %1029 = vector.load %arg2[%c1_803, %c18_804] : memref<9x24xf32, #tpu.memory_space<vmem>>, vector<1x1xf32>
    %1030 = vector.broadcast %1029 : vector<1x1xf32> to vector<3x1xf32>
    %1031 = arith.mulf %1024, %1030 : vector<3x1xf32>
    %1032 = arith.addf %1028, %1031 : vector<3x1xf32>
    %c2_805 = arith.constant 2 : index
    %c18_806 = arith.constant 18 : index
    %1033 = vector.load %arg2[%c2_805, %c18_806] : memref<9x24xf32, #tpu.memory_space<vmem>>, vector<1x1xf32>
    %1034 = vector.broadcast %1033 : vector<1x1xf32> to vector<3x1xf32>
    %1035 = arith.mulf %1025, %1034 : vector<3x1xf32>
    %1036 = arith.addf %1032, %1035 : vector<3x1xf32>
    %c0_807 = arith.constant 0 : index
    %c18_808 = arith.constant 18 : index
    %1037 = vector.load %arg11[%c0_807, %c18_808] : memref<12x24xf32, #tpu.memory_space<vmem>>, vector<3x1xf32>
    tpu.vector_store %arg11[%c0_807, %c18_808], %1036 {strides = array<i32>} : memref<12x24xf32, #tpu.memory_space<vmem>>, vector<3x1xf32>,
    %c3_809 = arith.constant 3 : index
    %c18_810 = arith.constant 18 : index
    %1038 = vector.load %arg2[%c3_809, %c18_810] : memref<9x24xf32, #tpu.memory_space<vmem>>, vector<1x1xf32>
    %1039 = vector.broadcast %1038 : vector<1x1xf32> to vector<3x1xf32>
    %1040 = arith.mulf %1023, %1039 : vector<3x1xf32>
    %c4_811 = arith.constant 4 : index
    %c18_812 = arith.constant 18 : index
    %1041 = vector.load %arg2[%c4_811, %c18_812] : memref<9x24xf32, #tpu.memory_space<vmem>>, vector<1x1xf32>
    %1042 = vector.broadcast %1041 : vector<1x1xf32> to vector<3x1xf32>
    %1043 = arith.mulf %1024, %1042 : vector<3x1xf32>
    %1044 = arith.addf %1040, %1043 : vector<3x1xf32>
    %c5_813 = arith.constant 5 : index
    %c18_814 = arith.constant 18 : index
    %1045 = vector.load %arg2[%c5_813, %c18_814] : memref<9x24xf32, #tpu.memory_space<vmem>>, vector<1x1xf32>
    %1046 = vector.broadcast %1045 : vector<1x1xf32> to vector<3x1xf32>
    %1047 = arith.mulf %1025, %1046 : vector<3x1xf32>
    %1048 = arith.addf %1044, %1047 : vector<3x1xf32>
    %c3_815 = arith.constant 3 : index
    %c18_816 = arith.constant 18 : index
    %1049 = vector.load %arg11[%c3_815, %c18_816] : memref<12x24xf32, #tpu.memory_space<vmem>>, vector<3x1xf32>
    tpu.vector_store %arg11[%c3_815, %c18_816], %1048 {strides = array<i32>} : memref<12x24xf32, #tpu.memory_space<vmem>>, vector<3x1xf32>,
    %c6_817 = arith.constant 6 : index
    %c18_818 = arith.constant 18 : index
    %1050 = vector.load %arg2[%c6_817, %c18_818] : memref<9x24xf32, #tpu.memory_space<vmem>>, vector<1x1xf32>
    %1051 = vector.broadcast %1050 : vector<1x1xf32> to vector<3x1xf32>
    %1052 = arith.mulf %1023, %1051 : vector<3x1xf32>
    %c7_819 = arith.constant 7 : index
    %c18_820 = arith.constant 18 : index
    %1053 = vector.load %arg2[%c7_819, %c18_820] : memref<9x24xf32, #tpu.memory_space<vmem>>, vector<1x1xf32>
    %1054 = vector.broadcast %1053 : vector<1x1xf32> to vector<3x1xf32>
    %1055 = arith.mulf %1024, %1054 : vector<3x1xf32>
    %1056 = arith.addf %1052, %1055 : vector<3x1xf32>
    %c8_821 = arith.constant 8 : index
    %c18_822 = arith.constant 18 : index
    %1057 = vector.load %arg2[%c8_821, %c18_822] : memref<9x24xf32, #tpu.memory_space<vmem>>, vector<1x1xf32>
    %1058 = vector.broadcast %1057 : vector<1x1xf32> to vector<3x1xf32>
    %1059 = arith.mulf %1025, %1058 : vector<3x1xf32>
    %1060 = arith.addf %1056, %1059 : vector<3x1xf32>
    %c6_823 = arith.constant 6 : index
    %c18_824 = arith.constant 18 : index
    %1061 = vector.load %arg11[%c6_823, %c18_824] : memref<12x24xf32, #tpu.memory_space<vmem>>, vector<3x1xf32>
    tpu.vector_store %arg11[%c6_823, %c18_824], %1060 {strides = array<i32>} : memref<12x24xf32, #tpu.memory_space<vmem>>, vector<3x1xf32>,
    %c0_825 = arith.constant 0 : index
    %c18_826 = arith.constant 18 : index
    %1062 = vector.load %arg10[%c0_825, %c18_826] : memref<3x24xf32, #tpu.memory_space<vmem>>, vector<1x1xf32>
    %c0_827 = arith.constant 0 : index
    %c16_828 = arith.constant 16 : index
    %1063 = vector.load %arg10[%c0_827, %c16_828] : memref<3x24xf32, #tpu.memory_space<vmem>>, vector<1x1xf32>
    %1064 = arith.subf %1062, %1063 : vector<1x1xf32>
    %c1_829 = arith.constant 1 : index
    %c18_830 = arith.constant 18 : index
    %1065 = vector.load %arg10[%c1_829, %c18_830] : memref<3x24xf32, #tpu.memory_space<vmem>>, vector<1x1xf32>
    %c1_831 = arith.constant 1 : index
    %c16_832 = arith.constant 16 : index
    %1066 = vector.load %arg10[%c1_831, %c16_832] : memref<3x24xf32, #tpu.memory_space<vmem>>, vector<1x1xf32>
    %1067 = arith.subf %1065, %1066 : vector<1x1xf32>
    %c2_833 = arith.constant 2 : index
    %c18_834 = arith.constant 18 : index
    %1068 = vector.load %arg10[%c2_833, %c18_834] : memref<3x24xf32, #tpu.memory_space<vmem>>, vector<1x1xf32>
    %c2_835 = arith.constant 2 : index
    %c16_836 = arith.constant 16 : index
    %1069 = vector.load %arg10[%c2_835, %c16_836] : memref<3x24xf32, #tpu.memory_space<vmem>>, vector<1x1xf32>
    %1070 = arith.subf %1068, %1069 : vector<1x1xf32>
    %1071 = vector.broadcast %1064 : vector<1x1xf32> to vector<3x1xf32>
    %1072 = arith.mulf %1023, %1071 : vector<3x1xf32>
    %1073 = vector.broadcast %1067 : vector<1x1xf32> to vector<3x1xf32>
    %1074 = arith.mulf %1024, %1073 : vector<3x1xf32>
    %1075 = arith.addf %1072, %1074 : vector<3x1xf32>
    %1076 = vector.broadcast %1070 : vector<1x1xf32> to vector<3x1xf32>
    %1077 = arith.mulf %1025, %1076 : vector<3x1xf32>
    %1078 = arith.addf %1075, %1077 : vector<3x1xf32>
    %c9_837 = arith.constant 9 : index
    %c16_838 = arith.constant 16 : index
    %1079 = vector.load %arg11[%c9_837, %c16_838] : memref<12x24xf32, #tpu.memory_space<vmem>>, vector<3x1xf32>
    %1080 = arith.addf %1078, %1079 : vector<3x1xf32>
    %c9_839 = arith.constant 9 : index
    %c18_840 = arith.constant 18 : index
    %1081 = vector.load %arg11[%c9_839, %c18_840] : memref<12x24xf32, #tpu.memory_space<vmem>>, vector<3x1xf32>
    tpu.vector_store %arg11[%c9_839, %c18_840], %1080 {strides = array<i32>} : memref<12x24xf32, #tpu.memory_space<vmem>>, vector<3x1xf32>,
    %c0_841 = arith.constant 0 : index
    %c17_842 = arith.constant 17 : index
    %1082 = vector.load %arg11[%c0_841, %c17_842] : memref<12x24xf32, #tpu.memory_space<vmem>>, vector<3x1xf32>
    %c3_843 = arith.constant 3 : index
    %c17_844 = arith.constant 17 : index
    %1083 = vector.load %arg11[%c3_843, %c17_844] : memref<12x24xf32, #tpu.memory_space<vmem>>, vector<3x1xf32>
    %c6_845 = arith.constant 6 : index
    %c17_846 = arith.constant 17 : index
    %1084 = vector.load %arg11[%c6_845, %c17_846] : memref<12x24xf32, #tpu.memory_space<vmem>>, vector<3x1xf32>
    %c0_847 = arith.constant 0 : index
    %c19 = arith.constant 19 : index
    %1085 = vector.load %arg2[%c0_847, %c19] : memref<9x24xf32, #tpu.memory_space<vmem>>, vector<1x1xf32>
    %1086 = vector.broadcast %1085 : vector<1x1xf32> to vector<3x1xf32>
    %1087 = arith.mulf %1082, %1086 : vector<3x1xf32>
    %c1_848 = arith.constant 1 : index
    %c19_849 = arith.constant 19 : index
    %1088 = vector.load %arg2[%c1_848, %c19_849] : memref<9x24xf32, #tpu.memory_space<vmem>>, vector<1x1xf32>
    %1089 = vector.broadcast %1088 : vector<1x1xf32> to vector<3x1xf32>
    %1090 = arith.mulf %1083, %1089 : vector<3x1xf32>
    %1091 = arith.addf %1087, %1090 : vector<3x1xf32>
    %c2_850 = arith.constant 2 : index
    %c19_851 = arith.constant 19 : index
    %1092 = vector.load %arg2[%c2_850, %c19_851] : memref<9x24xf32, #tpu.memory_space<vmem>>, vector<1x1xf32>
    %1093 = vector.broadcast %1092 : vector<1x1xf32> to vector<3x1xf32>
    %1094 = arith.mulf %1084, %1093 : vector<3x1xf32>
    %1095 = arith.addf %1091, %1094 : vector<3x1xf32>
    %c0_852 = arith.constant 0 : index
    %c19_853 = arith.constant 19 : index
    %1096 = vector.load %arg11[%c0_852, %c19_853] : memref<12x24xf32, #tpu.memory_space<vmem>>, vector<3x1xf32>
    tpu.vector_store %arg11[%c0_852, %c19_853], %1095 {strides = array<i32>} : memref<12x24xf32, #tpu.memory_space<vmem>>, vector<3x1xf32>,
    %c3_854 = arith.constant 3 : index
    %c19_855 = arith.constant 19 : index
    %1097 = vector.load %arg2[%c3_854, %c19_855] : memref<9x24xf32, #tpu.memory_space<vmem>>, vector<1x1xf32>
    %1098 = vector.broadcast %1097 : vector<1x1xf32> to vector<3x1xf32>
    %1099 = arith.mulf %1082, %1098 : vector<3x1xf32>
    %c4_856 = arith.constant 4 : index
    %c19_857 = arith.constant 19 : index
    %1100 = vector.load %arg2[%c4_856, %c19_857] : memref<9x24xf32, #tpu.memory_space<vmem>>, vector<1x1xf32>
    %1101 = vector.broadcast %1100 : vector<1x1xf32> to vector<3x1xf32>
    %1102 = arith.mulf %1083, %1101 : vector<3x1xf32>
    %1103 = arith.addf %1099, %1102 : vector<3x1xf32>
    %c5_858 = arith.constant 5 : index
    %c19_859 = arith.constant 19 : index
    %1104 = vector.load %arg2[%c5_858, %c19_859] : memref<9x24xf32, #tpu.memory_space<vmem>>, vector<1x1xf32>
    %1105 = vector.broadcast %1104 : vector<1x1xf32> to vector<3x1xf32>
    %1106 = arith.mulf %1084, %1105 : vector<3x1xf32>
    %1107 = arith.addf %1103, %1106 : vector<3x1xf32>
    %c3_860 = arith.constant 3 : index
    %c19_861 = arith.constant 19 : index
    %1108 = vector.load %arg11[%c3_860, %c19_861] : memref<12x24xf32, #tpu.memory_space<vmem>>, vector<3x1xf32>
    tpu.vector_store %arg11[%c3_860, %c19_861], %1107 {strides = array<i32>} : memref<12x24xf32, #tpu.memory_space<vmem>>, vector<3x1xf32>,
    %c6_862 = arith.constant 6 : index
    %c19_863 = arith.constant 19 : index
    %1109 = vector.load %arg2[%c6_862, %c19_863] : memref<9x24xf32, #tpu.memory_space<vmem>>, vector<1x1xf32>
    %1110 = vector.broadcast %1109 : vector<1x1xf32> to vector<3x1xf32>
    %1111 = arith.mulf %1082, %1110 : vector<3x1xf32>
    %c7_864 = arith.constant 7 : index
    %c19_865 = arith.constant 19 : index
    %1112 = vector.load %arg2[%c7_864, %c19_865] : memref<9x24xf32, #tpu.memory_space<vmem>>, vector<1x1xf32>
    %1113 = vector.broadcast %1112 : vector<1x1xf32> to vector<3x1xf32>
    %1114 = arith.mulf %1083, %1113 : vector<3x1xf32>
    %1115 = arith.addf %1111, %1114 : vector<3x1xf32>
    %c8_866 = arith.constant 8 : index
    %c19_867 = arith.constant 19 : index
    %1116 = vector.load %arg2[%c8_866, %c19_867] : memref<9x24xf32, #tpu.memory_space<vmem>>, vector<1x1xf32>
    %1117 = vector.broadcast %1116 : vector<1x1xf32> to vector<3x1xf32>
    %1118 = arith.mulf %1084, %1117 : vector<3x1xf32>
    %1119 = arith.addf %1115, %1118 : vector<3x1xf32>
    %c6_868 = arith.constant 6 : index
    %c19_869 = arith.constant 19 : index
    %1120 = vector.load %arg11[%c6_868, %c19_869] : memref<12x24xf32, #tpu.memory_space<vmem>>, vector<3x1xf32>
    tpu.vector_store %arg11[%c6_868, %c19_869], %1119 {strides = array<i32>} : memref<12x24xf32, #tpu.memory_space<vmem>>, vector<3x1xf32>,
    %c0_870 = arith.constant 0 : index
    %c19_871 = arith.constant 19 : index
    %1121 = vector.load %arg10[%c0_870, %c19_871] : memref<3x24xf32, #tpu.memory_space<vmem>>, vector<1x1xf32>
    %c0_872 = arith.constant 0 : index
    %c17_873 = arith.constant 17 : index
    %1122 = vector.load %arg10[%c0_872, %c17_873] : memref<3x24xf32, #tpu.memory_space<vmem>>, vector<1x1xf32>
    %1123 = arith.subf %1121, %1122 : vector<1x1xf32>
    %c1_874 = arith.constant 1 : index
    %c19_875 = arith.constant 19 : index
    %1124 = vector.load %arg10[%c1_874, %c19_875] : memref<3x24xf32, #tpu.memory_space<vmem>>, vector<1x1xf32>
    %c1_876 = arith.constant 1 : index
    %c17_877 = arith.constant 17 : index
    %1125 = vector.load %arg10[%c1_876, %c17_877] : memref<3x24xf32, #tpu.memory_space<vmem>>, vector<1x1xf32>
    %1126 = arith.subf %1124, %1125 : vector<1x1xf32>
    %c2_878 = arith.constant 2 : index
    %c19_879 = arith.constant 19 : index
    %1127 = vector.load %arg10[%c2_878, %c19_879] : memref<3x24xf32, #tpu.memory_space<vmem>>, vector<1x1xf32>
    %c2_880 = arith.constant 2 : index
    %c17_881 = arith.constant 17 : index
    %1128 = vector.load %arg10[%c2_880, %c17_881] : memref<3x24xf32, #tpu.memory_space<vmem>>, vector<1x1xf32>
    %1129 = arith.subf %1127, %1128 : vector<1x1xf32>
    %1130 = vector.broadcast %1123 : vector<1x1xf32> to vector<3x1xf32>
    %1131 = arith.mulf %1082, %1130 : vector<3x1xf32>
    %1132 = vector.broadcast %1126 : vector<1x1xf32> to vector<3x1xf32>
    %1133 = arith.mulf %1083, %1132 : vector<3x1xf32>
    %1134 = arith.addf %1131, %1133 : vector<3x1xf32>
    %1135 = vector.broadcast %1129 : vector<1x1xf32> to vector<3x1xf32>
    %1136 = arith.mulf %1084, %1135 : vector<3x1xf32>
    %1137 = arith.addf %1134, %1136 : vector<3x1xf32>
    %c9_882 = arith.constant 9 : index
    %c17_883 = arith.constant 17 : index
    %1138 = vector.load %arg11[%c9_882, %c17_883] : memref<12x24xf32, #tpu.memory_space<vmem>>, vector<3x1xf32>
    %1139 = arith.addf %1137, %1138 : vector<3x1xf32>
    %c9_884 = arith.constant 9 : index
    %c19_885 = arith.constant 19 : index
    %1140 = vector.load %arg11[%c9_884, %c19_885] : memref<12x24xf32, #tpu.memory_space<vmem>>, vector<3x1xf32>
    tpu.vector_store %arg11[%c9_884, %c19_885], %1139 {strides = array<i32>} : memref<12x24xf32, #tpu.memory_space<vmem>>, vector<3x1xf32>,
    %c0_886 = arith.constant 0 : index
    %c18_887 = arith.constant 18 : index
    %1141 = vector.load %arg11[%c0_886, %c18_887] : memref<12x24xf32, #tpu.memory_space<vmem>>, vector<3x1xf32>
    %c3_888 = arith.constant 3 : index
    %c18_889 = arith.constant 18 : index
    %1142 = vector.load %arg11[%c3_888, %c18_889] : memref<12x24xf32, #tpu.memory_space<vmem>>, vector<3x1xf32>
    %c6_890 = arith.constant 6 : index
    %c18_891 = arith.constant 18 : index
    %1143 = vector.load %arg11[%c6_890, %c18_891] : memref<12x24xf32, #tpu.memory_space<vmem>>, vector<3x1xf32>
    %c0_892 = arith.constant 0 : index
    %c20 = arith.constant 20 : index
    %1144 = vector.load %arg2[%c0_892, %c20] : memref<9x24xf32, #tpu.memory_space<vmem>>, vector<1x1xf32>
    %1145 = vector.broadcast %1144 : vector<1x1xf32> to vector<3x1xf32>
    %1146 = arith.mulf %1141, %1145 : vector<3x1xf32>
    %c1_893 = arith.constant 1 : index
    %c20_894 = arith.constant 20 : index
    %1147 = vector.load %arg2[%c1_893, %c20_894] : memref<9x24xf32, #tpu.memory_space<vmem>>, vector<1x1xf32>
    %1148 = vector.broadcast %1147 : vector<1x1xf32> to vector<3x1xf32>
    %1149 = arith.mulf %1142, %1148 : vector<3x1xf32>
    %1150 = arith.addf %1146, %1149 : vector<3x1xf32>
    %c2_895 = arith.constant 2 : index
    %c20_896 = arith.constant 20 : index
    %1151 = vector.load %arg2[%c2_895, %c20_896] : memref<9x24xf32, #tpu.memory_space<vmem>>, vector<1x1xf32>
    %1152 = vector.broadcast %1151 : vector<1x1xf32> to vector<3x1xf32>
    %1153 = arith.mulf %1143, %1152 : vector<3x1xf32>
    %1154 = arith.addf %1150, %1153 : vector<3x1xf32>
    %c0_897 = arith.constant 0 : index
    %c20_898 = arith.constant 20 : index
    %1155 = vector.load %arg11[%c0_897, %c20_898] : memref<12x24xf32, #tpu.memory_space<vmem>>, vector<3x1xf32>
    tpu.vector_store %arg11[%c0_897, %c20_898], %1154 {strides = array<i32>} : memref<12x24xf32, #tpu.memory_space<vmem>>, vector<3x1xf32>,
    %c3_899 = arith.constant 3 : index
    %c20_900 = arith.constant 20 : index
    %1156 = vector.load %arg2[%c3_899, %c20_900] : memref<9x24xf32, #tpu.memory_space<vmem>>, vector<1x1xf32>
    %1157 = vector.broadcast %1156 : vector<1x1xf32> to vector<3x1xf32>
    %1158 = arith.mulf %1141, %1157 : vector<3x1xf32>
    %c4_901 = arith.constant 4 : index
    %c20_902 = arith.constant 20 : index
    %1159 = vector.load %arg2[%c4_901, %c20_902] : memref<9x24xf32, #tpu.memory_space<vmem>>, vector<1x1xf32>
    %1160 = vector.broadcast %1159 : vector<1x1xf32> to vector<3x1xf32>
    %1161 = arith.mulf %1142, %1160 : vector<3x1xf32>
    %1162 = arith.addf %1158, %1161 : vector<3x1xf32>
    %c5_903 = arith.constant 5 : index
    %c20_904 = arith.constant 20 : index
    %1163 = vector.load %arg2[%c5_903, %c20_904] : memref<9x24xf32, #tpu.memory_space<vmem>>, vector<1x1xf32>
    %1164 = vector.broadcast %1163 : vector<1x1xf32> to vector<3x1xf32>
    %1165 = arith.mulf %1143, %1164 : vector<3x1xf32>
    %1166 = arith.addf %1162, %1165 : vector<3x1xf32>
    %c3_905 = arith.constant 3 : index
    %c20_906 = arith.constant 20 : index
    %1167 = vector.load %arg11[%c3_905, %c20_906] : memref<12x24xf32, #tpu.memory_space<vmem>>, vector<3x1xf32>
    tpu.vector_store %arg11[%c3_905, %c20_906], %1166 {strides = array<i32>} : memref<12x24xf32, #tpu.memory_space<vmem>>, vector<3x1xf32>,
    %c6_907 = arith.constant 6 : index
    %c20_908 = arith.constant 20 : index
    %1168 = vector.load %arg2[%c6_907, %c20_908] : memref<9x24xf32, #tpu.memory_space<vmem>>, vector<1x1xf32>
    %1169 = vector.broadcast %1168 : vector<1x1xf32> to vector<3x1xf32>
    %1170 = arith.mulf %1141, %1169 : vector<3x1xf32>
    %c7_909 = arith.constant 7 : index
    %c20_910 = arith.constant 20 : index
    %1171 = vector.load %arg2[%c7_909, %c20_910] : memref<9x24xf32, #tpu.memory_space<vmem>>, vector<1x1xf32>
    %1172 = vector.broadcast %1171 : vector<1x1xf32> to vector<3x1xf32>
    %1173 = arith.mulf %1142, %1172 : vector<3x1xf32>
    %1174 = arith.addf %1170, %1173 : vector<3x1xf32>
    %c8_911 = arith.constant 8 : index
    %c20_912 = arith.constant 20 : index
    %1175 = vector.load %arg2[%c8_911, %c20_912] : memref<9x24xf32, #tpu.memory_space<vmem>>, vector<1x1xf32>
    %1176 = vector.broadcast %1175 : vector<1x1xf32> to vector<3x1xf32>
    %1177 = arith.mulf %1143, %1176 : vector<3x1xf32>
    %1178 = arith.addf %1174, %1177 : vector<3x1xf32>
    %c6_913 = arith.constant 6 : index
    %c20_914 = arith.constant 20 : index
    %1179 = vector.load %arg11[%c6_913, %c20_914] : memref<12x24xf32, #tpu.memory_space<vmem>>, vector<3x1xf32>
    tpu.vector_store %arg11[%c6_913, %c20_914], %1178 {strides = array<i32>} : memref<12x24xf32, #tpu.memory_space<vmem>>, vector<3x1xf32>,
    %c0_915 = arith.constant 0 : index
    %c20_916 = arith.constant 20 : index
    %1180 = vector.load %arg10[%c0_915, %c20_916] : memref<3x24xf32, #tpu.memory_space<vmem>>, vector<1x1xf32>
    %c0_917 = arith.constant 0 : index
    %c18_918 = arith.constant 18 : index
    %1181 = vector.load %arg10[%c0_917, %c18_918] : memref<3x24xf32, #tpu.memory_space<vmem>>, vector<1x1xf32>
    %1182 = arith.subf %1180, %1181 : vector<1x1xf32>
    %c1_919 = arith.constant 1 : index
    %c20_920 = arith.constant 20 : index
    %1183 = vector.load %arg10[%c1_919, %c20_920] : memref<3x24xf32, #tpu.memory_space<vmem>>, vector<1x1xf32>
    %c1_921 = arith.constant 1 : index
    %c18_922 = arith.constant 18 : index
    %1184 = vector.load %arg10[%c1_921, %c18_922] : memref<3x24xf32, #tpu.memory_space<vmem>>, vector<1x1xf32>
    %1185 = arith.subf %1183, %1184 : vector<1x1xf32>
    %c2_923 = arith.constant 2 : index
    %c20_924 = arith.constant 20 : index
    %1186 = vector.load %arg10[%c2_923, %c20_924] : memref<3x24xf32, #tpu.memory_space<vmem>>, vector<1x1xf32>
    %c2_925 = arith.constant 2 : index
    %c18_926 = arith.constant 18 : index
    %1187 = vector.load %arg10[%c2_925, %c18_926] : memref<3x24xf32, #tpu.memory_space<vmem>>, vector<1x1xf32>
    %1188 = arith.subf %1186, %1187 : vector<1x1xf32>
    %1189 = vector.broadcast %1182 : vector<1x1xf32> to vector<3x1xf32>
    %1190 = arith.mulf %1141, %1189 : vector<3x1xf32>
    %1191 = vector.broadcast %1185 : vector<1x1xf32> to vector<3x1xf32>
    %1192 = arith.mulf %1142, %1191 : vector<3x1xf32>
    %1193 = arith.addf %1190, %1192 : vector<3x1xf32>
    %1194 = vector.broadcast %1188 : vector<1x1xf32> to vector<3x1xf32>
    %1195 = arith.mulf %1143, %1194 : vector<3x1xf32>
    %1196 = arith.addf %1193, %1195 : vector<3x1xf32>
    %c9_927 = arith.constant 9 : index
    %c18_928 = arith.constant 18 : index
    %1197 = vector.load %arg11[%c9_927, %c18_928] : memref<12x24xf32, #tpu.memory_space<vmem>>, vector<3x1xf32>
    %1198 = arith.addf %1196, %1197 : vector<3x1xf32>
    %c9_929 = arith.constant 9 : index
    %c20_930 = arith.constant 20 : index
    %1199 = vector.load %arg11[%c9_929, %c20_930] : memref<12x24xf32, #tpu.memory_space<vmem>>, vector<3x1xf32>
    tpu.vector_store %arg11[%c9_929, %c20_930], %1198 {strides = array<i32>} : memref<12x24xf32, #tpu.memory_space<vmem>>, vector<3x1xf32>,
    %c0_931 = arith.constant 0 : index
    %c19_932 = arith.constant 19 : index
    %1200 = vector.load %arg11[%c0_931, %c19_932] : memref<12x24xf32, #tpu.memory_space<vmem>>, vector<3x1xf32>
    %c3_933 = arith.constant 3 : index
    %c19_934 = arith.constant 19 : index
    %1201 = vector.load %arg11[%c3_933, %c19_934] : memref<12x24xf32, #tpu.memory_space<vmem>>, vector<3x1xf32>
    %c6_935 = arith.constant 6 : index
    %c19_936 = arith.constant 19 : index
    %1202 = vector.load %arg11[%c6_935, %c19_936] : memref<12x24xf32, #tpu.memory_space<vmem>>, vector<3x1xf32>
    %c0_937 = arith.constant 0 : index
    %c21 = arith.constant 21 : index
    %1203 = vector.load %arg2[%c0_937, %c21] : memref<9x24xf32, #tpu.memory_space<vmem>>, vector<1x1xf32>
    %1204 = vector.broadcast %1203 : vector<1x1xf32> to vector<3x1xf32>
    %1205 = arith.mulf %1200, %1204 : vector<3x1xf32>
    %c1_938 = arith.constant 1 : index
    %c21_939 = arith.constant 21 : index
    %1206 = vector.load %arg2[%c1_938, %c21_939] : memref<9x24xf32, #tpu.memory_space<vmem>>, vector<1x1xf32>
    %1207 = vector.broadcast %1206 : vector<1x1xf32> to vector<3x1xf32>
    %1208 = arith.mulf %1201, %1207 : vector<3x1xf32>
    %1209 = arith.addf %1205, %1208 : vector<3x1xf32>
    %c2_940 = arith.constant 2 : index
    %c21_941 = arith.constant 21 : index
    %1210 = vector.load %arg2[%c2_940, %c21_941] : memref<9x24xf32, #tpu.memory_space<vmem>>, vector<1x1xf32>
    %1211 = vector.broadcast %1210 : vector<1x1xf32> to vector<3x1xf32>
    %1212 = arith.mulf %1202, %1211 : vector<3x1xf32>
    %1213 = arith.addf %1209, %1212 : vector<3x1xf32>
    %c0_942 = arith.constant 0 : index
    %c21_943 = arith.constant 21 : index
    %1214 = vector.load %arg11[%c0_942, %c21_943] : memref<12x24xf32, #tpu.memory_space<vmem>>, vector<3x1xf32>
    tpu.vector_store %arg11[%c0_942, %c21_943], %1213 {strides = array<i32>} : memref<12x24xf32, #tpu.memory_space<vmem>>, vector<3x1xf32>,
    %c3_944 = arith.constant 3 : index
    %c21_945 = arith.constant 21 : index
    %1215 = vector.load %arg2[%c3_944, %c21_945] : memref<9x24xf32, #tpu.memory_space<vmem>>, vector<1x1xf32>
    %1216 = vector.broadcast %1215 : vector<1x1xf32> to vector<3x1xf32>
    %1217 = arith.mulf %1200, %1216 : vector<3x1xf32>
    %c4_946 = arith.constant 4 : index
    %c21_947 = arith.constant 21 : index
    %1218 = vector.load %arg2[%c4_946, %c21_947] : memref<9x24xf32, #tpu.memory_space<vmem>>, vector<1x1xf32>
    %1219 = vector.broadcast %1218 : vector<1x1xf32> to vector<3x1xf32>
    %1220 = arith.mulf %1201, %1219 : vector<3x1xf32>
    %1221 = arith.addf %1217, %1220 : vector<3x1xf32>
    %c5_948 = arith.constant 5 : index
    %c21_949 = arith.constant 21 : index
    %1222 = vector.load %arg2[%c5_948, %c21_949] : memref<9x24xf32, #tpu.memory_space<vmem>>, vector<1x1xf32>
    %1223 = vector.broadcast %1222 : vector<1x1xf32> to vector<3x1xf32>
    %1224 = arith.mulf %1202, %1223 : vector<3x1xf32>
    %1225 = arith.addf %1221, %1224 : vector<3x1xf32>
    %c3_950 = arith.constant 3 : index
    %c21_951 = arith.constant 21 : index
    %1226 = vector.load %arg11[%c3_950, %c21_951] : memref<12x24xf32, #tpu.memory_space<vmem>>, vector<3x1xf32>
    tpu.vector_store %arg11[%c3_950, %c21_951], %1225 {strides = array<i32>} : memref<12x24xf32, #tpu.memory_space<vmem>>, vector<3x1xf32>,
    %c6_952 = arith.constant 6 : index
    %c21_953 = arith.constant 21 : index
    %1227 = vector.load %arg2[%c6_952, %c21_953] : memref<9x24xf32, #tpu.memory_space<vmem>>, vector<1x1xf32>
    %1228 = vector.broadcast %1227 : vector<1x1xf32> to vector<3x1xf32>
    %1229 = arith.mulf %1200, %1228 : vector<3x1xf32>
    %c7_954 = arith.constant 7 : index
    %c21_955 = arith.constant 21 : index
    %1230 = vector.load %arg2[%c7_954, %c21_955] : memref<9x24xf32, #tpu.memory_space<vmem>>, vector<1x1xf32>
    %1231 = vector.broadcast %1230 : vector<1x1xf32> to vector<3x1xf32>
    %1232 = arith.mulf %1201, %1231 : vector<3x1xf32>
    %1233 = arith.addf %1229, %1232 : vector<3x1xf32>
    %c8_956 = arith.constant 8 : index
    %c21_957 = arith.constant 21 : index
    %1234 = vector.load %arg2[%c8_956, %c21_957] : memref<9x24xf32, #tpu.memory_space<vmem>>, vector<1x1xf32>
    %1235 = vector.broadcast %1234 : vector<1x1xf32> to vector<3x1xf32>
    %1236 = arith.mulf %1202, %1235 : vector<3x1xf32>
    %1237 = arith.addf %1233, %1236 : vector<3x1xf32>
    %c6_958 = arith.constant 6 : index
    %c21_959 = arith.constant 21 : index
    %1238 = vector.load %arg11[%c6_958, %c21_959] : memref<12x24xf32, #tpu.memory_space<vmem>>, vector<3x1xf32>
    tpu.vector_store %arg11[%c6_958, %c21_959], %1237 {strides = array<i32>} : memref<12x24xf32, #tpu.memory_space<vmem>>, vector<3x1xf32>,
    %c0_960 = arith.constant 0 : index
    %c21_961 = arith.constant 21 : index
    %1239 = vector.load %arg10[%c0_960, %c21_961] : memref<3x24xf32, #tpu.memory_space<vmem>>, vector<1x1xf32>
    %c0_962 = arith.constant 0 : index
    %c19_963 = arith.constant 19 : index
    %1240 = vector.load %arg10[%c0_962, %c19_963] : memref<3x24xf32, #tpu.memory_space<vmem>>, vector<1x1xf32>
    %1241 = arith.subf %1239, %1240 : vector<1x1xf32>
    %c1_964 = arith.constant 1 : index
    %c21_965 = arith.constant 21 : index
    %1242 = vector.load %arg10[%c1_964, %c21_965] : memref<3x24xf32, #tpu.memory_space<vmem>>, vector<1x1xf32>
    %c1_966 = arith.constant 1 : index
    %c19_967 = arith.constant 19 : index
    %1243 = vector.load %arg10[%c1_966, %c19_967] : memref<3x24xf32, #tpu.memory_space<vmem>>, vector<1x1xf32>
    %1244 = arith.subf %1242, %1243 : vector<1x1xf32>
    %c2_968 = arith.constant 2 : index
    %c21_969 = arith.constant 21 : index
    %1245 = vector.load %arg10[%c2_968, %c21_969] : memref<3x24xf32, #tpu.memory_space<vmem>>, vector<1x1xf32>
    %c2_970 = arith.constant 2 : index
    %c19_971 = arith.constant 19 : index
    %1246 = vector.load %arg10[%c2_970, %c19_971] : memref<3x24xf32, #tpu.memory_space<vmem>>, vector<1x1xf32>
    %1247 = arith.subf %1245, %1246 : vector<1x1xf32>
    %1248 = vector.broadcast %1241 : vector<1x1xf32> to vector<3x1xf32>
    %1249 = arith.mulf %1200, %1248 : vector<3x1xf32>
    %1250 = vector.broadcast %1244 : vector<1x1xf32> to vector<3x1xf32>
    %1251 = arith.mulf %1201, %1250 : vector<3x1xf32>
    %1252 = arith.addf %1249, %1251 : vector<3x1xf32>
    %1253 = vector.broadcast %1247 : vector<1x1xf32> to vector<3x1xf32>
    %1254 = arith.mulf %1202, %1253 : vector<3x1xf32>
    %1255 = arith.addf %1252, %1254 : vector<3x1xf32>
    %c9_972 = arith.constant 9 : index
    %c19_973 = arith.constant 19 : index
    %1256 = vector.load %arg11[%c9_972, %c19_973] : memref<12x24xf32, #tpu.memory_space<vmem>>, vector<3x1xf32>
    %1257 = arith.addf %1255, %1256 : vector<3x1xf32>
    %c9_974 = arith.constant 9 : index
    %c21_975 = arith.constant 21 : index
    %1258 = vector.load %arg11[%c9_974, %c21_975] : memref<12x24xf32, #tpu.memory_space<vmem>>, vector<3x1xf32>
    tpu.vector_store %arg11[%c9_974, %c21_975], %1257 {strides = array<i32>} : memref<12x24xf32, #tpu.memory_space<vmem>>, vector<3x1xf32>,
    %c0_976 = arith.constant 0 : index
    %c20_977 = arith.constant 20 : index
    %1259 = vector.load %arg11[%c0_976, %c20_977] : memref<12x24xf32, #tpu.memory_space<vmem>>, vector<3x1xf32>
    %c3_978 = arith.constant 3 : index
    %c20_979 = arith.constant 20 : index
    %1260 = vector.load %arg11[%c3_978, %c20_979] : memref<12x24xf32, #tpu.memory_space<vmem>>, vector<3x1xf32>
    %c6_980 = arith.constant 6 : index
    %c20_981 = arith.constant 20 : index
    %1261 = vector.load %arg11[%c6_980, %c20_981] : memref<12x24xf32, #tpu.memory_space<vmem>>, vector<3x1xf32>
    %c0_982 = arith.constant 0 : index
    %c22 = arith.constant 22 : index
    %1262 = vector.load %arg2[%c0_982, %c22] : memref<9x24xf32, #tpu.memory_space<vmem>>, vector<1x1xf32>
    %1263 = vector.broadcast %1262 : vector<1x1xf32> to vector<3x1xf32>
    %1264 = arith.mulf %1259, %1263 : vector<3x1xf32>
    %c1_983 = arith.constant 1 : index
    %c22_984 = arith.constant 22 : index
    %1265 = vector.load %arg2[%c1_983, %c22_984] : memref<9x24xf32, #tpu.memory_space<vmem>>, vector<1x1xf32>
    %1266 = vector.broadcast %1265 : vector<1x1xf32> to vector<3x1xf32>
    %1267 = arith.mulf %1260, %1266 : vector<3x1xf32>
    %1268 = arith.addf %1264, %1267 : vector<3x1xf32>
    %c2_985 = arith.constant 2 : index
    %c22_986 = arith.constant 22 : index
    %1269 = vector.load %arg2[%c2_985, %c22_986] : memref<9x24xf32, #tpu.memory_space<vmem>>, vector<1x1xf32>
    %1270 = vector.broadcast %1269 : vector<1x1xf32> to vector<3x1xf32>
    %1271 = arith.mulf %1261, %1270 : vector<3x1xf32>
    %1272 = arith.addf %1268, %1271 : vector<3x1xf32>
    %c0_987 = arith.constant 0 : index
    %c22_988 = arith.constant 22 : index
    %1273 = vector.load %arg11[%c0_987, %c22_988] : memref<12x24xf32, #tpu.memory_space<vmem>>, vector<3x1xf32>
    tpu.vector_store %arg11[%c0_987, %c22_988], %1272 {strides = array<i32>} : memref<12x24xf32, #tpu.memory_space<vmem>>, vector<3x1xf32>,
    %c3_989 = arith.constant 3 : index
    %c22_990 = arith.constant 22 : index
    %1274 = vector.load %arg2[%c3_989, %c22_990] : memref<9x24xf32, #tpu.memory_space<vmem>>, vector<1x1xf32>
    %1275 = vector.broadcast %1274 : vector<1x1xf32> to vector<3x1xf32>
    %1276 = arith.mulf %1259, %1275 : vector<3x1xf32>
    %c4_991 = arith.constant 4 : index
    %c22_992 = arith.constant 22 : index
    %1277 = vector.load %arg2[%c4_991, %c22_992] : memref<9x24xf32, #tpu.memory_space<vmem>>, vector<1x1xf32>
    %1278 = vector.broadcast %1277 : vector<1x1xf32> to vector<3x1xf32>
    %1279 = arith.mulf %1260, %1278 : vector<3x1xf32>
    %1280 = arith.addf %1276, %1279 : vector<3x1xf32>
    %c5_993 = arith.constant 5 : index
    %c22_994 = arith.constant 22 : index
    %1281 = vector.load %arg2[%c5_993, %c22_994] : memref<9x24xf32, #tpu.memory_space<vmem>>, vector<1x1xf32>
    %1282 = vector.broadcast %1281 : vector<1x1xf32> to vector<3x1xf32>
    %1283 = arith.mulf %1261, %1282 : vector<3x1xf32>
    %1284 = arith.addf %1280, %1283 : vector<3x1xf32>
    %c3_995 = arith.constant 3 : index
    %c22_996 = arith.constant 22 : index
    %1285 = vector.load %arg11[%c3_995, %c22_996] : memref<12x24xf32, #tpu.memory_space<vmem>>, vector<3x1xf32>
    tpu.vector_store %arg11[%c3_995, %c22_996], %1284 {strides = array<i32>} : memref<12x24xf32, #tpu.memory_space<vmem>>, vector<3x1xf32>,
    %c6_997 = arith.constant 6 : index
    %c22_998 = arith.constant 22 : index
    %1286 = vector.load %arg2[%c6_997, %c22_998] : memref<9x24xf32, #tpu.memory_space<vmem>>, vector<1x1xf32>
    %1287 = vector.broadcast %1286 : vector<1x1xf32> to vector<3x1xf32>
    %1288 = arith.mulf %1259, %1287 : vector<3x1xf32>
    %c7_999 = arith.constant 7 : index
    %c22_1000 = arith.constant 22 : index
    %1289 = vector.load %arg2[%c7_999, %c22_1000] : memref<9x24xf32, #tpu.memory_space<vmem>>, vector<1x1xf32>
    %1290 = vector.broadcast %1289 : vector<1x1xf32> to vector<3x1xf32>
    %1291 = arith.mulf %1260, %1290 : vector<3x1xf32>
    %1292 = arith.addf %1288, %1291 : vector<3x1xf32>
    %c8_1001 = arith.constant 8 : index
    %c22_1002 = arith.constant 22 : index
    %1293 = vector.load %arg2[%c8_1001, %c22_1002] : memref<9x24xf32, #tpu.memory_space<vmem>>, vector<1x1xf32>
    %1294 = vector.broadcast %1293 : vector<1x1xf32> to vector<3x1xf32>
    %1295 = arith.mulf %1261, %1294 : vector<3x1xf32>
    %1296 = arith.addf %1292, %1295 : vector<3x1xf32>
    %c6_1003 = arith.constant 6 : index
    %c22_1004 = arith.constant 22 : index
    %1297 = vector.load %arg11[%c6_1003, %c22_1004] : memref<12x24xf32, #tpu.memory_space<vmem>>, vector<3x1xf32>
    tpu.vector_store %arg11[%c6_1003, %c22_1004], %1296 {strides = array<i32>} : memref<12x24xf32, #tpu.memory_space<vmem>>, vector<3x1xf32>,
    %c0_1005 = arith.constant 0 : index
    %c22_1006 = arith.constant 22 : index
    %1298 = vector.load %arg10[%c0_1005, %c22_1006] : memref<3x24xf32, #tpu.memory_space<vmem>>, vector<1x1xf32>
    %c0_1007 = arith.constant 0 : index
    %c20_1008 = arith.constant 20 : index
    %1299 = vector.load %arg10[%c0_1007, %c20_1008] : memref<3x24xf32, #tpu.memory_space<vmem>>, vector<1x1xf32>
    %1300 = arith.subf %1298, %1299 : vector<1x1xf32>
    %c1_1009 = arith.constant 1 : index
    %c22_1010 = arith.constant 22 : index
    %1301 = vector.load %arg10[%c1_1009, %c22_1010] : memref<3x24xf32, #tpu.memory_space<vmem>>, vector<1x1xf32>
    %c1_1011 = arith.constant 1 : index
    %c20_1012 = arith.constant 20 : index
    %1302 = vector.load %arg10[%c1_1011, %c20_1012] : memref<3x24xf32, #tpu.memory_space<vmem>>, vector<1x1xf32>
    %1303 = arith.subf %1301, %1302 : vector<1x1xf32>
    %c2_1013 = arith.constant 2 : index
    %c22_1014 = arith.constant 22 : index
    %1304 = vector.load %arg10[%c2_1013, %c22_1014] : memref<3x24xf32, #tpu.memory_space<vmem>>, vector<1x1xf32>
    %c2_1015 = arith.constant 2 : index
    %c20_1016 = arith.constant 20 : index
    %1305 = vector.load %arg10[%c2_1015, %c20_1016] : memref<3x24xf32, #tpu.memory_space<vmem>>, vector<1x1xf32>
    %1306 = arith.subf %1304, %1305 : vector<1x1xf32>
    %1307 = vector.broadcast %1300 : vector<1x1xf32> to vector<3x1xf32>
    %1308 = arith.mulf %1259, %1307 : vector<3x1xf32>
    %1309 = vector.broadcast %1303 : vector<1x1xf32> to vector<3x1xf32>
    %1310 = arith.mulf %1260, %1309 : vector<3x1xf32>
    %1311 = arith.addf %1308, %1310 : vector<3x1xf32>
    %1312 = vector.broadcast %1306 : vector<1x1xf32> to vector<3x1xf32>
    %1313 = arith.mulf %1261, %1312 : vector<3x1xf32>
    %1314 = arith.addf %1311, %1313 : vector<3x1xf32>
    %c9_1017 = arith.constant 9 : index
    %c20_1018 = arith.constant 20 : index
    %1315 = vector.load %arg11[%c9_1017, %c20_1018] : memref<12x24xf32, #tpu.memory_space<vmem>>, vector<3x1xf32>
    %1316 = arith.addf %1314, %1315 : vector<3x1xf32>
    %c9_1019 = arith.constant 9 : index
    %c22_1020 = arith.constant 22 : index
    %1317 = vector.load %arg11[%c9_1019, %c22_1020] : memref<12x24xf32, #tpu.memory_space<vmem>>, vector<3x1xf32>
    tpu.vector_store %arg11[%c9_1019, %c22_1020], %1316 {strides = array<i32>} : memref<12x24xf32, #tpu.memory_space<vmem>>, vector<3x1xf32>,
    %c0_1021 = arith.constant 0 : index
    %c21_1022 = arith.constant 21 : index
    %1318 = vector.load %arg11[%c0_1021, %c21_1022] : memref<12x24xf32, #tpu.memory_space<vmem>>, vector<3x1xf32>
    %c3_1023 = arith.constant 3 : index
    %c21_1024 = arith.constant 21 : index
    %1319 = vector.load %arg11[%c3_1023, %c21_1024] : memref<12x24xf32, #tpu.memory_space<vmem>>, vector<3x1xf32>
    %c6_1025 = arith.constant 6 : index
    %c21_1026 = arith.constant 21 : index
    %1320 = vector.load %arg11[%c6_1025, %c21_1026] : memref<12x24xf32, #tpu.memory_space<vmem>>, vector<3x1xf32>
    %c0_1027 = arith.constant 0 : index
    %c23 = arith.constant 23 : index
    %1321 = vector.load %arg2[%c0_1027, %c23] : memref<9x24xf32, #tpu.memory_space<vmem>>, vector<1x1xf32>
    %1322 = vector.broadcast %1321 : vector<1x1xf32> to vector<3x1xf32>
    %1323 = arith.mulf %1318, %1322 : vector<3x1xf32>
    %c1_1028 = arith.constant 1 : index
    %c23_1029 = arith.constant 23 : index
    %1324 = vector.load %arg2[%c1_1028, %c23_1029] : memref<9x24xf32, #tpu.memory_space<vmem>>, vector<1x1xf32>
    %1325 = vector.broadcast %1324 : vector<1x1xf32> to vector<3x1xf32>
    %1326 = arith.mulf %1319, %1325 : vector<3x1xf32>
    %1327 = arith.addf %1323, %1326 : vector<3x1xf32>
    %c2_1030 = arith.constant 2 : index
    %c23_1031 = arith.constant 23 : index
    %1328 = vector.load %arg2[%c2_1030, %c23_1031] : memref<9x24xf32, #tpu.memory_space<vmem>>, vector<1x1xf32>
    %1329 = vector.broadcast %1328 : vector<1x1xf32> to vector<3x1xf32>
    %1330 = arith.mulf %1320, %1329 : vector<3x1xf32>
    %1331 = arith.addf %1327, %1330 : vector<3x1xf32>
    %c0_1032 = arith.constant 0 : index
    %c23_1033 = arith.constant 23 : index
    %1332 = vector.load %arg11[%c0_1032, %c23_1033] : memref<12x24xf32, #tpu.memory_space<vmem>>, vector<3x1xf32>
    tpu.vector_store %arg11[%c0_1032, %c23_1033], %1331 {strides = array<i32>} : memref<12x24xf32, #tpu.memory_space<vmem>>, vector<3x1xf32>,
    %c3_1034 = arith.constant 3 : index
    %c23_1035 = arith.constant 23 : index
    %1333 = vector.load %arg2[%c3_1034, %c23_1035] : memref<9x24xf32, #tpu.memory_space<vmem>>, vector<1x1xf32>
    %1334 = vector.broadcast %1333 : vector<1x1xf32> to vector<3x1xf32>
    %1335 = arith.mulf %1318, %1334 : vector<3x1xf32>
    %c4_1036 = arith.constant 4 : index
    %c23_1037 = arith.constant 23 : index
    %1336 = vector.load %arg2[%c4_1036, %c23_1037] : memref<9x24xf32, #tpu.memory_space<vmem>>, vector<1x1xf32>
    %1337 = vector.broadcast %1336 : vector<1x1xf32> to vector<3x1xf32>
    %1338 = arith.mulf %1319, %1337 : vector<3x1xf32>
    %1339 = arith.addf %1335, %1338 : vector<3x1xf32>
    %c5_1038 = arith.constant 5 : index
    %c23_1039 = arith.constant 23 : index
    %1340 = vector.load %arg2[%c5_1038, %c23_1039] : memref<9x24xf32, #tpu.memory_space<vmem>>, vector<1x1xf32>
    %1341 = vector.broadcast %1340 : vector<1x1xf32> to vector<3x1xf32>
    %1342 = arith.mulf %1320, %1341 : vector<3x1xf32>
    %1343 = arith.addf %1339, %1342 : vector<3x1xf32>
    %c3_1040 = arith.constant 3 : index
    %c23_1041 = arith.constant 23 : index
    %1344 = vector.load %arg11[%c3_1040, %c23_1041] : memref<12x24xf32, #tpu.memory_space<vmem>>, vector<3x1xf32>
    tpu.vector_store %arg11[%c3_1040, %c23_1041], %1343 {strides = array<i32>} : memref<12x24xf32, #tpu.memory_space<vmem>>, vector<3x1xf32>,
    %c6_1042 = arith.constant 6 : index
    %c23_1043 = arith.constant 23 : index
    %1345 = vector.load %arg2[%c6_1042, %c23_1043] : memref<9x24xf32, #tpu.memory_space<vmem>>, vector<1x1xf32>
    %1346 = vector.broadcast %1345 : vector<1x1xf32> to vector<3x1xf32>
    %1347 = arith.mulf %1318, %1346 : vector<3x1xf32>
    %c7_1044 = arith.constant 7 : index
    %c23_1045 = arith.constant 23 : index
    %1348 = vector.load %arg2[%c7_1044, %c23_1045] : memref<9x24xf32, #tpu.memory_space<vmem>>, vector<1x1xf32>
    %1349 = vector.broadcast %1348 : vector<1x1xf32> to vector<3x1xf32>
    %1350 = arith.mulf %1319, %1349 : vector<3x1xf32>
    %1351 = arith.addf %1347, %1350 : vector<3x1xf32>
    %c8_1046 = arith.constant 8 : index
    %c23_1047 = arith.constant 23 : index
    %1352 = vector.load %arg2[%c8_1046, %c23_1047] : memref<9x24xf32, #tpu.memory_space<vmem>>, vector<1x1xf32>
    %1353 = vector.broadcast %1352 : vector<1x1xf32> to vector<3x1xf32>
    %1354 = arith.mulf %1320, %1353 : vector<3x1xf32>
    %1355 = arith.addf %1351, %1354 : vector<3x1xf32>
    %c6_1048 = arith.constant 6 : index
    %c23_1049 = arith.constant 23 : index
    %1356 = vector.load %arg11[%c6_1048, %c23_1049] : memref<12x24xf32, #tpu.memory_space<vmem>>, vector<3x1xf32>
    tpu.vector_store %arg11[%c6_1048, %c23_1049], %1355 {strides = array<i32>} : memref<12x24xf32, #tpu.memory_space<vmem>>, vector<3x1xf32>,
    %c0_1050 = arith.constant 0 : index
    %c23_1051 = arith.constant 23 : index
    %1357 = vector.load %arg10[%c0_1050, %c23_1051] : memref<3x24xf32, #tpu.memory_space<vmem>>, vector<1x1xf32>
    %c0_1052 = arith.constant 0 : index
    %c21_1053 = arith.constant 21 : index
    %1358 = vector.load %arg10[%c0_1052, %c21_1053] : memref<3x24xf32, #tpu.memory_space<vmem>>, vector<1x1xf32>
    %1359 = arith.subf %1357, %1358 : vector<1x1xf32>
    %c1_1054 = arith.constant 1 : index
    %c23_1055 = arith.constant 23 : index
    %1360 = vector.load %arg10[%c1_1054, %c23_1055] : memref<3x24xf32, #tpu.memory_space<vmem>>, vector<1x1xf32>
    %c1_1056 = arith.constant 1 : index
    %c21_1057 = arith.constant 21 : index
    %1361 = vector.load %arg10[%c1_1056, %c21_1057] : memref<3x24xf32, #tpu.memory_space<vmem>>, vector<1x1xf32>
    %1362 = arith.subf %1360, %1361 : vector<1x1xf32>
    %c2_1058 = arith.constant 2 : index
    %c23_1059 = arith.constant 23 : index
    %1363 = vector.load %arg10[%c2_1058, %c23_1059] : memref<3x24xf32, #tpu.memory_space<vmem>>, vector<1x1xf32>
    %c2_1060 = arith.constant 2 : index
    %c21_1061 = arith.constant 21 : index
    %1364 = vector.load %arg10[%c2_1060, %c21_1061] : memref<3x24xf32, #tpu.memory_space<vmem>>, vector<1x1xf32>
    %1365 = arith.subf %1363, %1364 : vector<1x1xf32>
    %1366 = vector.broadcast %1359 : vector<1x1xf32> to vector<3x1xf32>
    %1367 = arith.mulf %1318, %1366 : vector<3x1xf32>
    %1368 = vector.broadcast %1362 : vector<1x1xf32> to vector<3x1xf32>
    %1369 = arith.mulf %1319, %1368 : vector<3x1xf32>
    %1370 = arith.addf %1367, %1369 : vector<3x1xf32>
    %1371 = vector.broadcast %1365 : vector<1x1xf32> to vector<3x1xf32>
    %1372 = arith.mulf %1320, %1371 : vector<3x1xf32>
    %1373 = arith.addf %1370, %1372 : vector<3x1xf32>
    %c9_1062 = arith.constant 9 : index
    %c21_1063 = arith.constant 21 : index
    %1374 = vector.load %arg11[%c9_1062, %c21_1063] : memref<12x24xf32, #tpu.memory_space<vmem>>, vector<3x1xf32>
    %1375 = arith.addf %1373, %1374 : vector<3x1xf32>
    %c9_1064 = arith.constant 9 : index
    %c23_1065 = arith.constant 23 : index
    %1376 = vector.load %arg11[%c9_1064, %c23_1065] : memref<12x24xf32, #tpu.memory_space<vmem>>, vector<3x1xf32>
    tpu.vector_store %arg11[%c9_1064, %c23_1065], %1375 {strides = array<i32>} : memref<12x24xf32, #tpu.memory_space<vmem>>, vector<3x1xf32>,
    %c9_1066 = arith.constant 9 : index
    %c0_1067 = arith.constant 0 : index
    %1377 = vector.load %arg11[%c9_1066, %c0_1067] : memref<12x24xf32, #tpu.memory_space<vmem>>, vector<3x24xf32>
    %c0_1068 = arith.constant 0 : index
    %c0_1069 = arith.constant 0 : index
    %1378 = vector.load %arg11[%c0_1068, %c0_1069] : memref<12x24xf32, #tpu.memory_space<vmem>>, vector<3x24xf32>
    %c0_1070 = arith.constant 0 : index
    %c0_1071 = arith.constant 0 : index
    %1379 = vector.load %arg10[%c0_1070, %c0_1071] : memref<3x24xf32, #tpu.memory_space<vmem>>, vector<1x24xf32>
    %1380 = vector.broadcast %1379 : vector<1x24xf32> to vector<3x24xf32>
    %1381 = arith.mulf %1378, %1380 : vector<3x24xf32>
    %c3_1072 = arith.constant 3 : index
    %c0_1073 = arith.constant 0 : index
    %1382 = vector.load %arg11[%c3_1072, %c0_1073] : memref<12x24xf32, #tpu.memory_space<vmem>>, vector<3x24xf32>
    %c1_1074 = arith.constant 1 : index
    %c0_1075 = arith.constant 0 : index
    %1383 = vector.load %arg10[%c1_1074, %c0_1075] : memref<3x24xf32, #tpu.memory_space<vmem>>, vector<1x24xf32>
    %1384 = vector.broadcast %1383 : vector<1x24xf32> to vector<3x24xf32>
    %1385 = arith.mulf %1382, %1384 : vector<3x24xf32>
    %1386 = arith.addf %1381, %1385 : vector<3x24xf32>
    %c6_1076 = arith.constant 6 : index
    %c0_1077 = arith.constant 0 : index
    %1387 = vector.load %arg11[%c6_1076, %c0_1077] : memref<12x24xf32, #tpu.memory_space<vmem>>, vector<3x24xf32>
    %c2_1078 = arith.constant 2 : index
    %c0_1079 = arith.constant 0 : index
    %1388 = vector.load %arg10[%c2_1078, %c0_1079] : memref<3x24xf32, #tpu.memory_space<vmem>>, vector<1x24xf32>
    %1389 = vector.broadcast %1388 : vector<1x24xf32> to vector<3x24xf32>
    %1390 = arith.mulf %1387, %1389 : vector<3x24xf32>
    %1391 = arith.addf %1386, %1390 : vector<3x24xf32>
    %1392 = arith.subf %1377, %1391 : vector<3x24xf32>
    %c9_1080 = arith.constant 9 : index
    %c0_1081 = arith.constant 0 : index
    %1393 = vector.load %arg11[%c9_1080, %c0_1081] : memref<12x24xf32, #tpu.memory_space<vmem>>, vector<3x24xf32>
    tpu.vector_store %arg11[%c9_1080, %c0_1081], %1392 {strides = array<i32>} : memref<12x24xf32, #tpu.memory_space<vmem>>, vector<3x24xf32>,
    %c0_1082 = arith.constant 0 : index
    %c0_1083 = arith.constant 0 : index
    %1394 = vector.load %arg11[%c0_1082, %c0_1083] : memref<12x24xf32, #tpu.memory_space<vmem>>, vector<12x24xf32>
    %c0_1084 = arith.constant 0 : index
    %c0_1085 = arith.constant 0 : index
    %1395 = vector.load %arg8[%c0_1084, %c0_1085] : memref<24x256xf32, #tpu.memory_space<vmem>>, vector<24x256xf32>
    %cst_1086 = arith.constant dense<0.000000e+00> : vector<12x256xf32>
    %1396 = tpu.matmul %1394, %1395, %cst_1086 {dimension_numbers = #tpu.dot_dimension_numbers<[1], [0], [0], [1], [0, 0, 1, 1], [], []>} : vector<12x24xf32>, vector<24x256xf32>, vector<12x256xf32> -> vector<12x256xf32>
    %1397 = vector.extract_strided_slice %1396 {offsets = [0, 0], sizes = [3, 256], strides = [1, 1]} : vector<12x256xf32> to vector<3x256xf32>
    %1398 = vector.extract_strided_slice %8 {offsets = [0, 0], sizes = [1, 256], strides = [1, 1]} : vector<3x256xf32> to vector<1x256xf32>
    %1399 = vector.broadcast %1398 : vector<1x256xf32> to vector<3x256xf32>
    %1400 = arith.mulf %1397, %1399 : vector<3x256xf32>
    %1401 = vector.extract_strided_slice %1396 {offsets = [3, 0], sizes = [3, 256], strides = [1, 1]} : vector<12x256xf32> to vector<3x256xf32>
    %1402 = vector.extract_strided_slice %8 {offsets = [1, 0], sizes = [1, 256], strides = [1, 1]} : vector<3x256xf32> to vector<1x256xf32>
    %1403 = vector.broadcast %1402 : vector<1x256xf32> to vector<3x256xf32>
    %1404 = arith.mulf %1401, %1403 : vector<3x256xf32>
    %1405 = arith.addf %1400, %1404 : vector<3x256xf32>
    %1406 = vector.extract_strided_slice %1396 {offsets = [6, 0], sizes = [3, 256], strides = [1, 1]} : vector<12x256xf32> to vector<3x256xf32>
    %1407 = vector.extract_strided_slice %8 {offsets = [2, 0], sizes = [1, 256], strides = [1, 1]} : vector<3x256xf32> to vector<1x256xf32>
    %1408 = vector.broadcast %1407 : vector<1x256xf32> to vector<3x256xf32>
    %1409 = arith.mulf %1406, %1408 : vector<3x256xf32>
    %1410 = arith.addf %1405, %1409 : vector<3x256xf32>
    %1411 = vector.extract_strided_slice %1396 {offsets = [9, 0], sizes = [3, 256], strides = [1, 1]} : vector<12x256xf32> to vector<3x256xf32>
    %1412 = arith.addf %1410, %1411 : vector<3x256xf32>
    %c0_1087 = arith.constant 0 : index
    %c0_1088 = arith.constant 0 : index
    %1413 = vector.load %arg3[%c0_1087, %c0_1088] : memref<3x1xf32, #tpu.memory_space<vmem>>, vector<3x1xf32>
    %1414 = vector.broadcast %1413 : vector<3x1xf32> to vector<3x256xf32>
    %1415 = arith.addf %1412, %1414 : vector<3x256xf32>
    %c0_1089 = arith.constant 0 : index
    %c0_1090 = arith.constant 0 : index
    %1416 = vector.load %arg9[%c0_1089, %c0_1090] : memref<3x256xf32, #tpu.memory_space<vmem>>, vector<3x256xf32>
    tpu.vector_store %arg9[%c0_1089, %c0_1090], %1415 {strides = array<i32>} : memref<3x256xf32, #tpu.memory_space<vmem>>, vector<3x256xf32>,
    return
  }
}

</mosaic_0001>

<bundles_post_ra>
// kernel: mul.51
= control target key start
LH: loop header
LB: loop body
LE: loop exit
PB: predicated region body
PF: predicated region fallthrough
CT: control target
= control target key end

     0   :  { %s634_s18 = smov 120   ;;  %s635_s19 = smov 123   ;;  %vm101_vm0 = vcmask 15360   ;;  %vm95_vm1 = vcmask 23552   ;;  %vm105_vm2 = vcmask 7168   ;;  %vm108_vm3 = vcmask 1048560   ;;  %s790_s0 = inlined_call_operand.vmem [shape: f32[23,3,3], index: 0, kind: input, shape index: {}]   ;;  %s791_s1 = inlined_call_operand.vmem [shape: f32[207], index: 1, kind: output, shape index: {}]  }
   0x1   :  { %v553_v0 = vld [vmem:[%s790_s0 + $0x34] sm:$0xf]  ;;  %v552_v1 = vld [vmem:[%s790_s0 + $0x38] sm:$0xf]  ;;  %v555_v2 = vld [vmem:[%s790_s0 + $0x2c] sm:$0xf] }
   0x2   :  { %43 = vst [vmem:[#allocation1 + $0x68] sm:$0xf] %v553_v0  ;;  %v554_v3 = vld [vmem:[%s790_s0 + $0x30] sm:$0xf]  ;;  %v556_v4 = vld [vmem:[%s790_s0 + $0x28] sm:$0xf] }
   0x3   :  { %39 = vst [vmem:[#allocation1 + $0x70] sm:$0xf] %v552_v1  ;;  %v557_v5 = vld [vmem:[%s790_s0 + $0x24] sm:$0xf]  ;;  %v558_v8 = vld [vmem:[%s790_s0 + $0x20] sm:$0xf] }
   0x4   :  { %51 = vst [vmem:[#allocation1 + $0x58] sm:$0xf] %v555_v2  ;;  %s636_s22 = smov 114   ;;  %v544_v14 = vld [vmem:[%s790_s0 + $0x58] sm:$0xf]  ;;  %s637_s25 = smov 117  }
   0x5   :  { %47 = vst [vmem:[#allocation1 + $0x60] sm:$0xf] %v554_v3  ;;  %s638_s26 = smov 126   ;;  %s639_s27 = smov 111   ;;  %v559_v18 = vld [vmem:[%s790_s0 + $0x1c] sm:$0xf] }
   0x6   :  { %55 = vst [vmem:[#allocation1 + $0x50] sm:$0xf] %v556_v4  ;;  %s640_s30 = smov 105   ;;  %s641_s2 = smov 108   ;;  %v545_v22 = vld [vmem:[%s790_s0 + $0x54] sm:$0xf] }
   0x7   :  { %59 = vst [vmem:[#allocation1 + $0x48] sm:$0xf] %v557_v5  ;;  %s642_s3 = smov 102   ;;  %s643_s6 = smov 96   ;;  %v560_v26 = vld [vmem:[%s790_s0 + $0x18] sm:$0xf] }
   0x8   :  { %63 = vst [vmem:[#allocation1 + $0x40] sm:$0xf] %v558_v8  ;;  %s644_s7 = smov 99   ;;  %s645_s8 = smov 93   ;;  %v546_v30 = vld [vmem:[%s790_s0 + $0x50] sm:$0xf] }
   0x9   :  { %v117_v6 = vld [vmem:[#allocation1 + $0x69] sm:$0x1]   ;;  %v111_v7 = vld [vmem:[#allocation1 + $0x6a] sm:$0x1]   ;;  %v123_v12 = vld [vmem:[#allocation1 + $0x68] sm:$0x1]  }
   0xa   :  { %118 = vrot.lane.b32.xlu1 %v117_v6, %s634_s18  ;;  %112 = vrot.lane.b32.xlu0 %v111_v7, %s635_s19  ;;  %v98_v9 = vld [vmem:[#allocation1 + $0x70] sm:$0x1]   ;;  %7 = vst [vmem:[#allocation1 + $0xb0] sm:$0xf] %v544_v14  ;;  %s646_s11 = smov 87   ;;  %s647_s12 = smov 90  }
   0xb   :  { %v100_v10 = vld [vmem:[#allocation1 + $0x70] sm:$0x1]   ;;  %v147_v16 = vld [vmem:[#allocation1 + $0x5a] sm:$0x1]   ;;  %v153_v19 = vld [vmem:[#allocation1 + $0x59] sm:$0x1]  }
   0xc   :  { %v129_v11 = vld [vmem:[#allocation1 + $0x62] sm:$0x1]   ;;  %v102_v13 = vsel %vm101_vm0, %v100_v10, %v98_v9  ;;  %v135_v15 = vld [vmem:[#allocation1 + $0x61] sm:$0x1]   ;;  %v141_v17 = vld [vmem:[#allocation1 + $0x60] sm:$0x1]  }
   0xd   :  { %130 = vrot.lane.b32.xlu2 %v129_v11, %s636_s22  ;;  %67 = vst [vmem:[#allocation1 + $0x38] sm:$0xf] %v559_v18  ;;  %v165_v20 = vld [vmem:[#allocation1 + $0x52] sm:$0x1]   ;;  %v159_v21 = vld [vmem:[#allocation1 + $0x58] sm:$0x1]  }
   0xe   :  { %v171_v23 = vld [vmem:[#allocation1 + $0x51] sm:$0x1]   ;;  %11 = vst [vmem:[#allocation1 + $0xa8] sm:$0xf] %v545_v22  ;;  %v183_v24 = vld [vmem:[#allocation1 + $0x4a] sm:$0x1]  }
   0xf   :  { %v177_v25 = vld [vmem:[#allocation1 + $0x50] sm:$0x1]   ;;  %v189_v27 = vld [vmem:[#allocation1 + $0x49] sm:$0x1]   ;;  %71 = vst [vmem:[#allocation1 + $0x30] sm:$0xf] %v560_v26 }
  0x10   :  { %s648_s13 = smov 84   ;;  %v201_v28 = vld [vmem:[#allocation1 + $0x42] sm:$0x1]   ;;  %v195_v29 = vld [vmem:[#allocation1 + $0x48] sm:$0x1]   ;;  %s649_s16 = smov 78  }
  0x11   :  { %s650_s17 = smov 81   ;;  %v207_v31 = vld [vmem:[#allocation1 + $0xb2] sm:$0x1]   ;;  %15 = vst [vmem:[#allocation1 + $0xa0] sm:$0xf] %v546_v30  ;;  %s651_s18 = smov 76  }
  0x12   :  { %124 = vrot.lane.b32.xlu1 %v123_v12, %s637_s25  ;;  %103 = vrot.lane.b32.xlu0 %v102_v13, %s638_s26  ;;  %v214_v32 = vld [vmem:[#allocation1 + $0x41] sm:$0x1]   ;;  %v220_v33 = vld [vmem:[#allocation1 + $0xb1] sm:$0x1]   ;;  %v561_v34 = vld [vmem:[%s790_s0 + $0x14] sm:$0xf] }
  0x13   :  { %s652_s21 = smov 75   ;;  %s653_s22 = smov 73   ;;  %v227_v35 = vld [vmem:[#allocation1 + $0x40] sm:$0x1]   ;;  %75 = vst [vmem:[#allocation1 + $0x28] sm:$0xf] %v561_v34 }
  0x14   :  { %s654_s23 = smov 72   ;;  %v233_v36 = vld [vmem:[#allocation1 + $0xb0] sm:$0x1]   ;;  %v240_v37 = vld [vmem:[#allocation1 + $0x3a] sm:$0x1]   ;;  %s655_s26 = smov 70  }
  0x15   :  { %136 = vrot.lane.b32.xlu2 %v135_v15, %s639_s27  ;;  %v547_v38 = vld [vmem:[%s790_s0 + $0x4c] sm:$0xf]  ;;  %s656_s27 = smov 69   ;;  %v246_v39 = vld [vmem:[#allocation1 + $0xaa] sm:$0x1]   ;;  %s657_s28 = smov 67  }
  0x16   :  { %19 = vst [vmem:[#allocation1 + $0x98] sm:$0xf] %v547_v38  ;;  %v253_v40 = vld [vmem:[#allocation1 + $0x39] sm:$0x1]   ;;  %v259_v41 = vld [vmem:[#allocation1 + $0xa9] sm:$0x1]  }
  0x17   :  { %v562_v42 = vld [vmem:[%s790_s0 + $0x10] sm:$0xf]  ;;  %v266_v43 = vld [vmem:[#allocation1 + $0x38] sm:$0x1]   ;;  %s660_s4 = smov 63   ;;  %s663_s9 = smov 58  }
  0x18   :  { %79 = vst [vmem:[#allocation1 + $0x20] sm:$0xf] %v562_v42  ;;  %v272_v44 = vld [vmem:[#allocation1 + $0xa8] sm:$0x1]   ;;  %v279_v45 = vld [vmem:[#allocation1 + $0x32] sm:$0x1]  }
  0x19   :  { %v548_v46 = vld [vmem:[%s790_s0 + $0x48] sm:$0xf]  ;;  %v292_v48 = vld [vmem:[#allocation1 + $0x31] sm:$0x1]   ;;  %v563_v50 = vld [vmem:[%s790_s0 + $0xc] sm:$0xf] }
  0x1a   :  { %148 = vrot.lane.b32.xlu1 %v147_v16, %s640_s30  ;;  %142 = vrot.lane.b32.xlu0 %v141_v17, %s641_s2  ;;  %s658_s2 = smov 66   ;;  %v285_v47 = vld [vmem:[#allocation1 + $0xa2] sm:$0x1]   ;;  %23 = vst [vmem:[#allocation1 + $0x90] sm:$0xf] %v548_v46  ;;  %vm114_vm4 = vcmask 1032152  }
  0x1b   :  { %v298_v49 = vld [vmem:[#allocation1 + $0xa1] sm:$0x1]   ;;  %v305_v51 = vld [vmem:[#allocation1 + $0x30] sm:$0x1]   ;;  %83 = vst [vmem:[#allocation1 + $0x18] sm:$0xf] %v563_v50 }
  0x1c   :  { %v92_v52 = vld [vmem:[%s790_s0] sm:$0xf]  ;;  %v311_v53 = vld [vmem:[#allocation1 + $0xa0] sm:$0x1]   ;;  %v318_v54 = vld [vmem:[#allocation1 + $0x2a] sm:$0x1]  }
  0x1d   :  { %154 = vrot.lane.b32.xlu2 %v153_v19, %s642_s3  ;;  %s659_s3 = smov 64   ;;  %93 = vst [vmem:[#allocation1] sm:$0xf] %v92_v52  ;;  %v324_v55 = vld [vmem:[#allocation1 + $0x9a] sm:$0x1]   ;;  %vm120_vm5 = vcmask 1007552  }
  0x1e   :  { %v549_v56 = vld [vmem:[%s790_s0 + $0x44] sm:$0xf]  ;;  %v331_v58 = vld [vmem:[#allocation1 + $0x29] sm:$0x1]   ;;  %v337_v59 = vld [vmem:[#allocation1 + $0x99] sm:$0x1]  }
  0x1f   :  { %27 = vst [vmem:[#allocation1 + $0x88] sm:$0xf] %v549_v56  ;;  %v344_v61 = vld [vmem:[#allocation1 + $0x28] sm:$0x1]   ;;  %v564_v62 = vld [vmem:[%s790_s0 + $0x8] sm:$0xf] }
  0x20   :  { %87 = vst [vmem:[#allocation1 + $0x10] sm:$0xf] %v564_v62  ;;  %v350_v63 = vld [vmem:[#allocation1 + $0x98] sm:$0x1]   ;;  %v357_v0 = vld [vmem:[#allocation1 + $0x22] sm:$0x1]  }
  0x21   :  { %v363_v2 = vld [vmem:[#allocation1 + $0x92] sm:$0x1]   ;;  %v550_v3 = vld [vmem:[%s790_s0 + $0x40] sm:$0xf]  ;;  %v370_v4 = vld [vmem:[#allocation1 + $0x21] sm:$0x1]  }
  0x22   :  { %166 = vrot.lane.b32.xlu1 %v165_v20, %s643_s6  ;;  %160 = vrot.lane.b32.xlu0 %v159_v21, %s644_s7  ;;  %s661_s7 = smov 61   ;;  %31 = vst [vmem:[#allocation1 + $0x80] sm:$0xf] %v550_v3  ;;  %v376_v5 = vld [vmem:[#allocation1 + $0x91] sm:$0x1]   ;;  %vm132_vm6 = vcmask 958352  }
  0x23   :  { %v383_v7 = vld [vmem:[#allocation1 + $0x20] sm:$0x1]   ;;  %v565_v8 = vld [vmem:[%s790_s0 + $0x4] sm:$0xf]  ;;  %v389_v11 = vld [vmem:[#allocation1 + $0x90] sm:$0x1]  }
  0x24   :  { %v94_v57 = vld [vmem:[#allocation1] sm:$0x1]   ;;  %91 = vst [vmem:[#allocation1 + $0x8] sm:$0xf] %v565_v8  ;;  %v396_v12 = vld [vmem:[#allocation1 + $0x1a] sm:$0x1]  }
  0x25   :  { %172 = vrot.lane.b32.xlu2 %v171_v23, %s645_s8  ;;  %s662_s8 = smov 60   ;;  %96 = vst.msk [vmem:[#allocation0] sm:$0x1] %vm95_vm1, %v94_v57   ;;  %v551_v15 = vld [vmem:[%s790_s0 + $0x3c] sm:$0xf]  ;;  %s681_s0 = smov 31  }
  0x26   :  { %v402_v14 = vld [vmem:[#allocation1 + $0x8a] sm:$0x1]   ;;  %35 = vst [vmem:[#allocation1 + $0x78] sm:$0xf] %v551_v15  ;;  %vm126_vm7 = vcmask 982952   ;;  %vm138_vm8 = vcmask 933752  }
  0x27   :  { %v409_v18 = vld [vmem:[#allocation1 + $0x19] sm:$0x1]   ;;  %v415_v19 = vld [vmem:[#allocation1 + $0x89] sm:$0x1]   ;;  %vm144_vm9 = vcmask 909152   ;;  %vm150_vm10 = vcmask 884552  }
  0x28   :  { %v422_v21 = vld [vmem:[#allocation1 + $0x18] sm:$0x1]   ;;  %vm156_vm11 = vcmask 859952   ;;  %s684_s14 = smov 27   ;;  %vm210_vm12 = vcmask 646752   ;;  %s685_s15 = smov 25  }
  0x29   :  { %vm162_vm13 = vcmask 835352   ;;  %vm168_vm14 = vcmask 810752   ;;  %vm174_vm15 = vcmask 786152   ;;  %v448_v30 = vld [vmem:[#allocation1 + $0x11] sm:$0x1]   ;;  %s689_s19 = smov 19  }
  0x2a   :  { %184 = vrot.lane.b32.xlu1 %v183_v24, %s646_s11  ;;  %178 = vrot.lane.b32.xlu0 %v177_v25, %s647_s12  ;;  %s664_s12 = smov 57   ;;  %v428_v24 = vld [vmem:[#allocation1 + $0x88] sm:$0x1]   ;;  %v435_v25 = vld [vmem:[#allocation1 + $0x12] sm:$0x1]   ;;  %vm180_vm0 = vcmask 761552  }
  0x2b   :  { %vm186_vm1 = vcmask 736952   ;;  %s690_s20 = smov 18   ;;  %v487_v42 = vld [vmem:[#allocation1 + $0x9] sm:$0x1]   ;;  %s694_s24 = smov 12  }
  0x2c   :  { %s695_s25 = smov 10   ;;  %s699_s29 = smov 4  }
  0x2d   :  { %190 = vrot.lane.b32.xlu2 %v189_v27, %s648_s13  ;;  %s665_s13 = smov 55   ;;  %v441_v27 = vld [vmem:[#allocation1 + $0x82] sm:$0x1]   ;;  %s700_s30 = smov 3  }
  0x32   :  { %202 = vrot.lane.b32.xlu1 %v201_v28, %s649_s16  ;;  %196 = vrot.lane.b32.xlu0 %v195_v29, %s650_s17  ;;  %s666_s16 = smov 54   ;;  %s667_s17 = smov 52  }
  0x35   :  { %208 = vrot.lane.b32.xlu2 %v207_v31, %s651_s18  ;;  %s668_s18 = smov 51   ;;  %v454_v31 = vld [vmem:[#allocation1 + $0x81] sm:$0x1]  }
  0x3a   :  { %215 = vrot.lane.b32.xlu0 %v214_v32, %s652_s21  ;;  %221 = vrot.lane.b32.xlu1 %v220_v33, %s653_s22  ;;  %s669_s21 = smov 49   ;;  %s670_s22 = smov 48   ;;  %v461_v33 = vld [vmem:[#allocation1 + $0x10] sm:$0x1]  }
  0x3d   :  { %228 = vrot.lane.b32.xlu2 %v227_v35, %s654_s23  ;;  %s671_s23 = smov 46  }
  0x42   :  { %234 = vrot.lane.b32.xlu0 %v233_v36, %s655_s26  ;;  %241 = vrot.lane.b32.xlu1 %v240_v37, %s656_s27  ;;  %s672_s26 = smov 45   ;;  %s673_s27 = smov 43   ;;  %v467_v36 = vld [vmem:[#allocation1 + $0x80] sm:$0x1]   ;;  %v474_v37 = vld [vmem:[#allocation1 + $0xa] sm:$0x1]  }
  0x45   :  { %247 = vrot.lane.b32.xlu2 %v246_v39, %s657_s28  ;;  %s674_s28 = smov 42   ;;  %v480_v39 = vld [vmem:[#allocation1 + $0x7a] sm:$0x1]  }
  0x4a   :  { %254 = vrot.lane.b32.xlu0 %v253_v40, %s658_s2  ;;  %260 = vrot.lane.b32.xlu1 %v259_v41, %s659_s3  ;;  %s675_s2 = smov 40   ;;  %s676_s3 = smov 39  }
  0x4d   :  { %267 = vrot.lane.b32.xlu2 %v266_v43, %s660_s4  ;;  %s677_s4 = smov 37   ;;  %v493_v43 = vld [vmem:[#allocation1 + $0x79] sm:$0x1]  }
  0x52   :  { %273 = vrot.lane.b32.xlu0 %v272_v44, %s661_s7  ;;  %280 = vrot.lane.b32.xlu1 %v279_v45, %s662_s8  ;;  %s678_s7 = smov 36   ;;  %s679_s8 = smov 34   ;;  %v500_v45 = vld [vmem:[#allocation1 + $0x8] sm:$0x1]  }
  0x55   :  { %286 = vrot.lane.b32.xlu2 %v285_v47, %s663_s9  ;;  %s680_s9 = smov 33  }
  0x5a   :  { %293 = vrot.lane.b32.xlu0 %v292_v48, %s664_s12  ;;  %299 = vrot.lane.b32.xlu1 %v298_v49, %s665_s13  ;;  %s682_s12 = smov 30   ;;  %s683_s13 = smov 28   ;;  %v506_v48 = vld [vmem:[#allocation1 + $0x78] sm:$0x1]   ;;  %v513_v49 = vld [vmem:[#allocation1 + $0x2] sm:$0x1]  }
  0x5d   :  { %306 = vrot.lane.b32.xlu2 %v305_v51, %s666_s16  ;;  %s686_s16 = smov 24   ;;  %v519_v51 = vld [vmem:[#allocation1 + $0x72] sm:$0x1]  }
  0x62   :  { %312 = vrot.lane.b32.xlu0 %v311_v53, %s667_s17  ;;  %319 = vrot.lane.b32.xlu1 %v318_v54, %s668_s18  ;;  %s687_s17 = smov 22   ;;  %s688_s18 = smov 21   ;;  %v526_v54 = vld [vmem:[#allocation1 + $0x1] sm:$0x1]  }
  0x65   :  { %325 = vrot.lane.b32.xlu2 %v324_v55, %s669_s21  ;;  %s691_s21 = smov 16   ;;  %v532_v55 = vld [vmem:[#allocation1 + $0x71] sm:$0x1]  }
  0x67   :  { %v769_v60 = vpop.permute.xlu2 %130  }
  0x6a   :  { %332 = vrot.lane.b32.xlu0 %v331_v58, %s670_s22  ;;  %338 = vrot.lane.b32.xlu1 %v337_v59, %s671_s23  ;;  %s692_s22 = smov 15   ;;  %s693_s23 = smov 13  }
  0x6d   :  { %345 = vrot.lane.b32.xlu2 %v344_v61, %s672_s26  ;;  %s696_s26 = smov 9  }
  0x6f   :  { %v137_v1 = vpop.permute.xlu2 %136  }
  0x72   :  { %351 = vrot.lane.b32.xlu0 %v350_v63, %s673_s27  ;;  %358 = vrot.lane.b32.xlu1 %v357_v0, %s674_s28  ;;  %s697_s27 = smov 7   ;;  %s698_s28 = smov 6  }
  0x75   :  { %364 = vrot.lane.b32.xlu2 %v363_v2, %s675_s2  ;;  %s701_s2 = smov 1  }
  0x77   :  { %v155_v6 = vpop.permute.xlu2 %154  }
  0x7a   :  { %371 = vrot.lane.b32.xlu0 %v370_v4, %s676_s3  ;;  %377 = vrot.lane.b32.xlu1 %v376_v5, %s677_s4 }
  0x7c   :  { %v119_v9 = vpop.permute.xlu1 %118   ;;  %v113_v10 = vpop.permute.xlu0 %112  }
  0x7d   :  { %384 = vrot.lane.b32.xlu2 %v383_v7, %s678_s7 }
  0x7f   :  { %v780_v13 = vpop.permute.xlu2 %172  }
  0x82   :  { %390 = vrot.lane.b32.xlu0 %v389_v11, %s679_s8  ;;  %397 = vrot.lane.b32.xlu1 %v396_v12, %s680_s9 }
  0x84   :  { %v125_v16 = vpop.permute.xlu1 %124   ;;  %v104_v17 = vpop.permute.xlu0 %103  }
  0x85   :  { %107 = vst.msk [vmem:[#allocation0 + $0x1] sm:$0x1] %vm105_vm2, %v104_v17   ;;  %403 = vrot.lane.b32.xlu2 %v402_v14, %s681_s0  ;;  %vm192_vm2 = vcmask 712352  }
  0x86   :  { %109 = vst.msk [vmem:[#allocation0] sm:$0x1] %vm108_vm3, %v104_v17   ;;  %vm198_vm3 = vcmask 687752  }
  0x87   :  { %115 = vst.msk [vmem:[#allocation0] sm:$0x1] %vm114_vm4, %v113_v10   ;;  %v191_v20 = vpop.permute.xlu2 %190   ;;  %vm204_vm4 = vcmask 663152  }
  0x88   :  { %121 = vst.msk [vmem:[#allocation0] sm:$0x1] %vm120_vm5, %v119_v9   ;;  %vm217_vm5 = vcmask 638552  }
  0x89   :  { %127 = vst.msk [vmem:[#allocation0] sm:$0x1] %vm126_vm7, %v125_v16   ;;  %vm230_vm7 = vcmask 613952  }
  0x8a   :  { %410 = vrot.lane.b32.xlu0 %v409_v18, %s682_s12  ;;  %416 = vrot.lane.b32.xlu1 %v415_v19, %s683_s13  ;;  %133 = vst.msk [vmem:[#allocation0] sm:$0x1] %vm132_vm6, %v769_v60   ;;  %vm223_vm6 = vcmask 622152  }
  0x8b   :  { %139 = vst.msk [vmem:[#allocation0] sm:$0x1] %vm138_vm8, %v137_v1   ;;  %vm236_vm8 = vcmask 597552  }
  0x8c   :  { %v149_v22 = vpop.permute.xlu1 %148   ;;  %v143_v23 = vpop.permute.xlu0 %142  }
  0x8d   :  { %145 = vst.msk [vmem:[#allocation0] sm:$0x1] %vm144_vm9, %v143_v23   ;;  %423 = vrot.lane.b32.xlu2 %v422_v21, %s684_s14  ;;  %vm243_vm9 = vcmask 589352  }
  0x8e   :  { %151 = vst.msk [vmem:[#allocation0] sm:$0x1] %vm150_vm10, %v149_v22   ;;  %vm249_vm10 = vcmask 572952  }
  0x8f   :  { %157 = vst.msk [vmem:[#allocation0] sm:$0x1] %vm156_vm11, %v155_v6   ;;  %v209_v26 = vpop.permute.xlu2 %208   ;;  %vm256_vm11 = vcmask 564752  }
  0x90   :  { %212 = vst.msk [vmem:[#allocation0 + $0x1] sm:$0x1] %vm210_vm12, %v209_v26   ;;  %vm262_vm12 = vcmask 548352  }
  0x92   :  { %429 = vrot.lane.b32.xlu0 %v428_v24, %s685_s15  ;;  %436 = vrot.lane.b32.xlu1 %v435_v25, %s686_s16 }
  0x94   :  { %v167_v28 = vpop.permute.xlu1 %166   ;;  %v161_v29 = vpop.permute.xlu0 %160  }
  0x95   :  { %163 = vst.msk [vmem:[#allocation0] sm:$0x1] %vm162_vm13, %v161_v29   ;;  %442 = vrot.lane.b32.xlu2 %v441_v27, %s687_s17  ;;  %vm269_vm13 = vcmask 540152  }
  0x96   :  { %169 = vst.msk [vmem:[#allocation0] sm:$0x1] %vm168_vm14, %v167_v28   ;;  %vm275_vm14 = vcmask 523752  }
  0x97   :  { %175 = vst.msk [vmem:[#allocation0] sm:$0x1] %vm174_vm15, %v780_v13   ;;  %v229_v32 = vpop.permute.xlu2 %228   ;;  %vm282_vm15 = vcmask 515552  }
  0x9a   :  { %449 = vrot.lane.b32.xlu0 %v448_v30, %s688_s18  ;;  %455 = vrot.lane.b32.xlu1 %v454_v31, %s689_s19 }
  0x9c   :  { %v185_v34 = vpop.permute.xlu1 %184   ;;  %v179_v35 = vpop.permute.xlu0 %178  }
  0x9d   :  { %181 = vst.msk [vmem:[#allocation0] sm:$0x1] %vm180_vm0, %v179_v35   ;;  %462 = vrot.lane.b32.xlu2 %v461_v33, %s690_s20  ;;  %vm288_vm0 = vcmask 499152  }
  0x9e   :  { %187 = vst.msk [vmem:[#allocation0] sm:$0x1] %vm186_vm1, %v185_v34   ;;  %vm295_vm1 = vcmask 490952  }
  0x9f   :  { %193 = vst.msk [vmem:[#allocation0] sm:$0x1] %vm192_vm2, %v191_v20   ;;  %v248_v38 = vpop.permute.xlu2 %247   ;;  %vm301_vm2 = vcmask 474552  }
  0xa2   :  { %468 = vrot.lane.b32.xlu0 %v467_v36, %s691_s21  ;;  %475 = vrot.lane.b32.xlu1 %v474_v37, %s692_s22 }
  0xa4   :  { %v203_v40 = vpop.permute.xlu1 %202   ;;  %v197_v41 = vpop.permute.xlu0 %196  }
  0xa5   :  { %199 = vst.msk [vmem:[#allocation0] sm:$0x1] %vm198_vm3, %v197_v41   ;;  %481 = vrot.lane.b32.xlu2 %v480_v39, %s693_s23  ;;  %vm308_vm3 = vcmask 466352  }
  0xa6   :  { %205 = vst.msk [vmem:[#allocation0] sm:$0x1] %vm204_vm4, %v203_v40   ;;  %vm314_vm4 = vcmask 449952  }
  0xa7   :  { %v268_v44 = vpop.permute.xlu2 %267  }
  0xaa   :  { %488 = vrot.lane.b32.xlu0 %v487_v42, %s694_s24  ;;  %494 = vrot.lane.b32.xlu1 %v493_v43, %s695_s25 }
  0xac   :  { %v216_v46 = vpop.permute.xlu0 %215   ;;  %v222_v47 = vpop.permute.xlu1 %221  }
  0xad   :  { %218 = vst.msk [vmem:[#allocation0] sm:$0x1] %vm217_vm5, %v216_v46   ;;  %501 = vrot.lane.b32.xlu2 %v500_v45, %s696_s26  ;;  %vm321_vm5 = vcmask 441752  }
  0xae   :  { %225 = vst.msk [vmem:[#allocation0 + $0x1] sm:$0x1] %vm223_vm6, %v222_v47   ;;  %vm327_vm6 = vcmask 425352  }
  0xaf   :  { %231 = vst.msk [vmem:[#allocation0] sm:$0x1] %vm230_vm7, %v229_v32   ;;  %v287_v50 = vpop.permute.xlu2 %286   ;;  %vm334_vm7 = vcmask 417152  }
  0xb2   :  { %507 = vrot.lane.b32.xlu0 %v506_v48, %s697_s27  ;;  %514 = vrot.lane.b32.xlu1 %v513_v49, %s698_s28 }
  0xb4   :  { %v235_v52 = vpop.permute.xlu0 %234   ;;  %v242_v53 = vpop.permute.xlu1 %241  }
  0xb5   :  { %238 = vst.msk [vmem:[#allocation0 + $0x1] sm:$0x1] %vm236_vm8, %v235_v52   ;;  %520 = vrot.lane.b32.xlu2 %v519_v51, %s699_s29  ;;  %vm340_vm8 = vcmask 400752  }
  0xb6   :  { %244 = vst.msk [vmem:[#allocation0] sm:$0x1] %vm243_vm9, %v242_v53   ;;  %vm347_vm9 = vcmask 392552  }
  0xb7   :  { %251 = vst.msk [vmem:[#allocation0 + $0x1] sm:$0x1] %vm249_vm10, %v248_v38   ;;  %v307_v56 = vpop.permute.xlu2 %306   ;;  %vm353_vm10 = vcmask 376152  }
  0xba   :  { %527 = vrot.lane.b32.xlu0 %v526_v54, %s700_s30  ;;  %533 = vrot.lane.b32.xlu1 %v532_v55, %s701_s2 }
  0xbc   :  { %v255_v57 = vpop.permute.xlu0 %254   ;;  %v261_v58 = vpop.permute.xlu1 %260  }
  0xbd   :  { %257 = vst.msk [vmem:[#allocation0] sm:$0x1] %vm256_vm11, %v255_v57   ;;  %vm360_vm11 = vcmask 367952  }
  0xbe   :  { %264 = vst.msk [vmem:[#allocation0 + $0x1] sm:$0x1] %vm262_vm12, %v261_v58   ;;  %vm366_vm12 = vcmask 351552  }
  0xbf   :  { %270 = vst.msk [vmem:[#allocation0] sm:$0x1] %vm269_vm13, %v268_v44   ;;  %v326_v59 = vpop.permute.xlu2 %325   ;;  %vm373_vm13 = vcmask 343352  }
  0xc4   :  { %v274_v60 = vpop.permute.xlu0 %273   ;;  %v281_v61 = vpop.permute.xlu1 %280  }
  0xc5   :  { %277 = vst.msk [vmem:[#allocation0 + $0x1] sm:$0x1] %vm275_vm14, %v274_v60   ;;  %vm379_vm14 = vcmask 326952  }
  0xc6   :  { %283 = vst.msk [vmem:[#allocation0] sm:$0x1] %vm282_vm15, %v281_v61   ;;  %vm386_vm15 = vcmask 318752  }
  0xc7   :  { %290 = vst.msk [vmem:[#allocation0 + $0x1] sm:$0x1] %vm288_vm0, %v287_v50   ;;  %v346_v62 = vpop.permute.xlu2 %345   ;;  %vm392_vm0 = vcmask 302352  }
  0xcc   :  { %v294_v63 = vpop.permute.xlu0 %293   ;;  %v300_v0 = vpop.permute.xlu1 %299  }
  0xcd   :  { %296 = vst.msk [vmem:[#allocation0] sm:$0x1] %vm295_vm1, %v294_v63   ;;  %vm399_vm1 = vcmask 294152  }
  0xce   :  { %303 = vst.msk [vmem:[#allocation0 + $0x1] sm:$0x1] %vm301_vm2, %v300_v0   ;;  %vm405_vm2 = vcmask 277752  }
  0xcf   :  { %309 = vst.msk [vmem:[#allocation0] sm:$0x1] %vm308_vm3, %v307_v56   ;;  %v365_v1 = vpop.permute.xlu2 %364   ;;  %vm412_vm3 = vcmask 269552  }
  0xd4   :  { %v313_v2 = vpop.permute.xlu0 %312   ;;  %v320_v3 = vpop.permute.xlu1 %319  }
  0xd5   :  { %316 = vst.msk [vmem:[#allocation0 + $0x1] sm:$0x1] %vm314_vm4, %v313_v2   ;;  %vm418_vm4 = vcmask 253152  }
  0xd6   :  { %322 = vst.msk [vmem:[#allocation0] sm:$0x1] %vm321_vm5, %v320_v3   ;;  %vm425_vm5 = vcmask 244952  }
  0xd7   :  { %329 = vst.msk [vmem:[#allocation0 + $0x1] sm:$0x1] %vm327_vm6, %v326_v59   ;;  %v385_v4 = vpop.permute.xlu2 %384   ;;  %vm431_vm6 = vcmask 228552  }
  0xdc   :  { %v333_v5 = vpop.permute.xlu0 %332   ;;  %v339_v6 = vpop.permute.xlu1 %338  }
  0xdd   :  { %335 = vst.msk [vmem:[#allocation0] sm:$0x1] %vm334_vm7, %v333_v5   ;;  %vm438_vm7 = vcmask 220352  }
  0xde   :  { %342 = vst.msk [vmem:[#allocation0 + $0x1] sm:$0x1] %vm340_vm8, %v339_v6   ;;  %vm444_vm8 = vcmask 203952  }
  0xdf   :  { %348 = vst.msk [vmem:[#allocation0] sm:$0x1] %vm347_vm9, %v346_v62   ;;  %v404_v7 = vpop.permute.xlu2 %403   ;;  %vm451_vm9 = vcmask 195752  }
  0xe4   :  { %v352_v8 = vpop.permute.xlu0 %351   ;;  %v359_v9 = vpop.permute.xlu1 %358  }
  0xe5   :  { %355 = vst.msk [vmem:[#allocation0 + $0x1] sm:$0x1] %vm353_vm10, %v352_v8   ;;  %vm457_vm10 = vcmask 179352  }
  0xe6   :  { %361 = vst.msk [vmem:[#allocation0] sm:$0x1] %vm360_vm11, %v359_v9   ;;  %vm464_vm11 = vcmask 171152  }
  0xe7   :  { %368 = vst.msk [vmem:[#allocation0 + $0x1] sm:$0x1] %vm366_vm12, %v365_v1   ;;  %v424_v10 = vpop.permute.xlu2 %423   ;;  %vm470_vm12 = vcmask 154752  }
  0xec   :  { %v372_v11 = vpop.permute.xlu0 %371   ;;  %v378_v12 = vpop.permute.xlu1 %377  }
  0xed   :  { %374 = vst.msk [vmem:[#allocation0] sm:$0x1] %vm373_vm13, %v372_v11   ;;  %vm477_vm13 = vcmask 146552  }
  0xee   :  { %381 = vst.msk [vmem:[#allocation0 + $0x1] sm:$0x1] %vm379_vm14, %v378_v12   ;;  %vm483_vm14 = vcmask 130152  }
  0xef   :  { %387 = vst.msk [vmem:[#allocation0] sm:$0x1] %vm386_vm15, %v385_v4   ;;  %v443_v13 = vpop.permute.xlu2 %442   ;;  %vm490_vm15 = vcmask 121952  }
  0xf4   :  { %v391_v14 = vpop.permute.xlu0 %390   ;;  %v398_v15 = vpop.permute.xlu1 %397  }
  0xf5   :  { %394 = vst.msk [vmem:[#allocation0 + $0x1] sm:$0x1] %vm392_vm0, %v391_v14   ;;  %vm496_vm0 = vcmask 105552  }
  0xf6   :  { %400 = vst.msk [vmem:[#allocation0] sm:$0x1] %vm399_vm1, %v398_v15   ;;  %vm503_vm1 = vcmask 97352  }
  0xf7   :  { %407 = vst.msk [vmem:[#allocation0 + $0x1] sm:$0x1] %vm405_vm2, %v404_v7   ;;  %v463_v16 = vpop.permute.xlu2 %462   ;;  %vm509_vm2 = vcmask 80952  }
  0xfc   :  { %v411_v17 = vpop.permute.xlu0 %410   ;;  %v417_v18 = vpop.permute.xlu1 %416  }
  0xfd   :  { %413 = vst.msk [vmem:[#allocation0] sm:$0x1] %vm412_vm3, %v411_v17   ;;  %vm516_vm3 = vcmask 72752  }
  0xfe   :  { %420 = vst.msk [vmem:[#allocation0 + $0x1] sm:$0x1] %vm418_vm4, %v417_v18   ;;  %vm522_vm4 = vcmask 56352  }
  0xff   :  { %426 = vst.msk [vmem:[#allocation0] sm:$0x1] %vm425_vm5, %v424_v10   ;;  %v482_v19 = vpop.permute.xlu2 %481   ;;  %vm529_vm5 = vcmask 48152  }
 0x104   :  { %v430_v20 = vpop.permute.xlu0 %429   ;;  %v437_v21 = vpop.permute.xlu1 %436  }
 0x105   :  { %433 = vst.msk [vmem:[#allocation0 + $0x1] sm:$0x1] %vm431_vm6, %v430_v20   ;;  %vm535_vm6 = vcmask 31752  }
 0x106   :  { %439 = vst.msk [vmem:[#allocation0] sm:$0x1] %vm438_vm7, %v437_v21  }
 0x107   :  { %446 = vst.msk [vmem:[#allocation0 + $0x1] sm:$0x1] %vm444_vm8, %v443_v13   ;;  %v502_v22 = vpop.permute.xlu2 %501  }
 0x10c   :  { %v450_v23 = vpop.permute.xlu0 %449   ;;  %v456_v24 = vpop.permute.xlu1 %455  }
 0x10d   :  { %452 = vst.msk [vmem:[#allocation0] sm:$0x1] %vm451_vm9, %v450_v23  }
 0x10e   :  { %459 = vst.msk [vmem:[#allocation0 + $0x1] sm:$0x1] %vm457_vm10, %v456_v24  }
 0x10f   :  { %465 = vst.msk [vmem:[#allocation0] sm:$0x1] %vm464_vm11, %v463_v16   ;;  %v521_v25 = vpop.permute.xlu2 %520  }
 0x114   :  { %v469_v26 = vpop.permute.xlu0 %468   ;;  %v476_v27 = vpop.permute.xlu1 %475  }
 0x115   :  { %472 = vst.msk [vmem:[#allocation0 + $0x1] sm:$0x1] %vm470_vm12, %v469_v26  }
 0x116   :  { %478 = vst.msk [vmem:[#allocation0] sm:$0x1] %vm477_vm13, %v476_v27  }
 0x117   :  { %485 = vst.msk [vmem:[#allocation0 + $0x1] sm:$0x1] %vm483_vm14, %v482_v19  }
 0x11c   :  { %v489_v28 = vpop.permute.xlu0 %488   ;;  %v495_v29 = vpop.permute.xlu1 %494  }
 0x11d   :  { %491 = vst.msk [vmem:[#allocation0] sm:$0x1] %vm490_vm15, %v489_v28  }
 0x11e   :  { %498 = vst.msk [vmem:[#allocation0 + $0x1] sm:$0x1] %vm496_vm0, %v495_v29  }
 0x11f   :  { %504 = vst.msk [vmem:[#allocation0] sm:$0x1] %vm503_vm1, %v502_v22  }
 0x124   :  { %v508_v30 = vpop.permute.xlu0 %507   ;;  %v515_v31 = vpop.permute.xlu1 %514  }
 0x125   :  { %511 = vst.msk [vmem:[#allocation0 + $0x1] sm:$0x1] %vm509_vm2, %v508_v30  }
 0x126   :  { %517 = vst.msk [vmem:[#allocation0] sm:$0x1] %vm516_vm3, %v515_v31  }
 0x127   :  { %524 = vst.msk [vmem:[#allocation0 + $0x1] sm:$0x1] %vm522_vm4, %v521_v25  }
 0x12c   :  { %v528_v32 = vpop.permute.xlu0 %527   ;;  %v534_v33 = vpop.permute.xlu1 %533  }
 0x12d   :  { %530 = vst.msk [vmem:[#allocation0] sm:$0x1] %vm529_vm5, %v528_v32  }
 0x12e   :  { %537 = vst.msk [vmem:[#allocation0 + $0x1] sm:$0x1] %vm535_vm6, %v534_v33  }
 0x135   :  { %v540_v34 = vld [vmem:[#allocation0] sm:$0x3] }
 0x136   :  { %543 = vst [vmem:[%s791_s1] sm:$0x3] %v540_v34 }

// kernel: _forward_impl.1
= control target key start
LH: loop header
LB: loop body
LE: loop exit
PB: predicated region body
PF: predicated region fallthrough
CT: control target
= control target key end

     0   :  { %14 = vsyncpa [#allocation5], 0  ;;  %s6050_s0 = inlined_call_operand.vmem [shape: f32[3,32], index: 0, kind: input, shape index: {}]   ;;  %s6051_s1 = inlined_call_operand.vmem [shape: f32[3,640], index: 1, kind: input, shape index: {}]   ;;  %s6052_s2 = inlined_call_operand.vmem [shape: f32[9,24], index: 2, kind: input, shape index: {}]   ;;  %s6053_s3 = inlined_call_operand.vmem [shape: f32[3,1], index: 3, kind: input, shape index: {}]   ;;  %s6054_s4 = inlined_call_operand.vmem [shape: f32[32,256], index: 4, kind: input, shape index: {}]   ;;  %s6055_s5 = inlined_call_operand.hbm [shape: f32[640,256], index: 5, kind: input, shape index: {}]   ;;  %s6056_s6 = inlined_call_operand.vmem [shape: f32[3,256], index: 6, kind: input, shape index: {}]   ;;  %s6057_s7 = inlined_call_operand.vmem [shape: f32[256,24], index: 7, kind: input, shape index: {}]   ;;  %s6058_s8 = inlined_call_operand.vmem [shape: f32[24,256], index: 8, kind: input, shape index: {}]   ;;  %s6059_s9 = inlined_call_operand.hbm [shape: f32[3,256], index: 9, kind: output, shape index: {}]  }
   0x1   :  { %15 = vsyncpa [#allocation6], 0  ;;  %s30_s11 = sshll.u32 %s6055_s5, 4  ;;  %s4074_s12 = smov [#allocation4]   ;;  %s31_s11 = int_to_ptr.hbm [resolvable:$true] %s30_s11 }
   0x2   :  { %s32_s13 = sshll.u32 %s4074_s12, 4  ;;  %s4075_s14 = smov 256   ;;  %s33_s13 = int_to_ptr.vmem [resolvable:$true] %s32_s13 }
   0x3   :  { %s4076_s15 = smov 16  }
   0x4   :  { %38 = dma.hbm_to_vmem [thread:$0]  %s31_s11, 20480, %s33_s13, [#allocation5], %s4075_s14, %s4075_s14, %s4076_s15  }
   0x5   :  { %4070 = dma.done.wait [#allocation5], 20480  }
   0x6   :  { %4071 = vsyncadd [#allocation5], 4294946816  ;;  %v56_v0 = vld [vmem:[%s6054_s4 + $0x30] sm:$0xff]  ;;  %v57_v1 = vld [vmem:[%s6054_s4 + $0x38] sm:$0xff]  ;;  %vm65_vm0 = vcmask 261120   ;;  %s4077_s14 = smov 127  }
   0x7   :  { %v142_v2 = vld [vmem:[#allocation4 + $0xf0] sm:$0xff]  ;;  %81 = vmatpush.msra.mxu0 %v56_v0  ;;  %101 = vmatpush.msra.mxu1 %v57_v1  ;;  %v54_v3 = vld [vmem:[%s6054_s4 + $0x20] sm:$0xff]  ;;  %v53_v8 = vld [vmem:[%s6054_s4 + $0x18] sm:$0xff]  ;;  %vm567_vm1 = vcmask 2048   ;;  %s4078_s23 = smov 126   ;;  %vm605_vm2 = vcmask 10248  }
   0x8   :  { %v55_v4 = vld [vmem:[%s6054_s4 + $0x28] sm:$0xff]  ;;  %v140_v5 = vld [vmem:[#allocation4 + $0xe0] sm:$0xff]  ;;  %290 = vmatpush.msra.mxu2 %v142_v2  ;;  %v52_v7 = vld [vmem:[%s6054_s4 + $0x10] sm:$0xff]  ;;  %vm564_vm3 = vcmask 190464   ;;  %s4080_s27 = smov 125   ;;  %s4081_s28 = smov 2  }
   0x9   :  { %v174_v6 = vld [vmem:[#allocation4 + $0x1f0] sm:$0xff]  ;;  %82 = vmatpush.msra.mxu0 %v54_v3  ;;  %102 = vmatpush.msra.mxu1 %v55_v4  ;;  %v172_v10 = vld [vmem:[#allocation4 + $0x1e0] sm:$0xff]  ;;  %v3814_v35 = vld [vmem:[%s6052_s2 + $0x4] ss:$0 sm:$0xff]  ;;  %s4082_s12 = smov 3   ;;  %vm738_vm4 = vcmask 18448  }
   0xa   :  { %v138_v9 = vld [vmem:[#allocation4 + $0xd0] sm:$0xff]  ;;  %291 = vmatpush.msra.mxu2 %v140_v5  ;;  %310 = vmatpush.msra.mxu3 %v174_v6  ;;  %v50_v11 = vld [vmem:[%s6054_s4] sm:$0xff]  ;;  %v143_v63 = vld [vmem:[#allocation4 + $0xf8] sm:$0xff]  ;;  %vm871_vm5 = vcmask 26648   ;;  %vm1004_vm6 = vcmask 34848   ;;  %vm1137_vm7 = vcmask 43048  }
   0xb   :  { %v51_v12 = vld [vmem:[%s6054_s4 + $0x8] sm:$0xff]  ;;  %83 = vmatpush.msra.mxu0 %v52_v7  ;;  %103 = vmatpush.msra.mxu1 %v53_v8  ;;  %v136_v13 = vld [vmem:[#allocation4 + $0xc0] sm:$0xff]  ;;  %v139_v5 = vld [vmem:[#allocation4 + $0xd8] sm:$0xff]  ;;  %vm1270_vm8 = vcmask 51248   ;;  %vm1403_vm9 = vcmask 59448   ;;  %vm1536_vm10 = vcmask 67648  }
   0xc   :  { %v170_v14 = vld [vmem:[#allocation4 + $0x1d0] sm:$0xff]  ;;  %292 = vmatpush.msra.mxu2 %v138_v9  ;;  %311 = vmatpush.msra.mxu3 %v172_v10  ;;  %v49_v15 = vld [vmem:[%s6050_s0] sm:$0x7]  ;;  %v3812_v24 = vld [vmem:[%s6052_s2 + $0x3] ss:$0 sm:$0xff]  ;;  %vm1669_vm11 = vcmask 75848  }
   0xd   :  { %84 = vmatpush.msra.mxu0 %v50_v11  ;;  %104 = vmatpush.msra.mxu1 %v51_v12  ;;  %v134_v16 = vld [vmem:[#allocation4 + $0xb0] sm:$0xff]  ;;  %v168_v17 = vld [vmem:[#allocation4 + $0x1c0] sm:$0xff]  ;;  %v141_v3 = vld [vmem:[#allocation4 + $0xe8] sm:$0xff]  ;;  %vm1802_vm12 = vcmask 84048   ;;  %vm1935_vm13 = vcmask 92248   ;;  %s4083_s25 = smov 124  }
   0xe   :  { %293 = vmatpush.msra.mxu2 %v136_v13  ;;  %312 = vmatpush.msra.mxu3 %v170_v14  ;;  %v132_v18 = vld [vmem:[#allocation4 + $0xa0] sm:$0xff]  ;;  %v166_v19 = vld [vmem:[#allocation4 + $0x1b0] sm:$0xff]  ;;  %v137_v14 = vld [vmem:[#allocation4 + $0xc8] sm:$0xff]  ;;  %s4084_s26 = smov 4   ;;  %vm2068_vm14 = vcmask 100448   ;;  %s4085_s20 = smov 5  }
   0xf   :  { %3789 = vmatmul.msk.f32.vlgmr.msra.gmra.mxu0 %vm65_vm0, %v49_v15  ;;  %3790 = vmatmul.msk.f32.vlgmr.msra.gmra.mxu1 %vm65_vm0, %v49_v15  ;;  %v130_v20 = vld [vmem:[#allocation4 + $0x90] sm:$0xff]  ;;  %v164_v21 = vld [vmem:[#allocation4 + $0x1a0] sm:$0xff]  ;;  %s4086_s22 = smov 123   ;;  %vm2201_vm15 = vcmask 108648   ;;  %vm2334_vm0 = vcmask 116848  }
  0x10   :  { %294 = vmatpush.msra.mxu2 %v134_v16  ;;  %313 = vmatpush.msra.mxu3 %v168_v17  ;;  %v128_v22 = vld [vmem:[#allocation4 + $0x80] sm:$0xff]  ;;  %v162_v23 = vld [vmem:[#allocation4 + $0x190] sm:$0xff] }
  0x11   :  { %v3813_v25 = vld [vmem:[%s6052_s2] ss:$0 sm:$0xff]  ;;  %v126_v26 = vld [vmem:[#allocation4 + $0x70] sm:$0xff]  ;;  %610 = vrot.lane.b32.xlu1 %v3812_v24, %s4077_s14  ;;  %v3815_v36 = vld [vmem:[%s6052_s2 + $0x1] ss:$0 sm:$0xff] }
  0x12   :  { %295 = vmatpush.msra.mxu2 %v132_v18  ;;  %314 = vmatpush.msra.mxu3 %v166_v19  ;;  %v160_v27 = vld [vmem:[#allocation4 + $0x180] sm:$0xff]  ;;  %v206_v28 = vld [vmem:[#allocation4 + $0x2f0] sm:$0xff]  ;;  %v135_v19 = vld [vmem:[#allocation4 + $0xb8] sm:$0xff] }
  0x13   :  { %581 = vrot.lane.b32.xlu0 %v3813_v25, %s4077_s14  ;;  %v124_v29 = vld [vmem:[#allocation4 + $0x60] sm:$0xff]  ;;  %v238_v31 = vld [vmem:[#allocation4 + $0x3f0] sm:$0xff]  ;;  %330 = vmatpush.msrb.mxu0 %v206_v28  ;;  %v131_v28 = vld [vmem:[#allocation4 + $0x98] sm:$0xff] }
  0x14   :  { %296 = vmatpush.msra.mxu2 %v130_v20  ;;  %315 = vmatpush.msra.mxu3 %v164_v21  ;;  %v204_v30 = vld [vmem:[#allocation4 + $0x2e0] sm:$0xff]  ;;  %v158_v32 = vld [vmem:[#allocation4 + $0x170] sm:$0xff] }
  0x15   :  { %v122_v33 = vld [vmem:[#allocation4 + $0x50] sm:$0xff]  ;;  %350 = vmatpush.msrb.mxu1 %v238_v31  ;;  %v156_v34 = vld [vmem:[#allocation4 + $0x160] sm:$0xff]  ;;  %331 = vmatpush.msrb.mxu0 %v204_v30  ;;  %v129_v30 = vld [vmem:[#allocation4 + $0x88] sm:$0xff] }
  0x16   :  { %297 = vmatpush.msra.mxu2 %v128_v22  ;;  %316 = vmatpush.msra.mxu3 %v162_v23  ;;  %v202_v37 = vld [vmem:[#allocation4 + $0x2d0] sm:$0xff]  ;;  %v236_v38 = vld [vmem:[#allocation4 + $0x3e0] sm:$0xff]  ;;  %v133_v23 = vld [vmem:[#allocation4 + $0xa8] sm:$0xff] }
  0x17   :  { %v120_v39 = vld [vmem:[#allocation4 + $0x40] sm:$0xff]  ;;  %v154_v40 = vld [vmem:[#allocation4 + $0x150] sm:$0xff]  ;;  %332 = vmatpush.msrb.mxu0 %v202_v37  ;;  %351 = vmatpush.msrb.mxu1 %v236_v38  ;;  %v3817_v37 = vld [vmem:[%s6052_s2 + $0x7] ss:$0 sm:$0xff] }
  0x18   :  { %298 = vmatpush.msra.mxu2 %v126_v26  ;;  %317 = vmatpush.msra.mxu3 %v160_v27  ;;  %v200_v41 = vld [vmem:[#allocation4 + $0x2c0] sm:$0xff]  ;;  %v234_v42 = vld [vmem:[#allocation4 + $0x3d0] sm:$0xff] }
  0x19   :  { %v118_v43 = vld [vmem:[#allocation4 + $0x30] sm:$0xff]  ;;  %v152_v44 = vld [vmem:[#allocation4 + $0x140] sm:$0xff]  ;;  %617 = vrot.lane.b32.xlu1 %v3814_v35, %s4077_s14  ;;  %333 = vmatpush.msrb.mxu0 %v200_v41  ;;  %v3818_v41 = vld [vmem:[%s6052_s2 + $0x5] ss:$0 sm:$0xff] }
  0x1a   :  { %299 = vmatpush.msra.mxu2 %v124_v29  ;;  %318 = vmatpush.msra.mxu3 %v158_v32  ;;  %v198_v45 = vld [vmem:[#allocation4 + $0x2b0] sm:$0xff]  ;;  %v232_v46 = vld [vmem:[#allocation4 + $0x3c0] sm:$0xff] }
  0x1b   :  { %588 = vrot.lane.b32.xlu0 %v3815_v36, %s4077_s14  ;;  %v116_v47 = vld [vmem:[#allocation4 + $0x20] sm:$0xff]  ;;  %v150_v48 = vld [vmem:[#allocation4 + $0x130] sm:$0xff]  ;;  %352 = vmatpush.msrb.mxu1 %v234_v42  ;;  %v127_v36 = vld [vmem:[#allocation4 + $0x78] sm:$0xff] }
  0x1c   :  { %300 = vmatpush.msra.mxu2 %v122_v33  ;;  %319 = vmatpush.msra.mxu3 %v156_v34  ;;  %v196_v49 = vld [vmem:[#allocation4 + $0x2a0] sm:$0xff]  ;;  %v230_v50 = vld [vmem:[#allocation4 + $0x3b0] sm:$0xff]  ;;  %v3819_v42 = vld [vmem:[%s6052_s2 + $0x6] ss:$0 sm:$0xff] }
  0x1d   :  { %v114_v51 = vld [vmem:[#allocation4 + $0x10] sm:$0xff]  ;;  %v148_v52 = vld [vmem:[#allocation4 + $0x120] sm:$0xff]  ;;  %334 = vmatpush.msrb.mxu0 %v198_v45  ;;  %353 = vmatpush.msrb.mxu1 %v232_v46 }
  0x1e   :  { %301 = vmatpush.msra.mxu2 %v120_v39  ;;  %320 = vmatpush.msra.mxu3 %v154_v40  ;;  %v194_v53 = vld [vmem:[#allocation4 + $0x290] sm:$0xff]  ;;  %v228_v54 = vld [vmem:[#allocation4 + $0x3a0] sm:$0xff]  ;;  %v125_v40 = vld [vmem:[#allocation4 + $0x68] sm:$0xff] }
  0x1f   :  { %v112_v55 = vld [vmem:[#allocation4] sm:$0xff]  ;;  %v146_v56 = vld [vmem:[#allocation4 + $0x110] sm:$0xff]  ;;  %335 = vmatpush.msrb.mxu0 %v196_v49  ;;  %354 = vmatpush.msrb.mxu1 %v230_v50 }
  0x20   :  { %302 = vmatpush.msra.mxu2 %v118_v43  ;;  %321 = vmatpush.msra.mxu3 %v152_v44  ;;  %v270_v57 = vld [vmem:[#allocation4 + $0x4f0] sm:$0xff]  ;;  %v144_v58 = vld [vmem:[#allocation4 + $0x100] sm:$0xff]  ;;  %v123_v44 = vld [vmem:[#allocation4 + $0x58] sm:$0xff] }
  0x21   :  { %v192_v59 = vld [vmem:[#allocation4 + $0x280] sm:$0xff]  ;;  %336 = vmatpush.msrb.mxu0 %v194_v53  ;;  %355 = vmatpush.msrb.mxu1 %v228_v54  ;;  %v226_v60 = vld [vmem:[#allocation4 + $0x390] sm:$0xff]  ;;  %v175_v53 = vld [vmem:[#allocation4 + $0x1f8] sm:$0xff] }
  0x22   :  { %303 = vmatpush.msra.mxu2 %v116_v47  ;;  %322 = vmatpush.msra.mxu3 %v150_v48  ;;  %v58_v61 = vld [vmem:[%s6056_s6] sm:$0x77]  ;;  %v190_v0 = vld [vmem:[#allocation4 + $0x270] sm:$0xff] }
  0x23   :  { %v268_v62 = vld [vmem:[#allocation4 + $0x4e0] sm:$0xff]  ;;  %60 = vst [vmem:[#allocation1] ss:$2 sm:$0xff] %v58_v61  ;;  %337 = vmatpush.msrb.mxu0 %v192_v59  ;;  %v266_v2 = vld [vmem:[#allocation4 + $0x4d0] sm:$0xff]  ;;  %356 = vmatpush.msrb.mxu1 %v226_v60  ;;  %v121_v48 = vld [vmem:[#allocation4 + $0x48] sm:$0xff] }
  0x24   :  { %304 = vmatpush.msra.mxu2 %v114_v51  ;;  %323 = vmatpush.msra.mxu3 %v148_v52  ;;  %v224_v1 = vld [vmem:[#allocation4 + $0x380] sm:$0xff]  ;;  %v222_v7 = vld [vmem:[#allocation4 + $0x370] sm:$0xff]  ;;  %v119_v52 = vld [vmem:[#allocation4 + $0x38] sm:$0xff] }
  0x25   :  { %v264_v4 = vld [vmem:[#allocation4 + $0x4c0] sm:$0xff]  ;;  %v262_v8 = vld [vmem:[#allocation4 + $0x4b0] sm:$0xff]  ;;  %338 = vmatpush.msrb.mxu0 %v190_v0  ;;  %357 = vmatpush.msrb.mxu1 %v224_v1  ;;  %v115_v60 = vld [vmem:[#allocation4 + $0x18] sm:$0xff] }
  0x26   :  { %305 = vmatpush.msra.mxu2 %v112_v55  ;;  %324 = vmatpush.msra.mxu3 %v146_v56  ;;  %v188_v6 = vld [vmem:[#allocation4 + $0x260] sm:$0xff]  ;;  %v186_v9 = vld [vmem:[#allocation4 + $0x250] sm:$0xff]  ;;  %v117_v56 = vld [vmem:[#allocation4 + $0x28] sm:$0xff] }
  0x27   :  { %v220_v10 = vld [vmem:[#allocation4 + $0x360] sm:$0xff]  ;;  %v111_v13 = vld [vmem:[%s6051_s1 + $0x10] sm:$0x7]  ;;  %339 = vmatpush.msrb.mxu0 %v188_v6  ;;  %358 = vmatpush.msrb.mxu1 %v222_v7  ;;  %v110_v24 = vld [vmem:[%s6051_s1 + $0x8] sm:$0x77] }
  0x28   :  { %370 = vmatpush.msrb.mxu2 %v270_v57  ;;  %325 = vmatpush.msra.mxu3 %v144_v58  ;;  %v109_v11 = vld [vmem:[%s6051_s1] sm:$0x77]  ;;  %279 = vst [vmem:[#allocation1 + $0x20] ss:$2 sm:$0xff] %v111_v13  ;;  %v218_v20 = vld [vmem:[#allocation4 + $0x350] sm:$0xff]  ;;  %v207_v58 = vld [vmem:[#allocation4 + $0x2f8] sm:$0xff] }
  0x29   :  { %v3816_v12 = vld [vmem:[%s6052_s2 + $0x2] ss:$0 sm:$0xff]  ;;  %340 = vmatpush.msrb.mxu0 %v186_v9  ;;  %359 = vmatpush.msrb.mxu1 %v220_v10  ;;  %v182_v21 = vld [vmem:[#allocation4 + $0x230] sm:$0xff]  ;;  %277 = vst [vmem:[#allocation1 + $0x10] ss:$2 sm:$0xff] %v110_v24  ;;  %v173_v57 = vld [vmem:[#allocation4 + $0x1e8] sm:$0xff] }
  0x2a   :  { %371 = vmatpush.msrb.mxu2 %v268_v62  ;;  %390 = vmatpush.msrb.mxu3 %v143_v63  ;;  %v184_v15 = vld [vmem:[#allocation4 + $0x240] sm:$0xff]  ;;  %v4199_v17 = vld.sshfl [vmem:[#allocation1 + $0x8] sm:$0xff pattern:$0x75316420]  ;;  %v171_v62 = vld [vmem:[#allocation4 + $0x1d8] sm:$0xff] }
  0x2b   :  { %v4197_v16 = vld.sshfl [vmem:[#allocation1] sm:$0xff pattern:$0x75316420]  ;;  %v258_v22 = vld [vmem:[#allocation4 + $0x490] sm:$0xff]  ;;  %596 = vrot.lane.b32.xlu2 %v3816_v12, %s4077_s14  ;;  %341 = vmatpush.msrb.mxu0 %v184_v15  ;;  %v239_v63 = vld [vmem:[#allocation4 + $0x3f8] sm:$0xff] }
  0x2c   :  { %372 = vmatpush.msrb.mxu2 %v266_v2  ;;  %391 = vmatpush.msrb.mxu3 %v141_v3  ;;  %v260_v18 = vld [vmem:[#allocation4 + $0x4a0] sm:$0xff]  ;;  %275 = vst [vmem:[#allocation1] ss:$2 sm:$0xff] %v109_v11  ;;  %v254_v29 = vld [vmem:[#allocation4 + $0x470] sm:$0xff]  ;;  %v113_v0 = vld [vmem:[#allocation4 + $0x8] sm:$0xff] }
  0x2d   :  { %v216_v25 = vld [vmem:[#allocation4 + $0x340] sm:$0xff]  ;;  %360 = vmatpush.msrb.mxu1 %v218_v20  ;;  %342 = vmatpush.msrb.mxu0 %v182_v21  ;;  %v214_v31 = vld [vmem:[#allocation4 + $0x330] sm:$0xff]  ;;  %v271_v1 = vld [vmem:[#allocation4 + $0x4f8] sm:$0xff] }
  0x2e   :  { %373 = vmatpush.msrb.mxu2 %v264_v4  ;;  %392 = vmatpush.msrb.mxu3 %v139_v5  ;;  %v180_v26 = vld [vmem:[#allocation4 + $0x220] sm:$0xff]  ;;  %v178_v32 = vld [vmem:[#allocation4 + $0x210] sm:$0xff]  ;;  %v205_v2 = vld [vmem:[#allocation4 + $0x2e8] sm:$0xff] }
  0x2f   :  { %v256_v27 = vld [vmem:[#allocation4 + $0x480] sm:$0xff]  ;;  %361 = vmatpush.msrb.mxu1 %v216_v25  ;;  %343 = vmatpush.msrb.mxu0 %v180_v26  ;;  %v250_v38 = vld [vmem:[#allocation4 + $0x450] sm:$0xff]  ;;  %v237_v3 = vld [vmem:[#allocation4 + $0x3e8] sm:$0xff] }
  0x30   :  { %374 = vmatpush.msrb.mxu2 %v262_v8  ;;  %393 = vmatpush.msrb.mxu3 %v137_v14  ;;  %v252_v35 = vld [vmem:[#allocation4 + $0x460] sm:$0xff]  ;;  %v210_v46 = vld [vmem:[#allocation4 + $0x310] sm:$0xff]  ;;  %v169_v4 = vld [vmem:[#allocation4 + $0x1c8] sm:$0xff] }
  0x31   :  { %v212_v39 = vld [vmem:[#allocation4 + $0x320] sm:$0xff]  ;;  %362 = vmatpush.msrb.mxu1 %v214_v31  ;;  %344 = vmatpush.msrb.mxu0 %v178_v32  ;;  %v246_v47 = vld [vmem:[#allocation4 + $0x430] sm:$0xff]  ;;  %v269_v5 = vld [vmem:[#allocation4 + $0x4e8] sm:$0xff] }
  0x32   :  { %375 = vmatpush.msrb.mxu2 %v260_v18  ;;  %394 = vmatpush.msrb.mxu3 %v135_v19  ;;  %v248_v43 = vld [vmem:[#allocation4 + $0x440] sm:$0xff]  ;;  %v4223_v49 = vld.sshfl [vmem:[#allocation1 + $0x10] sm:$0xff pattern:$0x75316420]  ;;  %v233_v9 = vld [vmem:[#allocation4 + $0x3c8] sm:$0xff] }
  0x33   :  { %v4205_v33 = vld.sshfl [vmem:[#allocation1] sm:$0xff pattern:$0x75316420]  ;;  %v4207_v34 = vld.sshfl [vmem:[#allocation1 + $0x8] sm:$0xff pattern:$0x75316420]  ;;  %363 = vmatpush.msrb.mxu1 %v212_v39  ;;  %645 = vrot.lane.b32.xlu1 %v3817_v37, %s4077_s14 }
  0x34   :  { %376 = vmatpush.msrb.mxu2 %v258_v22  ;;  %395 = vmatpush.msrb.mxu3 %v133_v23  ;;  %v176_v45 = vld [vmem:[#allocation4 + $0x200] sm:$0xff]  ;;  %v242_v55 = vld [vmem:[#allocation4 + $0x410] sm:$0xff]  ;;  %v203_v6 = vld [vmem:[#allocation4 + $0x2d8] sm:$0xff] }
  0x35   :  { %306 = vmatmul.f32.vlgmr.msra.gmra.mxu2 %v4205_v33  ;;  %326 = vmatmul.f32.vlgmr.msra.gmra.mxu3 %v4207_v34  ;;  %v208_v50 = vld [vmem:[#allocation4 + $0x300] sm:$0xff]  ;;  %v235_v7 = vld [vmem:[#allocation4 + $0x3d8] sm:$0xff]  ;;  %v201_v11 = vld [vmem:[#allocation4 + $0x2c8] sm:$0xff] }
  0x36   :  { %377 = vmatpush.msrb.mxu2 %v256_v27  ;;  %396 = vmatpush.msrb.mxu3 %v131_v28  ;;  %v244_v51 = vld [vmem:[#allocation4 + $0x420] sm:$0xff]  ;;  %v167_v8 = vld [vmem:[#allocation4 + $0x1b8] sm:$0xff]  ;;  %v265_v13 = vld [vmem:[#allocation4 + $0x4c8] sm:$0xff] }
  0x37   :  { %625 = vrot.lane.b32.xlu2 %v3818_v41, %s4077_s14  ;;  %638 = vrot.lane.b32.xlu0 %v3819_v42, %s4077_s14  ;;  %v4225_v54 = vld.sshfl [vmem:[#allocation1 + $0x18] sm:$0xff pattern:$0x75316420]  ;;  %v4229_v61 = vld.sshfl [vmem:[#allocation1 + $0x20] sm:$0xff pattern:$0x75316420] }
  0x38   :  { %378 = vmatpush.msrb.mxu2 %v254_v29  ;;  %397 = vmatpush.msrb.mxu3 %v129_v30  ;;  %v240_v59 = vld [vmem:[#allocation4 + $0x400] sm:$0xff]  ;;  %v267_v10 = vld [vmem:[#allocation4 + $0x4d8] sm:$0xff]  ;;  %v165_v14 = vld [vmem:[#allocation4 + $0x1a8] sm:$0xff] }
  0x39   :  { %345 = vmatpush.msrb.mxu0 %v176_v45  ;;  %364 = vmatpush.msrb.mxu1 %v210_v46  ;;  %v231_v12 = vld [vmem:[#allocation4 + $0x3b8] sm:$0xff]  ;;  %v229_v19 = vld [vmem:[#allocation4 + $0x3a8] sm:$0xff] }
  0x3a   :  { %379 = vmatpush.msrb.mxu2 %v252_v35  ;;  %398 = vmatpush.msrb.mxu3 %v127_v36  ;;  %v263_v15 = vld [vmem:[#allocation4 + $0x4b8] sm:$0xff]  ;;  %v261_v21 = vld [vmem:[#allocation4 + $0x4a8] sm:$0xff] }
  0x3b   :  { %346 = vmatmul.f32.vlgmr.msrb.gmra.mxu0 %v4223_v49  ;;  %365 = vmatpush.msrb.mxu1 %v208_v50  ;;  %v199_v18 = vld [vmem:[#allocation4 + $0x2b8] sm:$0xff]  ;;  %v197_v22 = vld [vmem:[#allocation4 + $0x2a8] sm:$0xff] }
  0x3c   :  { %380 = vmatpush.msrb.mxu2 %v250_v38  ;;  %399 = vmatpush.msrb.mxu3 %v125_v40  ;;  %v163_v20 = vld [vmem:[#allocation4 + $0x198] sm:$0xff]  ;;  %v161_v24 = vld [vmem:[#allocation4 + $0x188] sm:$0xff] }
  0x3d   :  { %410 = vmatpush.msra.mxu0 %v175_v53  ;;  %366 = vmatmul.f32.vlgmr.msrb.gmra.mxu1 %v4225_v54  ;;  %v227_v23 = vld [vmem:[#allocation4 + $0x398] sm:$0xff]  ;;  %v225_v27 = vld [vmem:[#allocation4 + $0x388] sm:$0xff] }
  0x3e   :  { %381 = vmatpush.msrb.mxu2 %v248_v43  ;;  %400 = vmatpush.msrb.mxu3 %v123_v44  ;;  %v259_v25 = vld [vmem:[#allocation4 + $0x498] sm:$0xff]  ;;  %v257_v29 = vld [vmem:[#allocation4 + $0x488] sm:$0xff] }
  0x3f   :  { %411 = vmatpush.msra.mxu0 %v173_v57  ;;  %430 = vmatpush.msra.mxu1 %v207_v58  ;;  %v195_v26 = vld [vmem:[#allocation4 + $0x298] sm:$0xff]  ;;  %v193_v30 = vld [vmem:[#allocation4 + $0x288] sm:$0xff] }
  0x40   :  { %382 = vmatpush.msrb.mxu2 %v246_v47  ;;  %401 = vmatpush.msrb.mxu3 %v121_v48  ;;  %v159_v28 = vld [vmem:[#allocation4 + $0x178] sm:$0xff]  ;;  %v157_v32 = vld [vmem:[#allocation4 + $0x168] sm:$0xff] }
  0x41   :  { %412 = vmatpush.msra.mxu0 %v171_v62  ;;  %431 = vmatpush.msra.mxu1 %v205_v2  ;;  %v223_v31 = vld [vmem:[#allocation4 + $0x378] sm:$0xff]  ;;  %v221_v37 = vld [vmem:[#allocation4 + $0x368] sm:$0xff] }
  0x42   :  { %383 = vmatpush.msrb.mxu2 %v244_v51  ;;  %402 = vmatpush.msrb.mxu3 %v119_v52  ;;  %v255_v35 = vld [vmem:[#allocation4 + $0x478] sm:$0xff]  ;;  %v253_v39 = vld [vmem:[#allocation4 + $0x468] sm:$0xff] }
  0x43   :  { %413 = vmatpush.msra.mxu0 %v169_v4  ;;  %432 = vmatpush.msra.mxu1 %v203_v6  ;;  %v191_v36 = vld [vmem:[#allocation4 + $0x278] sm:$0xff]  ;;  %v189_v40 = vld [vmem:[#allocation4 + $0x268] sm:$0xff] }
  0x44   :  { %384 = vmatpush.msrb.mxu2 %v242_v55  ;;  %403 = vmatpush.msrb.mxu3 %v117_v56  ;;  %v155_v38 = vld [vmem:[#allocation4 + $0x158] sm:$0xff]  ;;  %v153_v42 = vld [vmem:[#allocation4 + $0x148] sm:$0xff] }
  0x45   :  { %414 = vmatpush.msra.mxu0 %v167_v8  ;;  %433 = vmatpush.msra.mxu1 %v201_v11  ;;  %v219_v41 = vld [vmem:[#allocation4 + $0x358] sm:$0xff]  ;;  %v217_v45 = vld [vmem:[#allocation4 + $0x348] sm:$0xff]  ;;  %v3821_v11 = vld [vmem:[%s6052_s2 + $0x1] ss:$0 sm:$0xff] }
  0x46   :  { %385 = vmatpush.msrb.mxu2 %v240_v59  ;;  %404 = vmatpush.msrb.mxu3 %v115_v60  ;;  %v251_v43 = vld [vmem:[#allocation4 + $0x458] sm:$0xff]  ;;  %v249_v47 = vld [vmem:[#allocation4 + $0x448] sm:$0xff] }
  0x47   :  { %386 = vmatmul.f32.vlgmr.msrb.gmra.mxu2 %v4229_v61  ;;  %415 = vmatpush.msra.mxu0 %v165_v14  ;;  %v187_v44 = vld [vmem:[#allocation4 + $0x258] sm:$0xff]  ;;  %v185_v48 = vld [vmem:[#allocation4 + $0x248] sm:$0xff]  ;;  %v566_v14 = vld [vmem:[%s6052_s2] sm:$0x7] }
  0x48   :  { %450 = vmatpush.msra.mxu2 %v239_v63  ;;  %405 = vmatpush.msrb.mxu3 %v113_v0  ;;  %v151_v46 = vld [vmem:[#allocation4 + $0x138] sm:$0xff]  ;;  %v3820_v51 = vld [vmem:[%s6052_s2 + $0x8] ss:$0 sm:$0xff]  ;;  %568 = vst.msk [vmem:[#allocation3] sm:$0x7] %vm567_vm1, %v566_v14 }
  0x49   :  { %434 = vmatpush.msra.mxu1 %v199_v18  ;;  %416 = vmatpush.msra.mxu0 %v163_v20  ;;  %v215_v50 = vld [vmem:[#allocation4 + $0x338] sm:$0xff]  ;;  %v149_v53 = vld [vmem:[#allocation4 + $0x128] sm:$0xff] }
  0x4a   :  { %470 = vmatpush.msra.mxu3 %v271_v1  ;;  %451 = vmatpush.msra.mxu2 %v237_v3  ;;  %v247_v52 = vld [vmem:[#allocation4 + $0x438] sm:$0xff]  ;;  %v213_v55 = vld [vmem:[#allocation4 + $0x328] sm:$0xff] }
  0x4b   :  { %435 = vmatpush.msra.mxu1 %v197_v22  ;;  %417 = vmatpush.msra.mxu0 %v161_v24  ;;  %v183_v56 = vld [vmem:[#allocation4 + $0x238] sm:$0xff]  ;;  %v245_v57 = vld [vmem:[#allocation4 + $0x428] sm:$0xff] }
  0x4c   :  { %471 = vmatpush.msra.mxu3 %v269_v5  ;;  %452 = vmatpush.msra.mxu2 %v235_v7  ;;  %v147_v58 = vld [vmem:[#allocation4 + $0x118] sm:$0xff]  ;;  %v181_v60 = vld [vmem:[#allocation4 + $0x228] sm:$0xff] }
  0x4d   :  { %436 = vmatpush.msra.mxu1 %v195_v26  ;;  %418 = vmatpush.msra.mxu0 %v159_v28  ;;  %v211_v59 = vld [vmem:[#allocation4 + $0x318] sm:$0xff]  ;;  %v145_v63 = vld [vmem:[#allocation4 + $0x108] sm:$0xff] }
  0x4e   :  { %472 = vmatpush.msra.mxu3 %v267_v10  ;;  %453 = vmatpush.msra.mxu2 %v233_v9  ;;  %v243_v62 = vld [vmem:[#allocation4 + $0x418] sm:$0xff]  ;;  %v241_v1 = vld [vmem:[#allocation4 + $0x408] sm:$0xff] }
  0x4f   :  { %437 = vmatpush.msra.mxu1 %v193_v30  ;;  %419 = vmatpush.msra.mxu0 %v157_v32  ;;  %v179_v0 = vld [vmem:[#allocation4 + $0x218] sm:$0xff]  ;;  %v177_v2 = vld [vmem:[#allocation4 + $0x208] sm:$0xff] }
  0x50   :  { %473 = vmatpush.msra.mxu3 %v265_v13  ;;  %454 = vmatpush.msra.mxu2 %v231_v12  ;;  %v507_v3 = vld [vmem:[%s6057_s7 + $0x78] sm:$0xff]  ;;  %v506_v5 = vld [vmem:[%s6057_s7 + $0x70] sm:$0xff]  ;;  %v505_v7 = vld [vmem:[%s6057_s7 + $0x68] sm:$0xff] }
  0x51   :  { %438 = vmatpush.msra.mxu1 %v191_v36  ;;  %420 = vmatpush.msra.mxu0 %v155_v38  ;;  %v523_v4 = vld [vmem:[%s6057_s7 + $0xf8] sm:$0xff]  ;;  %v522_v6 = vld [vmem:[%s6057_s7 + $0xf0] sm:$0xff]  ;;  %v3822_v12 = vld [vmem:[%s6052_s2] ss:$0 sm:$0xff] }
  0x52   :  { %474 = vmatpush.msra.mxu3 %v263_v15  ;;  %455 = vmatpush.msra.mxu2 %v229_v19  ;;  %v519_v8 = vld [vmem:[%s6057_s7 + $0xd8] sm:$0xff]  ;;  %v502_v9 = vld [vmem:[%s6057_s7 + $0x50] sm:$0xff]  ;;  %v501_v13 = vld [vmem:[%s6057_s7 + $0x48] sm:$0xff] }
  0x53   :  { %439 = vmatpush.msra.mxu1 %v189_v40  ;;  %421 = vmatpush.msra.mxu0 %v153_v42  ;;  %v518_v10 = vld [vmem:[%s6057_s7 + $0xd0] sm:$0xff]  ;;  %v571_v15 = vld [vmem:[%s6052_s2 + $0x6] sm:$0x7]  ;;  %v569_v20 = vld [vmem:[%s6052_s2 + $0x3] sm:$0x7] }
  0x54   :  { %475 = vmatpush.msra.mxu3 %v261_v21  ;;  %456 = vmatpush.msra.mxu2 %v227_v23  ;;  %v517_v18 = vld [vmem:[%s6057_s7 + $0xc8] sm:$0xff]  ;;  %v500_v19 = vld [vmem:[%s6057_s7 + $0x40] sm:$0xff]  ;;  %572 = vst.msk [vmem:[#allocation3 + $0x6] sm:$0x7] %vm567_vm1, %v571_v15  ;;  %v499_v22 = vld [vmem:[%s6057_s7 + $0x38] sm:$0xff] }
  0x55   :  { %440 = vmatpush.msra.mxu1 %v187_v44  ;;  %406 = vmatmul.f32.vlgmr.msrb.gmra.mxu3 %v4205_v33  ;;  %v209_v33 = vld [vmem:[#allocation4 + $0x308] sm:$0xff]  ;;  %v3823_v23 = vld [vmem:[%s6052_s2 + $0x2] ss:$0 sm:$0xff]  ;;  %570 = vst.msk [vmem:[#allocation3 + $0x3] sm:$0x7] %vm567_vm1, %v569_v20  ;;  %v515_v24 = vld [vmem:[%s6057_s7 + $0xb8] sm:$0xff] }
  0x56   :  { %476 = vmatpush.msra.mxu3 %v259_v25  ;;  %457 = vmatpush.msra.mxu2 %v225_v27  ;;  %v516_v21 = vld [vmem:[%s6057_s7 + $0xc0] sm:$0xff]  ;;  %v498_v26 = vld [vmem:[%s6057_s7 + $0x30] sm:$0xff]  ;;  %v497_v28 = vld [vmem:[%s6057_s7 + $0x28] sm:$0xff] }
  0x57   :  { %422 = vmatpush.msra.mxu0 %v151_v46  ;;  %441 = vmatpush.msra.mxu1 %v185_v48  ;;  %v3824_v25 = vld [vmem:[%s6052_s2 + $0x4] ss:$0 sm:$0xff]  ;;  %v514_v27 = vld [vmem:[%s6057_s7 + $0xb0] sm:$0xff]  ;;  %v495_v32 = vld [vmem:[%s6057_s7 + $0x18] sm:$0xff] }
  0x58   :  { %477 = vmatpush.msra.mxu3 %v257_v29  ;;  %458 = vmatpush.msra.mxu2 %v223_v31  ;;  %v513_v29 = vld [vmem:[%s6057_s7 + $0xa8] sm:$0xff]  ;;  %v496_v30 = vld [vmem:[%s6057_s7 + $0x20] sm:$0xff]  ;;  %v511_v36 = vld [vmem:[%s6057_s7 + $0x98] sm:$0xff] }
  0x59   :  { %653 = vrot.lane.b32.xlu2 %v3820_v51, %s4077_s14  ;;  %423 = vmatpush.msra.mxu0 %v149_v53  ;;  %v512_v31 = vld [vmem:[%s6057_s7 + $0xa0] sm:$0xff]  ;;  %v510_v38 = vld [vmem:[%s6057_s7 + $0x90] sm:$0xff]  ;;  %v4373_v46 = vld [vmem:[#allocation3] sm:$0x7] }
  0x5a   :  { %478 = vmatpush.msra.mxu3 %v255_v35  ;;  %459 = vmatpush.msra.mxu2 %v221_v37  ;;  %v3825_v35 = vld [vmem:[%s6052_s2 + $0x3] ss:$0 sm:$0xff]  ;;  %v494_v37 = vld [vmem:[%s6057_s7 + $0x10] sm:$0xff]  ;;  %v3826_v40 = vld [vmem:[%s6052_s2 + $0x5] ss:$0 sm:$0xff] }
  0x5b   :  { %442 = vmatpush.msra.mxu1 %v183_v56  ;;  %424 = vmatpush.msra.mxu0 %v147_v58  ;;  %v492_v42 = vld [vmem:[%s6057_s7] sm:$0xff]  ;;  %v4375_v48 = vld [vmem:[#allocation3 + $0x6] sm:$0x7] }
  0x5c   :  { %479 = vmatpush.msra.mxu3 %v253_v39  ;;  %460 = vmatpush.msra.mxu2 %v219_v41  ;;  %v493_v39 = vld [vmem:[%s6057_s7 + $0x8] sm:$0xff] }
  0x5d   :  { %443 = vmatpush.msra.mxu1 %v181_v60  ;;  %425 = vmatpush.msra.mxu0 %v145_v63  ;;  %v509_v41 = vld [vmem:[%s6057_s7 + $0x88] sm:$0xff] }
  0x5e   :  { %480 = vmatpush.msra.mxu3 %v251_v43  ;;  %461 = vmatpush.msra.mxu2 %v217_v45  ;;  %v508_v43 = vld [vmem:[%s6057_s7 + $0x80] sm:$0xff] }
  0x5f   :  { %444 = vmatpush.msra.mxu1 %v179_v0  ;;  %426 = vmatmul.f32.vlgmr.msra.gmra.mxu0 %v4207_v34  ;;  %v521_v34 = vld [vmem:[%s6057_s7 + $0xe8] sm:$0xff] }
  0x60   :  { %481 = vmatpush.msra.mxu3 %v249_v47  ;;  %462 = vmatpush.msra.mxu2 %v215_v50  ;;  %v4377_v50 = vld [vmem:[#allocation3 + $0x3] sm:$0x7] }
  0x61   :  { %445 = vmatpush.msra.mxu1 %v177_v2  ;;  %524 = vmatpush.msrb.mxu0 %v507_v3 }
  0x62   :  { %482 = vmatpush.msra.mxu3 %v247_v52  ;;  %463 = vmatpush.msra.mxu2 %v213_v55 }
  0x63   :  { %446 = vmatmul.f32.vlgmr.msra.gmra.mxu1 %v4223_v49  ;;  %525 = vmatpush.msrb.mxu0 %v506_v5  ;;  %v503_v49 = vld [vmem:[%s6057_s7 + $0x58] sm:$0xff] }
  0x64   :  { %483 = vmatpush.msra.mxu3 %v245_v57  ;;  %464 = vmatpush.msra.mxu2 %v211_v59 }
  0x65   :  { %544 = vmatpush.msrb.mxu1 %v523_v4  ;;  %526 = vmatpush.msrb.mxu0 %v505_v7 }
  0x66   :  { %484 = vmatpush.msra.mxu3 %v243_v62  ;;  %465 = vmatpush.msra.mxu2 %v209_v33 }
  0x67   :  { %466 = vmatmul.f32.vlgmr.msra.gmra.mxu2 %v4225_v54  ;;  %v504_v54 = vld [vmem:[%s6057_s7 + $0x60] sm:$0xff]  ;;  %545 = vmatpush.msrb.mxu1 %v522_v6 }
  0x68   :  { %485 = vmatpush.msra.mxu3 %v241_v1  ;;  %527 = vmatpush.msrb.mxu0 %v504_v54 }
  0x69   :  { %486 = vmatmul.f32.vlgmr.msra.gmra.mxu3 %v4229_v61  ;;  %v520_v61 = vld [vmem:[%s6057_s7 + $0xe0] sm:$0xff]  ;;  %546 = vmatpush.msrb.mxu1 %v521_v34  ;;  %s4079_s7 = smov 1  }
  0x6a   :  { %528 = vmatpush.msrb.mxu0 %v503_v49  ;;  %721 = vrot.lane.b32.xlu1 %v3821_v11, %s4078_s23 }
  0x6b   :  { %547 = vmatpush.msrb.mxu1 %v520_v61  ;;  %714 = vrot.lane.b32.xlu0 %v3822_v12, %s4078_s23 }
  0x6c   :  { %529 = vmatpush.msrb.mxu0 %v502_v9  ;;  %743 = vrot.lane.b32.xlu2 %v3825_v35, %s4078_s23 }
  0x6d   :  { %548 = vmatpush.msrb.mxu1 %v519_v8 }
  0x6e   :  { %530 = vmatpush.msrb.mxu0 %v501_v13 }
  0x6f   :  { %549 = vmatpush.msrb.mxu1 %v518_v10 }
  0x70   :  { %531 = vmatpush.msrb.mxu0 %v500_v19 }
  0x71   :  { %550 = vmatpush.msrb.mxu1 %v517_v18 }
  0x72   :  { %532 = vmatpush.msrb.mxu0 %v499_v22  ;;  %729 = vrot.lane.b32.xlu1 %v3823_v23, %s4078_s23 }
  0x73   :  { %551 = vmatpush.msrb.mxu1 %v516_v21  ;;  %750 = vrot.lane.b32.xlu0 %v3824_v25, %s4078_s23 }
  0x74   :  { %533 = vmatpush.msrb.mxu0 %v498_v26  ;;  %758 = vrot.lane.b32.xlu2 %v3826_v40, %s4078_s23 }
  0x75   :  { %552 = vmatpush.msrb.mxu1 %v515_v24 }
  0x76   :  { %534 = vmatpush.msrb.mxu0 %v497_v28 }
  0x77   :  { %553 = vmatpush.msrb.mxu1 %v514_v27 }
  0x78   :  { %535 = vmatpush.msrb.mxu0 %v496_v30 }
  0x79   :  { %554 = vmatpush.msrb.mxu1 %v513_v29 }
  0x7a   :  { %536 = vmatpush.msrb.mxu0 %v495_v32 }
  0x7b   :  { %555 = vmatpush.msrb.mxu1 %v512_v31 }
  0x7c   :  { %537 = vmatpush.msrb.mxu0 %v494_v37 }
  0x7d   :  { %556 = vmatpush.msrb.mxu1 %v511_v36 }
  0x7e   :  { %538 = vmatpush.msrb.mxu0 %v493_v39 }
  0x7f   :  { %557 = vmatpush.msrb.mxu1 %v510_v38 }
  0x80   :  { %539 = vmatpush.msrb.mxu0 %v492_v42 }
  0x81   :  { %558 = vmatpush.msrb.mxu1 %v509_v41 }
  0x83   :  { %559 = vmatpush.msrb.mxu1 %v508_v43  ;;  %v611_v44 = vpop.permute.xlu1 %610 }
  0x84   :  { %v613_v62 = vmul.f32 %v611_v44, %v4373_v46  ;;  %v3827_v44 = vld [vmem:[%s6052_s2 + $0x8] ss:$0 sm:$0xff] }
  0x85   :  { %v582_v45 = vpop.permute.xlu0 %581  ;;  %v597_v47 = vpop.permute.xlu2 %596 }
  0x86   :  { %v584_v56 = vmul.f32 %v582_v45, %v4373_v46  ;;  %v599_v59 = vmul.f32 %v597_v47, %v4375_v48  ;;  %v3828_v45 = vld [vmem:[%s6052_s2 + $0x7] ss:$0 sm:$0xff]  ;;  %v3829_v47 = vld [vmem:[%s6052_s2 + $0x6] ss:$0 sm:$0xff] }
  0x8b   :  { %v618_v57 = vpop.permute.xlu1 %617 }
  0x8c   :  { %v86_v51 = vpop.f32.mrf.mxu0  ;;  %v106_v52 = vpop.f32.mrf.mxu1  ;;  %v620_v63 = vmul.f32 %v618_v57, %v4377_v50 }
  0x8d   :  { %v87_v53 = vadd.f32 %v86_v51, %v4197_v16  ;;  %v4381_v55 = vadd.f32 %v106_v52, %v4199_v17  ;;  %v589_v58 = vpop.permute.xlu0 %588 }
  0x8e   :  { %v591_v60 = vmul.f32 %v589_v58, %v4377_v50  ;;  %v621_v0 = vadd.f32 %v620_v63, %v613_v62  ;;  %v3830_v58 = vld [vmem:[%s6052_s2 + $0x3] ss:$0 sm:$0xff] }
  0x8f   :  { %540 = vmatmul.f32.vlgmr.msrb.gmra.mxu0 %v87_v53  ;;  %560 = vmatmul.f32.vlgmr.msrb.gmra.mxu1 %v4381_v55 }
  0x90   :  { %v592_v33 = vadd.f32 %v591_v60, %v584_v56  ;;  %v3831_v60 = vld [vmem:[%s6052_s2] ss:$0 sm:$0xff] }
  0x91   :  { %v626_v17 = vpop.permute.xlu2 %625 }
  0x92   :  { %v600_v16 = vadd.f32 %v599_v59, %v592_v33  ;;  %v628_v1 = vmul.f32 %v626_v17, %v4375_v48 }
  0x94   :  { %602 = vrot.lane.b32.xlu0 %v600_v16, %s4079_s7  ;;  %v629_v2 = vadd.f32 %v628_v1, %v621_v0 }
  0x96   :  { %631 = vrot.lane.b32.xlu1 %v629_v2, %s4079_s7 }
  0xa5   :  { %v646_v3 = vpop.permute.xlu1 %645 }
  0xa6   :  { %v648_v5 = vmul.f32 %v646_v3, %v4377_v50 }
  0xa9   :  { %v639_v4 = vpop.permute.xlu0 %638 }
  0xaa   :  { %v641_v6 = vmul.f32 %v639_v4, %v4373_v46 }
  0xac   :  { %v649_v7 = vadd.f32 %v648_v5, %v641_v6  ;;  %v3832_v6 = vld [vmem:[%s6052_s2 + $0x5] ss:$0 sm:$0xff] }
  0xb3   :  { %v654_v34 = vpop.permute.xlu2 %653 }
  0xb4   :  { %v656_v54 = vmul.f32 %v654_v34, %v4375_v48 }
  0xb6   :  { %v657_v9 = vadd.f32 %v656_v54, %v649_v7  ;;  %v3833_v7 = vld [vmem:[%s6052_s2 + $0x8] ss:$0 sm:$0xff] }
  0xb8   :  { %v307_v61 = vpop.f32.mrf.mxu2  ;;  %v327_v49 = vpop.f32.mrf.mxu3  ;;  %659 = vrot.lane.b32.xlu2 %v657_v9, %s4079_s7 }
  0xb9   :  { %v328_v8 = vadd.f32 %v327_v49, %v307_v61  ;;  %v347_v10 = vpop.f32.mrf.mxu0 }
  0xba   :  { %v367_v12 = vpop.f32.mrf.mxu1 }
  0xbb   :  { %v348_v11 = vadd.f32 %v347_v10, %v328_v8 }
  0xbd   :  { %v368_v13 = vadd.f32 %v367_v12, %v348_v11 }
  0xc6   :  { %v744_v27 = vpop.permute.xlu2 %743 }
  0xca   :  { %v387_v14 = vpop.f32.mrf.mxu2 }
  0xcb   :  { %v388_v15 = vadd.f32 %v387_v14, %v368_v13  ;;  %v3834_v13 = vld [vmem:[%s6052_s2 + $0x4] ss:$0 sm:$0xff] }
  0xcd   :  { %v4396_v18 = vadd.f32 %v388_v15, %v87_v53 }
  0xce   :  { %v759_v35 = vpop.permute.xlu2 %758 }
  0xd8   :  { %v407_v19 = vpop.f32.mrf.mxu3 }
  0xdc   :  { %v427_v20 = vpop.f32.mrf.mxu0  ;;  %v722_v25 = vpop.permute.xlu1 %721 }
  0xdd   :  { %v428_v21 = vadd.f32 %v427_v20, %v407_v19  ;;  %v715_v24 = vpop.permute.xlu0 %714 }
  0xe0   :  { %v447_v22 = vpop.f32.mrf.mxu1 }
  0xe1   :  { %v4398_v23 = vadd.f32 %v447_v22, %v428_v21  ;;  %v3835_v22 = vld [vmem:[%s6052_s2 + $0x6] ss:$0 sm:$0xff] }
  0xe4   :  { %v730_v28 = vpop.permute.xlu1 %729 }
  0xe5   :  { %v751_v26 = vpop.permute.xlu0 %750 }
 0x106   :  { %v603_v29 = vpop.permute.xlu0 %602 }
 0x107   :  { %606 = vst.msk [vmem:[#allocation3] sm:$0x7] %vm605_vm2, %v603_v29  ;;  %v3838_v29 = vld [vmem:[%s6052_s2 + $0x7] ss:$0 sm:$0xff] }
 0x108   :  { %v632_v36 = vpop.permute.xlu1 %631 }
 0x109   :  { %634 = vst.msk [vmem:[#allocation3 + $0x3] sm:$0x7] %vm605_vm2, %v632_v36 }
 0x10c   :  { %v541_v30 = vpop.f32.mrf.mxu0  ;;  %v561_v31 = vpop.f32.mrf.mxu1 }
 0x10d   :  { %v562_v32 = vadd.f32 %v561_v31, %v541_v30 }
 0x10e   :  { %v4412_v42 = vld [vmem:[#allocation3] sm:$0x7] }
 0x10f   :  { %565 = vst.msk [vmem:[#allocation2] sm:$0x7] %vm564_vm3, %v562_v32  ;;  %v717_v51 = vmul.f32 %v715_v24, %v4412_v42  ;;  %v746_v16 = vmul.f32 %v744_v27, %v4412_v42  ;;  %v3836_v24 = vld [vmem:[%s6052_s2 + $0x1] ss:$0 sm:$0xff] }
 0x110   :  { %v4410_v41 = vld [vmem:[#allocation3 + $0x3] sm:$0x7] }
 0x111   :  { %v724_v52 = vmul.f32 %v722_v25, %v4410_v41  ;;  %v753_v0 = vmul.f32 %v751_v26, %v4410_v41 }
 0x112   :  { %v660_v40 = vpop.permute.xlu2 %659 }
 0x113   :  { %662 = vst.msk [vmem:[#allocation3 + $0x6] sm:$0x7] %vm605_vm2, %v660_v40  ;;  %v725_v56 = vadd.f32 %v724_v52, %v717_v51  ;;  %v754_v17 = vadd.f32 %v753_v0, %v746_v16 }
 0x116   :  { %v675_v37 = vld [vmem:[#allocation2 + $0x2] sm:$0x1]  ;;  %v4403_v38 = vld [vmem:[#allocation2 + $0x1] sm:$0x1]  ;;  %v663_v39 = vld [vmem:[#allocation2] sm:$0x1] }
 0x117   :  { %677 = vrot.lane.b32.xlu2 %v675_v37, %s4079_s7  ;;  %671 = vrot.lane.b32.xlu1 %v4403_v38, %s4079_s7  ;;  %v573_v43 = vld [vmem:[#allocation2] sm:$0x7] }
 0x118   :  { %665 = vrot.lane.b32.xlu0 %v663_v39, %s4079_s7  ;;  %574 = vst.msk [vmem:[#allocation3 + $0x9] sm:$0x7] %vm567_vm1, %v573_v43  ;;  %v4440_v62 = vld [vmem:[#allocation2] sm:$0x1]  ;;  %v4445_v63 = vld [vmem:[#allocation2 + $0x2] sm:$0x1] }
 0x119   :  { %v4449_v33 = vld [vmem:[#allocation2 + $0x1] sm:$0x1]  ;;  %v4489_v26 = vld [vmem:[#allocation2 + $0x2] sm:$0x1]  ;;  %v4502_v30 = vld [vmem:[#allocation2] sm:$0x1] }
 0x11a   :  { %v4426_v53 = vld [vmem:[#allocation3 + $0x6] sm:$0x7]  ;;  %v4466_v8 = vld [vmem:[#allocation2 + $0x1] sm:$0x1]  ;;  %vm2467_vm1 = vcmask 125048  }
 0x11b   :  { %v732_v57 = vmul.f32 %v730_v28, %v4426_v53  ;;  %v761_v1 = vmul.f32 %v759_v35, %v4426_v53  ;;  %v3837_v28 = vld [vmem:[%s6052_s2 + $0x2] ss:$0 sm:$0xff] }
 0x11d   :  { %v733_v59 = vadd.f32 %v732_v57, %v725_v56  ;;  %v762_v2 = vadd.f32 %v761_v1, %v754_v17 }
 0x11f   :  { %786 = vrot.lane.b32.xlu2 %v3827_v44, %s4078_s23  ;;  %778 = vrot.lane.b32.xlu1 %v3828_v45, %s4078_s23 }
 0x120   :  { %771 = vrot.lane.b32.xlu0 %v3829_v47, %s4078_s23 }
 0x127   :  { %876 = vrot.lane.b32.xlu2 %v3830_v58, %s4080_s27  ;;  %764 = vrot.lane.b32.xlu1 %v762_v2, %s4081_s28 }
 0x128   :  { %735 = vrot.lane.b32.xlu0 %v733_v59, %s4081_s28 }
 0x12f   :  { %798 = vrot.lane.b32.xlu2 %v4440_v62, %s4081_s28 }
 0x130   :  { %847 = vrot.lane.b32.xlu0 %v3831_v60, %s4080_s27 }
 0x137   :  { %810 = vrot.lane.b32.xlu2 %v4445_v63, %s4081_s28 }
 0x138   :  { %804 = vrot.lane.b32.xlu0 %v4449_v33, %s4081_s28 }
 0x171   :  { %v678_v3 = vpop.permute.xlu2 %677 }
 0x172   :  { %v680_v4 = vsub.f32 %v675_v37, %v678_v3 }
 0x174   :  { %v694_v5 = vperm.slane %v680_v4, 0 }
 0x176   :  { %696 = vrot.lane.b32.xlu2 %v694_v5, %s4077_s14 }
 0x179   :  { %v787_v14 = vpop.permute.xlu2 %786 }
 0x17a   :  { %v789_v15 = vmul.f32 %v787_v14, %v4426_v53 }
 0x17e   :  { %891 = vrot.lane.b32.xlu2 %v3832_v6, %s4080_s27 }
 0x181   :  { %v877_v32 = vpop.permute.xlu2 %876 }
 0x186   :  { %919 = vrot.lane.b32.xlu2 %v3833_v7, %s4080_s27  ;;  %v3839_v7 = vld [vmem:[%s6052_s2 + $0x1] ss:$0 sm:$0xff] }
 0x189   :  { %v672_v34 = vpop.permute.xlu1 %671  ;;  %v799_v36 = vpop.permute.xlu2 %798 }
 0x18a   :  { %v666_v54 = vpop.permute.xlu0 %665  ;;  %v674_v25 = vsub.f32 %v4403_v38, %v672_v34 }
 0x18b   :  { %v668_v61 = vsub.f32 %v663_v39, %v666_v54  ;;  %v801_v54 = vsub.f32 %v4440_v62, %v799_v36  ;;  %v4564_v36 = vld [vmem:[#allocation2] sm:$0x1] }
 0x18c   :  { %v687_v27 = vperm.slane %v674_v25, 0 }
 0x18d   :  { %v681_v49 = vperm.slane %v668_v61, 0 }
 0x18e   :  { %937 = vrot.lane.b32.xlu2 %v4466_v8, %s4082_s12 }
 0x18f   :  { %683 = vrot.lane.b32.xlu0 %v681_v49, %s4077_s14 }
 0x191   :  { %v779_v9 = vpop.permute.xlu1 %778  ;;  %v811_v38 = vpop.permute.xlu2 %810 }
 0x192   :  { %v781_v10 = vmul.f32 %v779_v9, %v4410_v41  ;;  %v772_v11 = vpop.permute.xlu0 %771  ;;  %v813_v62 = vsub.f32 %v4445_v63, %v811_v38 }
 0x193   :  { %v774_v12 = vmul.f32 %v772_v11, %v4412_v42 }
 0x194   :  { %v827_v25 = vperm.slane %v813_v62, 0 }
 0x195   :  { %v782_v19 = vadd.f32 %v781_v10, %v774_v12  ;;  %v3840_v10 = vld [vmem:[%s6052_s2 + $0x2] ss:$0 sm:$0xff]  ;;  %v814_v12 = vperm.slane %v801_v54, 0 }
 0x197   :  { %883 = vrot.lane.b32.xlu0 %v3834_v13, %s4080_s27  ;;  %v790_v20 = vadd.f32 %v789_v15, %v782_v19 }
 0x199   :  { %792 = vrot.lane.b32.xlu1 %v790_v20, %s4081_s28  ;;  %v765_v31 = vpop.permute.xlu1 %764  ;;  %v3841_v20 = vld [vmem:[%s6052_s2] ss:$0 sm:$0xff] }
 0x19a   :  { %v736_v21 = vpop.permute.xlu0 %735  ;;  %767 = vst.msk [vmem:[#allocation3 + $0x3] sm:$0x7] %vm738_vm4, %v765_v31 }
 0x19b   :  { %739 = vst.msk [vmem:[#allocation3] sm:$0x7] %vm738_vm4, %v736_v21  ;;  %v3842_v21 = vld [vmem:[%s6052_s2 + $0x7] ss:$0 sm:$0xff] }
 0x19f   :  { %904 = vrot.lane.b32.xlu0 %v3835_v22, %s4080_s27 }
 0x1a1   :  { %854 = vrot.lane.b32.xlu1 %v3836_v24, %s4080_s27  ;;  %v4510_v47 = vld [vmem:[#allocation3 + $0x3] sm:$0x7] }
 0x1a2   :  { %v848_v35 = vpop.permute.xlu0 %847  ;;  %v4508_v45 = vld [vmem:[#allocation3] sm:$0x7] }
 0x1a3   :  { %v879_v52 = vmul.f32 %v877_v32, %v4508_v45  ;;  %v850_v3 = vmul.f32 %v848_v35, %v4508_v45 }
 0x1a7   :  { %943 = vrot.lane.b32.xlu0 %v4489_v26, %s4082_s12 }
 0x1a9   :  { %689 = vrot.lane.b32.xlu1 %v687_v27, %s4077_s14 }
 0x1aa   :  { %v805_v37 = vpop.permute.xlu0 %804 }
 0x1ab   :  { %v807_v0 = vsub.f32 %v4449_v33, %v805_v37 }
 0x1ad   :  { %v820_v1 = vperm.slane %v807_v0, 0 }
 0x1b1   :  { %862 = vrot.lane.b32.xlu1 %v3837_v28, %s4080_s27 }
 0x1b9   :  { %911 = vrot.lane.b32.xlu1 %v3838_v29, %s4080_s27  ;;  %v3843_v29 = vld [vmem:[%s6052_s2 + $0x4] ss:$0 sm:$0xff] }
 0x1c1   :  { %931 = vrot.lane.b32.xlu1 %v4502_v30, %s4082_s12 }
 0x1d0   :  { %v697_v40 = vpop.permute.xlu2 %696 }
 0x1d1   :  { %v699_v63 = vmul.f32 %v697_v40, %v4375_v48  ;;  %v3844_v48 = vld [vmem:[%s6052_s2 + $0x6] ss:$0 sm:$0xff]  ;;  %v3847_v40 = vld [vmem:[%s6052_s2 + $0x8] ss:$0 sm:$0xff] }
 0x1d8   :  { %v892_v56 = vpop.permute.xlu2 %891 }
 0x1e0   :  { %v920_v11 = vpop.permute.xlu2 %919 }
 0x201   :  { %v684_v39 = vpop.permute.xlu0 %683 }
 0x202   :  { %v686_v22 = vmul.f32 %v684_v39, %v4373_v46  ;;  %v701_v46 = vld [vmem:[#allocation3 + $0x9] sm:$0x7]  ;;  %v3846_v39 = vld [vmem:[%s6052_s2 + $0x5] ss:$0 sm:$0xff] }
 0x209   :  { %v884_v44 = vpop.permute.xlu0 %883 }
 0x20a   :  { %v886_v51 = vmul.f32 %v884_v44, %v4510_v47 }
 0x20b   :  { %v793_v43 = vpop.permute.xlu1 %792 }
 0x20c   :  { %795 = vst.msk [vmem:[#allocation3 + $0x6] sm:$0x7] %vm738_vm4, %v793_v43  ;;  %v887_v59 = vadd.f32 %v886_v51, %v879_v52  ;;  %v4579_v43 = vld [vmem:[#allocation2 + $0x2] sm:$0x1]  ;;  %v4586_v52 = vld [vmem:[#allocation2 + $0x1] sm:$0x1] }
 0x211   :  { %v905_v33 = vpop.permute.xlu0 %904 }
 0x212   :  { %v907_v49 = vmul.f32 %v905_v33, %v4508_v45 }
 0x213   :  { %v4514_v57 = vld [vmem:[#allocation3 + $0x6] sm:$0x7]  ;;  %v855_v58 = vpop.permute.xlu1 %854 }
 0x214   :  { %v894_v60 = vmul.f32 %v892_v56, %v4514_v57  ;;  %v857_v2 = vmul.f32 %v855_v58, %v4510_v47  ;;  %v922_v14 = vmul.f32 %v920_v11, %v4514_v57 }
 0x216   :  { %v895_v16 = vadd.f32 %v894_v60, %v887_v59  ;;  %v858_v5 = vadd.f32 %v857_v2, %v850_v3 }
 0x218   :  { %897 = vrot.lane.b32.xlu2 %v895_v16, %s4082_s12 }
 0x219   :  { %v944_v35 = vpop.permute.xlu0 %943 }
 0x21a   :  { %v946_v37 = vsub.f32 %v4489_v26, %v944_v35  ;;  %v938_v26 = vpop.permute.xlu2 %937 }
 0x21b   :  { %v690_v17 = vpop.permute.xlu1 %689  ;;  %v940_v44 = vsub.f32 %v4466_v8, %v938_v26  ;;  %v3854_v26 = vld [vmem:[%s6052_s2 + $0x7] ss:$0 sm:$0xff] }
 0x21c   :  { %v692_v19 = vmul.f32 %v690_v17, %v4377_v50  ;;  %v960_v38 = vperm.slane %v946_v37, 0 }
 0x21d   :  { %v953_v51 = vperm.slane %v940_v44, 0  ;;  %v3855_v44 = vld [vmem:[%s6052_s2 + $0x5] ss:$0 sm:$0xff] }
 0x21e   :  { %v693_v27 = vadd.f32 %v692_v19, %v686_v22 }
 0x220   :  { %822 = vrot.lane.b32.xlu2 %v820_v1, %s4078_s23  ;;  %v700_v28 = vadd.f32 %v699_v63, %v693_v27 }
 0x222   :  { %v702_v32 = vadd.f32 %v701_v46, %v700_v28 }
 0x223   :  { %v863_v4 = vpop.permute.xlu1 %862 }
 0x224   :  { %v865_v6 = vmul.f32 %v863_v4, %v4514_v57 }
 0x226   :  { %v866_v34 = vadd.f32 %v865_v6, %v858_v5 }
 0x228   :  { %868 = vrot.lane.b32.xlu1 %v866_v34, %s4082_s12  ;;  %987 = vrot.lane.b32.xlu2 %v3839_v7, %s4080_s27 }
 0x22b   :  { %v912_v61 = vpop.permute.xlu1 %911 }
 0x22c   :  { %v914_v9 = vmul.f32 %v912_v61, %v4510_v47 }
 0x22e   :  { %v915_v13 = vadd.f32 %v914_v9, %v907_v49  ;;  %v3848_v9 = vld [vmem:[%s6052_s2] ss:$0 sm:$0xff] }
 0x230   :  { %816 = vrot.lane.b32.xlu1 %v814_v12, %s4078_s23  ;;  %995 = vrot.lane.b32.xlu2 %v3840_v10, %s4080_s27  ;;  %v923_v15 = vadd.f32 %v922_v14, %v915_v13 }
 0x232   :  { %925 = vrot.lane.b32.xlu0 %v923_v15, %s4082_s12 }
 0x233   :  { %v932_v24 = vpop.permute.xlu1 %931 }
 0x234   :  { %v934_v50 = vsub.f32 %v4502_v30, %v932_v24  ;;  %v3845_v30 = vld [vmem:[%s6052_s2 + $0x3] ss:$0 sm:$0xff] }
 0x236   :  { %v947_v31 = vperm.slane %v934_v50, 0 }
 0x238   :  { %980 = vrot.lane.b32.xlu1 %v3841_v20, %s4080_s27  ;;  %1044 = vrot.lane.b32.xlu2 %v3842_v21, %s4080_s27 }
 0x23a   :  { %829 = vrot.lane.b32.xlu0 %v827_v25, %s4078_s23  ;;  %v3850_v25 = vld [vmem:[%s6052_s2 + $0x6] ss:$0 sm:$0xff] }
 0x240   :  { %1016 = vrot.lane.b32.xlu1 %v3843_v29, %s4080_s27  ;;  %949 = vrot.lane.b32.xlu2 %v947_v31, %s4080_s27 }
 0x242   :  { %704 = vrot.lane.b32.xlu0 %v702_v32, %s4079_s7 }
 0x248   :  { %1037 = vrot.lane.b32.xlu1 %v3844_v48, %s4080_s27  ;;  %1064 = vrot.lane.b32.xlu2 %v4564_v36, %s4082_s12 }
 0x24a   :  { %1009 = vrot.lane.b32.xlu0 %v3845_v30, %s4080_s27  ;;  %v3851_v30 = vld [vmem:[%s6052_s2 + $0x1] ss:$0 sm:$0xff] }
 0x250   :  { %962 = vrot.lane.b32.xlu1 %v960_v38, %s4080_s27  ;;  %v3852_v38 = vld [vmem:[%s6052_s2 + $0x2] ss:$0 sm:$0xff] }
 0x252   :  { %1024 = vrot.lane.b32.xlu0 %v3846_v39, %s4080_s27 }
 0x258   :  { %1076 = vrot.lane.b32.xlu1 %v4579_v43, %s4082_s12 }
 0x25a   :  { %1052 = vrot.lane.b32.xlu0 %v3847_v40, %s4080_s27  ;;  %v3853_v40 = vld [vmem:[%s6052_s2 + $0x3] ss:$0 sm:$0xff] }
 0x262   :  { %955 = vrot.lane.b32.xlu0 %v953_v51, %s4080_s27 }
 0x26a   :  { %1070 = vrot.lane.b32.xlu0 %v4586_v52, %s4082_s12 }
 0x272   :  { %v898_v56 = vpop.permute.xlu2 %897 }
 0x273   :  { %900 = vst.msk [vmem:[#allocation3 + $0x3] sm:$0x7] %vm871_vm5, %v898_v56 }
 0x27a   :  { %v823_v58 = vpop.permute.xlu2 %822  ;;  %v4593_v8 = vld [vmem:[#allocation3 + $0x3] sm:$0x7] }
 0x27b   :  { %v825_v10 = vmul.f32 %v823_v58, %v4410_v41 }
 0x282   :  { %v988_v60 = vpop.permute.xlu2 %987 }
 0x283   :  { %v990_v2 = vmul.f32 %v988_v60, %v4593_v8 }
 0x28a   :  { %v996_v4 = vpop.permute.xlu2 %995 }
 0x292   :  { %v1045_v63 = vpop.permute.xlu2 %1044 }
 0x293   :  { %v1047_v29 = vmul.f32 %v1045_v63, %v4593_v8 }
 0x29a   :  { %v869_v59 = vpop.permute.xlu1 %868  ;;  %v950_v39 = vpop.permute.xlu2 %949 }
 0x29b   :  { %872 = vst.msk [vmem:[#allocation3] sm:$0x7] %vm871_vm5, %v869_v59  ;;  %v3856_v59 = vld [vmem:[%s6052_s2 + $0x8] ss:$0 sm:$0xff] }
 0x2a2   :  { %v817_v16 = vpop.permute.xlu1 %816  ;;  %v4595_v17 = vld [vmem:[#allocation3] sm:$0x7]  ;;  %v1065_v56 = vpop.permute.xlu2 %1064 }
 0x2a3   :  { %v819_v49 = vmul.f32 %v817_v16, %v4412_v42  ;;  %v3849_v42 = vld [vmem:[%s6052_s2 + $0x4] ss:$0 sm:$0xff]  ;;  %v1067_v58 = vsub.f32 %v4564_v36, %v1065_v56  ;;  %v4666_v36 = vld [vmem:[#allocation2 + $0x1] sm:$0x1]  ;;  %v3863_v56 = vld [vmem:[%s6052_s2 + $0x7] ss:$0 sm:$0xff] }
 0x2a4   :  { %v926_v0 = vpop.permute.xlu0 %925 }
 0x2a5   :  { %928 = vst.msk [vmem:[#allocation3 + $0x6] sm:$0x7] %vm871_vm5, %v926_v0  ;;  %v826_v12 = vadd.f32 %v825_v10, %v819_v49  ;;  %v1080_v60 = vperm.slane %v1067_v58, 0  ;;  %v3864_v58 = vld [vmem:[%s6052_s2 + $0x5] ss:$0 sm:$0xff] }
 0x2aa   :  { %v981_v1 = vpop.permute.xlu1 %980 }
 0x2ab   :  { %v983_v3 = vmul.f32 %v981_v1, %v4595_v17 }
 0x2ac   :  { %v4599_v5 = vld [vmem:[#allocation3 + $0x6] sm:$0x7]  ;;  %v830_v6 = vpop.permute.xlu0 %829 }
 0x2ad   :  { %v991_v7 = vadd.f32 %v990_v2, %v983_v3  ;;  %v998_v34 = vmul.f32 %v996_v4, %v4599_v5  ;;  %v832_v11 = vmul.f32 %v830_v6, %v4426_v53  ;;  %v4661_v2 = vld [vmem:[#allocation2] sm:$0x1]  ;;  %v952_v6 = vmul.f32 %v950_v39, %v4508_v45  ;;  %v3861_v39 = vld [vmem:[%s6052_s2 + $0x6] ss:$0 sm:$0xff] }
 0x2af   :  { %v999_v33 = vadd.f32 %v998_v34, %v991_v7  ;;  %v833_v14 = vadd.f32 %v832_v11, %v826_v12 }
 0x2b1   :  { %1001 = vrot.lane.b32.xlu2 %v999_v33, %s4082_s12 }
 0x2b2   :  { %v1017_v54 = vpop.permute.xlu1 %1016 }
 0x2b3   :  { %v1019_v53 = vmul.f32 %v1017_v54, %v4593_v8 }
 0x2b4   :  { %v705_v61 = vpop.permute.xlu0 %704 }
 0x2b5   :  { %707 = vst.msk [vmem:[#allocation3 + $0x9] sm:$0x7] %vm605_vm2, %v705_v61  ;;  %vm2600_vm2 = vcmask 133248  }
 0x2b9   :  { %1113 = vrot.lane.b32.xlu2 %v3848_v9, %s4080_s27 }
 0x2ba   :  { %v1038_v13 = vpop.permute.xlu1 %1037 }
 0x2bb   :  { %v1040_v50 = vmul.f32 %v1038_v13, %v4595_v17 }
 0x2bc   :  { %v834_v15 = vld [vmem:[#allocation3 + $0x9] sm:$0x7]  ;;  %v1010_v62 = vpop.permute.xlu0 %1009 }
 0x2bd   :  { %v835_v19 = vadd.f32 %v834_v15, %v833_v14  ;;  %v1012_v20 = vmul.f32 %v1010_v62, %v4595_v17  ;;  %v1048_v32 = vadd.f32 %v1047_v29, %v1040_v50 }
 0x2bf   :  { %837 = vrot.lane.b32.xlu1 %v835_v19, %s4081_s28  ;;  %v1020_v22 = vadd.f32 %v1019_v53, %v1012_v20 }
 0x2c1   :  { %1149 = vrot.lane.b32.xlu2 %v3849_v42, %s4080_s27 }
 0x2c2   :  { %v963_v41 = vpop.permute.xlu1 %962 }
 0x2c3   :  { %v965_v34 = vmul.f32 %v963_v41, %v4514_v57 }
 0x2c4   :  { %v1025_v21 = vpop.permute.xlu0 %1024 }
 0x2c5   :  { %v1027_v24 = vmul.f32 %v1025_v21, %v4599_v5 }
 0x2c7   :  { %v1028_v27 = vadd.f32 %v1027_v24, %v1020_v22 }
 0x2c9   :  { %1170 = vrot.lane.b32.xlu2 %v3850_v25, %s4080_s27  ;;  %1030 = vrot.lane.b32.xlu0 %v1028_v27, %s4082_s12  ;;  %v3857_v27 = vld [vmem:[%s6052_s2] ss:$0 sm:$0xff] }
 0x2ca   :  { %v1077_v28 = vpop.permute.xlu1 %1076 }
 0x2cb   :  { %v1079_v31 = vsub.f32 %v4579_v43, %v1077_v28  ;;  %v4640_v43 = vld [vmem:[#allocation2 + $0x2] sm:$0x1] }
 0x2cc   :  { %v1053_v46 = vpop.permute.xlu0 %1052 }
 0x2cd   :  { %v1055_v48 = vmul.f32 %v1053_v46, %v4599_v5  ;;  %v1093_v35 = vperm.slane %v1079_v31, 0 }
 0x2cf   :  { %v1056_v37 = vadd.f32 %v1055_v48, %v1048_v32  ;;  %v3858_v48 = vld [vmem:[%s6052_s2 + $0x1] ss:$0 sm:$0xff] }
 0x2d1   :  { %1095 = vrot.lane.b32.xlu2 %v1093_v35, %s4080_s27  ;;  %1120 = vrot.lane.b32.xlu0 %v3851_v30, %s4080_s27  ;;  %v3859_v30 = vld [vmem:[%s6052_s2 + $0x4] ss:$0 sm:$0xff] }
 0x2d2   :  { %1058 = vrot.lane.b32.xlu1 %v1056_v37, %s4082_s12 }
 0x2d4   :  { %v956_v51 = vpop.permute.xlu0 %955 }
 0x2d5   :  { %v958_v4 = vmul.f32 %v956_v51, %v4510_v47 }
 0x2d7   :  { %v959_v7 = vadd.f32 %v958_v4, %v952_v6 }
 0x2d9   :  { %1209 = vrot.lane.b32.xlu2 %v4640_v43, %s4082_s12  ;;  %1128 = vrot.lane.b32.xlu0 %v3852_v38, %s4080_s27  ;;  %v966_v33 = vadd.f32 %v965_v34, %v959_v7  ;;  %v3860_v38 = vld [vmem:[%s6052_s2 + $0x2] ss:$0 sm:$0xff]  ;;  %v4741_v7 = vld [vmem:[#allocation2] sm:$0x1] }
 0x2da   :  { %1142 = vrot.lane.b32.xlu1 %v3853_v40, %s4080_s27 }
 0x2dc   :  { %v1071_v16 = vpop.permute.xlu0 %1070 }
 0x2dd   :  { %v1073_v0 = vsub.f32 %v4586_v52, %v1071_v16 }
 0x2df   :  { %v1086_v1 = vperm.slane %v1073_v0, 0 }
 0x2e1   :  { %1177 = vrot.lane.b32.xlu0 %v3854_v26, %s4080_s27  ;;  %v3862_v26 = vld [vmem:[%s6052_s2 + $0x3] ss:$0 sm:$0xff] }
 0x2e2   :  { %1157 = vrot.lane.b32.xlu1 %v3855_v44, %s4080_s27 }
 0x2e9   :  { %1082 = vrot.lane.b32.xlu0 %v1080_v60, %s4080_s27 }
 0x2ea   :  { %1185 = vrot.lane.b32.xlu1 %v3856_v59, %s4080_s27 }
 0x2f1   :  { %1197 = vrot.lane.b32.xlu0 %v4661_v2, %s4082_s12 }
 0x2f2   :  { %1088 = vrot.lane.b32.xlu1 %v1086_v1, %s4080_s27 }
 0x2fa   :  { %1203 = vrot.lane.b32.xlu1 %v4666_v36, %s4082_s12 }
 0x30b   :  { %v1002_v3 = vpop.permute.xlu2 %1001 }
 0x30c   :  { %1005 = vst.msk [vmem:[#allocation3] sm:$0x7] %vm1004_vm6, %v1002_v3  ;;  %v4734_v3 = vld [vmem:[#allocation2 + $0x2] sm:$0x1] }
 0x313   :  { %v1114_v9 = vpop.permute.xlu2 %1113  ;;  %v4680_v45 = vld [vmem:[#allocation3] sm:$0x7] }
 0x314   :  { %v1116_v13 = vmul.f32 %v1114_v9, %v4680_v45 }
 0x31b   :  { %v1150_v57 = vpop.permute.xlu2 %1149 }
 0x323   :  { %v1171_v21 = vpop.permute.xlu2 %1170 }
 0x324   :  { %v1173_v29 = vmul.f32 %v1171_v21, %v4680_v45 }
 0x32b   :  { %v1096_v35 = vpop.permute.xlu2 %1095 }
 0x331   :  { %v838_v52 = vpop.permute.xlu1 %837 }
 0x332   :  { %840 = vst.msk [vmem:[#allocation3 + $0x9] sm:$0x7] %vm738_vm4, %v838_v52  ;;  %vm2733_vm4 = vcmask 141448  }
 0x333   :  { %v1210_v44 = vpop.permute.xlu2 %1209 }
 0x334   :  { %v1212_v51 = vsub.f32 %v4640_v43, %v1210_v44  ;;  %v3865_v43 = vld [vmem:[%s6052_s2 + $0x8] ss:$0 sm:$0xff]  ;;  %v3869_v44 = vld [vmem:[%s6052_s2 + $0x4] ss:$0 sm:$0xff] }
 0x336   :  { %v1226_v59 = vperm.slane %v1212_v51, 0 }
 0x339   :  { %v967_v54 = vld [vmem:[#allocation3 + $0x9] sm:$0x7] }
 0x33a   :  { %v968_v61 = vadd.f32 %v967_v54, %v966_v33 }
 0x33b   :  { %v1031_v49 = vpop.permute.xlu0 %1030 }
 0x33c   :  { %1033 = vst.msk [vmem:[#allocation3 + $0x3] sm:$0x7] %vm1004_vm6, %v1031_v49  ;;  %970 = vrot.lane.b32.xlu2 %v968_v61, %s4082_s12  ;;  %v1098_v61 = vmul.f32 %v1096_v35, %v4599_v5  ;;  %v3867_v35 = vld [vmem:[%s6052_s2] ss:$0 sm:$0xff] }
 0x343   :  { %v1121_v10 = vpop.permute.xlu0 %1120  ;;  %v4678_v47 = vld [vmem:[#allocation3 + $0x3] sm:$0x7] }
 0x344   :  { %v1059_v11 = vpop.permute.xlu1 %1058  ;;  %v1123_v12 = vmul.f32 %v1121_v10, %v4678_v47  ;;  %v1152_v53 = vmul.f32 %v1150_v57, %v4678_v47 }
 0x345   :  { %1061 = vst.msk [vmem:[#allocation3 + $0x6] sm:$0x7] %vm1004_vm6, %v1059_v11 }
 0x346   :  { %v1124_v19 = vadd.f32 %v1123_v12, %v1116_v13 }
 0x34b   :  { %v1129_v14 = vpop.permute.xlu0 %1128 }
 0x34c   :  { %v4684_v15 = vld [vmem:[#allocation3 + $0x6] sm:$0x7]  ;;  %v1143_v62 = vpop.permute.xlu1 %1142 }
 0x34d   :  { %v1131_v42 = vmul.f32 %v1129_v14, %v4684_v15  ;;  %v1145_v41 = vmul.f32 %v1143_v62, %v4680_v45 }
 0x34f   :  { %v1132_v20 = vadd.f32 %v1131_v42, %v1124_v19  ;;  %v1153_v24 = vadd.f32 %v1152_v53, %v1145_v41 }
 0x351   :  { %1134 = vrot.lane.b32.xlu0 %v1132_v20, %s4082_s12 }
 0x353   :  { %v1178_v63 = vpop.permute.xlu0 %1177 }
 0x354   :  { %v1158_v22 = vpop.permute.xlu1 %1157  ;;  %v1180_v28 = vmul.f32 %v1178_v63, %v4678_v47 }
 0x355   :  { %v1160_v25 = vmul.f32 %v1158_v22, %v4684_v15 }
 0x356   :  { %v1181_v46 = vadd.f32 %v1180_v28, %v1173_v29  ;;  %v3866_v29 = vld [vmem:[%s6052_s2 + $0x1] ss:$0 sm:$0xff] }
 0x357   :  { %v1161_v50 = vadd.f32 %v1160_v25, %v1153_v24 }
 0x359   :  { %1163 = vrot.lane.b32.xlu1 %v1161_v50, %s4082_s12  ;;  %1246 = vrot.lane.b32.xlu0 %v3857_v27, %s4080_s27 }
 0x35b   :  { %v1083_v40 = vpop.permute.xlu0 %1082 }
 0x35c   :  { %v1186_v31 = vpop.permute.xlu1 %1185  ;;  %v1085_v54 = vmul.f32 %v1083_v40, %v4595_v17 }
 0x35d   :  { %v1188_v32 = vmul.f32 %v1186_v31, %v4684_v15 }
 0x35f   :  { %v1189_v37 = vadd.f32 %v1188_v32, %v1181_v46 }
 0x361   :  { %1253 = vrot.lane.b32.xlu1 %v3858_v48, %s4080_s27  ;;  %1282 = vrot.lane.b32.xlu0 %v3859_v30, %s4080_s27 }
 0x362   :  { %1191 = vrot.lane.b32.xlu2 %v1189_v37, %s4082_s12 }
 0x363   :  { %v1198_v16 = vpop.permute.xlu0 %1197 }
 0x364   :  { %v1089_v60 = vpop.permute.xlu1 %1088  ;;  %v1200_v0 = vsub.f32 %v4661_v2, %v1198_v16  ;;  %v4746_v2 = vld [vmem:[#allocation2 + $0x1] sm:$0x1]  ;;  %v3872_v16 = vld [vmem:[%s6052_s2 + $0x6] ss:$0 sm:$0xff] }
 0x365   :  { %v1091_v34 = vmul.f32 %v1089_v60, %v4593_v8 }
 0x366   :  { %v1213_v1 = vperm.slane %v1200_v0, 0  ;;  %v3873_v0 = vld [vmem:[%s6052_s2 + $0x5] ss:$0 sm:$0xff] }
 0x369   :  { %1261 = vrot.lane.b32.xlu1 %v3860_v38, %s4080_s27  ;;  %1303 = vrot.lane.b32.xlu0 %v3861_v39, %s4080_s27  ;;  %v3868_v39 = vld [vmem:[%s6052_s2 + $0x2] ss:$0 sm:$0xff] }
 0x36a   :  { %1275 = vrot.lane.b32.xlu2 %v3862_v26, %s4080_s27 }
 0x36c   :  { %v1204_v4 = vpop.permute.xlu1 %1203 }
 0x36d   :  { %v1206_v52 = vsub.f32 %v4666_v36, %v1204_v4  ;;  %v1092_v36 = vadd.f32 %v1091_v34, %v1085_v54 }
 0x36f   :  { %v1219_v6 = vperm.slane %v1206_v52, 0  ;;  %v1099_v49 = vadd.f32 %v1098_v61, %v1092_v36  ;;  %v4822_v36 = vld [vmem:[#allocation2 + $0x1] sm:$0x1] }
 0x371   :  { %1310 = vrot.lane.b32.xlu1 %v3863_v56, %s4080_s27  ;;  %1228 = vrot.lane.b32.xlu0 %v1226_v59, %s4080_s27  ;;  %v3870_v56 = vld [vmem:[%s6052_s2 + $0x7] ss:$0 sm:$0xff] }
 0x372   :  { %1290 = vrot.lane.b32.xlu2 %v3864_v58, %s4080_s27  ;;  %v3871_v58 = vld [vmem:[%s6052_s2 + $0x3] ss:$0 sm:$0xff] }
 0x379   :  { %1342 = vrot.lane.b32.xlu0 %v4734_v3, %s4082_s12  ;;  %1215 = vrot.lane.b32.xlu1 %v1213_v1, %s4080_s27 }
 0x37a   :  { %1318 = vrot.lane.b32.xlu2 %v3865_v43, %s4080_s27 }
 0x381   :  { %1330 = vrot.lane.b32.xlu1 %v4741_v7, %s4082_s12 }
 0x382   :  { %1221 = vrot.lane.b32.xlu2 %v1219_v6, %s4080_s27 }
 0x38a   :  { %1336 = vrot.lane.b32.xlu2 %v4746_v2, %s4082_s12 }
 0x396   :  { %v971_v33 = vpop.permute.xlu2 %970 }
 0x397   :  { %973 = vst.msk [vmem:[#allocation3 + $0x9] sm:$0x7] %vm871_vm5, %v971_v33  ;;  %v4815_v33 = vld [vmem:[#allocation2] sm:$0x1]  ;;  %vm2866_vm5 = vcmask 149648  }
 0x39e   :  { %v1100_v9 = vld [vmem:[#allocation3 + $0x9] sm:$0x7] }
 0x39f   :  { %v1101_v10 = vadd.f32 %v1100_v9, %v1099_v49 }
 0x3a1   :  { %1103 = vrot.lane.b32.xlu0 %v1101_v10, %s4082_s12 }
 0x3bc   :  { %v1192_v11 = vpop.permute.xlu2 %1191 }
 0x3bd   :  { %1194 = vst.msk [vmem:[#allocation3 + $0x6] sm:$0x7] %vm1137_vm7, %v1192_v11 }
 0x3c3   :  { %v1135_v12 = vpop.permute.xlu0 %1134 }
 0x3c4   :  { %1138 = vst.msk [vmem:[#allocation3] sm:$0x7] %vm1137_vm7, %v1135_v12  ;;  %v1276_v8 = vpop.permute.xlu2 %1275  ;;  %v4764_v41 = vld [vmem:[#allocation3 + $0x6] sm:$0x7] }
 0x3cb   :  { %v1164_v57 = vpop.permute.xlu1 %1163  ;;  %v1247_v17 = vpop.permute.xlu0 %1246  ;;  %v4758_v13 = vld [vmem:[#allocation3] sm:$0x7] }
 0x3cc   :  { %1166 = vst.msk [vmem:[#allocation3 + $0x3] sm:$0x7] %vm1137_vm7, %v1164_v57  ;;  %v1291_v5 = vpop.permute.xlu2 %1290  ;;  %v1278_v42 = vmul.f32 %v1276_v8, %v4758_v13  ;;  %v1249_v25 = vmul.f32 %v1247_v17, %v4758_v13  ;;  %v4831_v57 = vld [vmem:[#allocation2 + $0x2] sm:$0x1] }
 0x3cd   :  { %v1293_v53 = vmul.f32 %v1291_v5, %v4764_v41 }
 0x3d3   :  { %v4760_v14 = vld [vmem:[#allocation3 + $0x3] sm:$0x7]  ;;  %v1254_v62 = vpop.permute.xlu1 %1253  ;;  %v1283_v19 = vpop.permute.xlu0 %1282 }
 0x3d4   :  { %v1285_v20 = vmul.f32 %v1283_v19, %v4760_v14  ;;  %v1256_v22 = vmul.f32 %v1254_v62, %v4760_v14  ;;  %v1319_v46 = vpop.permute.xlu2 %1318 }
 0x3d5   :  { %v1321_v37 = vmul.f32 %v1319_v46, %v4764_v41 }
 0x3d6   :  { %v1286_v21 = vadd.f32 %v1285_v20, %v1278_v42  ;;  %v1257_v63 = vadd.f32 %v1256_v22, %v1249_v25 }
 0x3d8   :  { %v1294_v24 = vadd.f32 %v1293_v53, %v1286_v21 }
 0x3da   :  { %1296 = vrot.lane.b32.xlu2 %v1294_v24, %s4082_s12 }
 0x3db   :  { %v1262_v27 = vpop.permute.xlu1 %1261  ;;  %v1304_v31 = vpop.permute.xlu0 %1303 }
 0x3dc   :  { %v1264_v50 = vmul.f32 %v1262_v27, %v4764_v41  ;;  %v1306_v48 = vmul.f32 %v1304_v31, %v4758_v13  ;;  %v1222_v43 = vpop.permute.xlu2 %1221 }
 0x3dd   :  { %v1224_v9 = vmul.f32 %v1222_v43, %v4678_v47  ;;  %v3882_v43 = vld [vmem:[%s6052_s2 + $0x5] ss:$0 sm:$0xff] }
 0x3de   :  { %v1265_v28 = vadd.f32 %v1264_v50, %v1257_v63 }
 0x3e0   :  { %1267 = vrot.lane.b32.xlu1 %v1265_v28, %s4082_s12 }
 0x3e2   :  { %1386 = vrot.lane.b32.xlu2 %v3866_v29, %s4080_s27 }
 0x3e3   :  { %v1311_v32 = vpop.permute.xlu1 %1310  ;;  %v1229_v51 = vpop.permute.xlu0 %1228 }
 0x3e4   :  { %v1313_v30 = vmul.f32 %v1311_v32, %v4760_v14  ;;  %v1337_v34 = vpop.permute.xlu2 %1336  ;;  %v1231_v11 = vmul.f32 %v1229_v51, %v4684_v15  ;;  %v3875_v32 = vld [vmem:[%s6052_s2] ss:$0 sm:$0xff]  ;;  %v3877_v51 = vld [vmem:[%s6052_s2 + $0x1] ss:$0 sm:$0xff] }
 0x3e6   :  { %v1314_v38 = vadd.f32 %v1313_v30, %v1306_v48 }
 0x3e8   :  { %1379 = vrot.lane.b32.xlu1 %v3867_v35, %s4080_s27  ;;  %v1322_v40 = vadd.f32 %v1321_v37, %v1314_v38 }
 0x3ea   :  { %1394 = vrot.lane.b32.xlu2 %v3868_v39, %s4080_s27  ;;  %1324 = vrot.lane.b32.xlu0 %v1322_v40, %s4082_s12 }
 0x3eb   :  { %v1216_v26 = vpop.permute.xlu1 %1215  ;;  %v1343_v1 = vpop.permute.xlu0 %1342 }
 0x3ec   :  { %v1345_v52 = vsub.f32 %v4734_v3, %v1343_v1  ;;  %v1339_v3 = vsub.f32 %v4746_v2, %v1337_v34  ;;  %v1218_v61 = vmul.f32 %v1216_v26, %v4680_v45 }
 0x3ee   :  { %v1359_v6 = vperm.slane %v1345_v52, 0  ;;  %v1352_v54 = vperm.slane %v1339_v3, 0  ;;  %v1225_v10 = vadd.f32 %v1224_v9, %v1218_v61 }
 0x3f0   :  { %1415 = vrot.lane.b32.xlu1 %v3869_v44, %s4080_s27  ;;  %v1232_v12 = vadd.f32 %v1231_v11, %v1225_v10  ;;  %v3876_v44 = vld [vmem:[%s6052_s2 + $0x4] ss:$0 sm:$0xff]  ;;  %v4896_v10 = vld [vmem:[#allocation2] sm:$0x1] }
 0x3f2   :  { %1443 = vrot.lane.b32.xlu2 %v3870_v56, %s4080_s27  ;;  %1408 = vrot.lane.b32.xlu0 %v3871_v58, %s4080_s27  ;;  %v3878_v58 = vld [vmem:[%s6052_s2 + $0x6] ss:$0 sm:$0xff] }
 0x3f3   :  { %v1331_v59 = vpop.permute.xlu1 %1330 }
 0x3f4   :  { %v1333_v60 = vsub.f32 %v4741_v7, %v1331_v59  ;;  %v3874_v7 = vld [vmem:[%s6052_s2 + $0x8] ss:$0 sm:$0xff]  ;;  %v3879_v59 = vld [vmem:[%s6052_s2 + $0x2] ss:$0 sm:$0xff] }
 0x3f6   :  { %v1346_v4 = vperm.slane %v1333_v60, 0 }
 0x3f8   :  { %1436 = vrot.lane.b32.xlu1 %v3872_v16, %s4080_s27  ;;  %v3880_v16 = vld [vmem:[%s6052_s2 + $0x3] ss:$0 sm:$0xff] }
 0x3fa   :  { %1348 = vrot.lane.b32.xlu2 %v1346_v4, %s4080_s27  ;;  %1423 = vrot.lane.b32.xlu0 %v3873_v0, %s4080_s27  ;;  %v3881_v0 = vld [vmem:[%s6052_s2 + $0x7] ss:$0 sm:$0xff] }
 0x400   :  { %1361 = vrot.lane.b32.xlu1 %v1359_v6, %s4080_s27 }
 0x402   :  { %1463 = vrot.lane.b32.xlu2 %v4815_v33, %s4082_s12  ;;  %1451 = vrot.lane.b32.xlu0 %v3874_v7, %s4080_s27  ;;  %v3883_v7 = vld [vmem:[%s6052_s2 + $0x8] ss:$0 sm:$0xff] }
 0x40a   :  { %1354 = vrot.lane.b32.xlu0 %v1352_v54, %s4080_s27 }
 0x412   :  { %1469 = vrot.lane.b32.xlu0 %v4822_v36, %s4082_s12 }
 0x413   :  { %v1104_v49 = vpop.permute.xlu0 %1103 }
 0x414   :  { %1106 = vst.msk [vmem:[#allocation3 + $0x9] sm:$0x7] %vm1004_vm6, %v1104_v49  ;;  %vm2999_vm6 = vcmask 157848  }
 0x41b   :  { %v1233_v2 = vld [vmem:[#allocation3 + $0x9] sm:$0x7] }
 0x41c   :  { %v1234_v8 = vadd.f32 %v1233_v2, %v1232_v12 }
 0x41e   :  { %1236 = vrot.lane.b32.xlu1 %v1234_v8, %s4082_s12 }
 0x426   :  { %1475 = vrot.lane.b32.xlu1 %v4831_v57, %s4082_s12 }
 0x434   :  { %v1297_v45 = vpop.permute.xlu2 %1296 }
 0x435   :  { %1299 = vst.msk [vmem:[#allocation3 + $0x3] sm:$0x7] %vm1270_vm8, %v1297_v45 }
 0x43c   :  { %v1387_v17 = vpop.permute.xlu2 %1386  ;;  %v4840_v19 = vld [vmem:[#allocation3 + $0x3] sm:$0x7] }
 0x43d   :  { %v1389_v20 = vmul.f32 %v1387_v17, %v4840_v19  ;;  %v4906_v17 = vld [vmem:[#allocation2 + $0x1] sm:$0x1] }
 0x444   :  { %v1395_v53 = vpop.permute.xlu2 %1394 }
 0x44c   :  { %v1444_v35 = vpop.permute.xlu2 %1443 }
 0x44d   :  { %v1446_v38 = vmul.f32 %v1444_v35, %v4840_v19 }
 0x452   :  { %v1268_v47 = vpop.permute.xlu1 %1267 }
 0x453   :  { %1271 = vst.msk [vmem:[#allocation3] sm:$0x7] %vm1270_vm8, %v1268_v47 }
 0x454   :  { %v1349_v60 = vpop.permute.xlu2 %1348 }
 0x455   :  { %v1351_v12 = vmul.f32 %v1349_v60, %v4758_v13 }
 0x45a   :  { %v1380_v5 = vpop.permute.xlu1 %1379  ;;  %v4838_v62 = vld [vmem:[#allocation3] sm:$0x7] }
 0x45b   :  { %v1382_v42 = vmul.f32 %v1380_v5, %v4838_v62 }
 0x45c   :  { %v1325_v15 = vpop.permute.xlu0 %1324  ;;  %v1464_v4 = vpop.permute.xlu2 %1463 }
 0x45d   :  { %1327 = vst.msk [vmem:[#allocation3 + $0x6] sm:$0x7] %vm1270_vm8, %v1325_v15  ;;  %v1390_v25 = vadd.f32 %v1389_v20, %v1382_v42  ;;  %v1466_v6 = vsub.f32 %v4815_v33, %v1464_v4  ;;  %v3888_v4 = vld [vmem:[%s6052_s2 + $0x6] ss:$0 sm:$0xff] }
 0x45f   :  { %v1479_v34 = vperm.slane %v1466_v6, 0  ;;  %v3889_v6 = vld [vmem:[%s6052_s2 + $0x3] ss:$0 sm:$0xff] }
 0x462   :  { %v1416_v22 = vpop.permute.xlu1 %1415 }
 0x463   :  { %v1418_v28 = vmul.f32 %v1416_v22, %v4840_v19 }
 0x464   :  { %v4844_v21 = vld [vmem:[#allocation3 + $0x6] sm:$0x7]  ;;  %v1409_v24 = vpop.permute.xlu0 %1408 }
 0x465   :  { %v1397_v27 = vmul.f32 %v1395_v53, %v4844_v21  ;;  %v1411_v50 = vmul.f32 %v1409_v24, %v4838_v62 }
 0x467   :  { %v1398_v63 = vadd.f32 %v1397_v27, %v1390_v25  ;;  %v1419_v31 = vadd.f32 %v1418_v28, %v1411_v50 }
 0x469   :  { %1400 = vrot.lane.b32.xlu2 %v1398_v63, %s4082_s12 }
 0x46a   :  { %v1437_v48 = vpop.permute.xlu1 %1436 }
 0x46b   :  { %v1439_v37 = vmul.f32 %v1437_v48, %v4838_v62 }
 0x46c   :  { %v1424_v29 = vpop.permute.xlu0 %1423 }
 0x46d   :  { %v1426_v46 = vmul.f32 %v1424_v29, %v4844_v21  ;;  %v1447_v40 = vadd.f32 %v1446_v38, %v1439_v37 }
 0x46f   :  { %v1427_v30 = vadd.f32 %v1426_v46, %v1419_v31 }
 0x471   :  { %1512 = vrot.lane.b32.xlu2 %v3875_v32, %s4080_s27  ;;  %1429 = vrot.lane.b32.xlu0 %v1427_v30, %s4082_s12 }
 0x472   :  { %v1362_v52 = vpop.permute.xlu1 %1361 }
 0x474   :  { %v1452_v39 = vpop.permute.xlu0 %1451 }
 0x475   :  { %v1454_v26 = vmul.f32 %v1452_v39, %v4844_v21  ;;  %v3884_v39 = vld [vmem:[%s6052_s2] ss:$0 sm:$0xff] }
 0x477   :  { %v1455_v56 = vadd.f32 %v1454_v26, %v1447_v40 }
 0x479   :  { %1548 = vrot.lane.b32.xlu2 %v3876_v44, %s4080_s27  ;;  %1519 = vrot.lane.b32.xlu0 %v3877_v51, %s4080_s27 }
 0x47a   :  { %1457 = vrot.lane.b32.xlu1 %v1455_v56, %s4082_s12 }
 0x47c   :  { %v1355_v1 = vpop.permute.xlu0 %1354 }
 0x47d   :  { %v1357_v33 = vmul.f32 %v1355_v1, %v4760_v14  ;;  %v3887_v1 = vld [vmem:[%s6052_s2 + $0x2] ss:$0 sm:$0xff] }
 0x47f   :  { %v1358_v8 = vadd.f32 %v1357_v33, %v1351_v12 }
 0x481   :  { %1569 = vrot.lane.b32.xlu2 %v3878_v58, %s4080_s27  ;;  %1527 = vrot.lane.b32.xlu0 %v3879_v59, %s4080_s27 }
 0x482   :  { %1541 = vrot.lane.b32.xlu1 %v3880_v16, %s4080_s27  ;;  %v3885_v16 = vld [vmem:[%s6052_s2 + $0x1] ss:$0 sm:$0xff] }
 0x484   :  { %v1470_v54 = vpop.permute.xlu0 %1469 }
 0x485   :  { %v1472_v61 = vsub.f32 %v4822_v36, %v1470_v54  ;;  %v1364_v36 = vmul.f32 %v1362_v52, %v4764_v41 }
 0x487   :  { %v1485_v49 = vperm.slane %v1472_v61, 0  ;;  %v1365_v47 = vadd.f32 %v1364_v36, %v1358_v8  ;;  %v3892_v36 = vld [vmem:[%s6052_s2 + $0x8] ss:$0 sm:$0xff] }
 0x489   :  { %1576 = vrot.lane.b32.xlu0 %v3881_v0, %s4080_s27  ;;  %v3886_v0 = vld [vmem:[%s6052_s2 + $0x4] ss:$0 sm:$0xff] }
 0x48a   :  { %1556 = vrot.lane.b32.xlu1 %v3882_v43, %s4080_s27 }
 0x490   :  { %v1237_v3 = vpop.permute.xlu1 %1236 }
 0x491   :  { %1239 = vst.msk [vmem:[#allocation3 + $0x9] sm:$0x7] %vm1137_vm7, %v1237_v3  ;;  %1481 = vrot.lane.b32.xlu0 %v1479_v34, %s4080_s27  ;;  %vm3132_vm7 = vcmask 166048  }
 0x492   :  { %1584 = vrot.lane.b32.xlu1 %v3883_v7, %s4080_s27 }
 0x498   :  { %v1476_v9 = vpop.permute.xlu1 %1475  ;;  %v1366_v45 = vld [vmem:[#allocation3 + $0x9] sm:$0x7] }
 0x499   :  { %v1478_v11 = vsub.f32 %v4831_v57, %v1476_v9  ;;  %1596 = vrot.lane.b32.xlu0 %v4896_v10, %s4082_s12  ;;  %v1367_v14 = vadd.f32 %v1366_v45, %v1365_v47  ;;  %v1606_v57 = vld [vmem:[#allocation2 + $0x2] sm:$0x1]  ;;  %v3891_v9 = vld [vmem:[%s6052_s2 + $0x5] ss:$0 sm:$0xff] }
 0x49a   :  { %1487 = vrot.lane.b32.xlu1 %v1485_v49, %s4080_s27  ;;  %v3890_v49 = vld [vmem:[%s6052_s2 + $0x7] ss:$0 sm:$0xff] }
 0x49b   :  { %v1492_v2 = vperm.slane %v1478_v11, 0 }
 0x49d   :  { %1494 = vrot.lane.b32.xlu2 %v1492_v2, %s4080_s27 }
 0x4a2   :  { %1602 = vrot.lane.b32.xlu1 %v4906_v17, %s4082_s12 }
 0x4a5   :  { %1369 = vrot.lane.b32.xlu2 %v1367_v14, %s4082_s12 }
 0x4ad   :  { %1608 = vrot.lane.b32.xlu2 %v1606_v57, %s4082_s12 }
 0x4c3   :  { %v1401_v13 = vpop.permute.xlu2 %1400 }
 0x4c4   :  { %1404 = vst.msk [vmem:[#allocation3] sm:$0x7] %vm1403_vm9, %v1401_v13  ;;  %v4978_v13 = vld [vmem:[#allocation2 + $0x2] sm:$0x1] }
 0x4cb   :  { %v1513_v5 = vpop.permute.xlu2 %1512  ;;  %v4917_v24 = vld [vmem:[#allocation3] sm:$0x7] }
 0x4cc   :  { %v1515_v27 = vmul.f32 %v1513_v5, %v4917_v24  ;;  %v4987_v5 = vld [vmem:[#allocation2 + $0x1] sm:$0x1] }
 0x4d3   :  { %v1549_v41 = vpop.permute.xlu2 %1548 }
 0x4db   :  { %v1570_v22 = vpop.permute.xlu2 %1569 }
 0x4dc   :  { %v1572_v56 = vmul.f32 %v1570_v22, %v4917_v24 }
 0x4e3   :  { %v1430_v15 = vpop.permute.xlu0 %1429 }
 0x4e4   :  { %1432 = vst.msk [vmem:[#allocation3 + $0x3] sm:$0x7] %vm1403_vm9, %v1430_v15 }
 0x4eb   :  { %v1520_v42 = vpop.permute.xlu0 %1519  ;;  %v4915_v53 = vld [vmem:[#allocation3 + $0x3] sm:$0x7] }
 0x4ec   :  { %v1458_v20 = vpop.permute.xlu1 %1457  ;;  %v1522_v25 = vmul.f32 %v1520_v42, %v4915_v53  ;;  %v1551_v30 = vmul.f32 %v1549_v41, %v4915_v53 }
 0x4ed   :  { %1460 = vst.msk [vmem:[#allocation3 + $0x6] sm:$0x7] %vm1403_vm9, %v1458_v20 }
 0x4ee   :  { %v1523_v29 = vadd.f32 %v1522_v25, %v1515_v27 }
 0x4f3   :  { %v1528_v63 = vpop.permute.xlu0 %1527 }
 0x4f4   :  { %v4921_v50 = vld [vmem:[#allocation3 + $0x6] sm:$0x7]  ;;  %v1542_v28 = vpop.permute.xlu1 %1541 }
 0x4f5   :  { %v1530_v31 = vmul.f32 %v1528_v63, %v4921_v50  ;;  %v1544_v48 = vmul.f32 %v1542_v28, %v4917_v24 }
 0x4f7   :  { %v1531_v46 = vadd.f32 %v1530_v31, %v1523_v29  ;;  %v1495_v32 = vpop.permute.xlu2 %1494  ;;  %v1552_v37 = vadd.f32 %v1551_v30, %v1544_v48 }
 0x4f8   :  { %v1497_v2 = vmul.f32 %v1495_v32, %v4844_v21 }
 0x4f9   :  { %1533 = vrot.lane.b32.xlu0 %v1531_v46, %s4082_s12 }
 0x4fb   :  { %v1577_v40 = vpop.permute.xlu0 %1576 }
 0x4fc   :  { %v1557_v35 = vpop.permute.xlu1 %1556  ;;  %v1579_v51 = vmul.f32 %v1577_v40, %v4915_v53 }
 0x4fd   :  { %v1559_v38 = vmul.f32 %v1557_v35, %v4921_v50 }
 0x4fe   :  { %v1580_v59 = vadd.f32 %v1579_v51, %v1572_v56  ;;  %v3893_v51 = vld [vmem:[%s6052_s2 + $0x1] ss:$0 sm:$0xff] }
 0x4ff   :  { %v1560_v26 = vadd.f32 %v1559_v38, %v1552_v37  ;;  %v1370_v44 = vpop.permute.xlu2 %1369 }
 0x500   :  { %1372 = vst.msk [vmem:[#allocation3 + $0x9] sm:$0x7] %vm1270_vm8, %v1370_v44  ;;  %vm3265_vm8 = vcmask 174248  }
 0x501   :  { %1562 = vrot.lane.b32.xlu1 %v1560_v26, %s4082_s12  ;;  %1645 = vrot.lane.b32.xlu0 %v3884_v39, %s4080_s27 }
 0x503   :  { %v1482_v52 = vpop.permute.xlu0 %1481 }
 0x504   :  { %v1585_v58 = vpop.permute.xlu1 %1584  ;;  %v1484_v61 = vmul.f32 %v1482_v52, %v4838_v62 }
 0x505   :  { %v1587_v60 = vmul.f32 %v1585_v58, %v4921_v50 }
 0x507   :  { %v1588_v43 = vadd.f32 %v1587_v60, %v1580_v59  ;;  %v1609_v7 = vpop.permute.xlu2 %1608  ;;  %v1499_v8 = vld [vmem:[#allocation3 + $0x9] sm:$0x7] }
 0x508   :  { %v1611_v3 = vsub.f32 %v1606_v57, %v1609_v7 }
 0x509   :  { %1652 = vrot.lane.b32.xlu1 %v3885_v16, %s4080_s27  ;;  %1681 = vrot.lane.b32.xlu0 %v3886_v0, %s4080_s27  ;;  %v3894_v0 = vld [vmem:[%s6052_s2] ss:$0 sm:$0xff] }
 0x50a   :  { %1590 = vrot.lane.b32.xlu2 %v1588_v43, %s4082_s12  ;;  %v1625_v33 = vperm.slane %v1611_v3, 0  ;;  %v3897_v3 = vld [vmem:[%s6052_s2 + $0x7] ss:$0 sm:$0xff] }
 0x50b   :  { %v1597_v12 = vpop.permute.xlu0 %1596 }
 0x50c   :  { %v1488_v34 = vpop.permute.xlu1 %1487 }
 0x50d   :  { %v1490_v54 = vmul.f32 %v1488_v34, %v4840_v19  ;;  %v1599_v19 = vsub.f32 %v4896_v10, %v1597_v12  ;;  %v4980_v10 = vld [vmem:[#allocation2] sm:$0x1]  ;;  %v3896_v34 = vld [vmem:[%s6052_s2 + $0x4] ss:$0 sm:$0xff] }
 0x50f   :  { %v1491_v11 = vadd.f32 %v1490_v54, %v1484_v61  ;;  %v1612_v45 = vperm.slane %v1599_v19, 0  ;;  %v3898_v54 = vld [vmem:[%s6052_s2 + $0x3] ss:$0 sm:$0xff] }
 0x511   :  { %1660 = vrot.lane.b32.xlu1 %v3887_v1, %s4080_s27  ;;  %1702 = vrot.lane.b32.xlu0 %v3888_v4, %s4080_s27  ;;  %v1498_v62 = vadd.f32 %v1497_v2, %v1491_v11  ;;  %v3895_v4 = vld [vmem:[%s6052_s2 + $0x2] ss:$0 sm:$0xff] }
 0x512   :  { %1674 = vrot.lane.b32.xlu2 %v3889_v6, %s4080_s27 }
 0x513   :  { %v1500_v47 = vadd.f32 %v1499_v8, %v1498_v62 }
 0x514   :  { %v1603_v14 = vpop.permute.xlu1 %1602 }
 0x515   :  { %v1605_v21 = vsub.f32 %v4906_v17, %v1603_v14 }
 0x517   :  { %v1618_v57 = vperm.slane %v1605_v21, 0  ;;  %v5054_v21 = vld [vmem:[#allocation2] sm:$0x1] }
 0x519   :  { %1709 = vrot.lane.b32.xlu1 %v3890_v49, %s4080_s27  ;;  %1627 = vrot.lane.b32.xlu0 %v1625_v33, %s4080_s27  ;;  %v3900_v33 = vld [vmem:[%s6052_s2 + $0x5] ss:$0 sm:$0xff] }
 0x51a   :  { %1689 = vrot.lane.b32.xlu2 %v3891_v9, %s4080_s27  ;;  %v3899_v9 = vld [vmem:[%s6052_s2 + $0x6] ss:$0 sm:$0xff] }
 0x521   :  { %1502 = vrot.lane.b32.xlu0 %v1500_v47, %s4082_s12  ;;  %1614 = vrot.lane.b32.xlu1 %v1612_v45, %s4080_s27  ;;  %v3901_v45 = vld [vmem:[%s6052_s2 + $0x8] ss:$0 sm:$0xff] }
 0x522   :  { %1717 = vrot.lane.b32.xlu2 %v3892_v36, %s4080_s27 }
 0x529   :  { %1741 = vrot.lane.b32.xlu0 %v4978_v13, %s4082_s12  ;;  %1729 = vrot.lane.b32.xlu1 %v4980_v10, %s4082_s12 }
 0x52a   :  { %1620 = vrot.lane.b32.xlu2 %v1618_v57, %s4080_s27 }
 0x532   :  { %1735 = vrot.lane.b32.xlu2 %v4987_v5, %s4082_s12 }
 0x564   :  { %v1591_v17 = vpop.permute.xlu2 %1590 }
 0x565   :  { %1593 = vst.msk [vmem:[#allocation3 + $0x6] sm:$0x7] %vm1536_vm10, %v1591_v17 }
 0x56b   :  { %v1534_v15 = vpop.permute.xlu0 %1533 }
 0x56c   :  { %1537 = vst.msk [vmem:[#allocation3] sm:$0x7] %vm1536_vm10, %v1534_v15  ;;  %v1675_v41 = vpop.permute.xlu2 %1674  ;;  %v5000_v46 = vld [vmem:[#allocation3 + $0x6] sm:$0x7]  ;;  %v5063_v15 = vld [vmem:[#allocation2 + $0x2] sm:$0x1] }
 0x573   :  { %v1563_v42 = vpop.permute.xlu1 %1562  ;;  %v1646_v20 = vpop.permute.xlu0 %1645  ;;  %v4994_v22 = vld [vmem:[#allocation3] sm:$0x7] }
 0x574   :  { %1565 = vst.msk [vmem:[#allocation3 + $0x3] sm:$0x7] %vm1536_vm10, %v1563_v42  ;;  %v1690_v25 = vpop.permute.xlu2 %1689  ;;  %v1677_v29 = vmul.f32 %v1675_v41, %v4994_v22  ;;  %v1648_v37 = vmul.f32 %v1646_v20, %v4994_v22 }
 0x575   :  { %v1692_v32 = vmul.f32 %v1690_v25, %v5000_v46 }
 0x57b   :  { %v4996_v27 = vld [vmem:[#allocation3 + $0x3] sm:$0x7]  ;;  %v1653_v63 = vpop.permute.xlu1 %1652  ;;  %v1682_v28 = vpop.permute.xlu0 %1681 }
 0x57c   :  { %v1684_v31 = vmul.f32 %v1682_v28, %v4996_v27  ;;  %v1655_v30 = vmul.f32 %v1653_v63, %v4996_v27  ;;  %v1718_v56 = vpop.permute.xlu2 %1717 }
 0x57d   :  { %v1720_v43 = vmul.f32 %v1718_v56, %v5000_v46 }
 0x57e   :  { %v1685_v48 = vadd.f32 %v1684_v31, %v1677_v29  ;;  %v1656_v40 = vadd.f32 %v1655_v30, %v1648_v37 }
 0x580   :  { %v1693_v35 = vadd.f32 %v1692_v32, %v1685_v48 }
 0x582   :  { %1695 = vrot.lane.b32.xlu2 %v1693_v35, %s4082_s12 }
 0x583   :  { %v1661_v38 = vpop.permute.xlu1 %1660  ;;  %v1703_v39 = vpop.permute.xlu0 %1702 }
 0x584   :  { %v1663_v26 = vmul.f32 %v1661_v38, %v5000_v46  ;;  %v1705_v60 = vmul.f32 %v1703_v39, %v4994_v22  ;;  %v1621_v11 = vpop.permute.xlu2 %1620 }
 0x585   :  { %v1623_v8 = vmul.f32 %v1621_v11, %v4915_v53  ;;  %v3907_v11 = vld [vmem:[%s6052_s2 + $0x3] ss:$0 sm:$0xff] }
 0x586   :  { %v1664_v44 = vadd.f32 %v1663_v26, %v1656_v40 }
 0x588   :  { %1666 = vrot.lane.b32.xlu1 %v1664_v44, %s4082_s12 }
 0x58a   :  { %1785 = vrot.lane.b32.xlu2 %v3893_v51, %s4080_s27 }
 0x58b   :  { %v1710_v58 = vpop.permute.xlu1 %1709  ;;  %v1628_v59 = vpop.permute.xlu0 %1627 }
 0x58c   :  { %v1712_v16 = vmul.f32 %v1710_v58, %v4996_v27  ;;  %v1736_v14 = vpop.permute.xlu2 %1735  ;;  %v1630_v57 = vmul.f32 %v1628_v59, %v4921_v50  ;;  %v5067_v50 = vld [vmem:[#allocation2 + $0x1] sm:$0x1] }
 0x58d   :  { %v1738_v53 = vsub.f32 %v4987_v5, %v1736_v14 }
 0x58e   :  { %v1713_v1 = vadd.f32 %v1712_v16, %v1705_v60  ;;  %v3902_v60 = vld [vmem:[%s6052_s2] ss:$0 sm:$0xff] }
 0x58f   :  { %v1751_v17 = vperm.slane %v1738_v53, 0 }
 0x590   :  { %v1721_v52 = vadd.f32 %v1720_v43, %v1713_v1  ;;  %1778 = vrot.lane.b32.xlu1 %v3894_v0, %s4080_s27 }
 0x592   :  { %1793 = vrot.lane.b32.xlu2 %v3895_v4, %s4080_s27  ;;  %1723 = vrot.lane.b32.xlu0 %v1721_v52, %s4082_s12 }
 0x593   :  { %v1615_v6 = vpop.permute.xlu1 %1614  ;;  %v1503_v7 = vpop.permute.xlu0 %1502 }
 0x594   :  { %1505 = vst.msk [vmem:[#allocation3 + $0x9] sm:$0x7] %vm1403_vm9, %v1503_v7  ;;  %v1617_v19 = vmul.f32 %v1615_v6, %v4917_v24  ;;  %v3903_v7 = vld [vmem:[%s6052_s2 + $0x4] ss:$0 sm:$0xff]  ;;  %vm3398_vm9 = vcmask 182448  }
 0x596   :  { %v1624_v47 = vadd.f32 %v1623_v8, %v1617_v19 }
 0x598   :  { %1814 = vrot.lane.b32.xlu1 %v3896_v34, %s4080_s27  ;;  %v3904_v34 = vld [vmem:[%s6052_s2 + $0x1] ss:$0 sm:$0xff] }
 0x59a   :  { %1842 = vrot.lane.b32.xlu2 %v3897_v3, %s4080_s27  ;;  %1807 = vrot.lane.b32.xlu0 %v3898_v54, %s4080_s27 }
 0x59b   :  { %v1730_v61 = vpop.permute.xlu1 %1729  ;;  %v1742_v12 = vpop.permute.xlu0 %1741  ;;  %v1632_v24 = vld [vmem:[#allocation3 + $0x9] sm:$0x7] }
 0x59c   :  { %v1732_v49 = vsub.f32 %v4980_v10, %v1730_v61  ;;  %v1744_v62 = vsub.f32 %v4978_v13, %v1742_v12  ;;  %v1631_v13 = vadd.f32 %v1630_v57, %v1624_v47 }
 0x59e   :  { %v1745_v2 = vperm.slane %v1732_v49, 0  ;;  %v1758_v36 = vperm.slane %v1744_v62, 0  ;;  %v1633_v10 = vadd.f32 %v1632_v24, %v1631_v13  ;;  %v3909_v13 = vld [vmem:[%s6052_s2 + $0x7] ss:$0 sm:$0xff] }
 0x5a0   :  { %1835 = vrot.lane.b32.xlu1 %v3899_v9, %s4080_s27  ;;  %v3905_v9 = vld [vmem:[%s6052_s2 + $0x5] ss:$0 sm:$0xff] }
 0x5a2   :  { %1747 = vrot.lane.b32.xlu2 %v1745_v2, %s4080_s27  ;;  %1822 = vrot.lane.b32.xlu0 %v3900_v33, %s4080_s27  ;;  %v3906_v33 = vld [vmem:[%s6052_s2 + $0x6] ss:$0 sm:$0xff] }
 0x5a8   :  { %1760 = vrot.lane.b32.xlu1 %v1758_v36, %s4080_s27 }
 0x5aa   :  { %1862 = vrot.lane.b32.xlu2 %v5054_v21, %s4082_s12  ;;  %1850 = vrot.lane.b32.xlu0 %v3901_v45, %s4080_s27  ;;  %v3908_v45 = vld [vmem:[%s6052_s2 + $0x2] ss:$0 sm:$0xff] }
 0x5b0   :  { %1635 = vrot.lane.b32.xlu1 %v1633_v10, %s4082_s12 }
 0x5b2   :  { %1753 = vrot.lane.b32.xlu0 %v1751_v17, %s4080_s27 }
 0x5b8   :  { %1874 = vrot.lane.b32.xlu1 %v5063_v15, %s4082_s12 }
 0x5ba   :  { %1868 = vrot.lane.b32.xlu0 %v5067_v50, %s4082_s12 }
 0x5dc   :  { %v1696_v41 = vpop.permute.xlu2 %1695 }
 0x5dd   :  { %1698 = vst.msk [vmem:[#allocation3 + $0x3] sm:$0x7] %vm1669_vm11, %v1696_v41  ;;  %v1999_v41 = vld [vmem:[#allocation2 + $0x1] sm:$0x1] }
 0x5e4   :  { %v1786_v42 = vpop.permute.xlu2 %1785  ;;  %v5076_v28 = vld [vmem:[#allocation3 + $0x3] sm:$0x7] }
 0x5e5   :  { %v1788_v48 = vmul.f32 %v1786_v42, %v5076_v28 }
 0x5ec   :  { %v1794_v31 = vpop.permute.xlu2 %1793 }
 0x5f4   :  { %v1843_v51 = vpop.permute.xlu2 %1842 }
 0x5f5   :  { %v1845_v1 = vmul.f32 %v1843_v51, %v5076_v28 }
 0x5fa   :  { %v1667_v5 = vpop.permute.xlu1 %1666 }
 0x5fb   :  { %1670 = vst.msk [vmem:[#allocation3] sm:$0x7] %vm1669_vm11, %v1667_v5 }
 0x5fc   :  { %v1748_v3 = vpop.permute.xlu2 %1747 }
 0x5fd   :  { %v1750_v8 = vmul.f32 %v1748_v3, %v4994_v22 }
 0x602   :  { %v1779_v20 = vpop.permute.xlu1 %1778  ;;  %v5074_v63 = vld [vmem:[#allocation3] sm:$0x7] }
 0x603   :  { %v1781_v29 = vmul.f32 %v1779_v20, %v5074_v63 }
 0x604   :  { %v1724_v25 = vpop.permute.xlu0 %1723  ;;  %v1863_v12 = vpop.permute.xlu2 %1862 }
 0x605   :  { %1726 = vst.msk [vmem:[#allocation3 + $0x6] sm:$0x7] %vm1669_vm11, %v1724_v25  ;;  %v1789_v37 = vadd.f32 %v1788_v48, %v1781_v29  ;;  %v1865_v2 = vsub.f32 %v5054_v21, %v1863_v12  ;;  %v3912_v12 = vld [vmem:[%s6052_s2 + $0x4] ss:$0 sm:$0xff] }
 0x607   :  { %v1878_v47 = vperm.slane %v1865_v2, 0 }
 0x60a   :  { %v1815_v32 = vpop.permute.xlu1 %1814 }
 0x60b   :  { %v1817_v44 = vmul.f32 %v1815_v32, %v5076_v28 }
 0x60c   :  { %v5080_v30 = vld [vmem:[#allocation3 + $0x6] sm:$0x7]  ;;  %v1808_v35 = vpop.permute.xlu0 %1807 }
 0x60d   :  { %v1796_v38 = vmul.f32 %v1794_v31, %v5080_v30  ;;  %v1810_v40 = vmul.f32 %v1808_v35, %v5074_v63 }
 0x60f   :  { %v1797_v39 = vadd.f32 %v1796_v38, %v1789_v37  ;;  %v1818_v58 = vadd.f32 %v1817_v44, %v1810_v40 }
 0x611   :  { %1799 = vrot.lane.b32.xlu2 %v1797_v39, %s4082_s12 }
 0x612   :  { %v1836_v26 = vpop.permute.xlu1 %1835 }
 0x613   :  { %v1838_v0 = vmul.f32 %v1836_v26, %v5074_v63 }
 0x614   :  { %v1823_v56 = vpop.permute.xlu0 %1822 }
 0x615   :  { %v1825_v59 = vmul.f32 %v1823_v56, %v5080_v30  ;;  %v1846_v52 = vadd.f32 %v1845_v1, %v1838_v0 }
 0x617   :  { %v1826_v16 = vadd.f32 %v1825_v59, %v1818_v58 }
 0x619   :  { %1911 = vrot.lane.b32.xlu2 %v3902_v60, %s4080_s27  ;;  %1828 = vrot.lane.b32.xlu0 %v1826_v16, %s4082_s12 }
 0x61a   :  { %v1761_v43 = vpop.permute.xlu1 %1760 }
 0x61b   :  { %v1763_v53 = vmul.f32 %v1761_v43, %v5000_v46  ;;  %v3910_v46 = vld [vmem:[%s6052_s2 + $0x8] ss:$0 sm:$0xff] }
 0x61c   :  { %v1851_v4 = vpop.permute.xlu0 %1850 }
 0x61d   :  { %v1853_v6 = vmul.f32 %v1851_v4, %v5080_v30 }
 0x61f   :  { %v1854_v54 = vadd.f32 %v1853_v6, %v1846_v52 }
 0x621   :  { %1947 = vrot.lane.b32.xlu2 %v3903_v7, %s4080_s27  ;;  %1918 = vrot.lane.b32.xlu0 %v3904_v34, %s4080_s27  ;;  %v3911_v7 = vld [vmem:[%s6052_s2] ss:$0 sm:$0xff] }
 0x622   :  { %1856 = vrot.lane.b32.xlu1 %v1854_v54, %s4082_s12  ;;  %v1636_v61 = vpop.permute.xlu1 %1635 }
 0x623   :  { %1638 = vst.msk [vmem:[#allocation3 + $0x9] sm:$0x7] %vm1536_vm10, %v1636_v61  ;;  %vm3531_vm10 = vcmask 190648  }
 0x624   :  { %v1754_v49 = vpop.permute.xlu0 %1753 }
 0x625   :  { %v1756_v62 = vmul.f32 %v1754_v49, %v4996_v27 }
 0x627   :  { %v1757_v14 = vadd.f32 %v1756_v62, %v1750_v8  ;;  %v3914_v8 = vld [vmem:[%s6052_s2 + $0x1] ss:$0 sm:$0xff] }
 0x629   :  { %1955 = vrot.lane.b32.xlu2 %v3905_v9, %s4080_s27  ;;  %1968 = vrot.lane.b32.xlu0 %v3906_v33, %s4080_s27  ;;  %v1764_v27 = vadd.f32 %v1763_v53, %v1757_v14 }
 0x62a   :  { %1940 = vrot.lane.b32.xlu1 %v3907_v11, %s4080_s27  ;;  %v1875_v24 = vpop.permute.xlu1 %1874  ;;  %v1765_v21 = vld [vmem:[#allocation3 + $0x9] sm:$0x7] }
 0x62b   :  { %v1877_v22 = vsub.f32 %v5063_v15, %v1875_v24  ;;  %v1766_v17 = vadd.f32 %v1765_v21, %v1764_v27  ;;  %v1993_v15 = vld [vmem:[#allocation2] sm:$0x1] }
 0x62c   :  { %v1869_v19 = vpop.permute.xlu0 %1868 }
 0x62d   :  { %v1871_v36 = vsub.f32 %v5067_v50, %v1869_v19  ;;  %v1891_v10 = vperm.slane %v1877_v22, 0  ;;  %v5138_v50 = vld [vmem:[#allocation2 + $0x2] sm:$0x1] }
 0x62f   :  { %v1884_v57 = vperm.slane %v1871_v36, 0 }
 0x631   :  { %1880 = vrot.lane.b32.xlu2 %v1878_v47, %s4080_s27  ;;  %1886 = vrot.lane.b32.xlu0 %v1884_v57, %s4080_s27  ;;  %v3913_v47 = vld [vmem:[%s6052_s2 + $0x5] ss:$0 sm:$0xff] }
 0x632   :  { %1926 = vrot.lane.b32.xlu1 %v3908_v45, %s4080_s27 }
 0x639   :  { %1893 = vrot.lane.b32.xlu2 %v1891_v10, %s4080_s27  ;;  %1768 = vrot.lane.b32.xlu0 %v1766_v17, %s4082_s12  ;;  %v3918_v17 = vld [vmem:[%s6052_s2 + $0x6] ss:$0 sm:$0xff] }
 0x63a   :  { %1975 = vrot.lane.b32.xlu1 %v3909_v13, %s4080_s27  ;;  %v3915_v13 = vld [vmem:[%s6052_s2 + $0x3] ss:$0 sm:$0xff] }
 0x641   :  { %2007 = vrot.lane.b32.xlu2 %v5138_v50, %s4082_s12  ;;  %1995 = vrot.lane.b32.xlu0 %v1993_v15, %s4082_s12 }
 0x642   :  { %1983 = vrot.lane.b32.xlu1 %v3910_v46, %s4080_s27  ;;  %v3917_v46 = vld [vmem:[%s6052_s2 + $0x8] ss:$0 sm:$0xff] }
 0x64a   :  { %2001 = vrot.lane.b32.xlu1 %v1999_v41, %s4082_s12 }
 0x66b   :  { %v1800_v5 = vpop.permute.xlu2 %1799 }
 0x66c   :  { %1803 = vst.msk [vmem:[#allocation3] sm:$0x7] %vm1802_vm12, %v1800_v5  ;;  %v2132_v5 = vld [vmem:[#allocation2 + $0x1] sm:$0x1] }
 0x673   :  { %v1912_v42 = vpop.permute.xlu2 %1911  ;;  %v5150_v35 = vld [vmem:[#allocation3] sm:$0x7] }
 0x674   :  { %v1914_v59 = vmul.f32 %v1912_v42, %v5150_v35 }
 0x67b   :  { %v1948_v29 = vpop.permute.xlu2 %1947 }
 0x683   :  { %v1956_v26 = vpop.permute.xlu2 %1955 }
 0x68b   :  { %v1829_v20 = vpop.permute.xlu0 %1828  ;;  %v1881_v4 = vpop.permute.xlu2 %1880 }
 0x68c   :  { %1831 = vst.msk [vmem:[#allocation3 + $0x3] sm:$0x7] %vm1802_vm12, %v1829_v20  ;;  %v1883_v14 = vmul.f32 %v1881_v4, %v5074_v63 }
 0x693   :  { %v1919_v25 = vpop.permute.xlu0 %1918  ;;  %v5148_v32 = vld [vmem:[#allocation3 + $0x3] sm:$0x7]  ;;  %v1894_v9 = vpop.permute.xlu2 %1893 }
 0x694   :  { %v1857_v31 = vpop.permute.xlu1 %1856  ;;  %v1950_v40 = vmul.f32 %v1948_v29, %v5148_v32  ;;  %v1921_v56 = vmul.f32 %v1919_v25, %v5148_v32 }
 0x695   :  { %1859 = vst.msk [vmem:[#allocation3 + $0x6] sm:$0x7] %vm1802_vm12, %v1857_v31 }
 0x696   :  { %v1922_v0 = vadd.f32 %v1921_v56, %v1914_v59 }
 0x69b   :  { %v1969_v48 = vpop.permute.xlu0 %1968  ;;  %v2008_v57 = vpop.permute.xlu2 %2007 }
 0x69c   :  { %v5152_v37 = vld [vmem:[#allocation3 + $0x6] sm:$0x7]  ;;  %v1941_v38 = vpop.permute.xlu1 %1940  ;;  %v1971_v3 = vmul.f32 %v1969_v48, %v5150_v35  ;;  %v2010_v27 = vsub.f32 %v5138_v50, %v2008_v57  ;;  %v3919_v50 = vld [vmem:[%s6052_s2 + $0x7] ss:$0 sm:$0xff] }
 0x69d   :  { %v1943_v39 = vmul.f32 %v1941_v38, %v5150_v35  ;;  %v1958_v44 = vmul.f32 %v1956_v26, %v5152_v37 }
 0x69e   :  { %v2024_v63 = vperm.slane %v2010_v27, 0 }
 0x69f   :  { %v1951_v51 = vadd.f32 %v1950_v40, %v1943_v39 }
 0x6a1   :  { %v1959_v58 = vadd.f32 %v1958_v44, %v1951_v51 }
 0x6a3   :  { %1961 = vrot.lane.b32.xlu1 %v1959_v58, %s4082_s12  ;;  %v1887_v60 = vpop.permute.xlu0 %1886 }
 0x6a4   :  { %v1927_v16 = vpop.permute.xlu1 %1926  ;;  %v1889_v36 = vmul.f32 %v1887_v60, %v5076_v28  ;;  %v1896_v28 = vmul.f32 %v1894_v9, %v5080_v30  ;;  %v3916_v30 = vld [vmem:[%s6052_s2 + $0x2] ss:$0 sm:$0xff] }
 0x6a5   :  { %v1929_v43 = vmul.f32 %v1927_v16, %v5152_v37 }
 0x6a6   :  { %v1890_v53 = vadd.f32 %v1889_v36, %v1883_v14 }
 0x6a7   :  { %v1930_v1 = vadd.f32 %v1929_v43, %v1922_v0 }
 0x6a8   :  { %v1897_v21 = vadd.f32 %v1896_v28, %v1890_v53  ;;  %v2259_v28 = vld [vmem:[#allocation2] sm:$0x1] }
 0x6a9   :  { %1932 = vrot.lane.b32.xlu0 %v1930_v1, %s4082_s12 }
 0x6ab   :  { %v1769_v52 = vpop.permute.xlu0 %1768 }
 0x6ac   :  { %v1976_v6 = vpop.permute.xlu1 %1975  ;;  %1771 = vst.msk [vmem:[#allocation3 + $0x9] sm:$0x7] %vm1669_vm11, %v1769_v52  ;;  %vm3659_vm11 = vcmask 195584  }
 0x6ad   :  { %v1978_v34 = vmul.f32 %v1976_v6, %v5148_v32 }
 0x6af   :  { %v1979_v33 = vadd.f32 %v1978_v34, %v1971_v3 }
 0x6b1   :  { %2044 = vrot.lane.b32.xlu0 %v3911_v7, %s4080_s27 }
 0x6b3   :  { %v1996_v54 = vpop.permute.xlu0 %1995  ;;  %v1898_v22 = vld [vmem:[#allocation3 + $0x9] sm:$0x7] }
 0x6b4   :  { %v1984_v61 = vpop.permute.xlu1 %1983  ;;  %v1998_v49 = vsub.f32 %v1993_v15, %v1996_v54  ;;  %v1899_v10 = vadd.f32 %v1898_v22, %v1897_v21  ;;  %v2126_v15 = vld [vmem:[#allocation2] sm:$0x1] }
 0x6b5   :  { %v1986_v11 = vmul.f32 %v1984_v61, %v5152_v37 }
 0x6b6   :  { %v2011_v2 = vperm.slane %v1998_v49, 0 }
 0x6b7   :  { %v1987_v62 = vadd.f32 %v1986_v11, %v1979_v33 }
 0x6b8   :  { %2013 = vrot.lane.b32.xlu1 %v2011_v2, %s4080_s27 }
 0x6b9   :  { %2080 = vrot.lane.b32.xlu0 %v3912_v12, %s4080_s27  ;;  %1989 = vrot.lane.b32.xlu2 %v1987_v62, %s4082_s12  ;;  %v3920_v62 = vld [vmem:[%s6052_s2 + $0x1] ss:$0 sm:$0xff] }
 0x6bc   :  { %v2002_v19 = vpop.permute.xlu1 %2001 }
 0x6bd   :  { %v2004_v45 = vsub.f32 %v1999_v41, %v2002_v19  ;;  %v2138_v41 = vld [vmem:[#allocation2 + $0x2] sm:$0x1] }
 0x6bf   :  { %v2017_v24 = vperm.slane %v2004_v45, 0 }
 0x6c0   :  { %2051 = vrot.lane.b32.xlu1 %v3914_v8, %s4080_s27 }
 0x6c1   :  { %2088 = vrot.lane.b32.xlu0 %v3913_v47, %s4080_s27  ;;  %2019 = vrot.lane.b32.xlu2 %v2017_v24, %s4080_s27 }
 0x6c8   :  { %2026 = vrot.lane.b32.xlu1 %v2024_v63, %s4080_s27  ;;  %v3921_v63 = vld [vmem:[%s6052_s2] ss:$0 sm:$0xff] }
 0x6c9   :  { %2073 = vrot.lane.b32.xlu2 %v3915_v13, %s4080_s27  ;;  %1901 = vrot.lane.b32.xlu0 %v1899_v10, %s4082_s12 }
 0x6d0   :  { %2101 = vrot.lane.b32.xlu1 %v3918_v17, %s4080_s27  ;;  %v3922_v17 = vld [vmem:[%s6052_s2 + $0x3] ss:$0 sm:$0xff] }
 0x6d1   :  { %2059 = vrot.lane.b32.xlu2 %v3916_v30, %s4080_s27  ;;  %2116 = vrot.lane.b32.xlu0 %v3917_v46, %s4080_s27  ;;  %v2265_v46 = vld [vmem:[#allocation2 + $0x1] sm:$0x1] }
 0x6d8   :  { %2128 = vrot.lane.b32.xlu1 %v2126_v15, %s4082_s12 }
 0x6d9   :  { %2108 = vrot.lane.b32.xlu2 %v3919_v50, %s4080_s27  ;;  %2140 = vrot.lane.b32.xlu0 %v2138_v41, %s4082_s12  ;;  %v3925_v50 = vld [vmem:[%s6052_s2 + $0x2] ss:$0 sm:$0xff] }
 0x6e1   :  { %2134 = vrot.lane.b32.xlu2 %v2132_v5, %s4082_s12 }
 0x713   :  { %v1990_v42 = vpop.permute.xlu2 %1989 }
 0x714   :  { %1992 = vst.msk [vmem:[#allocation3 + $0x6] sm:$0x7] %vm1935_vm13, %v1990_v42  ;;  %v3928_v42 = vld [vmem:[%s6052_s2 + $0x8] ss:$0 sm:$0xff] }
 0x715   :  { %v1962_v20 = vpop.permute.xlu1 %1961 }
 0x716   :  { %1964 = vst.msk [vmem:[#allocation3 + $0x3] sm:$0x7] %vm1935_vm13, %v1962_v20 }
 0x71b   :  { %v2020_v25 = vpop.permute.xlu2 %2019  ;;  %v1933_v29 = vpop.permute.xlu0 %1932  ;;  %v5224_v60 = vld [vmem:[#allocation3 + $0x6] sm:$0x7] }
 0x71c   :  { %1936 = vst.msk [vmem:[#allocation3] sm:$0x7] %vm1935_vm13, %v1933_v29  ;;  %v2022_v22 = vmul.f32 %v2020_v25, %v5148_v32  ;;  %v3923_v32 = vld [vmem:[%s6052_s2 + $0x4] ss:$0 sm:$0xff] }
 0x71d   :  { %v5219_v44 = vld [vmem:[#allocation3 + $0x3] sm:$0x7] }
 0x723   :  { %v2074_v31 = vpop.permute.xlu2 %2073  ;;  %v2045_v48 = vpop.permute.xlu0 %2044  ;;  %v5217_v26 = vld [vmem:[#allocation3] sm:$0x7] }
 0x724   :  { %v2076_v56 = vmul.f32 %v2074_v31, %v5217_v26  ;;  %v2047_v59 = vmul.f32 %v2045_v48, %v5217_v26 }
 0x72a   :  { %v2014_v38 = vpop.permute.xlu1 %2013 }
 0x72b   :  { %v2060_v39 = vpop.permute.xlu2 %2059  ;;  %v2081_v40 = vpop.permute.xlu0 %2080  ;;  %v2016_v53 = vmul.f32 %v2014_v38, %v5150_v35 }
 0x72c   :  { %v2083_v51 = vmul.f32 %v2081_v40, %v5219_v44  ;;  %v2062_v52 = vmul.f32 %v2060_v39, %v5224_v60 }
 0x72d   :  { %v2023_v13 = vadd.f32 %v2022_v22, %v2016_v53 }
 0x72e   :  { %v2084_v1 = vadd.f32 %v2083_v51, %v2076_v56 }
 0x732   :  { %v2052_v58 = vpop.permute.xlu1 %2051 }
 0x733   :  { %v2109_v16 = vpop.permute.xlu2 %2108  ;;  %v2054_v0 = vmul.f32 %v2052_v58, %v5219_v44  ;;  %v2089_v43 = vpop.permute.xlu0 %2088 }
 0x734   :  { %v2091_v4 = vmul.f32 %v2089_v43, %v5224_v60  ;;  %v2111_v11 = vmul.f32 %v2109_v16, %v5219_v44 }
 0x735   :  { %v2055_v6 = vadd.f32 %v2054_v0, %v2047_v59 }
 0x736   :  { %v2092_v7 = vadd.f32 %v2091_v4, %v2084_v1 }
 0x737   :  { %v2063_v34 = vadd.f32 %v2062_v52, %v2055_v6 }
 0x738   :  { %2094 = vrot.lane.b32.xlu2 %v2092_v7, %s4082_s12 }
 0x739   :  { %2065 = vrot.lane.b32.xlu1 %v2063_v34, %s4082_s12 }
 0x73a   :  { %v2027_v3 = vpop.permute.xlu1 %2026 }
 0x73b   :  { %v2135_v54 = vpop.permute.xlu2 %2134  ;;  %v1902_v61 = vpop.permute.xlu0 %1901  ;;  %v2029_v21 = vmul.f32 %v2027_v3, %v5152_v37  ;;  %v3924_v37 = vld [vmem:[%s6052_s2 + $0x5] ss:$0 sm:$0xff] }
 0x73c   :  { %v2137_v49 = vsub.f32 %v2132_v5, %v2135_v54  ;;  %1904 = vst.msk [vmem:[#allocation3 + $0x9] sm:$0x7] %vm1802_vm12, %v1902_v61  ;;  %v3927_v5 = vld [vmem:[%s6052_s2 + $0x7] ss:$0 sm:$0xff]  ;;  %vm3768_vm12 = vcmask 1043456  }
 0x73d   :  { %v2030_v35 = vadd.f32 %v2029_v21, %v2023_v13 }
 0x73e   :  { %v2150_v9 = vperm.slane %v2137_v49, 0 }
 0x740   :  { %2152 = vrot.lane.b32.xlu0 %v2150_v9, %s4080_s27 }
 0x742   :  { %v2102_v33 = vpop.permute.xlu1 %2101 }
 0x743   :  { %v2104_v12 = vmul.f32 %v2102_v33, %v5217_v26  ;;  %v2117_v2 = vpop.permute.xlu0 %2116  ;;  %v2031_v10 = vld [vmem:[#allocation3 + $0x9] sm:$0x7] }
 0x744   :  { %v2119_v8 = vmul.f32 %v2117_v2, %v5224_v60  ;;  %v2032_v30 = vadd.f32 %v2031_v10, %v2030_v35  ;;  %v3930_v10 = vld [vmem:[%s6052_s2 + $0x4] ss:$0 sm:$0xff]  ;;  %v3931_v35 = vld [vmem:[%s6052_s2 + $0x1] ss:$0 sm:$0xff] }
 0x745   :  { %v2112_v19 = vadd.f32 %v2111_v11, %v2104_v12 }
 0x747   :  { %v2120_v36 = vadd.f32 %v2119_v8, %v2112_v19 }
 0x748   :  { %2184 = vrot.lane.b32.xlu0 %v3920_v62, %s4083_s25 }
 0x749   :  { %2122 = vrot.lane.b32.xlu1 %v2120_v36, %s4082_s12 }
 0x74a   :  { %v2129_v45 = vpop.permute.xlu1 %2128 }
 0x74b   :  { %v2131_v47 = vsub.f32 %v2126_v15, %v2129_v45  ;;  %v2141_v14 = vpop.permute.xlu0 %2140  ;;  %v3926_v15 = vld [vmem:[%s6052_s2 + $0x6] ss:$0 sm:$0xff] }
 0x74c   :  { %v2143_v57 = vsub.f32 %v2138_v41, %v2141_v14  ;;  %v2271_v41 = vld [vmem:[#allocation2 + $0x2] sm:$0x1]  ;;  %v2392_v14 = vld [vmem:[#allocation2] sm:$0x1] }
 0x74d   :  { %v2144_v24 = vperm.slane %v2131_v47, 0 }
 0x74e   :  { %v2157_v27 = vperm.slane %v2143_v57, 0 }
 0x74f   :  { %2146 = vrot.lane.b32.xlu2 %v2144_v24, %s4080_s27 }
 0x750   :  { %2261 = vrot.lane.b32.xlu0 %v2259_v28, %s4084_s26 }
 0x751   :  { %2159 = vrot.lane.b32.xlu1 %v2157_v27, %s4080_s27 }
 0x757   :  { %2177 = vrot.lane.b32.xlu2 %v3921_v63, %s4083_s25  ;;  %v2398_v63 = vld [vmem:[#allocation2 + $0x1] sm:$0x1] }
 0x758   :  { %2034 = vrot.lane.b32.xlu0 %v2032_v30, %s4082_s12  ;;  %v3932_v30 = vld [vmem:[%s6052_s2 + $0x6] ss:$0 sm:$0xff] }
 0x759   :  { %2206 = vrot.lane.b32.xlu1 %v3922_v17, %s4083_s25  ;;  %v2404_v17 = vld [vmem:[#allocation2 + $0x2] sm:$0x1] }
 0x75f   :  { %2213 = vrot.lane.b32.xlu2 %v3923_v32, %s4083_s25  ;;  %v3933_v32 = vld [vmem:[%s6052_s2 + $0x3] ss:$0 sm:$0xff] }
 0x760   :  { %2221 = vrot.lane.b32.xlu0 %v3924_v37, %s4083_s25  ;;  %v3934_v37 = vld [vmem:[%s6052_s2 + $0x2] ss:$0 sm:$0xff] }
 0x761   :  { %2267 = vrot.lane.b32.xlu1 %v2265_v46, %s4084_s26 }
 0x767   :  { %2192 = vrot.lane.b32.xlu2 %v3925_v50, %s4083_s25 }
 0x768   :  { %2273 = vrot.lane.b32.xlu0 %v2271_v41, %s4084_s26 }
 0x769   :  { %2234 = vrot.lane.b32.xlu1 %v3926_v15, %s4083_s25 }
 0x76f   :  { %2241 = vrot.lane.b32.xlu2 %v3927_v5, %s4083_s25 }
 0x771   :  { %2249 = vrot.lane.b32.xlu1 %v3928_v42, %s4083_s25 }
 0x792   :  { %v2095_v20 = vpop.permute.xlu2 %2094 }
 0x793   :  { %2097 = vst.msk [vmem:[#allocation3 + $0x3] sm:$0x7] %vm2068_vm14, %v2095_v20  ;;  %v3935_v20 = vld [vmem:[%s6052_s2 + $0x7] ss:$0 sm:$0xff] }
 0x79a   :  { %v5291_v56 = vld [vmem:[#allocation3 + $0x3] sm:$0x7] }
 0x7a9   :  { %v5283_v25 = vpop.permute.xlu2 %2146 }
 0x7aa   :  { %v2149_v50 = vmul.f32 %v5283_v25, %v5217_v26  ;;  %v3936_v26 = vld [vmem:[%s6052_s2 + $0x5] ss:$0 sm:$0xff] }
 0x7ab   :  { %v2066_v29 = vpop.permute.xlu1 %2065 }
 0x7ac   :  { %2069 = vst.msk [vmem:[#allocation3] sm:$0x7] %vm2068_vm14, %v2066_v29 }
 0x7b1   :  { %v2178_v31 = vpop.permute.xlu2 %2177 }
 0x7b2   :  { %v5286_v48 = vpop.permute.xlu0 %2152 }
 0x7b3   :  { %v5289_v51 = vld [vmem:[#allocation3] sm:$0x7] }
 0x7b4   :  { %v2180_v59 = vmul.f32 %v2178_v31, %v5289_v51 }
 0x7b9   :  { %v2214_v38 = vpop.permute.xlu2 %2213 }
 0x7ba   :  { %v2185_v39 = vpop.permute.xlu0 %2184  ;;  %v2216_v49 = vmul.f32 %v2214_v38, %v5291_v56 }
 0x7bb   :  { %v2123_v40 = vpop.permute.xlu1 %2122  ;;  %v2187_v58 = vmul.f32 %v2185_v39, %v5291_v56 }
 0x7bc   :  { %2125 = vst.msk [vmem:[#allocation3 + $0x6] sm:$0x7] %vm2068_vm14, %v2123_v40 }
 0x7bd   :  { %v2188_v52 = vadd.f32 %v2187_v58, %v2180_v59 }
 0x7c1   :  { %v2193_v0 = vpop.permute.xlu2 %2192 }
 0x7c2   :  { %v2262_v16 = vpop.permute.xlu0 %2261 }
 0x7c3   :  { %v5295_v43 = vld [vmem:[#allocation3 + $0x6] sm:$0x7]  ;;  %v2264_v1 = vsub.f32 %v2259_v28, %v2262_v16  ;;  %v2160_v4 = vpop.permute.xlu1 %2159  ;;  %v3929_v28 = vld [vmem:[%s6052_s2] ss:$0 sm:$0xff] }
 0x7c4   :  { %v2195_v6 = vmul.f32 %v2193_v0, %v5295_v43  ;;  %v2162_v15 = vmul.f32 %v2160_v4, %v5224_v60 }
 0x7c5   :  { %v2277_v7 = vperm.slane %v2264_v1, 0 }
 0x7c6   :  { %v2196_v34 = vadd.f32 %v2195_v6, %v2188_v52  ;;  %v5361_v52 = vld [vmem:[#allocation2] sm:$0x1] }
 0x7c7   :  { %2279 = vrot.lane.b32.xlu0 %v2277_v7, %s4083_s25 }
 0x7c8   :  { %2198 = vrot.lane.b32.xlu2 %v2196_v34, %s4084_s26 }
 0x7c9   :  { %v2242_v57 = vpop.permute.xlu2 %2241 }
 0x7ca   :  { %v2035_v3 = vpop.permute.xlu0 %2034  ;;  %v2244_v53 = vmul.f32 %v2242_v57, %v5291_v56 }
 0x7cb   :  { %2037 = vst.msk [vmem:[#allocation3 + $0x9] sm:$0x7] %vm1935_vm13, %v2035_v3  ;;  %v2207_v54 = vpop.permute.xlu1 %2206 }
 0x7cc   :  { %v2209_v61 = vmul.f32 %v2207_v54, %v5289_v51 }
 0x7ce   :  { %v2217_v33 = vadd.f32 %v2216_v49, %v2209_v61  ;;  %v5367_v49 = vld [vmem:[#allocation2 + $0x2] sm:$0x1] }
 0x7d2   :  { %v2222_v9 = vpop.permute.xlu0 %2221  ;;  %v2164_v5 = vld [vmem:[#allocation3 + $0x9] sm:$0x7] }
 0x7d3   :  { %v2224_v11 = vmul.f32 %v2222_v9, %v5295_v43  ;;  %v2268_v12 = vpop.permute.xlu1 %2267 }
 0x7d4   :  { %v2270_v2 = vsub.f32 %v2265_v46, %v2268_v12  ;;  %v2155_v46 = vmul.f32 %v5286_v48, %v5219_v44  ;;  %v3937_v44 = vld [vmem:[%s6052_s2 + $0x8] ss:$0 sm:$0xff] }
 0x7d5   :  { %v2225_v62 = vadd.f32 %v2224_v11, %v2217_v33 }
 0x7d6   :  { %v2283_v19 = vperm.slane %v2270_v2, 0 }
 0x7d7   :  { %2227 = vrot.lane.b32.xlu0 %v2225_v62, %s4084_s26 }
 0x7d8   :  { %2285 = vrot.lane.b32.xlu1 %v2283_v19, %s4083_s25 }
 0x7da   :  { %v2274_v8 = vpop.permute.xlu0 %2273 }
 0x7db   :  { %v2276_v36 = vsub.f32 %v2271_v41, %v2274_v8  ;;  %v2235_v45 = vpop.permute.xlu1 %2234  ;;  %v2156_v41 = vadd.f32 %v2155_v46, %v2149_v50 }
 0x7dc   :  { %v2237_v24 = vmul.f32 %v2235_v45, %v5289_v51 }
 0x7dd   :  { %v2290_v47 = vperm.slane %v2276_v36, 0  ;;  %v2163_v42 = vadd.f32 %v2162_v15, %v2156_v41  ;;  %v2531_v15 = vld [vmem:[#allocation2 + $0x1] sm:$0x1] }
 0x7de   :  { %v2245_v22 = vadd.f32 %v2244_v53, %v2237_v24 }
 0x7df   :  { %2394 = vrot.lane.b32.xlu0 %v2392_v14, %s4085_s20  ;;  %v2165_v29 = vadd.f32 %v2164_v5, %v2163_v42  ;;  %v3940_v5 = vld [vmem:[%s6052_s2 + $0x8] ss:$0 sm:$0xff]  ;;  %v3941_v42 = vld [vmem:[%s6052_s2] ss:$0 sm:$0xff] }
 0x7e0   :  { %2292 = vrot.lane.b32.xlu1 %v2290_v47, %s4083_s25 }
 0x7e3   :  { %v2250_v27 = vpop.permute.xlu1 %2249 }
 0x7e4   :  { %v2252_v21 = vmul.f32 %v2250_v27, %v5295_v43 }
 0x7e6   :  { %v2253_v13 = vadd.f32 %v2252_v21, %v2245_v22 }
 0x7e7   :  { %2310 = vrot.lane.b32.xlu0 %v3929_v28, %s4086_s22 }
 0x7e8   :  { %2255 = vrot.lane.b32.xlu2 %v2253_v13, %s4084_s26  ;;  %2400 = vrot.lane.b32.xlu1 %v2398_v63, %s4085_s20  ;;  %v3938_v13 = vld [vmem:[%s6052_s2 + $0x3] ss:$0 sm:$0xff] }
 0x7ef   :  { %2346 = vrot.lane.b32.xlu0 %v3930_v10, %s4086_s22 }
 0x7f0   :  { %2406 = vrot.lane.b32.xlu2 %v2404_v17, %s4085_s20  ;;  %2317 = vrot.lane.b32.xlu1 %v3931_v35, %s4086_s22 }
 0x7f7   :  { %2367 = vrot.lane.b32.xlu0 %v3932_v30, %s4086_s22 }
 0x7f8   :  { %2339 = vrot.lane.b32.xlu2 %v3933_v32, %s4086_s22  ;;  %2325 = vrot.lane.b32.xlu1 %v3934_v37, %s4086_s22  ;;  %v3939_v37 = vld [vmem:[%s6052_s2 + $0x5] ss:$0 sm:$0xff] }
 0x800   :  { %2167 = vrot.lane.b32.xlu2 %v2165_v29, %s4082_s12  ;;  %2374 = vrot.lane.b32.xlu1 %v3935_v20, %s4086_s22  ;;  %v3942_v20 = vld [vmem:[%s6052_s2 + $0x1] ss:$0 sm:$0xff]  ;;  %v3943_v29 = vld [vmem:[%s6052_s2 + $0x4] ss:$0 sm:$0xff] }
 0x808   :  { %2354 = vrot.lane.b32.xlu2 %v3936_v26, %s4086_s22  ;;  %v3944_v26 = vld [vmem:[%s6052_s2 + $0x2] ss:$0 sm:$0xff] }
 0x810   :  { %2382 = vrot.lane.b32.xlu2 %v3937_v44, %s4086_s22  ;;  %v3945_v44 = vld [vmem:[%s6052_s2 + $0x6] ss:$0 sm:$0xff] }
 0x822   :  { %v2199_v60 = vpop.permute.xlu2 %2198 }
 0x823   :  { %2202 = vst.msk [vmem:[#allocation3] sm:$0x7] %vm2201_vm15, %v2199_v60  ;;  %v3946_v60 = vld [vmem:[%s6052_s2 + $0x7] ss:$0 sm:$0xff] }
 0x82a   :  { %v5374_v12 = vld [vmem:[#allocation3] sm:$0x7] }
 0x839   :  { %v2280_v25 = vpop.permute.xlu0 %2279 }
 0x83a   :  { %v2282_v9 = vmul.f32 %v2280_v25, %v5289_v51 }
 0x842   :  { %v2256_v31 = vpop.permute.xlu2 %2255 }
 0x843   :  { %2258 = vst.msk [vmem:[#allocation3 + $0x6] sm:$0x7] %vm2201_vm15, %v2256_v31 }
 0x849   :  { %v2228_v48 = vpop.permute.xlu0 %2227 }
 0x84a   :  { %2230 = vst.msk [vmem:[#allocation3 + $0x3] sm:$0x7] %vm2201_vm15, %v2228_v48  ;;  %v2286_v38 = vpop.permute.xlu1 %2285  ;;  %v2407_v39 = vpop.permute.xlu2 %2406  ;;  %v5380_v8 = vld [vmem:[#allocation3 + $0x6] sm:$0x7] }
 0x84b   :  { %v2409_v40 = vsub.f32 %v2404_v17, %v2407_v39  ;;  %v2288_v54 = vmul.f32 %v2286_v38, %v5291_v56 }
 0x84d   :  { %v2423_v58 = vperm.slane %v2409_v40, 0  ;;  %v2289_v11 = vadd.f32 %v2288_v54, %v2282_v9 }
 0x84f   :  { %2425 = vrot.lane.b32.xlu0 %v2423_v58, %s4086_s22 }
 0x851   :  { %v2395_v59 = vpop.permute.xlu0 %2394  ;;  %v5376_v2 = vld [vmem:[#allocation3 + $0x3] sm:$0x7] }
 0x852   :  { %v2397_v16 = vsub.f32 %v2392_v14, %v2395_v59  ;;  %v2340_v0 = vpop.permute.xlu2 %2339  ;;  %v2293_v1 = vpop.permute.xlu1 %2292 }
 0x853   :  { %v2295_v33 = vmul.f32 %v2293_v1, %v5295_v43  ;;  %v2342_v56 = vmul.f32 %v2340_v0, %v5374_v12  ;;  %v5439_v1 = vld [vmem:[#allocation2] sm:$0x1] }
 0x854   :  { %v2410_v4 = vperm.slane %v2397_v16, 0 }
 0x855   :  { %v2296_v45 = vadd.f32 %v2295_v33, %v2289_v11 }
 0x856   :  { %2412 = vrot.lane.b32.xlu1 %v2410_v4, %s4086_s22 }
 0x857   :  { %2527 = vrot.lane.b32.xlu0 %v5361_v52, %s4082_s12 }
 0x859   :  { %v2311_v6 = vpop.permute.xlu0 %2310 }
 0x85a   :  { %v2168_v7 = vpop.permute.xlu2 %2167  ;;  %v2401_v34 = vpop.permute.xlu1 %2400  ;;  %v2313_v27 = vmul.f32 %v2311_v6, %v5374_v12 }
 0x85b   :  { %2170 = vst.msk [vmem:[#allocation3 + $0x9] sm:$0x7] %vm2068_vm14, %v2168_v7  ;;  %v2403_v3 = vsub.f32 %v2398_v63, %v2401_v34 }
 0x85d   :  { %v2416_v61 = vperm.slane %v2403_v3, 0 }
 0x85f   :  { %2539 = vrot.lane.b32.xlu0 %v5367_v49, %s4082_s12  ;;  %2418 = vrot.lane.b32.xlu2 %v2416_v61, %s4086_s22  ;;  %s3779_s22 = sshll.u32 %s6059_s9, 4  ;;  %s3780_s22 = int_to_ptr.hbm [resolvable:$true] %s3779_s22 }
 0x861   :  { %v2347_v62 = vpop.permute.xlu0 %2346 }
 0x862   :  { %v2349_v19 = vmul.f32 %v2347_v62, %v5376_v2  ;;  %v2355_v51 = vpop.permute.xlu2 %2354  ;;  %v2318_v36 = vpop.permute.xlu1 %2317  ;;  %v2297_v43 = vld [vmem:[#allocation3 + $0x9] sm:$0x7] }
 0x863   :  { %v2357_v47 = vmul.f32 %v2355_v51, %v5380_v8  ;;  %v2298_v57 = vadd.f32 %v2297_v43, %v2296_v45  ;;  %v2320_v53 = vmul.f32 %v2318_v36, %v5376_v2  ;;  %v5460_v45 = vld [vmem:[#allocation2 + $0x1] sm:$0x1] }
 0x864   :  { %v2350_v14 = vadd.f32 %v2349_v19, %v2342_v56 }
 0x865   :  { %v2321_v22 = vadd.f32 %v2320_v53, %v2313_v27 }
 0x866   :  { %v2358_v24 = vadd.f32 %v2357_v47, %v2350_v14 }
 0x867   :  { %2300 = vrot.lane.b32.xlu0 %v2298_v57, %s4084_s26 }
 0x868   :  { %2360 = vrot.lane.b32.xlu2 %v2358_v24, %s4085_s20 }
 0x869   :  { %v2368_v10 = vpop.permute.xlu0 %2367 }
 0x86a   :  { %v2326_v28 = vpop.permute.xlu1 %2325  ;;  %v2383_v35 = vpop.permute.xlu2 %2382  ;;  %v2370_v30 = vmul.f32 %v2368_v10, %v5374_v12 }
 0x86b   :  { %v2328_v21 = vmul.f32 %v2326_v28, %v5380_v8  ;;  %v2385_v46 = vmul.f32 %v2383_v35, %v5380_v8 }
 0x86d   :  { %v2329_v63 = vadd.f32 %v2328_v21, %v2321_v22  ;;  %v3947_v22 = vld [vmem:[%s6052_s2] ss:$0 sm:$0xff] }
 0x86f   :  { %2472 = vrot.lane.b32.xlu0 %v3938_v13, %s4080_s27  ;;  %2331 = vrot.lane.b32.xlu1 %v2329_v63, %s4085_s20 }
 0x872   :  { %v2375_v17 = vpop.permute.xlu1 %2374 }
 0x873   :  { %v2377_v32 = vmul.f32 %v2375_v17, %v5376_v2 }
 0x875   :  { %v2378_v50 = vadd.f32 %v2377_v32, %v2370_v30 }
 0x877   :  { %v2386_v41 = vadd.f32 %v2385_v46, %v2378_v50  ;;  %2487 = vrot.lane.b32.xlu0 %v3939_v37, %s4080_s27  ;;  %2533 = vrot.lane.b32.xlu1 %v2531_v15, %s4082_s12  ;;  %v3948_v37 = vld [vmem:[%s6052_s2 + $0x4] ss:$0 sm:$0xff]  ;;  %v3949_v46 = vld [vmem:[%s6052_s2 + $0x1] ss:$0 sm:$0xff] }
 0x879   :  { %2388 = vrot.lane.b32.xlu2 %v2386_v41, %s4085_s20 }
 0x87f   :  { %2515 = vrot.lane.b32.xlu0 %v3940_v5, %s4080_s27  ;;  %2443 = vrot.lane.b32.xlu1 %v3941_v42, %s4080_s27 }
 0x881   :  { %2450 = vrot.lane.b32.xlu2 %v3942_v20, %s4080_s27  ;;  %v3950_v20 = vld [vmem:[%s6052_s2 + $0x6] ss:$0 sm:$0xff] }
 0x887   :  { %2479 = vrot.lane.b32.xlu1 %v3943_v29, %s4080_s27 }
 0x889   :  { %2458 = vrot.lane.b32.xlu2 %v3944_v26, %s4080_s27 }
 0x88f   :  { %2500 = vrot.lane.b32.xlu1 %v3945_v44, %s4080_s27  ;;  %v3953_v44 = vld [vmem:[%s6052_s2 + $0x3] ss:$0 sm:$0xff] }
 0x891   :  { %2507 = vrot.lane.b32.xlu2 %v3946_v60, %s4080_s27  ;;  %v3954_v60 = vld [vmem:[%s6052_s2 + $0x5] ss:$0 sm:$0xff] }
 0x8b9   :  { %v5430_v25 = vpop.permute.xlu2 %2418 }
 0x8ba   :  { %v2421_v41 = vmul.f32 %v5430_v25, %v5376_v2  ;;  %v3955_v25 = vld [vmem:[%s6052_s2 + $0x8] ss:$0 sm:$0xff] }
 0x8c1   :  { %v5432_v31 = vpop.permute.xlu0 %2425 }
 0x8c2   :  { %v2361_v48 = vpop.permute.xlu2 %2360  ;;  %v2428_v42 = vmul.f32 %v5432_v31, %v5380_v8  ;;  %v3952_v8 = vld [vmem:[%s6052_s2 + $0x7] ss:$0 sm:$0xff] }
 0x8c3   :  { %2363 = vst.msk [vmem:[#allocation3 + $0x3] sm:$0x7] %vm2334_vm0, %v2361_v48 }
 0x8c8   :  { %v2413_v4 = vpop.permute.xlu1 %2412 }
 0x8c9   :  { %v2528_v38 = vpop.permute.xlu0 %2527  ;;  %v2415_v50 = vmul.f32 %v2413_v4, %v5374_v12  ;;  %v3951_v12 = vld [vmem:[%s6052_s2 + $0x2] ss:$0 sm:$0xff] }
 0x8ca   :  { %v2530_v39 = vsub.f32 %v5361_v52, %v2528_v38  ;;  %v5445_v52 = vld [vmem:[#allocation2 + $0x2] sm:$0x1]  ;;  %v5451_v9 = vld [vmem:[#allocation3 + $0x3] sm:$0x7] }
 0x8cb   :  { %v2422_v5 = vadd.f32 %v2421_v41, %v2415_v50 }
 0x8cc   :  { %v2543_v40 = vperm.slane %v2530_v39, 0 }
 0x8cd   :  { %v2429_v2 = vadd.f32 %v2428_v42, %v2422_v5 }
 0x8ce   :  { %2545 = vrot.lane.b32.xlu2 %v2543_v40, %s4080_s27  ;;  %v5517_v40 = vld [vmem:[#allocation2] sm:$0x1] }
 0x8d1   :  { %v2540_v58 = vpop.permute.xlu0 %2539 }
 0x8d2   :  { %v2542_v59 = vsub.f32 %v5367_v49, %v2540_v58 }
 0x8d3   :  { %v2389_v16 = vpop.permute.xlu2 %2388 }
 0x8d4   :  { %v2556_v0 = vperm.slane %v2542_v59, 0  ;;  %2391 = vst.msk [vmem:[#allocation3 + $0x6] sm:$0x7] %vm2334_vm0, %v2389_v16 }
 0x8d6   :  { %2660 = vrot.lane.b32.xlu2 %v5439_v1, %s4082_s12  ;;  %2558 = vrot.lane.b32.xlu1 %v2556_v0, %s4080_s27 }
 0x8d9   :  { %v2301_v6 = vpop.permute.xlu0 %2300 }
 0x8da   :  { %2303 = vst.msk [vmem:[#allocation3 + $0x9] sm:$0x7] %vm2201_vm15, %v2301_v6 }
 0x8db   :  { %v2451_v34 = vpop.permute.xlu2 %2450  ;;  %v5457_v51 = vld [vmem:[#allocation3 + $0x6] sm:$0x7] }
 0x8dc   :  { %v2453_v56 = vmul.f32 %v2451_v34, %v5451_v9 }
 0x8de   :  { %2672 = vrot.lane.b32.xlu1 %v5445_v52, %s4082_s12 }
 0x8e1   :  { %v2332_v7 = vpop.permute.xlu1 %2331  ;;  %v2473_v49 = vpop.permute.xlu0 %2472  ;;  %v2430_v29 = vld [vmem:[#allocation3 + $0x9] sm:$0x7] }
 0x8e2   :  { %2335 = vst.msk [vmem:[#allocation3] sm:$0x7] %vm2334_vm0, %v2332_v7  ;;  %v2431_v26 = vadd.f32 %v2430_v29, %v2429_v2  ;;  %v3958_v29 = vld [vmem:[%s6052_s2 + $0x1] ss:$0 sm:$0xff]  ;;  %v3959_v2 = vld [vmem:[%s6052_s2 + $0x6] ss:$0 sm:$0xff] }
 0x8e3   :  { %v2459_v11 = vpop.permute.xlu2 %2458 }
 0x8e4   :  { %v2461_v36 = vmul.f32 %v2459_v11, %v5457_v51 }
 0x8e9   :  { %v2534_v3 = vpop.permute.xlu1 %2533  ;;  %v5453_v33 = vld [vmem:[#allocation3] sm:$0x7]  ;;  %v2488_v14 = vpop.permute.xlu0 %2487 }
 0x8ea   :  { %v2536_v54 = vsub.f32 %v2531_v15, %v2534_v3  ;;  %v2475_v24 = vmul.f32 %v2473_v49, %v5453_v33  ;;  %v2490_v27 = vmul.f32 %v2488_v14, %v5457_v51 }
 0x8eb   :  { %v2508_v13 = vpop.permute.xlu2 %2507 }
 0x8ec   :  { %v2549_v61 = vperm.slane %v2536_v54, 0  ;;  %v2510_v35 = vmul.f32 %v2508_v13, %v5451_v9 }
 0x8ee   :  { %2551 = vrot.lane.b32.xlu0 %v2549_v61, %s4080_s27 }
 0x8f1   :  { %v2444_v62 = vpop.permute.xlu1 %2443  ;;  %v2516_v63 = vpop.permute.xlu0 %2515 }
 0x8f2   :  { %v2446_v19 = vmul.f32 %v2444_v62, %v5453_v33  ;;  %v2518_v30 = vmul.f32 %v2516_v63, %v5457_v51 }
 0x8f4   :  { %v2454_v43 = vadd.f32 %v2453_v56, %v2446_v19 }
 0x8f6   :  { %v2462_v47 = vadd.f32 %v2461_v36, %v2454_v43  ;;  %2666 = vrot.lane.b32.xlu0 %v5460_v45, %s4082_s12 }
 0x8f8   :  { %2464 = vrot.lane.b32.xlu2 %v2462_v47, %s4082_s12 }
 0x8f9   :  { %v2480_v57 = vpop.permute.xlu1 %2479 }
 0x8fa   :  { %v2482_v53 = vmul.f32 %v2480_v57, %v5451_v9 }
 0x8fc   :  { %v2483_v28 = vadd.f32 %v2482_v53, %v2475_v24 }
 0x8fe   :  { %v2491_v21 = vadd.f32 %v2490_v27, %v2483_v28 }
 0x900   :  { %2576 = vrot.lane.b32.xlu2 %v3947_v22, %s4080_s27  ;;  %2493 = vrot.lane.b32.xlu0 %v2491_v21, %s4082_s12 }
 0x901   :  { %v2501_v10 = vpop.permute.xlu1 %2500 }
 0x902   :  { %v2503_v17 = vmul.f32 %v2501_v10, %v5453_v33  ;;  %v3956_v10 = vld [vmem:[%s6052_s2] ss:$0 sm:$0xff] }
 0x904   :  { %v2511_v32 = vadd.f32 %v2510_v35, %v2503_v17 }
 0x906   :  { %v2519_v15 = vadd.f32 %v2518_v30, %v2511_v32 }
 0x908   :  { %2612 = vrot.lane.b32.xlu2 %v3948_v37, %s4080_s27  ;;  %2583 = vrot.lane.b32.xlu0 %v3949_v46, %s4080_s27  ;;  %v3957_v37 = vld [vmem:[%s6052_s2 + $0x4] ss:$0 sm:$0xff] }
 0x909   :  { %2521 = vrot.lane.b32.xlu1 %v2519_v15, %s4082_s12 }
 0x910   :  { %2633 = vrot.lane.b32.xlu2 %v3950_v20, %s4080_s27  ;;  %2591 = vrot.lane.b32.xlu0 %v3951_v12, %s4080_s27 }
 0x911   :  { %2433 = vrot.lane.b32.xlu1 %v2431_v26, %s4085_s20 }
 0x918   :  { %2640 = vrot.lane.b32.xlu0 %v3952_v8, %s4080_s27  ;;  %v3960_v8 = vld [vmem:[%s6052_s2 + $0x2] ss:$0 sm:$0xff] }
 0x919   :  { %2605 = vrot.lane.b32.xlu1 %v3953_v44, %s4080_s27  ;;  %v3961_v44 = vld [vmem:[%s6052_s2 + $0x3] ss:$0 sm:$0xff] }
 0x921   :  { %2620 = vrot.lane.b32.xlu1 %v3954_v60, %s4080_s27 }
 0x928   :  { %v2546_v31 = vpop.permute.xlu2 %2545 }
 0x929   :  { %2648 = vrot.lane.b32.xlu1 %v3955_v25, %s4080_s27  ;;  %v2548_v57 = vmul.f32 %v2546_v31, %v5453_v33  ;;  %v3962_v25 = vld [vmem:[%s6052_s2 + $0x7] ss:$0 sm:$0xff]  ;;  %v3963_v31 = vld [vmem:[%s6052_s2 + $0x5] ss:$0 sm:$0xff] }
 0x930   :  { %v2661_v48 = vpop.permute.xlu2 %2660 }
 0x931   :  { %v2663_v38 = vsub.f32 %v5439_v1, %v2661_v48  ;;  %v5524_v1 = vld [vmem:[#allocation2 + $0x2] sm:$0x1] }
 0x933   :  { %v2676_v39 = vperm.slane %v2663_v38, 0 }
 0x935   :  { %2678 = vrot.lane.b32.xlu0 %v2676_v39, %s4080_s27 }
 0x93d   :  { %2793 = vrot.lane.b32.xlu0 %v5517_v40, %s4082_s12 }
 0x948   :  { %v2559_v58 = vpop.permute.xlu1 %2558 }
 0x949   :  { %v2561_v22 = vmul.f32 %v2559_v58, %v5457_v51  ;;  %v3964_v58 = vld [vmem:[%s6052_s2 + $0x8] ss:$0 sm:$0xff] }
 0x950   :  { %v2673_v59 = vpop.permute.xlu1 %2672 }
 0x951   :  { %v2675_v16 = vsub.f32 %v5445_v52, %v2673_v59  ;;  %v5531_v52 = vld [vmem:[#allocation2 + $0x1] sm:$0x1] }
 0x952   :  { %v2465_v0 = vpop.permute.xlu2 %2464 }
 0x953   :  { %v2689_v4 = vperm.slane %v2675_v16, 0  ;;  %2468 = vst.msk [vmem:[#allocation3] sm:$0x7] %vm2467_vm1, %v2465_v0 }
 0x955   :  { %2691 = vrot.lane.b32.xlu2 %v2689_v4, %s4080_s27 }
 0x95a   :  { %v5538_v62 = vld [vmem:[#allocation3] sm:$0x7]  ;;  %v2577_v56 = vpop.permute.xlu2 %2576 }
 0x95b   :  { %v2579_v36 = vmul.f32 %v2577_v56, %v5538_v62 }
 0x95d   :  { %2805 = vrot.lane.b32.xlu2 %v5524_v1, %s4082_s12 }
 0x960   :  { %v2552_v6 = vpop.permute.xlu0 %2551 }
 0x961   :  { %v2554_v43 = vmul.f32 %v2552_v6, %v5451_v9  ;;  %v5599_v6 = vld [vmem:[#allocation2] sm:$0x1] }
 0x962   :  { %v2613_v33 = vpop.permute.xlu2 %2612 }
 0x963   :  { %v2555_v27 = vadd.f32 %v2554_v43, %v2548_v57 }
 0x965   :  { %v2562_v21 = vadd.f32 %v2561_v22, %v2555_v27 }
 0x968   :  { %v2667_v7 = vpop.permute.xlu0 %2666 }
 0x969   :  { %v2669_v34 = vsub.f32 %v5460_v45, %v2667_v7 }
 0x96a   :  { %v2634_v15 = vpop.permute.xlu2 %2633 }
 0x96b   :  { %v2682_v3 = vperm.slane %v2669_v34, 0  ;;  %v2636_v5 = vmul.f32 %v2634_v15, %v5538_v62 }
 0x96d   :  { %2684 = vrot.lane.b32.xlu1 %v2682_v3, %s4080_s27 }
 0x972   :  { %v2494_v54 = vpop.permute.xlu0 %2493 }
 0x973   :  { %2496 = vst.msk [vmem:[#allocation3 + $0x3] sm:$0x7] %vm2467_vm1, %v2494_v54 }
 0x975   :  { %2799 = vrot.lane.b32.xlu1 %v5531_v52, %s4082_s12 }
 0x97a   :  { %v2584_v61 = vpop.permute.xlu0 %2583  ;;  %v5536_v11 = vld [vmem:[#allocation3 + $0x3] sm:$0x7] }
 0x97b   :  { %v2522_v49 = vpop.permute.xlu1 %2521  ;;  %v2586_v19 = vmul.f32 %v2584_v61, %v5536_v11  ;;  %v2615_v17 = vmul.f32 %v2613_v33, %v5536_v11 }
 0x97c   :  { %2524 = vst.msk [vmem:[#allocation3 + $0x6] sm:$0x7] %vm2467_vm1, %v2522_v49 }
 0x97d   :  { %v2587_v24 = vadd.f32 %v2586_v19, %v2579_v36 }
 0x982   :  { %v2592_v45 = vpop.permute.xlu0 %2591 }
 0x983   :  { %v2434_v47 = vpop.permute.xlu1 %2433  ;;  %v5543_v14 = vld [vmem:[#allocation3 + $0x6] sm:$0x7] }
 0x984   :  { %2436 = vst.msk [vmem:[#allocation3 + $0x9] sm:$0x7] %vm2334_vm0, %v2434_v47  ;;  %v2594_v53 = vmul.f32 %v2592_v45, %v5543_v14 }
 0x986   :  { %v2595_v28 = vadd.f32 %v2594_v53, %v2587_v24 }
 0x988   :  { %2597 = vrot.lane.b32.xlu0 %v2595_v28, %s4082_s12 }
 0x98a   :  { %v2641_v46 = vpop.permute.xlu0 %2640 }
 0x98b   :  { %v2606_v13 = vpop.permute.xlu1 %2605  ;;  %v2563_v9 = vld [vmem:[#allocation3 + $0x9] sm:$0x7]  ;;  %v2643_v41 = vmul.f32 %v2641_v46, %v5536_v11  ;;  %v3965_v46 = vld [vmem:[%s6052_s2 + $0x1] ss:$0 sm:$0xff] }
 0x98c   :  { %v2564_v63 = vadd.f32 %v2563_v9, %v2562_v21  ;;  %v2608_v35 = vmul.f32 %v2606_v13, %v5538_v62 }
 0x98d   :  { %v2644_v20 = vadd.f32 %v2643_v41, %v2636_v5 }
 0x98e   :  { %2566 = vrot.lane.b32.xlu2 %v2564_v63, %s4082_s12  ;;  %v2616_v30 = vadd.f32 %v2615_v17, %v2608_v35 }
 0x990   :  { %2709 = vrot.lane.b32.xlu0 %v3956_v10, %s4080_s27 }
 0x993   :  { %v2621_v51 = vpop.permute.xlu1 %2620 }
 0x994   :  { %v2623_v32 = vmul.f32 %v2621_v51, %v5543_v14 }
 0x996   :  { %v2624_v50 = vadd.f32 %v2623_v32, %v2616_v30 }
 0x998   :  { %2626 = vrot.lane.b32.xlu1 %v2624_v50, %s4082_s12  ;;  %2745 = vrot.lane.b32.xlu0 %v3957_v37, %s4080_s27 }
 0x99b   :  { %v2649_v42 = vpop.permute.xlu1 %2648 }
 0x99c   :  { %v2651_v12 = vmul.f32 %v2649_v42, %v5543_v14 }
 0x99e   :  { %v2652_v26 = vadd.f32 %v2651_v12, %v2644_v20  ;;  %v3966_v20 = vld [vmem:[%s6052_s2] ss:$0 sm:$0xff] }
 0x9a0   :  { %2716 = vrot.lane.b32.xlu1 %v3958_v29, %s4080_s27  ;;  %2766 = vrot.lane.b32.xlu0 %v3959_v2, %s4080_s27  ;;  %v3967_v2 = vld [vmem:[%s6052_s2 + $0x2] ss:$0 sm:$0xff] }
 0x9a1   :  { %2654 = vrot.lane.b32.xlu2 %v2652_v26, %s4082_s12 }
 0x9a7   :  { %v2679_v60 = vpop.permute.xlu0 %2678 }
 0x9a8   :  { %2724 = vrot.lane.b32.xlu1 %v3960_v8, %s4080_s27  ;;  %v2681_v61 = vmul.f32 %v2679_v60, %v5538_v62  ;;  %v3969_v60 = vld [vmem:[%s6052_s2 + $0x7] ss:$0 sm:$0xff] }
 0x9a9   :  { %2738 = vrot.lane.b32.xlu2 %v3961_v44, %s4080_s27  ;;  %v3968_v44 = vld [vmem:[%s6052_s2 + $0x4] ss:$0 sm:$0xff] }
 0x9af   :  { %v2692_v48 = vpop.permute.xlu2 %2691  ;;  %v2794_v38 = vpop.permute.xlu0 %2793 }
 0x9b0   :  { %2773 = vrot.lane.b32.xlu1 %v3962_v25, %s4080_s27  ;;  %v2796_v39 = vsub.f32 %v5517_v40, %v2794_v38  ;;  %v5603_v40 = vld [vmem:[#allocation2 + $0x2] sm:$0x1]  ;;  %v2694_v19 = vmul.f32 %v2692_v48, %v5543_v14  ;;  %v3970_v25 = vld [vmem:[%s6052_s2 + $0x3] ss:$0 sm:$0xff] }
 0x9b1   :  { %2753 = vrot.lane.b32.xlu2 %v3963_v31, %s4080_s27 }
 0x9b2   :  { %v2809_v59 = vperm.slane %v2796_v39, 0  ;;  %v3971_v39 = vld [vmem:[%s6052_s2 + $0x6] ss:$0 sm:$0xff] }
 0x9b7   :  { %v2806_v16 = vpop.permute.xlu2 %2805 }
 0x9b8   :  { %v2808_v0 = vsub.f32 %v5524_v1, %v2806_v16  ;;  %2811 = vrot.lane.b32.xlu1 %v2809_v59, %s4080_s27 }
 0x9b9   :  { %2781 = vrot.lane.b32.xlu2 %v3964_v58, %s4080_s27  ;;  %v3972_v58 = vld [vmem:[%s6052_s2 + $0x5] ss:$0 sm:$0xff] }
 0x9ba   :  { %v2822_v4 = vperm.slane %v2808_v0, 0 }
 0x9bc   :  { %2824 = vrot.lane.b32.xlu0 %v2822_v4, %s4080_s27 }
 0x9c0   :  { %2926 = vrot.lane.b32.xlu1 %v5599_v6, %s4081_s28 }
 0x9c4   :  { %2938 = vrot.lane.b32.xlu0 %v5603_v40, %s4081_s28 }
 0x9df   :  { %v2685_v7 = vpop.permute.xlu1 %2684 }
 0x9e0   :  { %v2687_v1 = vmul.f32 %v2685_v7, %v5536_v11  ;;  %v5614_v11 = vld [vmem:[#allocation2 + $0x1] sm:$0x1]  ;;  %v5673_v7 = vld [vmem:[#allocation2] sm:$0x1] }
 0x9e2   :  { %v2688_v56 = vadd.f32 %v2687_v1, %v2681_v61 }
 0x9e4   :  { %v2695_v36 = vadd.f32 %v2694_v19, %v2688_v56 }
 0x9e7   :  { %v2800_v34 = vpop.permute.xlu1 %2799 }
 0x9e8   :  { %v2567_v3 = vpop.permute.xlu2 %2566  ;;  %v2802_v54 = vsub.f32 %v5531_v52, %v2800_v34 }
 0x9e9   :  { %2569 = vst.msk [vmem:[#allocation3 + $0x9] sm:$0x7] %vm2467_vm1, %v2567_v3 }
 0x9ea   :  { %v2815_v49 = vperm.slane %v2802_v54, 0  ;;  %v5680_v54 = vld [vmem:[#allocation2 + $0x1] sm:$0x1] }
 0x9ec   :  { %2817 = vrot.lane.b32.xlu2 %v2815_v49, %s4080_s27 }
 0x9f0   :  { %v2696_v43 = vld [vmem:[#allocation3 + $0x9] sm:$0x7] }
 0x9f1   :  { %v2697_v45 = vadd.f32 %v2696_v43, %v2695_v36 }
 0x9f3   :  { %2699 = vrot.lane.b32.xlu0 %v2697_v45, %s4082_s12 }
 0x9f4   :  { %2932 = vrot.lane.b32.xlu2 %v5614_v11, %s4081_s28 }
 0x9fa   :  { %v2598_v52 = vpop.permute.xlu0 %2597 }
 0x9fb   :  { %v2655_v62 = vpop.permute.xlu2 %2654  ;;  %2601 = vst.msk [vmem:[#allocation3] sm:$0x7] %vm2600_vm2, %v2598_v52 }
 0x9fc   :  { %2657 = vst.msk [vmem:[#allocation3 + $0x6] sm:$0x7] %vm2600_vm2, %v2655_v62  ;;  %v5689_v62 = vld [vmem:[#allocation2 + $0x2] sm:$0x1] }
 0xa02   :  { %v2710_v47 = vpop.permute.xlu0 %2709  ;;  %v5621_v24 = vld [vmem:[#allocation3] sm:$0x7] }
 0xa03   :  { %v2739_v57 = vpop.permute.xlu2 %2738  ;;  %v5624_v9 = vld [vmem:[#allocation3 + $0x6] sm:$0x7]  ;;  %v2712_v17 = vmul.f32 %v2710_v47, %v5621_v24 }
 0xa04   :  { %v2741_v21 = vmul.f32 %v2739_v57, %v5621_v24 }
 0xa0a   :  { %v2627_v14 = vpop.permute.xlu1 %2626  ;;  %v2746_v53 = vpop.permute.xlu0 %2745 }
 0xa0b   :  { %2629 = vst.msk [vmem:[#allocation3 + $0x3] sm:$0x7] %vm2600_vm2, %v2627_v14  ;;  %v2754_v27 = vpop.permute.xlu2 %2753 }
 0xa0c   :  { %v2756_v63 = vmul.f32 %v2754_v27, %v5624_v9 }
 0xa12   :  { %v2704_v28 = vld [vmem:[#allocation3 + $0x3] sm:$0x7]  ;;  %v2717_v22 = vpop.permute.xlu1 %2716  ;;  %v2767_v50 = vpop.permute.xlu0 %2766 }
 0xa13   :  { %v2748_v13 = vmul.f32 %v2746_v53, %v2704_v28  ;;  %v2719_v35 = vmul.f32 %v2717_v22, %v2704_v28  ;;  %v2782_v15 = vpop.permute.xlu2 %2781  ;;  %v2769_v5 = vmul.f32 %v2767_v50, %v5621_v24 }
 0xa14   :  { %v2784_v12 = vmul.f32 %v2782_v15, %v5624_v9 }
 0xa15   :  { %v2749_v10 = vadd.f32 %v2748_v13, %v2741_v21  ;;  %v2720_v30 = vadd.f32 %v2719_v35, %v2712_v17 }
 0xa17   :  { %v2757_v33 = vadd.f32 %v2756_v63, %v2749_v10 }
 0xa19   :  { %2759 = vrot.lane.b32.xlu2 %v2757_v33, %s4082_s12 }
 0xa1a   :  { %v2725_v51 = vpop.permute.xlu1 %2724 }
 0xa1b   :  { %v2727_v32 = vmul.f32 %v2725_v51, %v5624_v9 }
 0xa1d   :  { %v2728_v37 = vadd.f32 %v2727_v32, %v2720_v30 }
 0xa1f   :  { %2730 = vrot.lane.b32.xlu1 %v2728_v37, %s4082_s12 }
 0xa21   :  { %2849 = vrot.lane.b32.xlu2 %v3965_v46, %s4078_s23  ;;  %v3974_v46 = vld [vmem:[%s6052_s2] ss:$0 sm:$0xff] }
 0xa22   :  { %v2774_v41 = vpop.permute.xlu1 %2773 }
 0xa23   :  { %v2776_v42 = vmul.f32 %v2774_v41, %v2704_v28 }
 0xa25   :  { %v2777_v29 = vadd.f32 %v2776_v42, %v2769_v5 }
 0xa27   :  { %v2785_v26 = vadd.f32 %v2784_v12, %v2777_v29  ;;  %2842 = vrot.lane.b32.xlu1 %v3966_v20, %s4078_s23 }
 0xa29   :  { %2857 = vrot.lane.b32.xlu2 %v3967_v2, %s4078_s23  ;;  %2787 = vrot.lane.b32.xlu0 %v2785_v26, %s4082_s12  ;;  %v3975_v2 = vld [vmem:[%s6052_s2 + $0x4] ss:$0 sm:$0xff]  ;;  %v3976_v26 = vld [vmem:[%s6052_s2 + $0x1] ss:$0 sm:$0xff] }
 0xa2a   :  { %v2812_v8 = vpop.permute.xlu1 %2811 }
 0xa2b   :  { %v2814_v56 = vmul.f32 %v2812_v8, %v5621_v24 }
 0xa2e   :  { %v2825_v31 = vpop.permute.xlu0 %2824 }
 0xa2f   :  { %2878 = vrot.lane.b32.xlu1 %v3968_v44, %s4078_s23  ;;  %v2827_v36 = vmul.f32 %v2825_v31, %v5624_v9  ;;  %v3977_v44 = vld [vmem:[%s6052_s2 + $0x6] ss:$0 sm:$0xff]  ;;  %v3979_v31 = vld [vmem:[%s6052_s2 + $0x3] ss:$0 sm:$0xff] }
 0xa31   :  { %2906 = vrot.lane.b32.xlu2 %v3969_v60, %s4078_s23  ;;  %2871 = vrot.lane.b32.xlu0 %v3970_v25, %s4078_s23  ;;  %v3978_v60 = vld [vmem:[%s6052_s2 + $0x2] ss:$0 sm:$0xff] }
 0xa32   :  { %v2927_v48 = vpop.permute.xlu1 %2926 }
 0xa33   :  { %v2929_v38 = vsub.f32 %v5599_v6, %v2927_v48  ;;  %v3973_v6 = vld [vmem:[%s6052_s2 + $0x8] ss:$0 sm:$0xff]  ;;  %v3980_v48 = vld [vmem:[%s6052_s2 + $0x7] ss:$0 sm:$0xff] }
 0xa35   :  { %v2942_v16 = vperm.slane %v2929_v38, 0  ;;  %v3981_v38 = vld [vmem:[%s6052_s2 + $0x5] ss:$0 sm:$0xff] }
 0xa36   :  { %v2939_v59 = vpop.permute.xlu0 %2938 }
 0xa37   :  { %2899 = vrot.lane.b32.xlu1 %v3971_v39, %s4078_s23  ;;  %v2941_v0 = vsub.f32 %v5603_v40, %v2939_v59 }
 0xa39   :  { %2944 = vrot.lane.b32.xlu2 %v2942_v16, %s4078_s23  ;;  %2886 = vrot.lane.b32.xlu0 %v3972_v58, %s4078_s23  ;;  %v2955_v4 = vperm.slane %v2941_v0, 0  ;;  %v3982_v16 = vld [vmem:[%s6052_s2 + $0x8] ss:$0 sm:$0xff] }
 0xa3f   :  { %2957 = vrot.lane.b32.xlu1 %v2955_v4, %s4078_s23 }
 0xa41   :  { %3059 = vrot.lane.b32.xlu2 %v5673_v7, %s4081_s28  ;;  %2914 = vrot.lane.b32.xlu0 %v3973_v6, %s4078_s23 }
 0xa46   :  { %v2818_v1 = vpop.permute.xlu2 %2817 }
 0xa47   :  { %v2820_v61 = vmul.f32 %v2818_v1, %v2704_v28 }
 0xa49   :  { %v2821_v19 = vadd.f32 %v2820_v61, %v2814_v56 }
 0xa4b   :  { %v2828_v43 = vadd.f32 %v2827_v36, %v2821_v19 }
 0xa4e   :  { %v2933_v40 = vpop.permute.xlu2 %2932 }
 0xa4f   :  { %v2935_v34 = vsub.f32 %v5614_v11, %v2933_v40  ;;  %v5752_v40 = vld [vmem:[#allocation2] sm:$0x1] }
 0xa51   :  { %v2948_v3 = vperm.slane %v2935_v34, 0  ;;  %v5757_v34 = vld [vmem:[#allocation2 + $0x1] sm:$0x1] }
 0xa53   :  { %2950 = vrot.lane.b32.xlu0 %v2948_v3, %s4078_s23 }
 0xa5b   :  { %3065 = vrot.lane.b32.xlu0 %v5680_v54, %s4081_s28 }
 0xa65   :  { %v2700_v49 = vpop.permute.xlu0 %2699 }
 0xa66   :  { %2702 = vst.msk [vmem:[#allocation3 + $0x9] sm:$0x7] %vm2600_vm2, %v2700_v49 }
 0xa6d   :  { %v2829_v45 = vld [vmem:[#allocation3 + $0x9] sm:$0x7] }
 0xa6e   :  { %v2830_v11 = vadd.f32 %v2829_v45, %v2828_v43 }
 0xa70   :  { %2832 = vrot.lane.b32.xlu1 %v2830_v11, %s4082_s12 }
 0xa73   :  { %v2760_v52 = vpop.permute.xlu2 %2759 }
 0xa74   :  { %2762 = vst.msk [vmem:[#allocation3 + $0x3] sm:$0x7] %vm2733_vm4, %v2760_v52 }
 0xa78   :  { %3071 = vrot.lane.b32.xlu1 %v5689_v62, %s4081_s28 }
 0xa7b   :  { %v2850_v57 = vpop.permute.xlu2 %2849  ;;  %v5697_v27 = vld [vmem:[#allocation3 + $0x3] sm:$0x7] }
 0xa7c   :  { %v2852_v22 = vmul.f32 %v2850_v57, %v5697_v27 }
 0xa83   :  { %v2858_v21 = vpop.permute.xlu2 %2857 }
 0xa8b   :  { %v2907_v41 = vpop.permute.xlu2 %2906 }
 0xa8c   :  { %v2909_v42 = vmul.f32 %v2907_v41, %v5697_v27 }
 0xa91   :  { %v2731_v47 = vpop.permute.xlu1 %2730 }
 0xa92   :  { %2734 = vst.msk [vmem:[#allocation3] sm:$0x7] %vm2733_vm4, %v2731_v47  ;;  %v5768_v47 = vld [vmem:[#allocation2 + $0x2] sm:$0x1] }
 0xa93   :  { %v2945_v25 = vpop.permute.xlu2 %2944 }
 0xa99   :  { %v2843_v14 = vpop.permute.xlu1 %2842  ;;  %v5695_v53 = vld [vmem:[#allocation3] sm:$0x7] }
 0xa9a   :  { %v2845_v28 = vmul.f32 %v2843_v14, %v5695_v53  ;;  %v2947_v56 = vmul.f32 %v2945_v25, %v5695_v53  ;;  %v3986_v25 = vld [vmem:[%s6052_s2 + $0x2] ss:$0 sm:$0xff] }
 0xa9b   :  { %v2788_v24 = vpop.permute.xlu0 %2787  ;;  %v3060_v58 = vpop.permute.xlu2 %3059 }
 0xa9c   :  { %2790 = vst.msk [vmem:[#allocation3 + $0x6] sm:$0x7] %vm2733_vm4, %v2788_v24  ;;  %v2853_v10 = vadd.f32 %v2852_v22, %v2845_v28  ;;  %v3062_v59 = vsub.f32 %v5673_v7, %v3060_v58  ;;  %v3989_v58 = vld [vmem:[%s6052_s2 + $0x7] ss:$0 sm:$0xff] }
 0xa9e   :  { %v3075_v0 = vperm.slane %v3062_v59, 0  ;;  %v3990_v59 = vld [vmem:[%s6052_s2 + $0x5] ss:$0 sm:$0xff] }
 0xaa1   :  { %v2879_v13 = vpop.permute.xlu1 %2878 }
 0xaa2   :  { %v2881_v51 = vmul.f32 %v2879_v13, %v5697_v27 }
 0xaa3   :  { %v2872_v9 = vpop.permute.xlu0 %2871  ;;  %v5701_v63 = vld [vmem:[#allocation3 + $0x6] sm:$0x7] }
 0xaa4   :  { %v2860_v33 = vmul.f32 %v2858_v21, %v5701_v63  ;;  %v2874_v17 = vmul.f32 %v2872_v9, %v5695_v53 }
 0xaa6   :  { %v2861_v35 = vadd.f32 %v2860_v33, %v2853_v10  ;;  %v2882_v32 = vadd.f32 %v2881_v51, %v2874_v17 }
 0xaa8   :  { %2863 = vrot.lane.b32.xlu2 %v2861_v35, %s4081_s28 }
 0xaa9   :  { %v2900_v50 = vpop.permute.xlu1 %2899 }
 0xaaa   :  { %v2902_v5 = vmul.f32 %v2900_v50, %v5695_v53  ;;  %v3983_v50 = vld [vmem:[%s6052_s2] ss:$0 sm:$0xff] }
 0xaab   :  { %v2887_v30 = vpop.permute.xlu0 %2886 }
 0xaac   :  { %v2889_v37 = vmul.f32 %v2887_v30, %v5701_v63  ;;  %v2910_v12 = vadd.f32 %v2909_v42, %v2902_v5 }
 0xaae   :  { %v2890_v15 = vadd.f32 %v2889_v37, %v2882_v32 }
 0xab0   :  { %2975 = vrot.lane.b32.xlu2 %v3974_v46, %s4078_s23  ;;  %2892 = vrot.lane.b32.xlu0 %v2890_v15, %s4081_s28 }
 0xab1   :  { %v2958_v7 = vpop.permute.xlu1 %2957 }
 0xab2   :  { %v2960_v43 = vmul.f32 %v2958_v7, %v5701_v63 }
 0xab3   :  { %v2915_v20 = vpop.permute.xlu0 %2914 }
 0xab4   :  { %v2917_v29 = vmul.f32 %v2915_v20, %v5701_v63 }
 0xab6   :  { %v2918_v8 = vadd.f32 %v2917_v29, %v2910_v12 }
 0xab8   :  { %3011 = vrot.lane.b32.xlu2 %v3975_v2, %s4078_s23  ;;  %2982 = vrot.lane.b32.xlu0 %v3976_v26, %s4078_s23  ;;  %v3984_v26 = vld [vmem:[%s6052_s2 + $0x1] ss:$0 sm:$0xff] }
 0xab9   :  { %2920 = vrot.lane.b32.xlu1 %v2918_v8, %s4081_s28  ;;  %v3985_v8 = vld [vmem:[%s6052_s2 + $0x4] ss:$0 sm:$0xff] }
 0xac0   :  { %3032 = vrot.lane.b32.xlu2 %v3977_v44, %s4078_s23  ;;  %2990 = vrot.lane.b32.xlu0 %v3978_v60, %s4078_s23 }
 0xac1   :  { %3004 = vrot.lane.b32.xlu1 %v3979_v31, %s4078_s23  ;;  %v3987_v31 = vld [vmem:[%s6052_s2 + $0x6] ss:$0 sm:$0xff] }
 0xac5   :  { %v2951_v39 = vpop.permute.xlu0 %2950 }
 0xac8   :  { %3039 = vrot.lane.b32.xlu0 %v3980_v48, %s4078_s23 }
 0xac9   :  { %3019 = vrot.lane.b32.xlu1 %v3981_v38, %s4078_s23  ;;  %v3988_v38 = vld [vmem:[%s6052_s2 + $0x3] ss:$0 sm:$0xff] }
 0xacd   :  { %v3066_v4 = vpop.permute.xlu0 %3065 }
 0xace   :  { %v3068_v6 = vsub.f32 %v5680_v54, %v3066_v4  ;;  %v2953_v54 = vmul.f32 %v2951_v39, %v5697_v27 }
 0xad0   :  { %3077 = vrot.lane.b32.xlu0 %v3075_v0, %s4078_s23  ;;  %v3081_v1 = vperm.slane %v3068_v6, 0  ;;  %v2954_v36 = vadd.f32 %v2953_v54, %v2947_v56  ;;  %v3991_v54 = vld [vmem:[%s6052_s2 + $0x8] ss:$0 sm:$0xff] }
 0xad1   :  { %3047 = vrot.lane.b32.xlu1 %v3982_v16, %s4078_s23 }
 0xad2   :  { %v2961_v11 = vadd.f32 %v2960_v43, %v2954_v36 }
 0xad8   :  { %3192 = vrot.lane.b32.xlu0 %v5752_v40, %s4081_s28 }
 0xad9   :  { %3083 = vrot.lane.b32.xlu1 %v3081_v1, %s4078_s23 }
 0xae1   :  { %3198 = vrot.lane.b32.xlu1 %v5757_v34, %s4081_s28 }
 0xae2   :  { %v2833_v3 = vpop.permute.xlu1 %2832 }
 0xae3   :  { %2835 = vst.msk [vmem:[#allocation3 + $0x9] sm:$0x7] %vm2733_vm4, %v2833_v3 }
 0xaea   :  { %v3072_v61 = vpop.permute.xlu1 %3071  ;;  %v2962_v45 = vld [vmem:[#allocation3 + $0x9] sm:$0x7] }
 0xaeb   :  { %v3074_v49 = vsub.f32 %v5689_v62, %v3072_v61  ;;  %v2963_v52 = vadd.f32 %v2962_v45, %v2961_v11 }
 0xaed   :  { %v3088_v19 = vperm.slane %v3074_v49, 0 }
 0xaef   :  { %3090 = vrot.lane.b32.xlu2 %v3088_v19, %s4078_s23 }
 0xaf7   :  { %2965 = vrot.lane.b32.xlu2 %v2963_v52, %s4081_s28 }
 0xaff   :  { %3204 = vrot.lane.b32.xlu2 %v5768_v47, %s4081_s28 }
 0xb02   :  { %v2864_v62 = vpop.permute.xlu2 %2863 }
 0xb03   :  { %2867 = vst.msk [vmem:[#allocation3] sm:$0x7] %vm2866_vm5, %v2864_v62  ;;  %v5826_v62 = vld [vmem:[#allocation2 + $0x2] sm:$0x1] }
 0xb0a   :  { %v2976_v24 = vpop.permute.xlu2 %2975  ;;  %v2969_v28 = vld [vmem:[#allocation3] sm:$0x7] }
 0xb0b   :  { %v2978_v21 = vmul.f32 %v2976_v24, %v2969_v28 }
 0xb12   :  { %v3012_v35 = vpop.permute.xlu2 %3011 }
 0xb1a   :  { %v3033_v5 = vpop.permute.xlu2 %3032 }
 0xb1b   :  { %v3035_v20 = vmul.f32 %v3033_v5, %v2969_v28 }
 0xb22   :  { %v2893_v57 = vpop.permute.xlu0 %2892 }
 0xb23   :  { %2895 = vst.msk [vmem:[#allocation3 + $0x3] sm:$0x7] %vm2866_vm5, %v2893_v57  ;;  %v5830_v57 = vld [vmem:[#allocation2 + $0x1] sm:$0x1] }
 0xb2a   :  { %v2983_v14 = vpop.permute.xlu0 %2982  ;;  %v2970_v27 = vld [vmem:[#allocation3 + $0x3] sm:$0x7] }
 0xb2b   :  { %v2921_v53 = vpop.permute.xlu1 %2920  ;;  %v2985_v22 = vmul.f32 %v2983_v14, %v2970_v27  ;;  %v3014_v30 = vmul.f32 %v3012_v35, %v2970_v27 }
 0xb2c   :  { %2923 = vst.msk [vmem:[#allocation3 + $0x6] sm:$0x7] %vm2866_vm5, %v2921_v53 }
 0xb2d   :  { %v2986_v10 = vadd.f32 %v2985_v22, %v2978_v21 }
 0xb32   :  { %v2991_v13 = vpop.permute.xlu0 %2990 }
 0xb33   :  { %v3005_v9 = vpop.permute.xlu1 %3004  ;;  %v2971_v63 = vld [vmem:[#allocation3 + $0x6] sm:$0x7] }
 0xb34   :  { %v2993_v33 = vmul.f32 %v2991_v13, %v2971_v63  ;;  %v3007_v51 = vmul.f32 %v3005_v9, %v2969_v28 }
 0xb36   :  { %v2994_v17 = vadd.f32 %v2993_v33, %v2986_v10  ;;  %v3015_v37 = vadd.f32 %v3014_v30, %v3007_v51 }
 0xb38   :  { %2996 = vrot.lane.b32.xlu0 %v2994_v17, %s4081_s28 }
 0xb3a   :  { %v3040_v15 = vpop.permute.xlu0 %3039 }
 0xb3b   :  { %v3020_v32 = vpop.permute.xlu1 %3019  ;;  %v3042_v42 = vmul.f32 %v3040_v15, %v2970_v27 }
 0xb3c   :  { %v3022_v46 = vmul.f32 %v3020_v32, %v2971_v63 }
 0xb3d   :  { %v3043_v29 = vadd.f32 %v3042_v42, %v3035_v20 }
 0xb3e   :  { %v3023_v41 = vadd.f32 %v3022_v46, %v3015_v37 }
 0xb40   :  { %3025 = vrot.lane.b32.xlu1 %v3023_v41, %s4081_s28  ;;  %3108 = vrot.lane.b32.xlu0 %v3983_v50, %s4078_s23  ;;  %v3992_v41 = vld [vmem:[%s6052_s2 + $0x1] ss:$0 sm:$0xff] }
 0xb42   :  { %v3078_v48 = vpop.permute.xlu0 %3077 }
 0xb43   :  { %v3048_v12 = vpop.permute.xlu1 %3047  ;;  %v3080_v3 = vmul.f32 %v3078_v48, %v2969_v28  ;;  %v3995_v48 = vld [vmem:[%s6052_s2 + $0x4] ss:$0 sm:$0xff] }
 0xb44   :  { %v3050_v2 = vmul.f32 %v3048_v12, %v2971_v63 }
 0xb46   :  { %v3051_v44 = vadd.f32 %v3050_v2, %v3043_v29  ;;  %v3993_v2 = vld [vmem:[%s6052_s2] ss:$0 sm:$0xff] }
 0xb48   :  { %3115 = vrot.lane.b32.xlu1 %v3984_v26, %s4078_s23  ;;  %3144 = vrot.lane.b32.xlu0 %v3985_v8, %s4078_s23 }
 0xb49   :  { %3053 = vrot.lane.b32.xlu2 %v3051_v44, %s4081_s28  ;;  %v3091_v60 = vpop.permute.xlu2 %3090  ;;  %v3994_v44 = vld [vmem:[%s6052_s2 + $0x2] ss:$0 sm:$0xff] }
 0xb4a   :  { %v3193_v0 = vpop.permute.xlu0 %3192  ;;  %v3093_v19 = vmul.f32 %v3091_v60, %v2971_v63 }
 0xb4b   :  { %v3084_v16 = vpop.permute.xlu1 %3083  ;;  %v3195_v1 = vsub.f32 %v5752_v40, %v3193_v0 }
 0xb4c   :  { %v3086_v6 = vmul.f32 %v3084_v16, %v2970_v27 }
 0xb4d   :  { %v3208_v56 = vperm.slane %v3195_v1, 0 }
 0xb4e   :  { %v3087_v49 = vadd.f32 %v3086_v6, %v3080_v3  ;;  %v3998_v6 = vld [vmem:[%s6052_s2 + $0x6] ss:$0 sm:$0xff] }
 0xb50   :  { %3123 = vrot.lane.b32.xlu1 %v3986_v25, %s4078_s23  ;;  %3165 = vrot.lane.b32.xlu0 %v3987_v31, %s4078_s23  ;;  %v3094_v40 = vadd.f32 %v3093_v19, %v3087_v49 }
 0xb51   :  { %3137 = vrot.lane.b32.xlu2 %v3988_v38, %s4078_s23  ;;  %v2966_v39 = vpop.permute.xlu2 %2965  ;;  %v3996_v38 = vld [vmem:[%s6052_s2 + $0x7] ss:$0 sm:$0xff] }
 0xb52   :  { %2968 = vst.msk [vmem:[#allocation3 + $0x9] sm:$0x7] %vm2866_vm5, %v2966_v39  ;;  %v3997_v39 = vld [vmem:[%s6052_s2 + $0x3] ss:$0 sm:$0xff] }
 0xb53   :  { %v3199_v36 = vpop.permute.xlu1 %3198 }
 0xb54   :  { %v3201_v45 = vsub.f32 %v5757_v34, %v3199_v36  ;;  %v4000_v36 = vld [vmem:[%s6052_s2 + $0x8] ss:$0 sm:$0xff] }
 0xb56   :  { %v3214_v52 = vperm.slane %v3201_v45, 0  ;;  %v5879_v45 = vld [vmem:[#allocation2] sm:$0x1] }
 0xb58   :  { %3172 = vrot.lane.b32.xlu1 %v3989_v58, %s4078_s23 }
 0xb59   :  { %3152 = vrot.lane.b32.xlu2 %v3990_v59, %s4078_s23  ;;  %v3205_v4 = vpop.permute.xlu2 %3204  ;;  %v3095_v43 = vld [vmem:[#allocation3 + $0x9] sm:$0x7] }
 0xb5a   :  { %v3207_v7 = vsub.f32 %v5768_v47, %v3205_v4  ;;  %v3096_v11 = vadd.f32 %v3095_v43, %v3094_v40  ;;  %v5821_v47 = vld [vmem:[#allocation2] sm:$0x1] }
 0xb5c   :  { %v3221_v61 = vperm.slane %v3207_v7, 0  ;;  %v3999_v7 = vld [vmem:[%s6052_s2 + $0x5] ss:$0 sm:$0xff] }
 0xb5e   :  { %3223 = vrot.lane.b32.xlu0 %v3221_v61, %s4078_s23 }
 0xb60   :  { %3210 = vrot.lane.b32.xlu1 %v3208_v56, %s4078_s23 }
 0xb61   :  { %3180 = vrot.lane.b32.xlu2 %v3991_v54, %s4078_s23 }
 0xb66   :  { %3098 = vrot.lane.b32.xlu0 %v3096_v11, %s4081_s28 }
 0xb68   :  { %3325 = vrot.lane.b32.xlu1 %v5821_v47, %s4081_s28 }
 0xb69   :  { %3216 = vrot.lane.b32.xlu2 %v3214_v52, %s4078_s23 }
 0xb6e   :  { %3337 = vrot.lane.b32.xlu0 %v5826_v62, %s4081_s28 }
 0xb71   :  { %3331 = vrot.lane.b32.xlu2 %v5830_v57, %s4081_s28 }
 0xba3   :  { %v3054_v34 = vpop.permute.xlu2 %3053 }
 0xba4   :  { %3056 = vst.msk [vmem:[#allocation3 + $0x6] sm:$0x7] %vm2999_vm6, %v3054_v34 }
 0xbaa   :  { %v2997_v14 = vpop.permute.xlu0 %2996 }
 0xbab   :  { %3000 = vst.msk [vmem:[#allocation3] sm:$0x7] %vm2999_vm6, %v2997_v14  ;;  %v3138_v24 = vpop.permute.xlu2 %3137  ;;  %v3104_v33 = vld [vmem:[#allocation3 + $0x6] sm:$0x7]  ;;  %v5888_v14 = vld [vmem:[#allocation2 + $0x2] sm:$0x1] }
 0xbb2   :  { %v3026_v53 = vpop.permute.xlu1 %3025  ;;  %v3109_v27 = vpop.permute.xlu0 %3108  ;;  %v3102_v28 = vld [vmem:[#allocation3] sm:$0x7] }
 0xbb3   :  { %3028 = vst.msk [vmem:[#allocation3 + $0x3] sm:$0x7] %vm2999_vm6, %v3026_v53  ;;  %v3153_v22 = vpop.permute.xlu2 %3152  ;;  %v3140_v63 = vmul.f32 %v3138_v24, %v3102_v28  ;;  %v3111_v32 = vmul.f32 %v3109_v27, %v3102_v28  ;;  %v5892_v24 = vld [vmem:[#allocation2 + $0x1] sm:$0x1] }
 0xbb4   :  { %v3155_v35 = vmul.f32 %v3153_v22, %v3104_v33 }
 0xbba   :  { %v3103_v21 = vld [vmem:[#allocation3 + $0x3] sm:$0x7]  ;;  %v3116_v13 = vpop.permute.xlu1 %3115  ;;  %v3145_v9 = vpop.permute.xlu0 %3144 }
 0xbbb   :  { %v3147_v10 = vmul.f32 %v3145_v9, %v3103_v21  ;;  %v3118_v51 = vmul.f32 %v3116_v13, %v3103_v21  ;;  %v3181_v42 = vpop.permute.xlu2 %3180 }
 0xbbc   :  { %v3183_v26 = vmul.f32 %v3181_v42, %v3104_v33 }
 0xbbd   :  { %v3148_v17 = vadd.f32 %v3147_v10, %v3140_v63  ;;  %v3119_v46 = vadd.f32 %v3118_v51, %v3111_v32 }
 0xbbf   :  { %v3156_v30 = vadd.f32 %v3155_v35, %v3148_v17 }
 0xbc1   :  { %3158 = vrot.lane.b32.xlu2 %v3156_v30, %s4081_s28 }
 0xbc2   :  { %v3124_v37 = vpop.permute.xlu1 %3123  ;;  %v3166_v5 = vpop.permute.xlu0 %3165 }
 0xbc3   :  { %v3126_v50 = vmul.f32 %v3124_v37, %v3104_v33  ;;  %v3168_v12 = vmul.f32 %v3166_v5, %v3102_v28  ;;  %v3217_v59 = vpop.permute.xlu2 %3216  ;;  %v4001_v5 = vld [vmem:[%s6052_s2] ss:$0 sm:$0xff] }
 0xbc4   :  { %v3219_v1 = vmul.f32 %v3217_v59, %v3103_v21  ;;  %v4004_v59 = vld [vmem:[%s6052_s2 + $0x6] ss:$0 sm:$0xff] }
 0xbc5   :  { %v3127_v15 = vadd.f32 %v3126_v50, %v3119_v46 }
 0xbc7   :  { %3129 = vrot.lane.b32.xlu1 %v3127_v15, %s4081_s28 }
 0xbc9   :  { %3248 = vrot.lane.b32.xlu2 %v3992_v41, %s4078_s23 }
 0xbca   :  { %v3173_v20 = vpop.permute.xlu1 %3172 }
 0xbcb   :  { %v3175_v29 = vmul.f32 %v3173_v20, %v3103_v21  ;;  %v3332_v40 = vpop.permute.xlu2 %3331 }
 0xbcc   :  { %v3334_v52 = vsub.f32 %v5830_v57, %v3332_v40  ;;  %v4009_v40 = vld [vmem:[%s6052_s2 + $0x8] ss:$0 sm:$0xff] }
 0xbcd   :  { %v3176_v8 = vadd.f32 %v3175_v29, %v3168_v12 }
 0xbce   :  { %v3347_v34 = vperm.slane %v3334_v52, 0 }
 0xbcf   :  { %v3184_v60 = vadd.f32 %v3183_v26, %v3176_v8  ;;  %3241 = vrot.lane.b32.xlu1 %v3993_v2, %s4078_s23 }
 0xbd0   :  { %v3224_v25 = vpop.permute.xlu0 %3223 }
 0xbd1   :  { %3256 = vrot.lane.b32.xlu2 %v3994_v44, %s4078_s23  ;;  %3186 = vrot.lane.b32.xlu0 %v3184_v60, %s4081_s28  ;;  %v3226_v54 = vmul.f32 %v3224_v25, %v3104_v33  ;;  %v4002_v60 = vld [vmem:[%s6052_s2 + $0x4] ss:$0 sm:$0xff]  ;;  %v4003_v25 = vld [vmem:[%s6052_s2 + $0x1] ss:$0 sm:$0xff] }
 0xbd2   :  { %v3211_v31 = vpop.permute.xlu1 %3210 }
 0xbd3   :  { %v3213_v0 = vmul.f32 %v3211_v31, %v3102_v28 }
 0xbd5   :  { %v3220_v3 = vadd.f32 %v3219_v1, %v3213_v0 }
 0xbd7   :  { %3277 = vrot.lane.b32.xlu1 %v3995_v48, %s4078_s23  ;;  %v3227_v56 = vadd.f32 %v3226_v54, %v3220_v3  ;;  %v4007_v3 = vld [vmem:[%s6052_s2 + $0x7] ss:$0 sm:$0xff]  ;;  %v4008_v54 = vld [vmem:[%s6052_s2 + $0x5] ss:$0 sm:$0xff] }
 0xbd8   :  { %v3099_v58 = vpop.permute.xlu0 %3098 }
 0xbd9   :  { %3305 = vrot.lane.b32.xlu2 %v3996_v38, %s4078_s23  ;;  %3270 = vrot.lane.b32.xlu0 %v3997_v39, %s4078_s23  ;;  %3101 = vst.msk [vmem:[#allocation3 + $0x9] sm:$0x7] %vm2999_vm6, %v3099_v58 }
 0xbda   :  { %v3326_v16 = vpop.permute.xlu1 %3325 }
 0xbdb   :  { %v3328_v4 = vsub.f32 %v5821_v47, %v3326_v16  ;;  %v4005_v16 = vld [vmem:[%s6052_s2 + $0x2] ss:$0 sm:$0xff] }
 0xbdd   :  { %v3341_v61 = vperm.slane %v3328_v4, 0  ;;  %v4006_v4 = vld [vmem:[%s6052_s2 + $0x3] ss:$0 sm:$0xff] }
 0xbdf   :  { %3298 = vrot.lane.b32.xlu1 %v3998_v6, %s4078_s23 }
 0xbe0   :  { %v3228_v49 = vld [vmem:[#allocation3 + $0x9] sm:$0x7]  ;;  %v3338_v43 = vpop.permute.xlu0 %3337 }
 0xbe1   :  { %3343 = vrot.lane.b32.xlu2 %v3341_v61, %s4078_s23  ;;  %3285 = vrot.lane.b32.xlu0 %v3999_v7, %s4078_s23  ;;  %v3229_v19 = vadd.f32 %v3228_v49, %v3227_v56  ;;  %v3340_v11 = vsub.f32 %v5826_v62, %v3338_v43 }
 0xbe3   :  { %v3354_v47 = vperm.slane %v3340_v11, 0 }
 0xbe7   :  { %3231 = vrot.lane.b32.xlu1 %v3229_v19, %s4081_s28 }
 0xbe9   :  { %3458 = vrot.lane.b32.xlu2 %v5879_v45, %s4081_s28  ;;  %3313 = vrot.lane.b32.xlu0 %v4000_v36, %s4078_s23 }
 0xbef   :  { %3356 = vrot.lane.b32.xlu1 %v3354_v47, %s4078_s23 }
 0xbf1   :  { %3349 = vrot.lane.b32.xlu0 %v3347_v34, %s4078_s23 }
 0xbf7   :  { %3470 = vrot.lane.b32.xlu1 %v5888_v14, %s4081_s28 }
 0xbf9   :  { %3464 = vrot.lane.b32.xlu0 %v5892_v24, %s4081_s28 }
 0xc1b   :  { %v3159_v62 = vpop.permute.xlu2 %3158 }
 0xc1c   :  { %3161 = vst.msk [vmem:[#allocation3 + $0x3] sm:$0x7] %vm3132_vm7, %v3159_v62 }
 0xc23   :  { %v3249_v53 = vpop.permute.xlu2 %3248  ;;  %v3236_v21 = vld [vmem:[#allocation3 + $0x3] sm:$0x7] }
 0xc24   :  { %v3251_v63 = vmul.f32 %v3249_v53, %v3236_v21 }
 0xc2b   :  { %v3257_v10 = vpop.permute.xlu2 %3256 }
 0xc33   :  { %v3306_v20 = vpop.permute.xlu2 %3305 }
 0xc34   :  { %v3308_v2 = vmul.f32 %v3306_v20, %v3236_v21  ;;  %v4010_v20 = vld [vmem:[%s6052_s2] ss:$0 sm:$0xff] }
 0xc39   :  { %v3130_v57 = vpop.permute.xlu1 %3129 }
 0xc3a   :  { %3133 = vst.msk [vmem:[#allocation3] sm:$0x7] %vm3132_vm7, %v3130_v57  ;;  %v5945_v57 = vld [vmem:[#allocation2] sm:$0x1] }
 0xc3b   :  { %v3344_v48 = vpop.permute.xlu2 %3343 }
 0xc41   :  { %v3242_v27 = vpop.permute.xlu1 %3241  ;;  %v3235_v22 = vld [vmem:[#allocation3] sm:$0x7] }
 0xc42   :  { %v3244_v13 = vmul.f32 %v3242_v27, %v3235_v22  ;;  %v3346_v39 = vmul.f32 %v3344_v48, %v3235_v22 }
 0xc43   :  { %v3187_v28 = vpop.permute.xlu0 %3186  ;;  %v3459_v56 = vpop.permute.xlu2 %3458 }
 0xc44   :  { %3189 = vst.msk [vmem:[#allocation3 + $0x6] sm:$0x7] %vm3132_vm7, %v3187_v28  ;;  %v3252_v17 = vadd.f32 %v3251_v63, %v3244_v13  ;;  %v3461_v36 = vsub.f32 %v5879_v45, %v3459_v56  ;;  %v5947_v45 = vld [vmem:[#allocation2 + $0x2] sm:$0x1] }
 0xc46   :  { %v3474_v11 = vperm.slane %v3461_v36, 0 }
 0xc49   :  { %v3278_v9 = vpop.permute.xlu1 %3277 }
 0xc4a   :  { %v3280_v46 = vmul.f32 %v3278_v9, %v3236_v21 }
 0xc4b   :  { %v3271_v33 = vpop.permute.xlu0 %3270  ;;  %v3237_v35 = vld [vmem:[#allocation3 + $0x6] sm:$0x7] }
 0xc4c   :  { %v3259_v51 = vmul.f32 %v3257_v10, %v3237_v35  ;;  %v3273_v32 = vmul.f32 %v3271_v33, %v3235_v22 }
 0xc4e   :  { %v3260_v30 = vadd.f32 %v3259_v51, %v3252_v17  ;;  %v3281_v15 = vadd.f32 %v3280_v46, %v3273_v32 }
 0xc50   :  { %3262 = vrot.lane.b32.xlu2 %v3260_v30, %s4081_s28 }
 0xc51   :  { %v3299_v37 = vpop.permute.xlu1 %3298 }
 0xc52   :  { %v3301_v12 = vmul.f32 %v3299_v37, %v3235_v22 }
 0xc53   :  { %v3286_v50 = vpop.permute.xlu0 %3285 }
 0xc54   :  { %v3288_v41 = vmul.f32 %v3286_v50, %v3237_v35  ;;  %v3309_v8 = vadd.f32 %v3308_v2, %v3301_v12 }
 0xc56   :  { %v3289_v42 = vadd.f32 %v3288_v41, %v3281_v15 }
 0xc58   :  { %3374 = vrot.lane.b32.xlu2 %v4001_v5, %s4078_s23  ;;  %3291 = vrot.lane.b32.xlu0 %v3289_v42, %s4081_s28 }
 0xc59   :  { %v3232_v29 = vpop.permute.xlu1 %3231 }
 0xc5a   :  { %3234 = vst.msk [vmem:[#allocation3 + $0x9] sm:$0x7] %vm3132_vm7, %v3232_v29 }
 0xc5b   :  { %v3314_v26 = vpop.permute.xlu0 %3313 }
 0xc5c   :  { %v3316_v44 = vmul.f32 %v3314_v26, %v3237_v35 }
 0xc5e   :  { %v3317_v31 = vadd.f32 %v3316_v44, %v3309_v8 }
 0xc60   :  { %3410 = vrot.lane.b32.xlu2 %v4002_v60, %s4078_s23  ;;  %3381 = vrot.lane.b32.xlu0 %v4003_v25, %s4078_s23  ;;  %v4011_v25 = vld [vmem:[%s6052_s2 + $0x1] ss:$0 sm:$0xff] }
 0xc61   :  { %3319 = vrot.lane.b32.xlu1 %v3317_v31, %s4081_s28  ;;  %v3357_v0 = vpop.permute.xlu1 %3356  ;;  %v3361_v61 = vld [vmem:[#allocation3 + $0x9] sm:$0x7]  ;;  %v4012_v31 = vld [vmem:[%s6052_s2 + $0x4] ss:$0 sm:$0xff] }
 0xc62   :  { %v3359_v1 = vmul.f32 %v3357_v0, %v3237_v35  ;;  %v4014_v0 = vld [vmem:[%s6052_s2 + $0x5] ss:$0 sm:$0xff] }
 0xc63   :  { %v3350_v38 = vpop.permute.xlu0 %3349 }
 0xc64   :  { %v3352_v58 = vmul.f32 %v3350_v38, %v3236_v21 }
 0xc66   :  { %v3353_v6 = vadd.f32 %v3352_v58, %v3346_v39 }
 0xc68   :  { %3431 = vrot.lane.b32.xlu2 %v4004_v59, %s4078_s23  ;;  %3389 = vrot.lane.b32.xlu0 %v4005_v16, %s4078_s23  ;;  %v3360_v7 = vadd.f32 %v3359_v1, %v3353_v6  ;;  %v4013_v16 = vld [vmem:[%s6052_s2 + $0x6] ss:$0 sm:$0xff]  ;;  %v4015_v6 = vld [vmem:[%s6052_s2 + $0x3] ss:$0 sm:$0xff] }
 0xc69   :  { %3403 = vrot.lane.b32.xlu1 %v4006_v4, %s4078_s23  ;;  %v3471_v19 = vpop.permute.xlu1 %3470 }
 0xc6a   :  { %v3362_v49 = vadd.f32 %v3361_v61, %v3360_v7  ;;  %v3473_v43 = vsub.f32 %v5888_v14, %v3471_v19  ;;  %v5954_v14 = vld [vmem:[#allocation2 + $0x1] sm:$0x1]  ;;  %v4016_v61 = vld [vmem:[%s6052_s2 + $0x8] ss:$0 sm:$0xff] }
 0xc6b   :  { %v3465_v47 = vpop.permute.xlu0 %3464 }
 0xc6c   :  { %v3487_v52 = vperm.slane %v3473_v43, 0  ;;  %v3467_v34 = vsub.f32 %v5892_v24, %v3465_v47 }
 0xc6e   :  { %v3480_v62 = vperm.slane %v3467_v34, 0 }
 0xc70   :  { %3438 = vrot.lane.b32.xlu0 %v4007_v3, %s4078_s23  ;;  %3364 = vrot.lane.b32.xlu2 %v3362_v49, %s4081_s28  ;;  %v4017_v49 = vld [vmem:[%s6052_s2 + $0x2] ss:$0 sm:$0xff] }
 0xc71   :  { %3418 = vrot.lane.b32.xlu1 %v4008_v54, %s4078_s23 }
 0xc78   :  { %3476 = vrot.lane.b32.xlu0 %v3474_v11, %s4078_s23  ;;  %3489 = vrot.lane.b32.xlu2 %v3487_v52, %s4078_s23  ;;  %v4018_v11 = vld [vmem:[%s6052_s2 + $0x7] ss:$0 sm:$0xff] }
 0xc79   :  { %3446 = vrot.lane.b32.xlu1 %v4009_v40, %s4078_s23 }
 0xc80   :  { %3591 = vrot.lane.b32.xlu0 %v5945_v57, %s4081_s28  ;;  %3603 = vrot.lane.b32.xlu2 %v5947_v45, %s4081_s28 }
 0xc81   :  { %3482 = vrot.lane.b32.xlu1 %v3480_v62, %s4078_s23 }
 0xc89   :  { %3597 = vrot.lane.b32.xlu1 %v5954_v14, %s4081_s28 }
 0xcaa   :  { %v3263_v24 = vpop.permute.xlu2 %3262 }
 0xcab   :  { %3266 = vst.msk [vmem:[#allocation3] sm:$0x7] %vm3265_vm8, %v3263_v24 }
 0xcb2   :  { %v3375_v53 = vpop.permute.xlu2 %3374  ;;  %v3368_v10 = vld [vmem:[#allocation3] sm:$0x7] }
 0xcb3   :  { %v3377_v35 = vmul.f32 %v3375_v53, %v3368_v10 }
 0xcba   :  { %v3411_v27 = vpop.permute.xlu2 %3410 }
 0xcc2   :  { %v3432_v28 = vpop.permute.xlu2 %3431 }
 0xcc3   :  { %v3434_v26 = vmul.f32 %v3432_v28, %v3368_v10 }
 0xcca   :  { %v3365_v22 = vpop.permute.xlu2 %3364  ;;  %v3292_v21 = vpop.permute.xlu0 %3291 }
 0xccb   :  { %3367 = vst.msk [vmem:[#allocation3 + $0x9] sm:$0x7] %vm3265_vm8, %v3365_v22 }
 0xccc   :  { %3294 = vst.msk [vmem:[#allocation3 + $0x3] sm:$0x7] %vm3265_vm8, %v3292_v21 }
 0xcd2   :  { %v3382_v13 = vpop.permute.xlu0 %3381  ;;  %v3490_v4 = vpop.permute.xlu2 %3489  ;;  %v3494_v54 = vld [vmem:[#allocation3 + $0x9] sm:$0x7] }
 0xcd3   :  { %v3320_v9 = vpop.permute.xlu1 %3319  ;;  %v3369_v63 = vld [vmem:[#allocation3 + $0x3] sm:$0x7] }
 0xcd4   :  { %3322 = vst.msk [vmem:[#allocation3 + $0x6] sm:$0x7] %vm3265_vm8, %v3320_v9  ;;  %v3384_v33 = vmul.f32 %v3382_v13, %v3369_v63  ;;  %v3413_v15 = vmul.f32 %v3411_v27, %v3369_v63 }
 0xcd6   :  { %v3385_v32 = vadd.f32 %v3384_v33, %v3377_v35 }
 0xcda   :  { %v3390_v17 = vpop.permute.xlu0 %3389  ;;  %v3604_v19 = vpop.permute.xlu2 %3603 }
 0xcdb   :  { %v3370_v51 = vld [vmem:[#allocation3 + $0x6] sm:$0x7]  ;;  %v3404_v30 = vpop.permute.xlu1 %3403  ;;  %v3606_v43 = vsub.f32 %v5947_v45, %v3604_v19  ;;  %v4087_v19 = vmov 0  }
 0xcdc   :  { %v3392_v37 = vmul.f32 %v3390_v17, %v3370_v51  ;;  %v3406_v50 = vmul.f32 %v3404_v30, %v3368_v10  ;;  %v3492_v7 = vmul.f32 %v3490_v4, %v3370_v51  ;;  %v3657_v4 = vld [vmem:[%s6058_s8 + $0x20] sm:$0xff]  ;;  %3810 = vset.pattern.permute.xlu2 %v4087_v19  ;;  %3811 = vset.pattern.permute.xlu0 %v4087_v19 }
 0xcdd   :  { %v3620_v52 = vperm.slane %v3606_v43, 0  ;;  %3679 = vmatpush.msrb.mxu2 %v3657_v4 }
 0xcde   :  { %v3393_v46 = vadd.f32 %v3392_v37, %v3385_v32  ;;  %v3414_v5 = vadd.f32 %v3413_v15, %v3406_v50 }
 0xce0   :  { %3395 = vrot.lane.b32.xlu0 %v3393_v46, %s4081_s28 }
 0xce2   :  { %v3439_v12 = vpop.permute.xlu0 %3438 }
 0xce3   :  { %v3419_v41 = vpop.permute.xlu1 %3418  ;;  %v3441_v2 = vmul.f32 %v3439_v12, %v3369_v63 }
 0xce4   :  { %v3421_v42 = vmul.f32 %v3419_v41, %v3370_v51 }
 0xce5   :  { %v3442_v44 = vadd.f32 %v3441_v2, %v3434_v26 }
 0xce6   :  { %v3422_v29 = vadd.f32 %v3421_v42, %v3414_v5 }
 0xce8   :  { %3424 = vrot.lane.b32.xlu1 %v3422_v29, %s4081_s28  ;;  %3507 = vrot.lane.b32.xlu0 %v4010_v20, %s4078_s23 }
 0xcea   :  { %v3477_v38 = vpop.permute.xlu0 %3476 }
 0xceb   :  { %v3447_v8 = vpop.permute.xlu1 %3446  ;;  %v3479_v58 = vmul.f32 %v3477_v38, %v3368_v10 }
 0xcec   :  { %v3449_v60 = vmul.f32 %v3447_v8, %v3370_v51 }
 0xcee   :  { %v3450_v48 = vadd.f32 %v3449_v60, %v3442_v44 }
 0xcf0   :  { %3514 = vrot.lane.b32.xlu1 %v4011_v25, %s4078_s23  ;;  %3543 = vrot.lane.b32.xlu0 %v4012_v31, %s4078_s23 }
 0xcf1   :  { %3452 = vrot.lane.b32.xlu2 %v3450_v48, %s4081_s28 }
 0xcf2   :  { %v3592_v36 = vpop.permute.xlu0 %3591 }
 0xcf3   :  { %v3483_v39 = vpop.permute.xlu1 %3482  ;;  %v3594_v40 = vsub.f32 %v5945_v57, %v3592_v36 }
 0xcf4   :  { %v3485_v59 = vmul.f32 %v3483_v39, %v3369_v63 }
 0xcf5   :  { %v3607_v47 = vperm.slane %v3594_v40, 0  ;;  %v4020_v40 = vld [vmem:[#allocation2] ss:$0 sm:$0xff] }
 0xcf6   :  { %v3486_v1 = vadd.f32 %v3485_v59, %v3479_v58 }
 0xcf8   :  { %3564 = vrot.lane.b32.xlu1 %v4013_v16, %s4078_s23  ;;  %3551 = vrot.lane.b32.xlu0 %v4014_v0, %s4078_s23  ;;  %v3493_v3 = vadd.f32 %v3492_v7, %v3486_v1  ;;  %v3655_v1 = vld [vmem:[%s6058_s8 + $0x10] sm:$0xff]  ;;  %v3656_v7 = vld [vmem:[%s6058_s8 + $0x18] sm:$0xff] }
 0xcf9   :  { %3536 = vrot.lane.b32.xlu2 %v4015_v6, %s4078_s23  ;;  %v3658_v6 = vld [vmem:[%s6058_s8 + $0x28] sm:$0xff]  ;;  %3680 = vmatpush.msrb.mxu2 %v3655_v1 }
 0xcfa   :  { %v3495_v56 = vadd.f32 %v3494_v54, %v3493_v3  ;;  %3702 = vmatpush.msrb.mxu3 %v3658_v6  ;;  %v3653_v3 = vld [vmem:[%s6058_s8] sm:$0xff] }
 0xcfb   :  { %v3598_v34 = vpop.permute.xlu1 %3597  ;;  %3681 = vmatpush.msrb.mxu2 %v3653_v3 }
 0xcfc   :  { %v3600_v62 = vsub.f32 %v5954_v14, %v3598_v34  ;;  %3703 = vmatpush.msrb.mxu3 %v3656_v7  ;;  %v4019_v34 = vld [vmem:[#allocation2 + $0x1] ss:$0 sm:$0xff] }
 0xcfe   :  { %v3613_v24 = vperm.slane %v3600_v62, 0 }
 0xd00   :  { %3579 = vrot.lane.b32.xlu0 %v4016_v61, %s4078_s23  ;;  %3497 = vrot.lane.b32.xlu1 %v3495_v56, %s4081_s28  ;;  %v3654_v61 = vld [vmem:[%s6058_s8 + $0x8] sm:$0xff] }
 0xd01   :  { %3522 = vrot.lane.b32.xlu2 %v4017_v49, %s4078_s23  ;;  %3704 = vmatpush.msrb.mxu3 %v3654_v61  ;;  %v3757_v49 = vld [vmem:[%s6053_s3] sm:$0x7]  ;;  %s4088_s3 = smov [#allocation7]  }
 0xd02   :  { %s3777_s8 = sshll.u32 %s4088_s3, 4  ;;  %s3778_s8 = int_to_ptr.vmem [resolvable:$true] %s3777_s8 }
 0xd08   :  { %3622 = vrot.lane.b32.xlu0 %v3620_v52, %s4078_s23  ;;  %3609 = vrot.lane.b32.xlu1 %v3607_v47, %s4078_s23 }
 0xd09   :  { %3571 = vrot.lane.b32.xlu2 %v4018_v11, %s4078_s23 }
 0xd11   :  { %3615 = vrot.lane.b32.xlu2 %v3613_v24, %s4078_s23  ;;  %v4021_v24 = vld [vmem:[#allocation2 + $0x2] ss:$0 sm:$0xff] }
 0xd4b   :  { %v3453_v57 = vpop.permute.xlu2 %3452 }
 0xd4c   :  { %3455 = vst.msk [vmem:[#allocation3 + $0x6] sm:$0x7] %vm3398_vm9, %v3453_v57 }
 0xd52   :  { %v3396_v45 = vpop.permute.xlu0 %3395 }
 0xd53   :  { %3399 = vst.msk [vmem:[#allocation3] sm:$0x7] %vm3398_vm9, %v3396_v45  ;;  %v3537_v53 = vpop.permute.xlu2 %3536  ;;  %v3503_v33 = vld [vmem:[#allocation3 + $0x6] sm:$0x7] }
 0xd5a   :  { %v3425_v27 = vpop.permute.xlu1 %3424  ;;  %v3508_v28 = vpop.permute.xlu0 %3507  ;;  %v3501_v22 = vld [vmem:[#allocation3] sm:$0x7] }
 0xd5b   :  { %3427 = vst.msk [vmem:[#allocation3 + $0x3] sm:$0x7] %vm3398_vm9, %v3425_v27  ;;  %v3523_v21 = vpop.permute.xlu2 %3522  ;;  %v3510_v63 = vmul.f32 %v3508_v28, %v3501_v22  ;;  %v3539_v32 = vmul.f32 %v3537_v53, %v3501_v22 }
 0xd5c   :  { %v3525_v35 = vmul.f32 %v3523_v21, %v3503_v33 }
 0xd62   :  { %v3502_v13 = vld [vmem:[#allocation3 + $0x3] sm:$0x7]  ;;  %v3515_v9 = vpop.permute.xlu1 %3514  ;;  %v3544_v14 = vpop.permute.xlu0 %3543 }
 0xd63   :  { %v3517_v10 = vmul.f32 %v3515_v9, %v3502_v13  ;;  %v3546_v30 = vmul.f32 %v3544_v14, %v3502_v13  ;;  %v3572_v5 = vpop.permute.xlu2 %3571  ;;  %v487_v14 = vpop.f32.mrf.mxu3 }
 0xd64   :  { %v3574_v20 = vmul.f32 %v3572_v5, %v3502_v13 }
 0xd65   :  { %v3518_v17 = vadd.f32 %v3517_v10, %v3510_v63  ;;  %v3547_v50 = vadd.f32 %v3546_v30, %v3539_v32 }
 0xd67   :  { %v3526_v51 = vadd.f32 %v3525_v35, %v3518_v17  ;;  %v3716_v17 = vperm.slane %v4396_v18, 1 }
 0xd69   :  { %3528 = vrot.lane.b32.xlu1 %v3526_v51, %s4081_s28 }
 0xd6a   :  { %v3565_v37 = vpop.permute.xlu1 %3564  ;;  %v3552_v46 = vpop.permute.xlu0 %3551 }
 0xd6b   :  { %v3554_v15 = vmul.f32 %v3552_v46, %v3503_v33  ;;  %v3567_v42 = vmul.f32 %v3565_v37, %v3501_v22  ;;  %v3616_v44 = vpop.permute.xlu2 %3615  ;;  %v3728_v37 = vperm.slane %v4396_v18, 2 }
 0xd6c   :  { %v3618_v31 = vmul.f32 %v3616_v44, %v3502_v13  ;;  %v467_v13 = vpop.f32.mrf.mxu2 }
 0xd6d   :  { %v3555_v41 = vadd.f32 %v3554_v15, %v3547_v50  ;;  %v3575_v2 = vadd.f32 %v3574_v20, %v3567_v42  ;;  %v468_v9 = vadd.f32 %v467_v13, %v4398_v23 }
 0xd6f   :  { %3557 = vrot.lane.b32.xlu2 %v3555_v41, %s4081_s28  ;;  %v488_v63 = vadd.f32 %v487_v14, %v468_v9  ;;  %v3712_v41 = vperm.slane %v4396_v18, 0 }
 0xd71   :  { %v491_v10 = vadd.f32 %v488_v63, %v4381_v55 }
 0xd72   :  { %v3498_v12 = vpop.permute.xlu1 %3497  ;;  %v3580_v29 = vpop.permute.xlu0 %3579 }
 0xd73   :  { %3500 = vst.msk [vmem:[#allocation3 + $0x9] sm:$0x7] %vm3398_vm9, %v3498_v12  ;;  %v3582_v26 = vmul.f32 %v3580_v29, %v3503_v33  ;;  %v3717_v51 = vperm.slane %v491_v10, 1  ;;  %v3729_v46 = vperm.slane %v491_v10, 2  ;;  %v3713_v23 = vperm.slane %v491_v10, 0 }
 0xd75   :  { %v3583_v8 = vadd.f32 %v3582_v26, %v3575_v2 }
 0xd77   :  { %3585 = vrot.lane.b32.xlu0 %v3583_v8, %s4081_s28  ;;  %3760 = vperm.xlu2 %3810, %v3757_v49  }
 0xd7a   :  { %v3610_v60 = vpop.permute.xlu1 %3609  ;;  %v3623_v25 = vpop.permute.xlu0 %3622  ;;  %v3627_v59 = vld [vmem:[#allocation3 + $0x9] sm:$0x7] }
 0xd7b   :  { %v3612_v48 = vmul.f32 %v3610_v60, %v3501_v22  ;;  %v3625_v39 = vmul.f32 %v3623_v25, %v3503_v33 }
 0xd7d   :  { %v3619_v38 = vadd.f32 %v3618_v31, %v3612_v48 }
 0xd7f   :  { %v3626_v58 = vadd.f32 %v3625_v39, %v3619_v38 }
 0xd81   :  { %v3628_v16 = vadd.f32 %v3627_v59, %v3626_v58 }
 0xd83   :  { %3630 = vrot.lane.b32.xlu1 %v3628_v16, %s4081_s28 }
 0xdc9   :  { %v3558_v0 = vpop.permute.xlu2 %3557 }
 0xdca   :  { %3560 = vst.msk [vmem:[#allocation3 + $0x3] sm:$0x7] %vm3531_vm10, %v3558_v0 }
 0xdd1   :  { %v3639_v11 = vld [vmem:[#allocation3 + $0x3] sm:$0x7]  ;;  %v3761_v0 = vpop.permute.xlu2 %3760 }
 0xdd2   :  { %v3642_v57 = vmul.f32 %v4019_v34, %v3639_v11 }
 0xddb   :  { %v3529_v54 = vpop.permute.xlu1 %3528 }
 0xddc   :  { %3532 = vst.msk [vmem:[#allocation3] sm:$0x7] %vm3531_vm10, %v3529_v54 }
 0xde3   :  { %v3635_v43 = vld [vmem:[#allocation3] sm:$0x7] }
 0xde4   :  { %v3638_v62 = vmul.f32 %v4020_v40, %v3635_v43 }
 0xde6   :  { %v3643_v53 = vadd.f32 %v3642_v57, %v3638_v62 }
 0xde9   :  { %v3586_v56 = vpop.permute.xlu0 %3585 }
 0xdea   :  { %3588 = vst.msk [vmem:[#allocation3 + $0x6] sm:$0x7] %vm3531_vm10, %v3586_v56 }
 0xdf1   :  { %v3651_v36 = vld [vmem:[#allocation3] sm:$0xff] }
 0xdf2   :  { %3791 = vmatmul.msk.f32.vlgmr.msrb.gmra.mxu2 %vm3659_vm11, %v3651_v36  ;;  %3793 = vmatmul.msk.f32.vlgmr.msrb.gmra.mxu3 %vm3659_vm11, %v3651_v36  ;;  %v3644_v52 = vld [vmem:[#allocation3 + $0x6] sm:$0x7] }
 0xdf3   :  { %v3647_v45 = vmul.f32 %v4021_v24, %v3644_v52 }
 0xdf5   :  { %v3631_v47 = vpop.permute.xlu1 %3630  ;;  %v3648_v27 = vadd.f32 %v3647_v45, %v3643_v53 }
 0xdf6   :  { %3633 = vst.msk [vmem:[#allocation3 + $0x9] sm:$0x7] %vm3531_vm10, %v3631_v47 }
 0xdfd   :  { %v3634_v28 = vld [vmem:[#allocation3 + $0x9] sm:$0x7] }
 0xdfe   :  { %v3649_v22 = vsub.f32 %v3634_v28, %v3648_v27 }
 0xe00   :  { %3650 = vst.msk [vmem:[#allocation3 + $0x9] sm:$0x7] %vm564_vm3, %v3649_v22  ;;  %vm3738_vm3 = vcmask 1041408  }
 0xe07   :  { %v3652_v21 = vld [vmem:[#allocation3 + $0x8] sm:$0xf] }
 0xe08   :  { %3792 = vmatmul.msk.f32.gmra.mxu2 %vm3659_vm11, %v3652_v21  ;;  %3794 = vmatmul.msk.f32.gmra.mxu3 %vm3659_vm11, %v3652_v21 }
 0xe75   :  { %v3683_v33 = vpop.f32.mrf.mxu2  ;;  %v3706_v35 = vpop.f32.mrf.mxu3 }
 0xe76   :  { %v3718_v30 = vmul.f32 %v3716_v17, %v3683_v33  ;;  %v3719_v32 = vmul.f32 %v3717_v51, %v3706_v35  ;;  %v3730_v50 = vmul.f32 %v3728_v37, %v3683_v33  ;;  %v3731_v15 = vmul.f32 %v3729_v46, %v3706_v35 }
 0xe77   :  { %v3714_v2 = vmul.f32 %v3712_v41, %v3683_v33  ;;  %v3715_v26 = vmul.f32 %v3713_v23, %v3706_v35 }
 0xe78   :  { %v3722_v5 = vrot.slane %v3718_v30, 3  ;;  %v3723_v42 = vrot.slane %v3719_v32, 3  ;;  %v3739_v8 = vrot.slane %v3730_v50, 6  ;;  %v3742_v60 = vrot.slane %v3731_v15, 6 }
 0xe7a   :  { %v3726_v31 = vadd.f32 %v3722_v5, %v3714_v2  ;;  %v3727_v48 = vadd.f32 %v3723_v42, %v3715_v26 }
 0xe8b   :  { %v3686_v20 = vpop.f32.mrf.mxu2  ;;  %v3709_v12 = vpop.f32.mrf.mxu3 }
 0xe8c   :  { %v3732_v55 = vmul.f32 %v3728_v37, %v3686_v20  ;;  %v3733_v29 = vmul.f32 %v3729_v46, %v3709_v12  ;;  %v3751_v58 = vrot.slane %v3686_v20, 1  ;;  %v3752_v18 = vrot.slane %v3709_v12, 1 }
 0xe8e   :  { %v3740_v44 = vrot.slane %v3732_v55, 6  ;;  %v3743_v25 = vrot.slane %v3733_v29, 6 }
 0xe90   :  { %v3741_v38 = vsel %vm3738_vm3, %v3739_v8, %v3740_v44  ;;  %v3744_v39 = vsel %vm3738_vm3, %v3742_v60, %v3743_v25 }
 0xe91   :  { %v3747_v59 = vadd.f32 %v3741_v38, %v3726_v31  ;;  %v3748_v16 = vadd.f32 %v3744_v39, %v3727_v48 }
 0xe93   :  { %v3755_v4 = vadd.f32 %v3751_v58, %v3747_v59  ;;  %v3756_v6 = vadd.f32 %v3752_v18, %v3748_v16 }
 0xe95   :  { %v3764_v1 = vadd.f32 %v3761_v0, %v3756_v6  ;;  %v3763_v7 = vadd.f32 %v3761_v0, %v3755_v4 }
 0xe97   :  { %v3767_v3 = vrot.slane %v3764_v1, 4 }
 0xe99   :  { %v3769_v61 = vsel %vm3768_vm12, %v3763_v7, %v3767_v3 }
 0xe9a   :  { %3771 = vst [vmem:[#allocation7] sm:$0x77] %v3769_v61 }
 0xe9b   :  { %3782 = dma.vmem_to_hbm [thread:$0]  %s3778_s8, 128, %s3780_s22, [#allocation6]  }
 0xe9c   :  { %4072 = dma.done.wait [#allocation6], 128  }
 0xe9d   :  { %4073 = vsyncadd [#allocation6], 4294967168 }
 0xe9e   :  { %3787 = vsyncpa [#allocation5], 1 }
 0xe9f   :  { %3788 = vsyncpa [#allocation6], 1 }

</bundles_post_ra>
